<compile_context>
chip_gen: v6e
topology: v6e:2x2x1
jax: 0.10.0
libtpu: 0.0.40
codegen_flags: <defaults>
</compile_context>

<pallas_src>
import numpy as np
import jax
import jax.numpy as jnp
from jax import lax
from jax.experimental import pallas as pl
from jax.experimental.pallas import tpu as pltpu

CONTEXT_POOL = 6                      # doc_context_pool window (fixed in the module)
KMAX_VIEW_PCT = (0.25, 0.5, 0.75, 1.0)
NEG = -1e30
H1, H2 = 100, 10                      # dense / dense2 widths (fixed in the module)
H1P, H2P = 128, 128                   # lane-padded head widths


def _round_up(x, m):
    return (x + m - 1) // m * m


def _make_copacrr_call(B, TB, Q, D, E, ncks, conv_out_ch, kmax, Wc):
    views = [int(D * p) for p in KMAX_VIEW_PCT]
    n_views = len(views)
    n_convs = ncks - 1
    feat_per_entry = 2 * n_views * kmax
    F = ncks * feat_per_entry
    max_pad = ncks - 1
    C = conv_out_ch
    QH = Q * H1P

    def kernel(q_ref, d_ref, band_ref, cbias_ref, w1_ref, b1_ref,
               w2_ref, b2_ref, w3_ref, out_ref, convbuf):
        eps = jnp.float32(1e-13)

        # ---- structural matrices (iota-built once, shared by all TB items) ---
        col = lax.broadcasted_iota(jnp.int32, (Q, D), 1)           # doc position per lane
        ar = lax.broadcasted_iota(jnp.int32, (D, D), 0)
        ac = lax.broadcasted_iota(jnp.int32, (D, D), 1)
        avg_mat = jnp.where((ac >= ar) & (ac < ar + CONTEXT_POOL),
                            jnp.float32(1.0 / CONTEXT_POOL),
                            jnp.float32(0.0))                      # rolling-mean band (D, D)
        sr = lax.broadcasted_iota(jnp.int32, (Q, Q), 0)
        sc = lax.broadcasted_iota(jnp.int32, (Q, Q), 1)
        shift_mats = [jnp.where(sc == sr + a, jnp.float32(1.0), jnp.float32(0.0))
                      for a in range(1, max_pad + 1)]              # query-axis down-shift sel.

        def kmax_with_context(score, ctx):
            # cascaded k-max pooling over document prefixes + context gather;
            # all results are kept in registers and concatenated lane-dense.
            cols_v, cols_s = [], []
            for vs in views:
                x = jnp.where(col < vs, score, NEG)
                for _ in range(kmax):
                    m = jnp.max(x, axis=1, keepdims=True)                       # (Q, 1)
                    idx = jnp.min(jnp.where(x == m, col, D), axis=1, keepdims=True)
                    hit = col == idx                                            # mask reused twice
                    sel = jnp.sum(jnp.where(hit, ctx, 0.0), axis=1, keepdims=True)
                    cols_v.append(m)
                    cols_s.append(sel)
                    x = jnp.where(hit, NEG, x)
            return jnp.concatenate(cols_v + cols_s, axis=1)        # (Q, 2*n_views*kmax)

        def one_item(t, carry):
            q = q_ref[t]                                   # (Q, E)
            d = d_ref[t]                                   # (D, E)

            # ---- cosine similarity matrix (Q, D) -----------------------------
            qn = q / (jnp.sqrt(jnp.sum(q * q, axis=1, keepdims=True)) + eps)
            dn = d / (jnp.sqrt(jnp.sum(d * d, axis=1, keepdims=True)) + eps)
            cos = lax.dot_general(qn, dn, (((1,), (1,)), ((), ())),
                                  preferred_element_type=jnp.float32)

            # ---- context vectors (query mean / doc rolling-average pool) -----
            qc = jnp.mean(q, axis=0, keepdims=True)                              # (1, E)
            qcn = qc / (jnp.sqrt(jnp.sum(qc * qc, axis=1, keepdims=True)) + eps)
            dc = jnp.dot(avg_mat, d, preferred_element_type=jnp.float32)         # (D, E)
            dcn = dc / (jnp.sqrt(jnp.sum(dc * dc, axis=1, keepdims=True)) + eps)
            ctx = lax.dot_general(qcn, dcn, (((1,), (1,)), ((), ())),
                                  preferred_element_type=jnp.float32)            # (1, D)

            # entry 0: raw similarity matrix
            entry_blocks = [kmax_with_context(cos, ctx)]

            # ---- all convs fused into one banded MXU matmul -------------------
            # out[q, ci*C*D + c*D + d] = sum_{a,b} cos_pad[q+a, d+b] * w_ci[a,b,c]
            conv_all = jnp.dot(cos, band_ref[0], preferred_element_type=jnp.float32)
            for a in range(1, max_pad + 1):
                r_a = jnp.dot(shift_mats[a - 1], cos,
                              preferred_element_type=jnp.float32)  # rows shifted up, zero-fill
                conv_all = conv_all + jnp.dot(r_a, band_ref[a],
                                              preferred_element_type=jnp.float32)
            convbuf[...] = conv_all + cbias_ref[...]               # one lane-dense store (Q, Wc)

            for ci in range(n_convs):
                off = ci * C * D
                maxed = convbuf[:, off:off + D]                    # MaxPool3d over channels
                for c in range(1, C):
                    maxed = jnp.maximum(maxed, convbuf[:, off + c * D:off + (c + 1) * D])
                entry_blocks.append(kmax_with_context(maxed, ctx))

            pq = jnp.concatenate(entry_blocks, axis=1)             # (Q, F) in registers

            # ---- MLP head: one MXU matmul + block-diagonal gather -------------
            y = jnp.dot(pq, w1_ref[...], preferred_element_type=jnp.float32)   # (Q, Q*H1P)
            h1 = y[0:1, 0:H1P]
            for qq in range(1, Q):
                h1 = h1 + y[qq:qq + 1, qq * H1P:(qq + 1) * H1P]    # 128-lane-aligned slices
            h1 = jnp.maximum(h1 + b1_ref[...], 0.0)                # (1, H1P)
            h2 = jnp.maximum(jnp.dot(h1, w2_ref[...], preferred_element_type=jnp.float32)
                             + b2_ref[...], 0.0)                   # (1, H2P)
            score = jnp.sum(h2 * w3_ref[...], axis=1, keepdims=True)            # (1, 1)
            out_ref[pl.ds(t, 1), :] = score
            return carry

        if TB <= 4:
            for t in range(TB):                 # fully unrolled for small batch blocks
                one_item(t, 0)
        else:
            lax.fori_loop(0, TB, one_item, 0)

    in_specs = [
        pl.BlockSpec((TB, Q, E), lambda i: (i, 0, 0)),
        pl.BlockSpec((TB, D, E), lambda i: (i, 0, 0)),
        pl.BlockSpec((ncks, D, Wc), lambda i: (0, 0, 0)),          # banded conv weights
        pl.BlockSpec((1, Wc), lambda i: (0, 0)),                   # conv bias row
        pl.BlockSpec((F, QH), lambda i: (0, 0)),                   # head W1 (F, Q*H1P)
        pl.BlockSpec((1, H1P), lambda i: (0, 0)),
        pl.BlockSpec((H1P, H2P), lambda i: (0, 0)),
        pl.BlockSpec((1, H2P), lambda i: (0, 0)),
        pl.BlockSpec((1, H2P), lambda i: (0, 0)),
    ]
    grid_spec = pltpu.PrefetchScalarGridSpec(
        num_scalar_prefetch=0,
        grid=(B // TB,),
        in_specs=in_specs,
        out_specs=pl.BlockSpec((TB, 1), lambda i: (i, 0)),
        scratch_shapes=[pltpu.VMEM((Q, Wc), jnp.float32)],         # packed conv outputs
    )
    return pl.pallas_call(
        kernel,
        out_shape=jax.ShapeDtypeStruct((B, 1), jnp.float32),
        grid_spec=grid_spec,
        compiler_params=pltpu.CompilerParams(dimension_semantics=("parallel",)),
    )


def co_pacrr_forward(params, query_embeddings, document_embeddings,
                     query_pad_oov_mask, document_pad_oov_mask,
                     query_idfs, document_idfs):
    # query_pad_oov_mask / query_idfs / document_* mirror the PyTorch signature;
    # they do not influence the returned score (see module).
    B, Q, E = query_embeddings.shape
    D = document_embeddings.shape[1]
    ncks = params['max_conv_kernel_size']
    C = params['conv_output_size']
    kmax = params['kmax_pooling_size']
    n_convs = ncks - 1
    F = ncks * 2 * len(KMAX_VIEW_PCT) * kmax

    # batch block per grid step: 8-aligned if possible, else the whole batch
    # (keeps the (8,128)/full-dim rule on the (TB, 1) output block).
    TB = 8 if B % 8 == 0 else B

    # ---- host-side parameter preparation (layout plumbing, done once) --------
    Wc_raw = n_convs * C * D
    Wc = _round_up(Wc_raw, 128)

    # banded conv weight matrices: band[a][e, ci*C*D + c*D + d] = w_ci[a, e-d, c]
    d_idx = jnp.arange(D)
    diff = d_idx[:, None] - d_idx[None, :]                 # (e, d) -> e - d
    bands = []
    for a in range(ncks):                                  # a = 0 .. max_pad
        blocks = []
        for ci in range(n_convs):
            ksz = ci + 2
            w = params[f'conv{ksz}_w']                     # (ksz, ksz, C)
            if a < ksz:
                wa = w[a]                                  # (ksz, C)
                safe = jnp.clip(diff, 0, ksz - 1)
                vals = wa[safe]                            # (D, D, C) indexed [e, d, c]
                vals = jnp.where(((diff >= 0) & (diff < ksz))[:, :, None], vals, 0.0)
                block = jnp.transpose(vals, (0, 2, 1)).reshape(D, C * D)
            else:
                block = jnp.zeros((D, C * D), jnp.float32)
            blocks.append(block)
        band = jnp.concatenate(blocks, axis=1)             # (D, Wc_raw)
        bands.append(jnp.pad(band, ((0, 0), (0, Wc - Wc_raw))))
    band_stack = jnp.stack(bands, axis=0)                  # (ncks, D, Wc)

    cbias = jnp.concatenate(
        [jnp.repeat(params[f'conv{ci + 2}_b'], D).reshape(1, C * D)
         for ci in range(n_convs)], axis=1)
    cbias = jnp.pad(cbias, ((0, 0), (0, Wc - Wc_raw)))     # (1, Wc)

    # dense head, lane-padded to 128 and laid out for a single MXU matmul:
    # w1_2d[f, q*H1P + h] = w1[q, f, h]
    w1p = jnp.pad(params['w1'], ((0, 0), (0, 0), (0, H1P - H1)))        # (Q, F, H1P)
    w1_2d = jnp.transpose(w1p, (1, 0, 2)).reshape(F, Q * H1P)
    b1p = jnp.pad(params['b1'].reshape(1, -1), ((0, 0), (0, H1P - H1)))
    w2p = jnp.pad(params['w2'], ((0, H1P - H1), (0, H2P - H2)))
    b2p = jnp.pad(params['b2'].reshape(1, -1), ((0, 0), (0, H2P - H2)))
    w3p = jnp.pad(params['w3'].reshape(1, -1), ((0, 0), (0, H2P - H2)))

    fn = _make_copacrr_call(B, TB, Q, D, E, ncks, C, kmax, Wc)
    out = fn(query_embeddings, document_embeddings, band_stack, cbias,
             w1_2d, b1p, w2p, b2p, w3p)
    return out[:, 0]


def co_pacrr_reference(params, q_emb, d_emb):
    """Pure-JAX reference mirroring the PyTorch forward (eval mode)."""
    eps = 1e-13
    B, Q, E = q_emb.shape
    D = d_emb.shape[1]
    ncks = params['max_conv_kernel_size']
    C = params['conv_output_size']
    k = params['kmax_pooling_size']
    views = [int(D * p) for p in KMAX_VIEW_PCT]

    qn = q_emb / (jnp.linalg.norm(q_emb, axis=-1, keepdims=True) + eps)
    dn = d_emb / (jnp.linalg.norm(d_emb, axis=-1, keepdims=True) + eps)
    cos = jnp.einsum('bqe,bde->bqd', qn, dn)

    qc = jnp.mean(q_emb, axis=1)                                        # (B, E)
    dpad = jnp.pad(d_emb, ((0, 0), (0, CONTEXT_POOL - 1), (0, 0)))
    dc = sum(dpad[:, t:t + D, :] for t in range(CONTEXT_POOL)) / CONTEXT_POOL
    qcn = qc / (jnp.linalg.norm(qc, axis=-1, keepdims=True) + eps)
    dcn = dc / (jnp.linalg.norm(dc, axis=-1, keepdims=True) + eps)
    ctx = jnp.einsum('be,bde->bd', qcn, dcn)

    col = jnp.arange(D)[None, None, :]

    def kmax_ctx(score):
        vals, sels = [], []
        for vs in views:
            x = jnp.where(col < vs, score, NEG)
            for _ in range(k):
                m = jnp.max(x, axis=-1, keepdims=True)
                idx = jnp.min(jnp.where(x == m, col, D), axis=-1, keepdims=True)
                sel = jnp.sum(jnp.where(col == idx, ctx[:, None, :], 0.0),
                              axis=-1, keepdims=True)
                vals.append(m)
                sels.append(sel)
                x = jnp.where(col == idx, NEG, x)
        return jnp.concatenate(vals + sels, axis=-1)

    entries = [kmax_ctx(cos)]
    for ksz in range(2, ncks + 1):
        w = params[f'conv{ksz}_w']
        bs = params[f'conv{ksz}_b']
        cpad = jnp.pad(cos, ((0, 0), (0, ksz - 1), (0, ksz - 1)))
        chans = []
        for c in range(C):
            acc = sum(w[a, bb, c] * cpad[:, a:a + Q, bb:bb + D]
                      for a in range(ksz) for bb in range(ksz)) + bs[c]
            chans.append(acc)
        maxed = jnp.max(jnp.stack(chans, axis=1), axis=1)
        entries.append(kmax_ctx(maxed))

    pq = jnp.concatenate(entries, axis=-1)                  # (B, Q, F)
    flat = pq.reshape(B, -1)
    w1flat = params['w1'].reshape(-1, H1)
    h1 = jax.nn.relu(flat @ w1flat + params['b1'])
    h2 = jax.nn.relu(h1 @ params['w2'] + params['b2'])
    return jnp.sum(h2 * params['w3'].reshape(1, -1), axis=-1)


if __name__ == "__main__":
    # small config consistent with the module
    B, Q, D, E = 2, 8, 32, 32
    max_conv_kernel_size = 3
    conv_output_size = 8
    kmax_pooling_size = 2
    F = max_conv_kernel_size * 2 * len(KMAX_VIEW_PCT) * kmax_pooling_size

    key = jax.random.PRNGKey(0)
    keys = jax.random.split(key, 16)
    ki = 0

    params = {
        'max_conv_kernel_size': max_conv_kernel_size,
        'conv_output_size': conv_output_size,
        'kmax_pooling_size': kmax_pooling_size,
    }
    for ksz in range(2, max_conv_kernel_size + 1):
        params[f'conv{ksz}_w'] = 0.2 * jax.random.normal(
            keys[ki], (ksz, ksz, conv_output_size), jnp.float32); ki += 1
        params[f'conv{ksz}_b'] = 0.1 * jax.random.normal(
            keys[ki], (conv_output_size,), jnp.float32); ki += 1
    params['w1'] = 0.05 * jax.random.normal(keys[ki], (Q, F, H1), jnp.float32); ki += 1
    params['b1'] = 0.05 * jax.random.normal(keys[ki], (H1,), jnp.float32); ki += 1
    params['w2'] = 0.1 * jax.random.normal(keys[ki], (H1, H2), jnp.float32); ki += 1
    params['b2'] = 0.1 * jax.random.normal(keys[ki], (H2,), jnp.float32); ki += 1
    params['w3'] = 0.1 * jax.random.normal(keys[ki], (H2,), jnp.float32); ki += 1

    q_emb = jax.random.normal(keys[ki], (B, Q, E), jnp.float32); ki += 1
    d_emb = jax.random.normal(keys[ki], (B, D, E), jnp.float32); ki += 1
    q_mask = jnp.ones((B, Q), jnp.float32)
    d_mask = jnp.ones((B, D), jnp.float32)
    q_idfs = jax.random.uniform(keys[ki], (B, Q, 1), jnp.float32); ki += 1
    d_idfs = jax.random.uniform(keys[ki], (B, D, 1), jnp.float32); ki += 1

    out = co_pacrr_forward(params, q_emb, d_emb, q_mask, d_mask, q_idfs, d_idfs)
    out = jax.block_until_ready(out)

    ref = co_pacrr_reference(params, q_emb, d_emb)
    ref = jax.block_until_ready(ref)
    np.testing.assert_allclose(np.asarray(out), np.asarray(ref), rtol=2e-2, atol=2e-2)

    print("KERNEL_OK")
</pallas_src>

<mosaic_0001>
module attributes {stable_mosaic.version = 11 : i64} {
  func.func @kernel(%arg0: i32, %arg1: memref<2x8x32xf32, #tpu.memory_space<vmem>>, %arg2: memref<2x32x32xf32, #tpu.memory_space<vmem>>, %arg3: memref<3x32x512xf32, #tpu.memory_space<vmem>>, %arg4: memref<1x512xf32, #tpu.memory_space<vmem>>, %arg5: memref<48x1024xf32, #tpu.memory_space<vmem>>, %arg6: memref<1x128xf32, #tpu.memory_space<vmem>>, %arg7: memref<128x128xf32, #tpu.memory_space<vmem>>, %arg8: memref<1x128xf32, #tpu.memory_space<vmem>>, %arg9: memref<1x128xf32, #tpu.memory_space<vmem>>, %arg10: memref<2x1xf32, #tpu.memory_space<vmem>>, %arg11: memref<8x512xf32, #tpu.memory_space<vmem>>) attributes {dimension_semantics = [#tpu.dimension_semantics<parallel>], iteration_bounds = array<i64: 1>, scalar_prefetch = 0 : i64, scratch_operands = 1 : i64, tpu.core_type = #tpu.core_type<tc>, window_params = [{transform_indices = @transform_0, window_bounds = array<i64: 2, 8, 32>}, {transform_indices = @transform_1, window_bounds = array<i64: 2, 32, 32>}, {pipeline_mode = #tpu.pipeline_mode<synchronous>, transform_indices = @transform_2, window_bounds = array<i64: 3, 32, 512>}, {pipeline_mode = #tpu.pipeline_mode<synchronous>, transform_indices = @transform_3, window_bounds = array<i64: 1, 512>}, {pipeline_mode = #tpu.pipeline_mode<synchronous>, transform_indices = @transform_4, window_bounds = array<i64: 48, 1024>}, {pipeline_mode = #tpu.pipeline_mode<synchronous>, transform_indices = @transform_5, window_bounds = array<i64: 1, 128>}, {pipeline_mode = #tpu.pipeline_mode<synchronous>, transform_indices = @transform_6, window_bounds = array<i64: 128, 128>}, {pipeline_mode = #tpu.pipeline_mode<synchronous>, transform_indices = @transform_7, window_bounds = array<i64: 1, 128>}, {pipeline_mode = #tpu.pipeline_mode<synchronous>, transform_indices = @transform_8, window_bounds = array<i64: 1, 128>}, {transform_indices = @transform_9, window_bounds = array<i64: 2, 1>}]} {
    %0 = tpu.iota {dimensions = array<i32: 1>} : vector<8x32xi32>
    %1 = tpu.iota {dimensions = array<i32: 0>} : vector<32x32xi32>
    %2 = tpu.iota {dimensions = array<i32: 1>} : vector<32x32xi32>
    %3 = arith.cmpi sge, %2, %1 : vector<32x32xi32>
    %c6_i32 = arith.constant 6 : i32
    %4 = vector.broadcast %c6_i32 : i32 to vector<32x32xi32>
    %5 = arith.addi %1, %4 : vector<32x32xi32>
    %6 = arith.cmpi slt, %2, %5 : vector<32x32xi32>
    %7 = arith.andi %3, %6 : vector<32x32xi1>
    %cst = arith.constant 0.166666672 : f32
    %cst_0 = arith.constant 0.000000e+00 : f32
    %8 = vector.broadcast %cst : f32 to vector<32x32xf32>
    %9 = vector.broadcast %cst_0 : f32 to vector<32x32xf32>
    %10 = arith.select %7, %8, %9 : vector<32x32xi1>, vector<32x32xf32>
    %11 = tpu.iota {dimensions = array<i32: 0>} : vector<8x8xi32>
    %12 = tpu.iota {dimensions = array<i32: 1>} : vector<8x8xi32>
    %c1_i32 = arith.constant 1 : i32
    %13 = vector.broadcast %c1_i32 : i32 to vector<8x8xi32>
    %14 = arith.addi %11, %13 : vector<8x8xi32>
    %15 = arith.cmpi eq, %12, %14 : vector<8x8xi32>
    %cst_1 = arith.constant 1.000000e+00 : f32
    %cst_2 = arith.constant 0.000000e+00 : f32
    %16 = vector.broadcast %cst_1 : f32 to vector<8x8xf32>
    %17 = vector.broadcast %cst_2 : f32 to vector<8x8xf32>
    %18 = arith.select %15, %16, %17 : vector<8x8xi1>, vector<8x8xf32>
    %c2_i32 = arith.constant 2 : i32
    %19 = vector.broadcast %c2_i32 : i32 to vector<8x8xi32>
    %20 = arith.addi %11, %19 : vector<8x8xi32>
    %21 = arith.cmpi eq, %12, %20 : vector<8x8xi32>
    %cst_3 = arith.constant 1.000000e+00 : f32
    %cst_4 = arith.constant 0.000000e+00 : f32
    %22 = vector.broadcast %cst_3 : f32 to vector<8x8xf32>
    %23 = vector.broadcast %cst_4 : f32 to vector<8x8xf32>
    %24 = arith.select %21, %22, %23 : vector<8x8xi1>, vector<8x8xf32>
    %c0 = arith.constant 0 : index
    %c0_5 = arith.constant 0 : index
    %c0_6 = arith.constant 0 : index
    %25 = vector.load %arg1[%c0, %c0_5, %c0_6] : memref<2x8x32xf32, #tpu.memory_space<vmem>>, vector<1x8x32xf32>
    %26 = vector.shape_cast %25 : vector<1x8x32xf32> to vector<8x32xf32>
    %c0_7 = arith.constant 0 : index
    %c0_8 = arith.constant 0 : index
    %c0_9 = arith.constant 0 : index
    %27 = vector.load %arg2[%c0_7, %c0_8, %c0_9] : memref<2x32x32xf32, #tpu.memory_space<vmem>>, vector<1x32x32xf32>
    %28 = vector.shape_cast %27 : vector<1x32x32xf32> to vector<32x32xf32>
    %29 = arith.mulf %26, %26 : vector<8x32xf32>
    %cst_10 = arith.constant dense<0.000000e+00> : vector<8xf32>
    %30 = vector.multi_reduction <add>, %29, %cst_10 [1] : vector<8x32xf32> to vector<8xf32>
    %31 = vector.shape_cast %30 : vector<8xf32> to vector<8x1xf32>
    %32 = math.sqrt %31 : vector<8x1xf32>
    %cst_11 = arith.constant 9.99999982E-14 : f32
    %33 = vector.broadcast %cst_11 : f32 to vector<8x1xf32>
    %34 = arith.addf %32, %33 : vector<8x1xf32>
    %35 = vector.broadcast %34 : vector<8x1xf32> to vector<8x32xf32>
    %36 = arith.divf %26, %35 : vector<8x32xf32>
    %37 = arith.mulf %28, %28 : vector<32x32xf32>
    %cst_12 = arith.constant dense<0.000000e+00> : vector<32xf32>
    %38 = vector.multi_reduction <add>, %37, %cst_12 [1] : vector<32x32xf32> to vector<32xf32>
    %39 = vector.shape_cast %38 : vector<32xf32> to vector<32x1xf32>
    %40 = math.sqrt %39 : vector<32x1xf32>
    %cst_13 = arith.constant 9.99999982E-14 : f32
    %41 = vector.broadcast %cst_13 : f32 to vector<32x1xf32>
    %42 = arith.addf %40, %41 : vector<32x1xf32>
    %43 = vector.broadcast %42 : vector<32x1xf32> to vector<32x32xf32>
    %44 = arith.divf %28, %43 : vector<32x32xf32>
    %cst_14 = arith.constant dense<0.000000e+00> : vector<8x32xf32>
    %45 = tpu.matmul %36, %44, %cst_14 {dimension_numbers = #tpu.dot_dimension_numbers<[1], [1], [0], [0], [0, 0, 1, 0], [], []>} : vector<8x32xf32>, vector<32x32xf32>, vector<8x32xf32> -> vector<8x32xf32>
    %cst_15 = arith.constant dense<0.000000e+00> : vector<32xf32>
    %46 = vector.multi_reduction <add>, %26, %cst_15 [0] : vector<8x32xf32> to vector<32xf32>
    %47 = vector.shape_cast %46 : vector<32xf32> to vector<1x32xf32>
    %cst_16 = arith.constant 8.000000e+00 : f32
    %48 = vector.broadcast %cst_16 : f32 to vector<1x32xf32>
    %49 = arith.divf %47, %48 : vector<1x32xf32>
    %50 = arith.mulf %49, %49 : vector<1x32xf32>
    %cst_17 = arith.constant dense<0.000000e+00> : vector<1xf32>
    %51 = vector.multi_reduction <add>, %50, %cst_17 [1] : vector<1x32xf32> to vector<1xf32>
    %52 = vector.shape_cast %51 : vector<1xf32> to vector<1x1xf32>
    %53 = math.sqrt %52 : vector<1x1xf32>
    %cst_18 = arith.constant 9.99999982E-14 : f32
    %54 = vector.broadcast %cst_18 : f32 to vector<1x1xf32>
    %55 = arith.addf %53, %54 : vector<1x1xf32>
    %56 = vector.broadcast %55 : vector<1x1xf32> to vector<1x32xf32>
    %57 = arith.divf %49, %56 : vector<1x32xf32>
    %cst_19 = arith.constant dense<0.000000e+00> : vector<32x32xf32>
    %58 = tpu.matmul %10, %28, %cst_19 {dimension_numbers = #tpu.dot_dimension_numbers<[1], [0], [0], [1], [0, 0, 1, 1], [], []>} : vector<32x32xf32>, vector<32x32xf32>, vector<32x32xf32> -> vector<32x32xf32>
    %59 = arith.mulf %58, %58 : vector<32x32xf32>
    %cst_20 = arith.constant dense<0.000000e+00> : vector<32xf32>
    %60 = vector.multi_reduction <add>, %59, %cst_20 [1] : vector<32x32xf32> to vector<32xf32>
    %61 = vector.shape_cast %60 : vector<32xf32> to vector<32x1xf32>
    %62 = math.sqrt %61 : vector<32x1xf32>
    %cst_21 = arith.constant 9.99999982E-14 : f32
    %63 = vector.broadcast %cst_21 : f32 to vector<32x1xf32>
    %64 = arith.addf %62, %63 : vector<32x1xf32>
    %65 = vector.broadcast %64 : vector<32x1xf32> to vector<32x32xf32>
    %66 = arith.divf %58, %65 : vector<32x32xf32>
    %cst_22 = arith.constant dense<0.000000e+00> : vector<1x32xf32>
    %67 = tpu.matmul %57, %66, %cst_22 {dimension_numbers = #tpu.dot_dimension_numbers<[1], [1], [0], [0], [0, 0, 1, 0], [], []>} : vector<1x32xf32>, vector<32x32xf32>, vector<1x32xf32> -> vector<1x32xf32>
    %c8_i32 = arith.constant 8 : i32
    %68 = vector.broadcast %c8_i32 : i32 to vector<8x32xi32>
    %69 = arith.cmpi slt, %0, %68 : vector<8x32xi32>
    %cst_23 = arith.constant -1.000000e+30 : f32
    %70 = vector.broadcast %cst_23 : f32 to vector<8x32xf32>
    %71 = arith.select %69, %45, %70 : vector<8x32xi1>, vector<8x32xf32>
    %cst_24 = arith.constant dense<0xFF800000> : vector<8xf32>
    %72 = vector.multi_reduction <maximumf>, %71, %cst_24 [1] : vector<8x32xf32> to vector<8xf32>
    %73 = vector.shape_cast %72 : vector<8xf32> to vector<8x1xf32>
    %74 = vector.broadcast %73 : vector<8x1xf32> to vector<8x32xf32>
    %75 = arith.cmpf oeq, %71, %74 : vector<8x32xf32>
    %c32_i32 = arith.constant 32 : i32
    %76 = vector.broadcast %c32_i32 : i32 to vector<8x32xi32>
    %77 = arith.select %75, %0, %76 : vector<8x32xi1>, vector<8x32xi32>
    %cst_25 = arith.constant dense<2147483647> : vector<8xi32>
    %78 = vector.multi_reduction <minsi>, %77, %cst_25 [1] : vector<8x32xi32> to vector<8xi32>
    %79 = vector.shape_cast %78 : vector<8xi32> to vector<8x1xi32>
    %80 = vector.broadcast %79 : vector<8x1xi32> to vector<8x32xi32>
    %81 = arith.cmpi eq, %0, %80 : vector<8x32xi32>
    %cst_26 = arith.constant 0.000000e+00 : f32
    %82 = vector.shape_cast %67 : vector<1x32xf32> to vector<1x32xf32>
    %83 = vector.broadcast %82 : vector<1x32xf32> to vector<8x32xf32>
    %84 = vector.broadcast %cst_26 : f32 to vector<8x32xf32>
    %85 = arith.select %81, %83, %84 : vector<8x32xi1>, vector<8x32xf32>
    %cst_27 = arith.constant dense<0.000000e+00> : vector<8xf32>
    %86 = vector.multi_reduction <add>, %85, %cst_27 [1] : vector<8x32xf32> to vector<8xf32>
    %87 = vector.shape_cast %86 : vector<8xf32> to vector<8x1xf32>
    %cst_28 = arith.constant -1.000000e+30 : f32
    %88 = vector.broadcast %cst_28 : f32 to vector<8x32xf32>
    %89 = arith.select %81, %88, %71 : vector<8x32xi1>, vector<8x32xf32>
    %cst_29 = arith.constant dense<0xFF800000> : vector<8xf32>
    %90 = vector.multi_reduction <maximumf>, %89, %cst_29 [1] : vector<8x32xf32> to vector<8xf32>
    %91 = vector.shape_cast %90 : vector<8xf32> to vector<8x1xf32>
    %92 = vector.broadcast %91 : vector<8x1xf32> to vector<8x32xf32>
    %93 = arith.cmpf oeq, %89, %92 : vector<8x32xf32>
    %c32_i32_30 = arith.constant 32 : i32
    %94 = vector.broadcast %c32_i32_30 : i32 to vector<8x32xi32>
    %95 = arith.select %93, %0, %94 : vector<8x32xi1>, vector<8x32xi32>
    %cst_31 = arith.constant dense<2147483647> : vector<8xi32>
    %96 = vector.multi_reduction <minsi>, %95, %cst_31 [1] : vector<8x32xi32> to vector<8xi32>
    %97 = vector.shape_cast %96 : vector<8xi32> to vector<8x1xi32>
    %98 = vector.broadcast %97 : vector<8x1xi32> to vector<8x32xi32>
    %99 = arith.cmpi eq, %0, %98 : vector<8x32xi32>
    %cst_32 = arith.constant 0.000000e+00 : f32
    %100 = vector.shape_cast %67 : vector<1x32xf32> to vector<1x32xf32>
    %101 = vector.broadcast %100 : vector<1x32xf32> to vector<8x32xf32>
    %102 = vector.broadcast %cst_32 : f32 to vector<8x32xf32>
    %103 = arith.select %99, %101, %102 : vector<8x32xi1>, vector<8x32xf32>
    %cst_33 = arith.constant dense<0.000000e+00> : vector<8xf32>
    %104 = vector.multi_reduction <add>, %103, %cst_33 [1] : vector<8x32xf32> to vector<8xf32>
    %105 = vector.shape_cast %104 : vector<8xf32> to vector<8x1xf32>
    %c16_i32 = arith.constant 16 : i32
    %106 = vector.broadcast %c16_i32 : i32 to vector<8x32xi32>
    %107 = arith.cmpi slt, %0, %106 : vector<8x32xi32>
    %cst_34 = arith.constant -1.000000e+30 : f32
    %108 = vector.broadcast %cst_34 : f32 to vector<8x32xf32>
    %109 = arith.select %107, %45, %108 : vector<8x32xi1>, vector<8x32xf32>
    %cst_35 = arith.constant dense<0xFF800000> : vector<8xf32>
    %110 = vector.multi_reduction <maximumf>, %109, %cst_35 [1] : vector<8x32xf32> to vector<8xf32>
    %111 = vector.shape_cast %110 : vector<8xf32> to vector<8x1xf32>
    %112 = vector.broadcast %111 : vector<8x1xf32> to vector<8x32xf32>
    %113 = arith.cmpf oeq, %109, %112 : vector<8x32xf32>
    %c32_i32_36 = arith.constant 32 : i32
    %114 = vector.broadcast %c32_i32_36 : i32 to vector<8x32xi32>
    %115 = arith.select %113, %0, %114 : vector<8x32xi1>, vector<8x32xi32>
    %cst_37 = arith.constant dense<2147483647> : vector<8xi32>
    %116 = vector.multi_reduction <minsi>, %115, %cst_37 [1] : vector<8x32xi32> to vector<8xi32>
    %117 = vector.shape_cast %116 : vector<8xi32> to vector<8x1xi32>
    %118 = vector.broadcast %117 : vector<8x1xi32> to vector<8x32xi32>
    %119 = arith.cmpi eq, %0, %118 : vector<8x32xi32>
    %cst_38 = arith.constant 0.000000e+00 : f32
    %120 = vector.shape_cast %67 : vector<1x32xf32> to vector<1x32xf32>
    %121 = vector.broadcast %120 : vector<1x32xf32> to vector<8x32xf32>
    %122 = vector.broadcast %cst_38 : f32 to vector<8x32xf32>
    %123 = arith.select %119, %121, %122 : vector<8x32xi1>, vector<8x32xf32>
    %cst_39 = arith.constant dense<0.000000e+00> : vector<8xf32>
    %124 = vector.multi_reduction <add>, %123, %cst_39 [1] : vector<8x32xf32> to vector<8xf32>
    %125 = vector.shape_cast %124 : vector<8xf32> to vector<8x1xf32>
    %cst_40 = arith.constant -1.000000e+30 : f32
    %126 = vector.broadcast %cst_40 : f32 to vector<8x32xf32>
    %127 = arith.select %119, %126, %109 : vector<8x32xi1>, vector<8x32xf32>
    %cst_41 = arith.constant dense<0xFF800000> : vector<8xf32>
    %128 = vector.multi_reduction <maximumf>, %127, %cst_41 [1] : vector<8x32xf32> to vector<8xf32>
    %129 = vector.shape_cast %128 : vector<8xf32> to vector<8x1xf32>
    %130 = vector.broadcast %129 : vector<8x1xf32> to vector<8x32xf32>
    %131 = arith.cmpf oeq, %127, %130 : vector<8x32xf32>
    %c32_i32_42 = arith.constant 32 : i32
    %132 = vector.broadcast %c32_i32_42 : i32 to vector<8x32xi32>
    %133 = arith.select %131, %0, %132 : vector<8x32xi1>, vector<8x32xi32>
    %cst_43 = arith.constant dense<2147483647> : vector<8xi32>
    %134 = vector.multi_reduction <minsi>, %133, %cst_43 [1] : vector<8x32xi32> to vector<8xi32>
    %135 = vector.shape_cast %134 : vector<8xi32> to vector<8x1xi32>
    %136 = vector.broadcast %135 : vector<8x1xi32> to vector<8x32xi32>
    %137 = arith.cmpi eq, %0, %136 : vector<8x32xi32>
    %cst_44 = arith.constant 0.000000e+00 : f32
    %138 = vector.shape_cast %67 : vector<1x32xf32> to vector<1x32xf32>
    %139 = vector.broadcast %138 : vector<1x32xf32> to vector<8x32xf32>
    %140 = vector.broadcast %cst_44 : f32 to vector<8x32xf32>
    %141 = arith.select %137, %139, %140 : vector<8x32xi1>, vector<8x32xf32>
    %cst_45 = arith.constant dense<0.000000e+00> : vector<8xf32>
    %142 = vector.multi_reduction <add>, %141, %cst_45 [1] : vector<8x32xf32> to vector<8xf32>
    %143 = vector.shape_cast %142 : vector<8xf32> to vector<8x1xf32>
    %c24_i32 = arith.constant 24 : i32
    %144 = vector.broadcast %c24_i32 : i32 to vector<8x32xi32>
    %145 = arith.cmpi slt, %0, %144 : vector<8x32xi32>
    %cst_46 = arith.constant -1.000000e+30 : f32
    %146 = vector.broadcast %cst_46 : f32 to vector<8x32xf32>
    %147 = arith.select %145, %45, %146 : vector<8x32xi1>, vector<8x32xf32>
    %cst_47 = arith.constant dense<0xFF800000> : vector<8xf32>
    %148 = vector.multi_reduction <maximumf>, %147, %cst_47 [1] : vector<8x32xf32> to vector<8xf32>
    %149 = vector.shape_cast %148 : vector<8xf32> to vector<8x1xf32>
    %150 = vector.broadcast %149 : vector<8x1xf32> to vector<8x32xf32>
    %151 = arith.cmpf oeq, %147, %150 : vector<8x32xf32>
    %c32_i32_48 = arith.constant 32 : i32
    %152 = vector.broadcast %c32_i32_48 : i32 to vector<8x32xi32>
    %153 = arith.select %151, %0, %152 : vector<8x32xi1>, vector<8x32xi32>
    %cst_49 = arith.constant dense<2147483647> : vector<8xi32>
    %154 = vector.multi_reduction <minsi>, %153, %cst_49 [1] : vector<8x32xi32> to vector<8xi32>
    %155 = vector.shape_cast %154 : vector<8xi32> to vector<8x1xi32>
    %156 = vector.broadcast %155 : vector<8x1xi32> to vector<8x32xi32>
    %157 = arith.cmpi eq, %0, %156 : vector<8x32xi32>
    %cst_50 = arith.constant 0.000000e+00 : f32
    %158 = vector.shape_cast %67 : vector<1x32xf32> to vector<1x32xf32>
    %159 = vector.broadcast %158 : vector<1x32xf32> to vector<8x32xf32>
    %160 = vector.broadcast %cst_50 : f32 to vector<8x32xf32>
    %161 = arith.select %157, %159, %160 : vector<8x32xi1>, vector<8x32xf32>
    %cst_51 = arith.constant dense<0.000000e+00> : vector<8xf32>
    %162 = vector.multi_reduction <add>, %161, %cst_51 [1] : vector<8x32xf32> to vector<8xf32>
    %163 = vector.shape_cast %162 : vector<8xf32> to vector<8x1xf32>
    %cst_52 = arith.constant -1.000000e+30 : f32
    %164 = vector.broadcast %cst_52 : f32 to vector<8x32xf32>
    %165 = arith.select %157, %164, %147 : vector<8x32xi1>, vector<8x32xf32>
    %cst_53 = arith.constant dense<0xFF800000> : vector<8xf32>
    %166 = vector.multi_reduction <maximumf>, %165, %cst_53 [1] : vector<8x32xf32> to vector<8xf32>
    %167 = vector.shape_cast %166 : vector<8xf32> to vector<8x1xf32>
    %168 = vector.broadcast %167 : vector<8x1xf32> to vector<8x32xf32>
    %169 = arith.cmpf oeq, %165, %168 : vector<8x32xf32>
    %c32_i32_54 = arith.constant 32 : i32
    %170 = vector.broadcast %c32_i32_54 : i32 to vector<8x32xi32>
    %171 = arith.select %169, %0, %170 : vector<8x32xi1>, vector<8x32xi32>
    %cst_55 = arith.constant dense<2147483647> : vector<8xi32>
    %172 = vector.multi_reduction <minsi>, %171, %cst_55 [1] : vector<8x32xi32> to vector<8xi32>
    %173 = vector.shape_cast %172 : vector<8xi32> to vector<8x1xi32>
    %174 = vector.broadcast %173 : vector<8x1xi32> to vector<8x32xi32>
    %175 = arith.cmpi eq, %0, %174 : vector<8x32xi32>
    %cst_56 = arith.constant 0.000000e+00 : f32
    %176 = vector.shape_cast %67 : vector<1x32xf32> to vector<1x32xf32>
    %177 = vector.broadcast %176 : vector<1x32xf32> to vector<8x32xf32>
    %178 = vector.broadcast %cst_56 : f32 to vector<8x32xf32>
    %179 = arith.select %175, %177, %178 : vector<8x32xi1>, vector<8x32xf32>
    %cst_57 = arith.constant dense<0.000000e+00> : vector<8xf32>
    %180 = vector.multi_reduction <add>, %179, %cst_57 [1] : vector<8x32xf32> to vector<8xf32>
    %181 = vector.shape_cast %180 : vector<8xf32> to vector<8x1xf32>
    %c32_i32_58 = arith.constant 32 : i32
    %182 = vector.broadcast %c32_i32_58 : i32 to vector<8x32xi32>
    %183 = arith.cmpi slt, %0, %182 : vector<8x32xi32>
    %cst_59 = arith.constant -1.000000e+30 : f32
    %184 = vector.broadcast %cst_59 : f32 to vector<8x32xf32>
    %185 = arith.select %183, %45, %184 : vector<8x32xi1>, vector<8x32xf32>
    %cst_60 = arith.constant dense<0xFF800000> : vector<8xf32>
    %186 = vector.multi_reduction <maximumf>, %185, %cst_60 [1] : vector<8x32xf32> to vector<8xf32>
    %187 = vector.shape_cast %186 : vector<8xf32> to vector<8x1xf32>
    %188 = vector.broadcast %187 : vector<8x1xf32> to vector<8x32xf32>
    %189 = arith.cmpf oeq, %185, %188 : vector<8x32xf32>
    %c32_i32_61 = arith.constant 32 : i32
    %190 = vector.broadcast %c32_i32_61 : i32 to vector<8x32xi32>
    %191 = arith.select %189, %0, %190 : vector<8x32xi1>, vector<8x32xi32>
    %cst_62 = arith.constant dense<2147483647> : vector<8xi32>
    %192 = vector.multi_reduction <minsi>, %191, %cst_62 [1] : vector<8x32xi32> to vector<8xi32>
    %193 = vector.shape_cast %192 : vector<8xi32> to vector<8x1xi32>
    %194 = vector.broadcast %193 : vector<8x1xi32> to vector<8x32xi32>
    %195 = arith.cmpi eq, %0, %194 : vector<8x32xi32>
    %cst_63 = arith.constant 0.000000e+00 : f32
    %196 = vector.shape_cast %67 : vector<1x32xf32> to vector<1x32xf32>
    %197 = vector.broadcast %196 : vector<1x32xf32> to vector<8x32xf32>
    %198 = vector.broadcast %cst_63 : f32 to vector<8x32xf32>
    %199 = arith.select %195, %197, %198 : vector<8x32xi1>, vector<8x32xf32>
    %cst_64 = arith.constant dense<0.000000e+00> : vector<8xf32>
    %200 = vector.multi_reduction <add>, %199, %cst_64 [1] : vector<8x32xf32> to vector<8xf32>
    %201 = vector.shape_cast %200 : vector<8xf32> to vector<8x1xf32>
    %cst_65 = arith.constant -1.000000e+30 : f32
    %202 = vector.broadcast %cst_65 : f32 to vector<8x32xf32>
    %203 = arith.select %195, %202, %185 : vector<8x32xi1>, vector<8x32xf32>
    %cst_66 = arith.constant dense<0xFF800000> : vector<8xf32>
    %204 = vector.multi_reduction <maximumf>, %203, %cst_66 [1] : vector<8x32xf32> to vector<8xf32>
    %205 = vector.shape_cast %204 : vector<8xf32> to vector<8x1xf32>
    %206 = vector.broadcast %205 : vector<8x1xf32> to vector<8x32xf32>
    %207 = arith.cmpf oeq, %203, %206 : vector<8x32xf32>
    %c32_i32_67 = arith.constant 32 : i32
    %208 = vector.broadcast %c32_i32_67 : i32 to vector<8x32xi32>
    %209 = arith.select %207, %0, %208 : vector<8x32xi1>, vector<8x32xi32>
    %cst_68 = arith.constant dense<2147483647> : vector<8xi32>
    %210 = vector.multi_reduction <minsi>, %209, %cst_68 [1] : vector<8x32xi32> to vector<8xi32>
    %211 = vector.shape_cast %210 : vector<8xi32> to vector<8x1xi32>
    %212 = vector.broadcast %211 : vector<8x1xi32> to vector<8x32xi32>
    %213 = arith.cmpi eq, %0, %212 : vector<8x32xi32>
    %cst_69 = arith.constant 0.000000e+00 : f32
    %214 = vector.shape_cast %67 : vector<1x32xf32> to vector<1x32xf32>
    %215 = vector.broadcast %214 : vector<1x32xf32> to vector<8x32xf32>
    %216 = vector.broadcast %cst_69 : f32 to vector<8x32xf32>
    %217 = arith.select %213, %215, %216 : vector<8x32xi1>, vector<8x32xf32>
    %cst_70 = arith.constant dense<0.000000e+00> : vector<8xf32>
    %218 = vector.multi_reduction <add>, %217, %cst_70 [1] : vector<8x32xf32> to vector<8xf32>
    %219 = vector.shape_cast %218 : vector<8xf32> to vector<8x1xf32>
    %220 = tpu.concatenate %73, %91, %111, %129, %149, %167, %187, %205, %87, %105, %125, %143, %163, %181, %201, %219 in 1 : vector<8x1xf32>, vector<8x1xf32>, vector<8x1xf32>, vector<8x1xf32>, vector<8x1xf32>, vector<8x1xf32>, vector<8x1xf32>, vector<8x1xf32>, vector<8x1xf32>, vector<8x1xf32>, vector<8x1xf32>, vector<8x1xf32>, vector<8x1xf32>, vector<8x1xf32>, vector<8x1xf32>, vector<8x1xf32> -> vector<8x16xf32>
    %c0_71 = arith.constant 0 : index
    %c0_72 = arith.constant 0 : index
    %c0_73 = arith.constant 0 : index
    %221 = vector.load %arg3[%c0_71, %c0_72, %c0_73] : memref<3x32x512xf32, #tpu.memory_space<vmem>>, vector<1x32x512xf32>
    %222 = vector.shape_cast %221 : vector<1x32x512xf32> to vector<32x512xf32>
    %cst_74 = arith.constant dense<0.000000e+00> : vector<8x512xf32>
    %223 = tpu.matmul %45, %222, %cst_74 {dimension_numbers = #tpu.dot_dimension_numbers<[1], [0], [0], [1], [0, 0, 1, 1], [], []>} : vector<8x32xf32>, vector<32x512xf32>, vector<8x512xf32> -> vector<8x512xf32>
    %cst_75 = arith.constant dense<0.000000e+00> : vector<8x32xf32>
    %224 = tpu.matmul %18, %45, %cst_75 {dimension_numbers = #tpu.dot_dimension_numbers<[1], [0], [0], [1], [0, 0, 1, 1], [], []>} : vector<8x8xf32>, vector<8x32xf32>, vector<8x32xf32> -> vector<8x32xf32>
    %c1 = arith.constant 1 : index
    %c0_76 = arith.constant 0 : index
    %c0_77 = arith.constant 0 : index
    %225 = vector.load %arg3[%c1, %c0_76, %c0_77] : memref<3x32x512xf32, #tpu.memory_space<vmem>>, vector<1x32x512xf32>
    %226 = vector.shape_cast %225 : vector<1x32x512xf32> to vector<32x512xf32>
    %cst_78 = arith.constant dense<0.000000e+00> : vector<8x512xf32>
    %227 = tpu.matmul %224, %226, %cst_78 {dimension_numbers = #tpu.dot_dimension_numbers<[1], [0], [0], [1], [0, 0, 1, 1], [], []>} : vector<8x32xf32>, vector<32x512xf32>, vector<8x512xf32> -> vector<8x512xf32>
    %228 = arith.addf %223, %227 : vector<8x512xf32>
    %cst_79 = arith.constant dense<0.000000e+00> : vector<8x32xf32>
    %229 = tpu.matmul %24, %45, %cst_79 {dimension_numbers = #tpu.dot_dimension_numbers<[1], [0], [0], [1], [0, 0, 1, 1], [], []>} : vector<8x8xf32>, vector<8x32xf32>, vector<8x32xf32> -> vector<8x32xf32>
    %c2 = arith.constant 2 : index
    %c0_80 = arith.constant 0 : index
    %c0_81 = arith.constant 0 : index
    %230 = vector.load %arg3[%c2, %c0_80, %c0_81] : memref<3x32x512xf32, #tpu.memory_space<vmem>>, vector<1x32x512xf32>
    %231 = vector.shape_cast %230 : vector<1x32x512xf32> to vector<32x512xf32>
    %cst_82 = arith.constant dense<0.000000e+00> : vector<8x512xf32>
    %232 = tpu.matmul %229, %231, %cst_82 {dimension_numbers = #tpu.dot_dimension_numbers<[1], [0], [0], [1], [0, 0, 1, 1], [], []>} : vector<8x32xf32>, vector<32x512xf32>, vector<8x512xf32> -> vector<8x512xf32>
    %233 = arith.addf %228, %232 : vector<8x512xf32>
    %c0_83 = arith.constant 0 : index
    %c0_84 = arith.constant 0 : index
    %234 = vector.load %arg4[%c0_83, %c0_84] : memref<1x512xf32, #tpu.memory_space<vmem>>, vector<1x512xf32>
    %235 = vector.broadcast %234 : vector<1x512xf32> to vector<8x512xf32>
    %236 = arith.addf %233, %235 : vector<8x512xf32>
    %c0_85 = arith.constant 0 : index
    %c0_86 = arith.constant 0 : index
    %237 = vector.load %arg11[%c0_85, %c0_86] : memref<8x512xf32, #tpu.memory_space<vmem>>, vector<8x512xf32>
    tpu.vector_store %arg11[%c0_85, %c0_86], %236 {strides = array<i32>} : memref<8x512xf32, #tpu.memory_space<vmem>>, vector<8x512xf32>,
    %c0_87 = arith.constant 0 : index
    %c0_88 = arith.constant 0 : index
    %238 = vector.load %arg11[%c0_87, %c0_88] : memref<8x512xf32, #tpu.memory_space<vmem>>, vector<8x32xf32>
    %c0_89 = arith.constant 0 : index
    %c32 = arith.constant 32 : index
    %239 = vector.load %arg11[%c0_89, %c32] : memref<8x512xf32, #tpu.memory_space<vmem>>, vector<8x32xf32>
    %240 = arith.maximumf %238, %239 : vector<8x32xf32>
    %c0_90 = arith.constant 0 : index
    %c64 = arith.constant 64 : index
    %241 = vector.load %arg11[%c0_90, %c64] : memref<8x512xf32, #tpu.memory_space<vmem>>, vector<8x32xf32>
    %242 = arith.maximumf %240, %241 : vector<8x32xf32>
    %c0_91 = arith.constant 0 : index
    %c96 = arith.constant 96 : index
    %243 = vector.load %arg11[%c0_91, %c96] : memref<8x512xf32, #tpu.memory_space<vmem>>, vector<8x32xf32>
    %244 = arith.maximumf %242, %243 : vector<8x32xf32>
    %c0_92 = arith.constant 0 : index
    %c128 = arith.constant 128 : index
    %245 = vector.load %arg11[%c0_92, %c128] : memref<8x512xf32, #tpu.memory_space<vmem>>, vector<8x32xf32>
    %246 = arith.maximumf %244, %245 : vector<8x32xf32>
    %c0_93 = arith.constant 0 : index
    %c160 = arith.constant 160 : index
    %247 = vector.load %arg11[%c0_93, %c160] : memref<8x512xf32, #tpu.memory_space<vmem>>, vector<8x32xf32>
    %248 = arith.maximumf %246, %247 : vector<8x32xf32>
    %c0_94 = arith.constant 0 : index
    %c192 = arith.constant 192 : index
    %249 = vector.load %arg11[%c0_94, %c192] : memref<8x512xf32, #tpu.memory_space<vmem>>, vector<8x32xf32>
    %250 = arith.maximumf %248, %249 : vector<8x32xf32>
    %c0_95 = arith.constant 0 : index
    %c224 = arith.constant 224 : index
    %251 = vector.load %arg11[%c0_95, %c224] : memref<8x512xf32, #tpu.memory_space<vmem>>, vector<8x32xf32>
    %252 = arith.maximumf %250, %251 : vector<8x32xf32>
    %c8_i32_96 = arith.constant 8 : i32
    %253 = vector.broadcast %c8_i32_96 : i32 to vector<8x32xi32>
    %254 = arith.cmpi slt, %0, %253 : vector<8x32xi32>
    %cst_97 = arith.constant -1.000000e+30 : f32
    %255 = vector.broadcast %cst_97 : f32 to vector<8x32xf32>
    %256 = arith.select %254, %252, %255 : vector<8x32xi1>, vector<8x32xf32>
    %cst_98 = arith.constant dense<0xFF800000> : vector<8xf32>
    %257 = vector.multi_reduction <maximumf>, %256, %cst_98 [1] : vector<8x32xf32> to vector<8xf32>
    %258 = vector.shape_cast %257 : vector<8xf32> to vector<8x1xf32>
    %259 = vector.broadcast %258 : vector<8x1xf32> to vector<8x32xf32>
    %260 = arith.cmpf oeq, %256, %259 : vector<8x32xf32>
    %c32_i32_99 = arith.constant 32 : i32
    %261 = vector.broadcast %c32_i32_99 : i32 to vector<8x32xi32>
    %262 = arith.select %260, %0, %261 : vector<8x32xi1>, vector<8x32xi32>
    %cst_100 = arith.constant dense<2147483647> : vector<8xi32>
    %263 = vector.multi_reduction <minsi>, %262, %cst_100 [1] : vector<8x32xi32> to vector<8xi32>
    %264 = vector.shape_cast %263 : vector<8xi32> to vector<8x1xi32>
    %265 = vector.broadcast %264 : vector<8x1xi32> to vector<8x32xi32>
    %266 = arith.cmpi eq, %0, %265 : vector<8x32xi32>
    %cst_101 = arith.constant 0.000000e+00 : f32
    %267 = vector.shape_cast %67 : vector<1x32xf32> to vector<1x32xf32>
    %268 = vector.broadcast %267 : vector<1x32xf32> to vector<8x32xf32>
    %269 = vector.broadcast %cst_101 : f32 to vector<8x32xf32>
    %270 = arith.select %266, %268, %269 : vector<8x32xi1>, vector<8x32xf32>
    %cst_102 = arith.constant dense<0.000000e+00> : vector<8xf32>
    %271 = vector.multi_reduction <add>, %270, %cst_102 [1] : vector<8x32xf32> to vector<8xf32>
    %272 = vector.shape_cast %271 : vector<8xf32> to vector<8x1xf32>
    %cst_103 = arith.constant -1.000000e+30 : f32
    %273 = vector.broadcast %cst_103 : f32 to vector<8x32xf32>
    %274 = arith.select %266, %273, %256 : vector<8x32xi1>, vector<8x32xf32>
    %cst_104 = arith.constant dense<0xFF800000> : vector<8xf32>
    %275 = vector.multi_reduction <maximumf>, %274, %cst_104 [1] : vector<8x32xf32> to vector<8xf32>
    %276 = vector.shape_cast %275 : vector<8xf32> to vector<8x1xf32>
    %277 = vector.broadcast %276 : vector<8x1xf32> to vector<8x32xf32>
    %278 = arith.cmpf oeq, %274, %277 : vector<8x32xf32>
    %c32_i32_105 = arith.constant 32 : i32
    %279 = vector.broadcast %c32_i32_105 : i32 to vector<8x32xi32>
    %280 = arith.select %278, %0, %279 : vector<8x32xi1>, vector<8x32xi32>
    %cst_106 = arith.constant dense<2147483647> : vector<8xi32>
    %281 = vector.multi_reduction <minsi>, %280, %cst_106 [1] : vector<8x32xi32> to vector<8xi32>
    %282 = vector.shape_cast %281 : vector<8xi32> to vector<8x1xi32>
    %283 = vector.broadcast %282 : vector<8x1xi32> to vector<8x32xi32>
    %284 = arith.cmpi eq, %0, %283 : vector<8x32xi32>
    %cst_107 = arith.constant 0.000000e+00 : f32
    %285 = vector.shape_cast %67 : vector<1x32xf32> to vector<1x32xf32>
    %286 = vector.broadcast %285 : vector<1x32xf32> to vector<8x32xf32>
    %287 = vector.broadcast %cst_107 : f32 to vector<8x32xf32>
    %288 = arith.select %284, %286, %287 : vector<8x32xi1>, vector<8x32xf32>
    %cst_108 = arith.constant dense<0.000000e+00> : vector<8xf32>
    %289 = vector.multi_reduction <add>, %288, %cst_108 [1] : vector<8x32xf32> to vector<8xf32>
    %290 = vector.shape_cast %289 : vector<8xf32> to vector<8x1xf32>
    %c16_i32_109 = arith.constant 16 : i32
    %291 = vector.broadcast %c16_i32_109 : i32 to vector<8x32xi32>
    %292 = arith.cmpi slt, %0, %291 : vector<8x32xi32>
    %cst_110 = arith.constant -1.000000e+30 : f32
    %293 = vector.broadcast %cst_110 : f32 to vector<8x32xf32>
    %294 = arith.select %292, %252, %293 : vector<8x32xi1>, vector<8x32xf32>
    %cst_111 = arith.constant dense<0xFF800000> : vector<8xf32>
    %295 = vector.multi_reduction <maximumf>, %294, %cst_111 [1] : vector<8x32xf32> to vector<8xf32>
    %296 = vector.shape_cast %295 : vector<8xf32> to vector<8x1xf32>
    %297 = vector.broadcast %296 : vector<8x1xf32> to vector<8x32xf32>
    %298 = arith.cmpf oeq, %294, %297 : vector<8x32xf32>
    %c32_i32_112 = arith.constant 32 : i32
    %299 = vector.broadcast %c32_i32_112 : i32 to vector<8x32xi32>
    %300 = arith.select %298, %0, %299 : vector<8x32xi1>, vector<8x32xi32>
    %cst_113 = arith.constant dense<2147483647> : vector<8xi32>
    %301 = vector.multi_reduction <minsi>, %300, %cst_113 [1] : vector<8x32xi32> to vector<8xi32>
    %302 = vector.shape_cast %301 : vector<8xi32> to vector<8x1xi32>
    %303 = vector.broadcast %302 : vector<8x1xi32> to vector<8x32xi32>
    %304 = arith.cmpi eq, %0, %303 : vector<8x32xi32>
    %cst_114 = arith.constant 0.000000e+00 : f32
    %305 = vector.shape_cast %67 : vector<1x32xf32> to vector<1x32xf32>
    %306 = vector.broadcast %305 : vector<1x32xf32> to vector<8x32xf32>
    %307 = vector.broadcast %cst_114 : f32 to vector<8x32xf32>
    %308 = arith.select %304, %306, %307 : vector<8x32xi1>, vector<8x32xf32>
    %cst_115 = arith.constant dense<0.000000e+00> : vector<8xf32>
    %309 = vector.multi_reduction <add>, %308, %cst_115 [1] : vector<8x32xf32> to vector<8xf32>
    %310 = vector.shape_cast %309 : vector<8xf32> to vector<8x1xf32>
    %cst_116 = arith.constant -1.000000e+30 : f32
    %311 = vector.broadcast %cst_116 : f32 to vector<8x32xf32>
    %312 = arith.select %304, %311, %294 : vector<8x32xi1>, vector<8x32xf32>
    %cst_117 = arith.constant dense<0xFF800000> : vector<8xf32>
    %313 = vector.multi_reduction <maximumf>, %312, %cst_117 [1] : vector<8x32xf32> to vector<8xf32>
    %314 = vector.shape_cast %313 : vector<8xf32> to vector<8x1xf32>
    %315 = vector.broadcast %314 : vector<8x1xf32> to vector<8x32xf32>
    %316 = arith.cmpf oeq, %312, %315 : vector<8x32xf32>
    %c32_i32_118 = arith.constant 32 : i32
    %317 = vector.broadcast %c32_i32_118 : i32 to vector<8x32xi32>
    %318 = arith.select %316, %0, %317 : vector<8x32xi1>, vector<8x32xi32>
    %cst_119 = arith.constant dense<2147483647> : vector<8xi32>
    %319 = vector.multi_reduction <minsi>, %318, %cst_119 [1] : vector<8x32xi32> to vector<8xi32>
    %320 = vector.shape_cast %319 : vector<8xi32> to vector<8x1xi32>
    %321 = vector.broadcast %320 : vector<8x1xi32> to vector<8x32xi32>
    %322 = arith.cmpi eq, %0, %321 : vector<8x32xi32>
    %cst_120 = arith.constant 0.000000e+00 : f32
    %323 = vector.shape_cast %67 : vector<1x32xf32> to vector<1x32xf32>
    %324 = vector.broadcast %323 : vector<1x32xf32> to vector<8x32xf32>
    %325 = vector.broadcast %cst_120 : f32 to vector<8x32xf32>
    %326 = arith.select %322, %324, %325 : vector<8x32xi1>, vector<8x32xf32>
    %cst_121 = arith.constant dense<0.000000e+00> : vector<8xf32>
    %327 = vector.multi_reduction <add>, %326, %cst_121 [1] : vector<8x32xf32> to vector<8xf32>
    %328 = vector.shape_cast %327 : vector<8xf32> to vector<8x1xf32>
    %c24_i32_122 = arith.constant 24 : i32
    %329 = vector.broadcast %c24_i32_122 : i32 to vector<8x32xi32>
    %330 = arith.cmpi slt, %0, %329 : vector<8x32xi32>
    %cst_123 = arith.constant -1.000000e+30 : f32
    %331 = vector.broadcast %cst_123 : f32 to vector<8x32xf32>
    %332 = arith.select %330, %252, %331 : vector<8x32xi1>, vector<8x32xf32>
    %cst_124 = arith.constant dense<0xFF800000> : vector<8xf32>
    %333 = vector.multi_reduction <maximumf>, %332, %cst_124 [1] : vector<8x32xf32> to vector<8xf32>
    %334 = vector.shape_cast %333 : vector<8xf32> to vector<8x1xf32>
    %335 = vector.broadcast %334 : vector<8x1xf32> to vector<8x32xf32>
    %336 = arith.cmpf oeq, %332, %335 : vector<8x32xf32>
    %c32_i32_125 = arith.constant 32 : i32
    %337 = vector.broadcast %c32_i32_125 : i32 to vector<8x32xi32>
    %338 = arith.select %336, %0, %337 : vector<8x32xi1>, vector<8x32xi32>
    %cst_126 = arith.constant dense<2147483647> : vector<8xi32>
    %339 = vector.multi_reduction <minsi>, %338, %cst_126 [1] : vector<8x32xi32> to vector<8xi32>
    %340 = vector.shape_cast %339 : vector<8xi32> to vector<8x1xi32>
    %341 = vector.broadcast %340 : vector<8x1xi32> to vector<8x32xi32>
    %342 = arith.cmpi eq, %0, %341 : vector<8x32xi32>
    %cst_127 = arith.constant 0.000000e+00 : f32
    %343 = vector.shape_cast %67 : vector<1x32xf32> to vector<1x32xf32>
    %344 = vector.broadcast %343 : vector<1x32xf32> to vector<8x32xf32>
    %345 = vector.broadcast %cst_127 : f32 to vector<8x32xf32>
    %346 = arith.select %342, %344, %345 : vector<8x32xi1>, vector<8x32xf32>
    %cst_128 = arith.constant dense<0.000000e+00> : vector<8xf32>
    %347 = vector.multi_reduction <add>, %346, %cst_128 [1] : vector<8x32xf32> to vector<8xf32>
    %348 = vector.shape_cast %347 : vector<8xf32> to vector<8x1xf32>
    %cst_129 = arith.constant -1.000000e+30 : f32
    %349 = vector.broadcast %cst_129 : f32 to vector<8x32xf32>
    %350 = arith.select %342, %349, %332 : vector<8x32xi1>, vector<8x32xf32>
    %cst_130 = arith.constant dense<0xFF800000> : vector<8xf32>
    %351 = vector.multi_reduction <maximumf>, %350, %cst_130 [1] : vector<8x32xf32> to vector<8xf32>
    %352 = vector.shape_cast %351 : vector<8xf32> to vector<8x1xf32>
    %353 = vector.broadcast %352 : vector<8x1xf32> to vector<8x32xf32>
    %354 = arith.cmpf oeq, %350, %353 : vector<8x32xf32>
    %c32_i32_131 = arith.constant 32 : i32
    %355 = vector.broadcast %c32_i32_131 : i32 to vector<8x32xi32>
    %356 = arith.select %354, %0, %355 : vector<8x32xi1>, vector<8x32xi32>
    %cst_132 = arith.constant dense<2147483647> : vector<8xi32>
    %357 = vector.multi_reduction <minsi>, %356, %cst_132 [1] : vector<8x32xi32> to vector<8xi32>
    %358 = vector.shape_cast %357 : vector<8xi32> to vector<8x1xi32>
    %359 = vector.broadcast %358 : vector<8x1xi32> to vector<8x32xi32>
    %360 = arith.cmpi eq, %0, %359 : vector<8x32xi32>
    %cst_133 = arith.constant 0.000000e+00 : f32
    %361 = vector.shape_cast %67 : vector<1x32xf32> to vector<1x32xf32>
    %362 = vector.broadcast %361 : vector<1x32xf32> to vector<8x32xf32>
    %363 = vector.broadcast %cst_133 : f32 to vector<8x32xf32>
    %364 = arith.select %360, %362, %363 : vector<8x32xi1>, vector<8x32xf32>
    %cst_134 = arith.constant dense<0.000000e+00> : vector<8xf32>
    %365 = vector.multi_reduction <add>, %364, %cst_134 [1] : vector<8x32xf32> to vector<8xf32>
    %366 = vector.shape_cast %365 : vector<8xf32> to vector<8x1xf32>
    %c32_i32_135 = arith.constant 32 : i32
    %367 = vector.broadcast %c32_i32_135 : i32 to vector<8x32xi32>
    %368 = arith.cmpi slt, %0, %367 : vector<8x32xi32>
    %cst_136 = arith.constant -1.000000e+30 : f32
    %369 = vector.broadcast %cst_136 : f32 to vector<8x32xf32>
    %370 = arith.select %368, %252, %369 : vector<8x32xi1>, vector<8x32xf32>
    %cst_137 = arith.constant dense<0xFF800000> : vector<8xf32>
    %371 = vector.multi_reduction <maximumf>, %370, %cst_137 [1] : vector<8x32xf32> to vector<8xf32>
    %372 = vector.shape_cast %371 : vector<8xf32> to vector<8x1xf32>
    %373 = vector.broadcast %372 : vector<8x1xf32> to vector<8x32xf32>
    %374 = arith.cmpf oeq, %370, %373 : vector<8x32xf32>
    %c32_i32_138 = arith.constant 32 : i32
    %375 = vector.broadcast %c32_i32_138 : i32 to vector<8x32xi32>
    %376 = arith.select %374, %0, %375 : vector<8x32xi1>, vector<8x32xi32>
    %cst_139 = arith.constant dense<2147483647> : vector<8xi32>
    %377 = vector.multi_reduction <minsi>, %376, %cst_139 [1] : vector<8x32xi32> to vector<8xi32>
    %378 = vector.shape_cast %377 : vector<8xi32> to vector<8x1xi32>
    %379 = vector.broadcast %378 : vector<8x1xi32> to vector<8x32xi32>
    %380 = arith.cmpi eq, %0, %379 : vector<8x32xi32>
    %cst_140 = arith.constant 0.000000e+00 : f32
    %381 = vector.shape_cast %67 : vector<1x32xf32> to vector<1x32xf32>
    %382 = vector.broadcast %381 : vector<1x32xf32> to vector<8x32xf32>
    %383 = vector.broadcast %cst_140 : f32 to vector<8x32xf32>
    %384 = arith.select %380, %382, %383 : vector<8x32xi1>, vector<8x32xf32>
    %cst_141 = arith.constant dense<0.000000e+00> : vector<8xf32>
    %385 = vector.multi_reduction <add>, %384, %cst_141 [1] : vector<8x32xf32> to vector<8xf32>
    %386 = vector.shape_cast %385 : vector<8xf32> to vector<8x1xf32>
    %cst_142 = arith.constant -1.000000e+30 : f32
    %387 = vector.broadcast %cst_142 : f32 to vector<8x32xf32>
    %388 = arith.select %380, %387, %370 : vector<8x32xi1>, vector<8x32xf32>
    %cst_143 = arith.constant dense<0xFF800000> : vector<8xf32>
    %389 = vector.multi_reduction <maximumf>, %388, %cst_143 [1] : vector<8x32xf32> to vector<8xf32>
    %390 = vector.shape_cast %389 : vector<8xf32> to vector<8x1xf32>
    %391 = vector.broadcast %390 : vector<8x1xf32> to vector<8x32xf32>
    %392 = arith.cmpf oeq, %388, %391 : vector<8x32xf32>
    %c32_i32_144 = arith.constant 32 : i32
    %393 = vector.broadcast %c32_i32_144 : i32 to vector<8x32xi32>
    %394 = arith.select %392, %0, %393 : vector<8x32xi1>, vector<8x32xi32>
    %cst_145 = arith.constant dense<2147483647> : vector<8xi32>
    %395 = vector.multi_reduction <minsi>, %394, %cst_145 [1] : vector<8x32xi32> to vector<8xi32>
    %396 = vector.shape_cast %395 : vector<8xi32> to vector<8x1xi32>
    %397 = vector.broadcast %396 : vector<8x1xi32> to vector<8x32xi32>
    %398 = arith.cmpi eq, %0, %397 : vector<8x32xi32>
    %cst_146 = arith.constant 0.000000e+00 : f32
    %399 = vector.shape_cast %67 : vector<1x32xf32> to vector<1x32xf32>
    %400 = vector.broadcast %399 : vector<1x32xf32> to vector<8x32xf32>
    %401 = vector.broadcast %cst_146 : f32 to vector<8x32xf32>
    %402 = arith.select %398, %400, %401 : vector<8x32xi1>, vector<8x32xf32>
    %cst_147 = arith.constant dense<0.000000e+00> : vector<8xf32>
    %403 = vector.multi_reduction <add>, %402, %cst_147 [1] : vector<8x32xf32> to vector<8xf32>
    %404 = vector.shape_cast %403 : vector<8xf32> to vector<8x1xf32>
    %405 = tpu.concatenate %258, %276, %296, %314, %334, %352, %372, %390, %272, %290, %310, %328, %348, %366, %386, %404 in 1 : vector<8x1xf32>, vector<8x1xf32>, vector<8x1xf32>, vector<8x1xf32>, vector<8x1xf32>, vector<8x1xf32>, vector<8x1xf32>, vector<8x1xf32>, vector<8x1xf32>, vector<8x1xf32>, vector<8x1xf32>, vector<8x1xf32>, vector<8x1xf32>, vector<8x1xf32>, vector<8x1xf32>, vector<8x1xf32> -> vector<8x16xf32>
    %c0_148 = arith.constant 0 : index
    %c256 = arith.constant 256 : index
    %406 = vector.load %arg11[%c0_148, %c256] : memref<8x512xf32, #tpu.memory_space<vmem>>, vector<8x32xf32>
    %c0_149 = arith.constant 0 : index
    %c288 = arith.constant 288 : index
    %407 = vector.load %arg11[%c0_149, %c288] : memref<8x512xf32, #tpu.memory_space<vmem>>, vector<8x32xf32>
    %408 = arith.maximumf %406, %407 : vector<8x32xf32>
    %c0_150 = arith.constant 0 : index
    %c320 = arith.constant 320 : index
    %409 = vector.load %arg11[%c0_150, %c320] : memref<8x512xf32, #tpu.memory_space<vmem>>, vector<8x32xf32>
    %410 = arith.maximumf %408, %409 : vector<8x32xf32>
    %c0_151 = arith.constant 0 : index
    %c352 = arith.constant 352 : index
    %411 = vector.load %arg11[%c0_151, %c352] : memref<8x512xf32, #tpu.memory_space<vmem>>, vector<8x32xf32>
    %412 = arith.maximumf %410, %411 : vector<8x32xf32>
    %c0_152 = arith.constant 0 : index
    %c384 = arith.constant 384 : index
    %413 = vector.load %arg11[%c0_152, %c384] : memref<8x512xf32, #tpu.memory_space<vmem>>, vector<8x32xf32>
    %414 = arith.maximumf %412, %413 : vector<8x32xf32>
    %c0_153 = arith.constant 0 : index
    %c416 = arith.constant 416 : index
    %415 = vector.load %arg11[%c0_153, %c416] : memref<8x512xf32, #tpu.memory_space<vmem>>, vector<8x32xf32>
    %416 = arith.maximumf %414, %415 : vector<8x32xf32>
    %c0_154 = arith.constant 0 : index
    %c448 = arith.constant 448 : index
    %417 = vector.load %arg11[%c0_154, %c448] : memref<8x512xf32, #tpu.memory_space<vmem>>, vector<8x32xf32>
    %418 = arith.maximumf %416, %417 : vector<8x32xf32>
    %c0_155 = arith.constant 0 : index
    %c480 = arith.constant 480 : index
    %419 = vector.load %arg11[%c0_155, %c480] : memref<8x512xf32, #tpu.memory_space<vmem>>, vector<8x32xf32>
    %420 = arith.maximumf %418, %419 : vector<8x32xf32>
    %c8_i32_156 = arith.constant 8 : i32
    %421 = vector.broadcast %c8_i32_156 : i32 to vector<8x32xi32>
    %422 = arith.cmpi slt, %0, %421 : vector<8x32xi32>
    %cst_157 = arith.constant -1.000000e+30 : f32
    %423 = vector.broadcast %cst_157 : f32 to vector<8x32xf32>
    %424 = arith.select %422, %420, %423 : vector<8x32xi1>, vector<8x32xf32>
    %cst_158 = arith.constant dense<0xFF800000> : vector<8xf32>
    %425 = vector.multi_reduction <maximumf>, %424, %cst_158 [1] : vector<8x32xf32> to vector<8xf32>
    %426 = vector.shape_cast %425 : vector<8xf32> to vector<8x1xf32>
    %427 = vector.broadcast %426 : vector<8x1xf32> to vector<8x32xf32>
    %428 = arith.cmpf oeq, %424, %427 : vector<8x32xf32>
    %c32_i32_159 = arith.constant 32 : i32
    %429 = vector.broadcast %c32_i32_159 : i32 to vector<8x32xi32>
    %430 = arith.select %428, %0, %429 : vector<8x32xi1>, vector<8x32xi32>
    %cst_160 = arith.constant dense<2147483647> : vector<8xi32>
    %431 = vector.multi_reduction <minsi>, %430, %cst_160 [1] : vector<8x32xi32> to vector<8xi32>
    %432 = vector.shape_cast %431 : vector<8xi32> to vector<8x1xi32>
    %433 = vector.broadcast %432 : vector<8x1xi32> to vector<8x32xi32>
    %434 = arith.cmpi eq, %0, %433 : vector<8x32xi32>
    %cst_161 = arith.constant 0.000000e+00 : f32
    %435 = vector.shape_cast %67 : vector<1x32xf32> to vector<1x32xf32>
    %436 = vector.broadcast %435 : vector<1x32xf32> to vector<8x32xf32>
    %437 = vector.broadcast %cst_161 : f32 to vector<8x32xf32>
    %438 = arith.select %434, %436, %437 : vector<8x32xi1>, vector<8x32xf32>
    %cst_162 = arith.constant dense<0.000000e+00> : vector<8xf32>
    %439 = vector.multi_reduction <add>, %438, %cst_162 [1] : vector<8x32xf32> to vector<8xf32>
    %440 = vector.shape_cast %439 : vector<8xf32> to vector<8x1xf32>
    %cst_163 = arith.constant -1.000000e+30 : f32
    %441 = vector.broadcast %cst_163 : f32 to vector<8x32xf32>
    %442 = arith.select %434, %441, %424 : vector<8x32xi1>, vector<8x32xf32>
    %cst_164 = arith.constant dense<0xFF800000> : vector<8xf32>
    %443 = vector.multi_reduction <maximumf>, %442, %cst_164 [1] : vector<8x32xf32> to vector<8xf32>
    %444 = vector.shape_cast %443 : vector<8xf32> to vector<8x1xf32>
    %445 = vector.broadcast %444 : vector<8x1xf32> to vector<8x32xf32>
    %446 = arith.cmpf oeq, %442, %445 : vector<8x32xf32>
    %c32_i32_165 = arith.constant 32 : i32
    %447 = vector.broadcast %c32_i32_165 : i32 to vector<8x32xi32>
    %448 = arith.select %446, %0, %447 : vector<8x32xi1>, vector<8x32xi32>
    %cst_166 = arith.constant dense<2147483647> : vector<8xi32>
    %449 = vector.multi_reduction <minsi>, %448, %cst_166 [1] : vector<8x32xi32> to vector<8xi32>
    %450 = vector.shape_cast %449 : vector<8xi32> to vector<8x1xi32>
    %451 = vector.broadcast %450 : vector<8x1xi32> to vector<8x32xi32>
    %452 = arith.cmpi eq, %0, %451 : vector<8x32xi32>
    %cst_167 = arith.constant 0.000000e+00 : f32
    %453 = vector.shape_cast %67 : vector<1x32xf32> to vector<1x32xf32>
    %454 = vector.broadcast %453 : vector<1x32xf32> to vector<8x32xf32>
    %455 = vector.broadcast %cst_167 : f32 to vector<8x32xf32>
    %456 = arith.select %452, %454, %455 : vector<8x32xi1>, vector<8x32xf32>
    %cst_168 = arith.constant dense<0.000000e+00> : vector<8xf32>
    %457 = vector.multi_reduction <add>, %456, %cst_168 [1] : vector<8x32xf32> to vector<8xf32>
    %458 = vector.shape_cast %457 : vector<8xf32> to vector<8x1xf32>
    %c16_i32_169 = arith.constant 16 : i32
    %459 = vector.broadcast %c16_i32_169 : i32 to vector<8x32xi32>
    %460 = arith.cmpi slt, %0, %459 : vector<8x32xi32>
    %cst_170 = arith.constant -1.000000e+30 : f32
    %461 = vector.broadcast %cst_170 : f32 to vector<8x32xf32>
    %462 = arith.select %460, %420, %461 : vector<8x32xi1>, vector<8x32xf32>
    %cst_171 = arith.constant dense<0xFF800000> : vector<8xf32>
    %463 = vector.multi_reduction <maximumf>, %462, %cst_171 [1] : vector<8x32xf32> to vector<8xf32>
    %464 = vector.shape_cast %463 : vector<8xf32> to vector<8x1xf32>
    %465 = vector.broadcast %464 : vector<8x1xf32> to vector<8x32xf32>
    %466 = arith.cmpf oeq, %462, %465 : vector<8x32xf32>
    %c32_i32_172 = arith.constant 32 : i32
    %467 = vector.broadcast %c32_i32_172 : i32 to vector<8x32xi32>
    %468 = arith.select %466, %0, %467 : vector<8x32xi1>, vector<8x32xi32>
    %cst_173 = arith.constant dense<2147483647> : vector<8xi32>
    %469 = vector.multi_reduction <minsi>, %468, %cst_173 [1] : vector<8x32xi32> to vector<8xi32>
    %470 = vector.shape_cast %469 : vector<8xi32> to vector<8x1xi32>
    %471 = vector.broadcast %470 : vector<8x1xi32> to vector<8x32xi32>
    %472 = arith.cmpi eq, %0, %471 : vector<8x32xi32>
    %cst_174 = arith.constant 0.000000e+00 : f32
    %473 = vector.shape_cast %67 : vector<1x32xf32> to vector<1x32xf32>
    %474 = vector.broadcast %473 : vector<1x32xf32> to vector<8x32xf32>
    %475 = vector.broadcast %cst_174 : f32 to vector<8x32xf32>
    %476 = arith.select %472, %474, %475 : vector<8x32xi1>, vector<8x32xf32>
    %cst_175 = arith.constant dense<0.000000e+00> : vector<8xf32>
    %477 = vector.multi_reduction <add>, %476, %cst_175 [1] : vector<8x32xf32> to vector<8xf32>
    %478 = vector.shape_cast %477 : vector<8xf32> to vector<8x1xf32>
    %cst_176 = arith.constant -1.000000e+30 : f32
    %479 = vector.broadcast %cst_176 : f32 to vector<8x32xf32>
    %480 = arith.select %472, %479, %462 : vector<8x32xi1>, vector<8x32xf32>
    %cst_177 = arith.constant dense<0xFF800000> : vector<8xf32>
    %481 = vector.multi_reduction <maximumf>, %480, %cst_177 [1] : vector<8x32xf32> to vector<8xf32>
    %482 = vector.shape_cast %481 : vector<8xf32> to vector<8x1xf32>
    %483 = vector.broadcast %482 : vector<8x1xf32> to vector<8x32xf32>
    %484 = arith.cmpf oeq, %480, %483 : vector<8x32xf32>
    %c32_i32_178 = arith.constant 32 : i32
    %485 = vector.broadcast %c32_i32_178 : i32 to vector<8x32xi32>
    %486 = arith.select %484, %0, %485 : vector<8x32xi1>, vector<8x32xi32>
    %cst_179 = arith.constant dense<2147483647> : vector<8xi32>
    %487 = vector.multi_reduction <minsi>, %486, %cst_179 [1] : vector<8x32xi32> to vector<8xi32>
    %488 = vector.shape_cast %487 : vector<8xi32> to vector<8x1xi32>
    %489 = vector.broadcast %488 : vector<8x1xi32> to vector<8x32xi32>
    %490 = arith.cmpi eq, %0, %489 : vector<8x32xi32>
    %cst_180 = arith.constant 0.000000e+00 : f32
    %491 = vector.shape_cast %67 : vector<1x32xf32> to vector<1x32xf32>
    %492 = vector.broadcast %491 : vector<1x32xf32> to vector<8x32xf32>
    %493 = vector.broadcast %cst_180 : f32 to vector<8x32xf32>
    %494 = arith.select %490, %492, %493 : vector<8x32xi1>, vector<8x32xf32>
    %cst_181 = arith.constant dense<0.000000e+00> : vector<8xf32>
    %495 = vector.multi_reduction <add>, %494, %cst_181 [1] : vector<8x32xf32> to vector<8xf32>
    %496 = vector.shape_cast %495 : vector<8xf32> to vector<8x1xf32>
    %c24_i32_182 = arith.constant 24 : i32
    %497 = vector.broadcast %c24_i32_182 : i32 to vector<8x32xi32>
    %498 = arith.cmpi slt, %0, %497 : vector<8x32xi32>
    %cst_183 = arith.constant -1.000000e+30 : f32
    %499 = vector.broadcast %cst_183 : f32 to vector<8x32xf32>
    %500 = arith.select %498, %420, %499 : vector<8x32xi1>, vector<8x32xf32>
    %cst_184 = arith.constant dense<0xFF800000> : vector<8xf32>
    %501 = vector.multi_reduction <maximumf>, %500, %cst_184 [1] : vector<8x32xf32> to vector<8xf32>
    %502 = vector.shape_cast %501 : vector<8xf32> to vector<8x1xf32>
    %503 = vector.broadcast %502 : vector<8x1xf32> to vector<8x32xf32>
    %504 = arith.cmpf oeq, %500, %503 : vector<8x32xf32>
    %c32_i32_185 = arith.constant 32 : i32
    %505 = vector.broadcast %c32_i32_185 : i32 to vector<8x32xi32>
    %506 = arith.select %504, %0, %505 : vector<8x32xi1>, vector<8x32xi32>
    %cst_186 = arith.constant dense<2147483647> : vector<8xi32>
    %507 = vector.multi_reduction <minsi>, %506, %cst_186 [1] : vector<8x32xi32> to vector<8xi32>
    %508 = vector.shape_cast %507 : vector<8xi32> to vector<8x1xi32>
    %509 = vector.broadcast %508 : vector<8x1xi32> to vector<8x32xi32>
    %510 = arith.cmpi eq, %0, %509 : vector<8x32xi32>
    %cst_187 = arith.constant 0.000000e+00 : f32
    %511 = vector.shape_cast %67 : vector<1x32xf32> to vector<1x32xf32>
    %512 = vector.broadcast %511 : vector<1x32xf32> to vector<8x32xf32>
    %513 = vector.broadcast %cst_187 : f32 to vector<8x32xf32>
    %514 = arith.select %510, %512, %513 : vector<8x32xi1>, vector<8x32xf32>
    %cst_188 = arith.constant dense<0.000000e+00> : vector<8xf32>
    %515 = vector.multi_reduction <add>, %514, %cst_188 [1] : vector<8x32xf32> to vector<8xf32>
    %516 = vector.shape_cast %515 : vector<8xf32> to vector<8x1xf32>
    %cst_189 = arith.constant -1.000000e+30 : f32
    %517 = vector.broadcast %cst_189 : f32 to vector<8x32xf32>
    %518 = arith.select %510, %517, %500 : vector<8x32xi1>, vector<8x32xf32>
    %cst_190 = arith.constant dense<0xFF800000> : vector<8xf32>
    %519 = vector.multi_reduction <maximumf>, %518, %cst_190 [1] : vector<8x32xf32> to vector<8xf32>
    %520 = vector.shape_cast %519 : vector<8xf32> to vector<8x1xf32>
    %521 = vector.broadcast %520 : vector<8x1xf32> to vector<8x32xf32>
    %522 = arith.cmpf oeq, %518, %521 : vector<8x32xf32>
    %c32_i32_191 = arith.constant 32 : i32
    %523 = vector.broadcast %c32_i32_191 : i32 to vector<8x32xi32>
    %524 = arith.select %522, %0, %523 : vector<8x32xi1>, vector<8x32xi32>
    %cst_192 = arith.constant dense<2147483647> : vector<8xi32>
    %525 = vector.multi_reduction <minsi>, %524, %cst_192 [1] : vector<8x32xi32> to vector<8xi32>
    %526 = vector.shape_cast %525 : vector<8xi32> to vector<8x1xi32>
    %527 = vector.broadcast %526 : vector<8x1xi32> to vector<8x32xi32>
    %528 = arith.cmpi eq, %0, %527 : vector<8x32xi32>
    %cst_193 = arith.constant 0.000000e+00 : f32
    %529 = vector.shape_cast %67 : vector<1x32xf32> to vector<1x32xf32>
    %530 = vector.broadcast %529 : vector<1x32xf32> to vector<8x32xf32>
    %531 = vector.broadcast %cst_193 : f32 to vector<8x32xf32>
    %532 = arith.select %528, %530, %531 : vector<8x32xi1>, vector<8x32xf32>
    %cst_194 = arith.constant dense<0.000000e+00> : vector<8xf32>
    %533 = vector.multi_reduction <add>, %532, %cst_194 [1] : vector<8x32xf32> to vector<8xf32>
    %534 = vector.shape_cast %533 : vector<8xf32> to vector<8x1xf32>
    %c32_i32_195 = arith.constant 32 : i32
    %535 = vector.broadcast %c32_i32_195 : i32 to vector<8x32xi32>
    %536 = arith.cmpi slt, %0, %535 : vector<8x32xi32>
    %cst_196 = arith.constant -1.000000e+30 : f32
    %537 = vector.broadcast %cst_196 : f32 to vector<8x32xf32>
    %538 = arith.select %536, %420, %537 : vector<8x32xi1>, vector<8x32xf32>
    %cst_197 = arith.constant dense<0xFF800000> : vector<8xf32>
    %539 = vector.multi_reduction <maximumf>, %538, %cst_197 [1] : vector<8x32xf32> to vector<8xf32>
    %540 = vector.shape_cast %539 : vector<8xf32> to vector<8x1xf32>
    %541 = vector.broadcast %540 : vector<8x1xf32> to vector<8x32xf32>
    %542 = arith.cmpf oeq, %538, %541 : vector<8x32xf32>
    %c32_i32_198 = arith.constant 32 : i32
    %543 = vector.broadcast %c32_i32_198 : i32 to vector<8x32xi32>
    %544 = arith.select %542, %0, %543 : vector<8x32xi1>, vector<8x32xi32>
    %cst_199 = arith.constant dense<2147483647> : vector<8xi32>
    %545 = vector.multi_reduction <minsi>, %544, %cst_199 [1] : vector<8x32xi32> to vector<8xi32>
    %546 = vector.shape_cast %545 : vector<8xi32> to vector<8x1xi32>
    %547 = vector.broadcast %546 : vector<8x1xi32> to vector<8x32xi32>
    %548 = arith.cmpi eq, %0, %547 : vector<8x32xi32>
    %cst_200 = arith.constant 0.000000e+00 : f32
    %549 = vector.shape_cast %67 : vector<1x32xf32> to vector<1x32xf32>
    %550 = vector.broadcast %549 : vector<1x32xf32> to vector<8x32xf32>
    %551 = vector.broadcast %cst_200 : f32 to vector<8x32xf32>
    %552 = arith.select %548, %550, %551 : vector<8x32xi1>, vector<8x32xf32>
    %cst_201 = arith.constant dense<0.000000e+00> : vector<8xf32>
    %553 = vector.multi_reduction <add>, %552, %cst_201 [1] : vector<8x32xf32> to vector<8xf32>
    %554 = vector.shape_cast %553 : vector<8xf32> to vector<8x1xf32>
    %cst_202 = arith.constant -1.000000e+30 : f32
    %555 = vector.broadcast %cst_202 : f32 to vector<8x32xf32>
    %556 = arith.select %548, %555, %538 : vector<8x32xi1>, vector<8x32xf32>
    %cst_203 = arith.constant dense<0xFF800000> : vector<8xf32>
    %557 = vector.multi_reduction <maximumf>, %556, %cst_203 [1] : vector<8x32xf32> to vector<8xf32>
    %558 = vector.shape_cast %557 : vector<8xf32> to vector<8x1xf32>
    %559 = vector.broadcast %558 : vector<8x1xf32> to vector<8x32xf32>
    %560 = arith.cmpf oeq, %556, %559 : vector<8x32xf32>
    %c32_i32_204 = arith.constant 32 : i32
    %561 = vector.broadcast %c32_i32_204 : i32 to vector<8x32xi32>
    %562 = arith.select %560, %0, %561 : vector<8x32xi1>, vector<8x32xi32>
    %cst_205 = arith.constant dense<2147483647> : vector<8xi32>
    %563 = vector.multi_reduction <minsi>, %562, %cst_205 [1] : vector<8x32xi32> to vector<8xi32>
    %564 = vector.shape_cast %563 : vector<8xi32> to vector<8x1xi32>
    %565 = vector.broadcast %564 : vector<8x1xi32> to vector<8x32xi32>
    %566 = arith.cmpi eq, %0, %565 : vector<8x32xi32>
    %cst_206 = arith.constant 0.000000e+00 : f32
    %567 = vector.shape_cast %67 : vector<1x32xf32> to vector<1x32xf32>
    %568 = vector.broadcast %567 : vector<1x32xf32> to vector<8x32xf32>
    %569 = vector.broadcast %cst_206 : f32 to vector<8x32xf32>
    %570 = arith.select %566, %568, %569 : vector<8x32xi1>, vector<8x32xf32>
    %cst_207 = arith.constant dense<0.000000e+00> : vector<8xf32>
    %571 = vector.multi_reduction <add>, %570, %cst_207 [1] : vector<8x32xf32> to vector<8xf32>
    %572 = vector.shape_cast %571 : vector<8xf32> to vector<8x1xf32>
    %573 = tpu.concatenate %426, %444, %464, %482, %502, %520, %540, %558, %440, %458, %478, %496, %516, %534, %554, %572 in 1 : vector<8x1xf32>, vector<8x1xf32>, vector<8x1xf32>, vector<8x1xf32>, vector<8x1xf32>, vector<8x1xf32>, vector<8x1xf32>, vector<8x1xf32>, vector<8x1xf32>, vector<8x1xf32>, vector<8x1xf32>, vector<8x1xf32>, vector<8x1xf32>, vector<8x1xf32>, vector<8x1xf32>, vector<8x1xf32> -> vector<8x16xf32>
    %574 = tpu.concatenate %220, %405, %573 in 1 : vector<8x16xf32>, vector<8x16xf32>, vector<8x16xf32> -> vector<8x48xf32>
    %c0_208 = arith.constant 0 : index
    %c0_209 = arith.constant 0 : index
    %575 = vector.load %arg5[%c0_208, %c0_209] : memref<48x1024xf32, #tpu.memory_space<vmem>>, vector<48x1024xf32>
    %cst_210 = arith.constant dense<0.000000e+00> : vector<8x1024xf32>
    %576 = tpu.matmul %574, %575, %cst_210 {dimension_numbers = #tpu.dot_dimension_numbers<[1], [0], [0], [1], [0, 0, 1, 1], [], []>} : vector<8x48xf32>, vector<48x1024xf32>, vector<8x1024xf32> -> vector<8x1024xf32>
    %577 = vector.extract_strided_slice %576 {offsets = [0, 0], sizes = [1, 128], strides = [1, 1]} : vector<8x1024xf32> to vector<1x128xf32>
    %578 = vector.extract_strided_slice %576 {offsets = [1, 128], sizes = [1, 128], strides = [1, 1]} : vector<8x1024xf32> to vector<1x128xf32>
    %579 = arith.addf %577, %578 : vector<1x128xf32>
    %580 = vector.extract_strided_slice %576 {offsets = [2, 256], sizes = [1, 128], strides = [1, 1]} : vector<8x1024xf32> to vector<1x128xf32>
    %581 = arith.addf %579, %580 : vector<1x128xf32>
    %582 = vector.extract_strided_slice %576 {offsets = [3, 384], sizes = [1, 128], strides = [1, 1]} : vector<8x1024xf32> to vector<1x128xf32>
    %583 = arith.addf %581, %582 : vector<1x128xf32>
    %584 = vector.extract_strided_slice %576 {offsets = [4, 512], sizes = [1, 128], strides = [1, 1]} : vector<8x1024xf32> to vector<1x128xf32>
    %585 = arith.addf %583, %584 : vector<1x128xf32>
    %586 = vector.extract_strided_slice %576 {offsets = [5, 640], sizes = [1, 128], strides = [1, 1]} : vector<8x1024xf32> to vector<1x128xf32>
    %587 = arith.addf %585, %586 : vector<1x128xf32>
    %588 = vector.extract_strided_slice %576 {offsets = [6, 768], sizes = [1, 128], strides = [1, 1]} : vector<8x1024xf32> to vector<1x128xf32>
    %589 = arith.addf %587, %588 : vector<1x128xf32>
    %590 = vector.extract_strided_slice %576 {offsets = [7, 896], sizes = [1, 128], strides = [1, 1]} : vector<8x1024xf32> to vector<1x128xf32>
    %591 = arith.addf %589, %590 : vector<1x128xf32>
    %c0_211 = arith.constant 0 : index
    %c0_212 = arith.constant 0 : index
    %592 = vector.load %arg6[%c0_211, %c0_212] : memref<1x128xf32, #tpu.memory_space<vmem>>, vector<1x128xf32>
    %593 = arith.addf %591, %592 : vector<1x128xf32>
    %cst_213 = arith.constant 0.000000e+00 : f32
    %594 = vector.broadcast %cst_213 : f32 to vector<1x128xf32>
    %595 = arith.maximumf %593, %594 : vector<1x128xf32>
    %c0_214 = arith.constant 0 : index
    %c0_215 = arith.constant 0 : index
    %596 = vector.load %arg7[%c0_214, %c0_215] : memref<128x128xf32, #tpu.memory_space<vmem>>, vector<128x128xf32>
    %cst_216 = arith.constant dense<0.000000e+00> : vector<1x128xf32>
    %597 = tpu.matmul %595, %596, %cst_216 {dimension_numbers = #tpu.dot_dimension_numbers<[1], [0], [0], [1], [0, 0, 1, 1], [], []>} : vector<1x128xf32>, vector<128x128xf32>, vector<1x128xf32> -> vector<1x128xf32>
    %c0_217 = arith.constant 0 : index
    %c0_218 = arith.constant 0 : index
    %598 = vector.load %arg8[%c0_217, %c0_218] : memref<1x128xf32, #tpu.memory_space<vmem>>, vector<1x128xf32>
    %599 = arith.addf %597, %598 : vector<1x128xf32>
    %cst_219 = arith.constant 0.000000e+00 : f32
    %600 = vector.broadcast %cst_219 : f32 to vector<1x128xf32>
    %601 = arith.maximumf %599, %600 : vector<1x128xf32>
    %c0_220 = arith.constant 0 : index
    %c0_221 = arith.constant 0 : index
    %602 = vector.load %arg9[%c0_220, %c0_221] : memref<1x128xf32, #tpu.memory_space<vmem>>, vector<1x128xf32>
    %603 = arith.mulf %601, %602 : vector<1x128xf32>
    %cst_222 = arith.constant dense<0.000000e+00> : vector<1xf32>
    %604 = vector.multi_reduction <add>, %603, %cst_222 [1] : vector<1x128xf32> to vector<1xf32>
    %605 = vector.shape_cast %604 : vector<1xf32> to vector<1x1xf32>
    %c0_223 = arith.constant 0 : index
    %c0_224 = arith.constant 0 : index
    %606 = vector.load %arg10[%c0_223, %c0_224] : memref<2x1xf32, #tpu.memory_space<vmem>>, vector<1x1xf32>
    tpu.vector_store %arg10[%c0_223, %c0_224], %605 {strides = array<i32>} : memref<2x1xf32, #tpu.memory_space<vmem>>, vector<1x1xf32>,
    %c1_225 = arith.constant 1 : index
    %c0_226 = arith.constant 0 : index
    %c0_227 = arith.constant 0 : index
    %607 = vector.load %arg1[%c1_225, %c0_226, %c0_227] : memref<2x8x32xf32, #tpu.memory_space<vmem>>, vector<1x8x32xf32>
    %608 = vector.shape_cast %607 : vector<1x8x32xf32> to vector<8x32xf32>
    %c1_228 = arith.constant 1 : index
    %c0_229 = arith.constant 0 : index
    %c0_230 = arith.constant 0 : index
    %609 = vector.load %arg2[%c1_228, %c0_229, %c0_230] : memref<2x32x32xf32, #tpu.memory_space<vmem>>, vector<1x32x32xf32>
    %610 = vector.shape_cast %609 : vector<1x32x32xf32> to vector<32x32xf32>
    %611 = arith.mulf %608, %608 : vector<8x32xf32>
    %cst_231 = arith.constant dense<0.000000e+00> : vector<8xf32>
    %612 = vector.multi_reduction <add>, %611, %cst_231 [1] : vector<8x32xf32> to vector<8xf32>
    %613 = vector.shape_cast %612 : vector<8xf32> to vector<8x1xf32>
    %614 = math.sqrt %613 : vector<8x1xf32>
    %cst_232 = arith.constant 9.99999982E-14 : f32
    %615 = vector.broadcast %cst_232 : f32 to vector<8x1xf32>
    %616 = arith.addf %614, %615 : vector<8x1xf32>
    %617 = vector.broadcast %616 : vector<8x1xf32> to vector<8x32xf32>
    %618 = arith.divf %608, %617 : vector<8x32xf32>
    %619 = arith.mulf %610, %610 : vector<32x32xf32>
    %cst_233 = arith.constant dense<0.000000e+00> : vector<32xf32>
    %620 = vector.multi_reduction <add>, %619, %cst_233 [1] : vector<32x32xf32> to vector<32xf32>
    %621 = vector.shape_cast %620 : vector<32xf32> to vector<32x1xf32>
    %622 = math.sqrt %621 : vector<32x1xf32>
    %cst_234 = arith.constant 9.99999982E-14 : f32
    %623 = vector.broadcast %cst_234 : f32 to vector<32x1xf32>
    %624 = arith.addf %622, %623 : vector<32x1xf32>
    %625 = vector.broadcast %624 : vector<32x1xf32> to vector<32x32xf32>
    %626 = arith.divf %610, %625 : vector<32x32xf32>
    %cst_235 = arith.constant dense<0.000000e+00> : vector<8x32xf32>
    %627 = tpu.matmul %618, %626, %cst_235 {dimension_numbers = #tpu.dot_dimension_numbers<[1], [1], [0], [0], [0, 0, 1, 0], [], []>} : vector<8x32xf32>, vector<32x32xf32>, vector<8x32xf32> -> vector<8x32xf32>
    %cst_236 = arith.constant dense<0.000000e+00> : vector<32xf32>
    %628 = vector.multi_reduction <add>, %608, %cst_236 [0] : vector<8x32xf32> to vector<32xf32>
    %629 = vector.shape_cast %628 : vector<32xf32> to vector<1x32xf32>
    %cst_237 = arith.constant 8.000000e+00 : f32
    %630 = vector.broadcast %cst_237 : f32 to vector<1x32xf32>
    %631 = arith.divf %629, %630 : vector<1x32xf32>
    %632 = arith.mulf %631, %631 : vector<1x32xf32>
    %cst_238 = arith.constant dense<0.000000e+00> : vector<1xf32>
    %633 = vector.multi_reduction <add>, %632, %cst_238 [1] : vector<1x32xf32> to vector<1xf32>
    %634 = vector.shape_cast %633 : vector<1xf32> to vector<1x1xf32>
    %635 = math.sqrt %634 : vector<1x1xf32>
    %cst_239 = arith.constant 9.99999982E-14 : f32
    %636 = vector.broadcast %cst_239 : f32 to vector<1x1xf32>
    %637 = arith.addf %635, %636 : vector<1x1xf32>
    %638 = vector.broadcast %637 : vector<1x1xf32> to vector<1x32xf32>
    %639 = arith.divf %631, %638 : vector<1x32xf32>
    %cst_240 = arith.constant dense<0.000000e+00> : vector<32x32xf32>
    %640 = tpu.matmul %10, %610, %cst_240 {dimension_numbers = #tpu.dot_dimension_numbers<[1], [0], [0], [1], [0, 0, 1, 1], [], []>} : vector<32x32xf32>, vector<32x32xf32>, vector<32x32xf32> -> vector<32x32xf32>
    %641 = arith.mulf %640, %640 : vector<32x32xf32>
    %cst_241 = arith.constant dense<0.000000e+00> : vector<32xf32>
    %642 = vector.multi_reduction <add>, %641, %cst_241 [1] : vector<32x32xf32> to vector<32xf32>
    %643 = vector.shape_cast %642 : vector<32xf32> to vector<32x1xf32>
    %644 = math.sqrt %643 : vector<32x1xf32>
    %cst_242 = arith.constant 9.99999982E-14 : f32
    %645 = vector.broadcast %cst_242 : f32 to vector<32x1xf32>
    %646 = arith.addf %644, %645 : vector<32x1xf32>
    %647 = vector.broadcast %646 : vector<32x1xf32> to vector<32x32xf32>
    %648 = arith.divf %640, %647 : vector<32x32xf32>
    %cst_243 = arith.constant dense<0.000000e+00> : vector<1x32xf32>
    %649 = tpu.matmul %639, %648, %cst_243 {dimension_numbers = #tpu.dot_dimension_numbers<[1], [1], [0], [0], [0, 0, 1, 0], [], []>} : vector<1x32xf32>, vector<32x32xf32>, vector<1x32xf32> -> vector<1x32xf32>
    %c8_i32_244 = arith.constant 8 : i32
    %650 = vector.broadcast %c8_i32_244 : i32 to vector<8x32xi32>
    %651 = arith.cmpi slt, %0, %650 : vector<8x32xi32>
    %cst_245 = arith.constant -1.000000e+30 : f32
    %652 = vector.broadcast %cst_245 : f32 to vector<8x32xf32>
    %653 = arith.select %651, %627, %652 : vector<8x32xi1>, vector<8x32xf32>
    %cst_246 = arith.constant dense<0xFF800000> : vector<8xf32>
    %654 = vector.multi_reduction <maximumf>, %653, %cst_246 [1] : vector<8x32xf32> to vector<8xf32>
    %655 = vector.shape_cast %654 : vector<8xf32> to vector<8x1xf32>
    %656 = vector.broadcast %655 : vector<8x1xf32> to vector<8x32xf32>
    %657 = arith.cmpf oeq, %653, %656 : vector<8x32xf32>
    %c32_i32_247 = arith.constant 32 : i32
    %658 = vector.broadcast %c32_i32_247 : i32 to vector<8x32xi32>
    %659 = arith.select %657, %0, %658 : vector<8x32xi1>, vector<8x32xi32>
    %cst_248 = arith.constant dense<2147483647> : vector<8xi32>
    %660 = vector.multi_reduction <minsi>, %659, %cst_248 [1] : vector<8x32xi32> to vector<8xi32>
    %661 = vector.shape_cast %660 : vector<8xi32> to vector<8x1xi32>
    %662 = vector.broadcast %661 : vector<8x1xi32> to vector<8x32xi32>
    %663 = arith.cmpi eq, %0, %662 : vector<8x32xi32>
    %cst_249 = arith.constant 0.000000e+00 : f32
    %664 = vector.shape_cast %649 : vector<1x32xf32> to vector<1x32xf32>
    %665 = vector.broadcast %664 : vector<1x32xf32> to vector<8x32xf32>
    %666 = vector.broadcast %cst_249 : f32 to vector<8x32xf32>
    %667 = arith.select %663, %665, %666 : vector<8x32xi1>, vector<8x32xf32>
    %cst_250 = arith.constant dense<0.000000e+00> : vector<8xf32>
    %668 = vector.multi_reduction <add>, %667, %cst_250 [1] : vector<8x32xf32> to vector<8xf32>
    %669 = vector.shape_cast %668 : vector<8xf32> to vector<8x1xf32>
    %cst_251 = arith.constant -1.000000e+30 : f32
    %670 = vector.broadcast %cst_251 : f32 to vector<8x32xf32>
    %671 = arith.select %663, %670, %653 : vector<8x32xi1>, vector<8x32xf32>
    %cst_252 = arith.constant dense<0xFF800000> : vector<8xf32>
    %672 = vector.multi_reduction <maximumf>, %671, %cst_252 [1] : vector<8x32xf32> to vector<8xf32>
    %673 = vector.shape_cast %672 : vector<8xf32> to vector<8x1xf32>
    %674 = vector.broadcast %673 : vector<8x1xf32> to vector<8x32xf32>
    %675 = arith.cmpf oeq, %671, %674 : vector<8x32xf32>
    %c32_i32_253 = arith.constant 32 : i32
    %676 = vector.broadcast %c32_i32_253 : i32 to vector<8x32xi32>
    %677 = arith.select %675, %0, %676 : vector<8x32xi1>, vector<8x32xi32>
    %cst_254 = arith.constant dense<2147483647> : vector<8xi32>
    %678 = vector.multi_reduction <minsi>, %677, %cst_254 [1] : vector<8x32xi32> to vector<8xi32>
    %679 = vector.shape_cast %678 : vector<8xi32> to vector<8x1xi32>
    %680 = vector.broadcast %679 : vector<8x1xi32> to vector<8x32xi32>
    %681 = arith.cmpi eq, %0, %680 : vector<8x32xi32>
    %cst_255 = arith.constant 0.000000e+00 : f32
    %682 = vector.shape_cast %649 : vector<1x32xf32> to vector<1x32xf32>
    %683 = vector.broadcast %682 : vector<1x32xf32> to vector<8x32xf32>
    %684 = vector.broadcast %cst_255 : f32 to vector<8x32xf32>
    %685 = arith.select %681, %683, %684 : vector<8x32xi1>, vector<8x32xf32>
    %cst_256 = arith.constant dense<0.000000e+00> : vector<8xf32>
    %686 = vector.multi_reduction <add>, %685, %cst_256 [1] : vector<8x32xf32> to vector<8xf32>
    %687 = vector.shape_cast %686 : vector<8xf32> to vector<8x1xf32>
    %c16_i32_257 = arith.constant 16 : i32
    %688 = vector.broadcast %c16_i32_257 : i32 to vector<8x32xi32>
    %689 = arith.cmpi slt, %0, %688 : vector<8x32xi32>
    %cst_258 = arith.constant -1.000000e+30 : f32
    %690 = vector.broadcast %cst_258 : f32 to vector<8x32xf32>
    %691 = arith.select %689, %627, %690 : vector<8x32xi1>, vector<8x32xf32>
    %cst_259 = arith.constant dense<0xFF800000> : vector<8xf32>
    %692 = vector.multi_reduction <maximumf>, %691, %cst_259 [1] : vector<8x32xf32> to vector<8xf32>
    %693 = vector.shape_cast %692 : vector<8xf32> to vector<8x1xf32>
    %694 = vector.broadcast %693 : vector<8x1xf32> to vector<8x32xf32>
    %695 = arith.cmpf oeq, %691, %694 : vector<8x32xf32>
    %c32_i32_260 = arith.constant 32 : i32
    %696 = vector.broadcast %c32_i32_260 : i32 to vector<8x32xi32>
    %697 = arith.select %695, %0, %696 : vector<8x32xi1>, vector<8x32xi32>
    %cst_261 = arith.constant dense<2147483647> : vector<8xi32>
    %698 = vector.multi_reduction <minsi>, %697, %cst_261 [1] : vector<8x32xi32> to vector<8xi32>
    %699 = vector.shape_cast %698 : vector<8xi32> to vector<8x1xi32>
    %700 = vector.broadcast %699 : vector<8x1xi32> to vector<8x32xi32>
    %701 = arith.cmpi eq, %0, %700 : vector<8x32xi32>
    %cst_262 = arith.constant 0.000000e+00 : f32
    %702 = vector.shape_cast %649 : vector<1x32xf32> to vector<1x32xf32>
    %703 = vector.broadcast %702 : vector<1x32xf32> to vector<8x32xf32>
    %704 = vector.broadcast %cst_262 : f32 to vector<8x32xf32>
    %705 = arith.select %701, %703, %704 : vector<8x32xi1>, vector<8x32xf32>
    %cst_263 = arith.constant dense<0.000000e+00> : vector<8xf32>
    %706 = vector.multi_reduction <add>, %705, %cst_263 [1] : vector<8x32xf32> to vector<8xf32>
    %707 = vector.shape_cast %706 : vector<8xf32> to vector<8x1xf32>
    %cst_264 = arith.constant -1.000000e+30 : f32
    %708 = vector.broadcast %cst_264 : f32 to vector<8x32xf32>
    %709 = arith.select %701, %708, %691 : vector<8x32xi1>, vector<8x32xf32>
    %cst_265 = arith.constant dense<0xFF800000> : vector<8xf32>
    %710 = vector.multi_reduction <maximumf>, %709, %cst_265 [1] : vector<8x32xf32> to vector<8xf32>
    %711 = vector.shape_cast %710 : vector<8xf32> to vector<8x1xf32>
    %712 = vector.broadcast %711 : vector<8x1xf32> to vector<8x32xf32>
    %713 = arith.cmpf oeq, %709, %712 : vector<8x32xf32>
    %c32_i32_266 = arith.constant 32 : i32
    %714 = vector.broadcast %c32_i32_266 : i32 to vector<8x32xi32>
    %715 = arith.select %713, %0, %714 : vector<8x32xi1>, vector<8x32xi32>
    %cst_267 = arith.constant dense<2147483647> : vector<8xi32>
    %716 = vector.multi_reduction <minsi>, %715, %cst_267 [1] : vector<8x32xi32> to vector<8xi32>
    %717 = vector.shape_cast %716 : vector<8xi32> to vector<8x1xi32>
    %718 = vector.broadcast %717 : vector<8x1xi32> to vector<8x32xi32>
    %719 = arith.cmpi eq, %0, %718 : vector<8x32xi32>
    %cst_268 = arith.constant 0.000000e+00 : f32
    %720 = vector.shape_cast %649 : vector<1x32xf32> to vector<1x32xf32>
    %721 = vector.broadcast %720 : vector<1x32xf32> to vector<8x32xf32>
    %722 = vector.broadcast %cst_268 : f32 to vector<8x32xf32>
    %723 = arith.select %719, %721, %722 : vector<8x32xi1>, vector<8x32xf32>
    %cst_269 = arith.constant dense<0.000000e+00> : vector<8xf32>
    %724 = vector.multi_reduction <add>, %723, %cst_269 [1] : vector<8x32xf32> to vector<8xf32>
    %725 = vector.shape_cast %724 : vector<8xf32> to vector<8x1xf32>
    %c24_i32_270 = arith.constant 24 : i32
    %726 = vector.broadcast %c24_i32_270 : i32 to vector<8x32xi32>
    %727 = arith.cmpi slt, %0, %726 : vector<8x32xi32>
    %cst_271 = arith.constant -1.000000e+30 : f32
    %728 = vector.broadcast %cst_271 : f32 to vector<8x32xf32>
    %729 = arith.select %727, %627, %728 : vector<8x32xi1>, vector<8x32xf32>
    %cst_272 = arith.constant dense<0xFF800000> : vector<8xf32>
    %730 = vector.multi_reduction <maximumf>, %729, %cst_272 [1] : vector<8x32xf32> to vector<8xf32>
    %731 = vector.shape_cast %730 : vector<8xf32> to vector<8x1xf32>
    %732 = vector.broadcast %731 : vector<8x1xf32> to vector<8x32xf32>
    %733 = arith.cmpf oeq, %729, %732 : vector<8x32xf32>
    %c32_i32_273 = arith.constant 32 : i32
    %734 = vector.broadcast %c32_i32_273 : i32 to vector<8x32xi32>
    %735 = arith.select %733, %0, %734 : vector<8x32xi1>, vector<8x32xi32>
    %cst_274 = arith.constant dense<2147483647> : vector<8xi32>
    %736 = vector.multi_reduction <minsi>, %735, %cst_274 [1] : vector<8x32xi32> to vector<8xi32>
    %737 = vector.shape_cast %736 : vector<8xi32> to vector<8x1xi32>
    %738 = vector.broadcast %737 : vector<8x1xi32> to vector<8x32xi32>
    %739 = arith.cmpi eq, %0, %738 : vector<8x32xi32>
    %cst_275 = arith.constant 0.000000e+00 : f32
    %740 = vector.shape_cast %649 : vector<1x32xf32> to vector<1x32xf32>
    %741 = vector.broadcast %740 : vector<1x32xf32> to vector<8x32xf32>
    %742 = vector.broadcast %cst_275 : f32 to vector<8x32xf32>
    %743 = arith.select %739, %741, %742 : vector<8x32xi1>, vector<8x32xf32>
    %cst_276 = arith.constant dense<0.000000e+00> : vector<8xf32>
    %744 = vector.multi_reduction <add>, %743, %cst_276 [1] : vector<8x32xf32> to vector<8xf32>
    %745 = vector.shape_cast %744 : vector<8xf32> to vector<8x1xf32>
    %cst_277 = arith.constant -1.000000e+30 : f32
    %746 = vector.broadcast %cst_277 : f32 to vector<8x32xf32>
    %747 = arith.select %739, %746, %729 : vector<8x32xi1>, vector<8x32xf32>
    %cst_278 = arith.constant dense<0xFF800000> : vector<8xf32>
    %748 = vector.multi_reduction <maximumf>, %747, %cst_278 [1] : vector<8x32xf32> to vector<8xf32>
    %749 = vector.shape_cast %748 : vector<8xf32> to vector<8x1xf32>
    %750 = vector.broadcast %749 : vector<8x1xf32> to vector<8x32xf32>
    %751 = arith.cmpf oeq, %747, %750 : vector<8x32xf32>
    %c32_i32_279 = arith.constant 32 : i32
    %752 = vector.broadcast %c32_i32_279 : i32 to vector<8x32xi32>
    %753 = arith.select %751, %0, %752 : vector<8x32xi1>, vector<8x32xi32>
    %cst_280 = arith.constant dense<2147483647> : vector<8xi32>
    %754 = vector.multi_reduction <minsi>, %753, %cst_280 [1] : vector<8x32xi32> to vector<8xi32>
    %755 = vector.shape_cast %754 : vector<8xi32> to vector<8x1xi32>
    %756 = vector.broadcast %755 : vector<8x1xi32> to vector<8x32xi32>
    %757 = arith.cmpi eq, %0, %756 : vector<8x32xi32>
    %cst_281 = arith.constant 0.000000e+00 : f32
    %758 = vector.shape_cast %649 : vector<1x32xf32> to vector<1x32xf32>
    %759 = vector.broadcast %758 : vector<1x32xf32> to vector<8x32xf32>
    %760 = vector.broadcast %cst_281 : f32 to vector<8x32xf32>
    %761 = arith.select %757, %759, %760 : vector<8x32xi1>, vector<8x32xf32>
    %cst_282 = arith.constant dense<0.000000e+00> : vector<8xf32>
    %762 = vector.multi_reduction <add>, %761, %cst_282 [1] : vector<8x32xf32> to vector<8xf32>
    %763 = vector.shape_cast %762 : vector<8xf32> to vector<8x1xf32>
    %c32_i32_283 = arith.constant 32 : i32
    %764 = vector.broadcast %c32_i32_283 : i32 to vector<8x32xi32>
    %765 = arith.cmpi slt, %0, %764 : vector<8x32xi32>
    %cst_284 = arith.constant -1.000000e+30 : f32
    %766 = vector.broadcast %cst_284 : f32 to vector<8x32xf32>
    %767 = arith.select %765, %627, %766 : vector<8x32xi1>, vector<8x32xf32>
    %cst_285 = arith.constant dense<0xFF800000> : vector<8xf32>
    %768 = vector.multi_reduction <maximumf>, %767, %cst_285 [1] : vector<8x32xf32> to vector<8xf32>
    %769 = vector.shape_cast %768 : vector<8xf32> to vector<8x1xf32>
    %770 = vector.broadcast %769 : vector<8x1xf32> to vector<8x32xf32>
    %771 = arith.cmpf oeq, %767, %770 : vector<8x32xf32>
    %c32_i32_286 = arith.constant 32 : i32
    %772 = vector.broadcast %c32_i32_286 : i32 to vector<8x32xi32>
    %773 = arith.select %771, %0, %772 : vector<8x32xi1>, vector<8x32xi32>
    %cst_287 = arith.constant dense<2147483647> : vector<8xi32>
    %774 = vector.multi_reduction <minsi>, %773, %cst_287 [1] : vector<8x32xi32> to vector<8xi32>
    %775 = vector.shape_cast %774 : vector<8xi32> to vector<8x1xi32>
    %776 = vector.broadcast %775 : vector<8x1xi32> to vector<8x32xi32>
    %777 = arith.cmpi eq, %0, %776 : vector<8x32xi32>
    %cst_288 = arith.constant 0.000000e+00 : f32
    %778 = vector.shape_cast %649 : vector<1x32xf32> to vector<1x32xf32>
    %779 = vector.broadcast %778 : vector<1x32xf32> to vector<8x32xf32>
    %780 = vector.broadcast %cst_288 : f32 to vector<8x32xf32>
    %781 = arith.select %777, %779, %780 : vector<8x32xi1>, vector<8x32xf32>
    %cst_289 = arith.constant dense<0.000000e+00> : vector<8xf32>
    %782 = vector.multi_reduction <add>, %781, %cst_289 [1] : vector<8x32xf32> to vector<8xf32>
    %783 = vector.shape_cast %782 : vector<8xf32> to vector<8x1xf32>
    %cst_290 = arith.constant -1.000000e+30 : f32
    %784 = vector.broadcast %cst_290 : f32 to vector<8x32xf32>
    %785 = arith.select %777, %784, %767 : vector<8x32xi1>, vector<8x32xf32>
    %cst_291 = arith.constant dense<0xFF800000> : vector<8xf32>
    %786 = vector.multi_reduction <maximumf>, %785, %cst_291 [1] : vector<8x32xf32> to vector<8xf32>
    %787 = vector.shape_cast %786 : vector<8xf32> to vector<8x1xf32>
    %788 = vector.broadcast %787 : vector<8x1xf32> to vector<8x32xf32>
    %789 = arith.cmpf oeq, %785, %788 : vector<8x32xf32>
    %c32_i32_292 = arith.constant 32 : i32
    %790 = vector.broadcast %c32_i32_292 : i32 to vector<8x32xi32>
    %791 = arith.select %789, %0, %790 : vector<8x32xi1>, vector<8x32xi32>
    %cst_293 = arith.constant dense<2147483647> : vector<8xi32>
    %792 = vector.multi_reduction <minsi>, %791, %cst_293 [1] : vector<8x32xi32> to vector<8xi32>
    %793 = vector.shape_cast %792 : vector<8xi32> to vector<8x1xi32>
    %794 = vector.broadcast %793 : vector<8x1xi32> to vector<8x32xi32>
    %795 = arith.cmpi eq, %0, %794 : vector<8x32xi32>
    %cst_294 = arith.constant 0.000000e+00 : f32
    %796 = vector.shape_cast %649 : vector<1x32xf32> to vector<1x32xf32>
    %797 = vector.broadcast %796 : vector<1x32xf32> to vector<8x32xf32>
    %798 = vector.broadcast %cst_294 : f32 to vector<8x32xf32>
    %799 = arith.select %795, %797, %798 : vector<8x32xi1>, vector<8x32xf32>
    %cst_295 = arith.constant dense<0.000000e+00> : vector<8xf32>
    %800 = vector.multi_reduction <add>, %799, %cst_295 [1] : vector<8x32xf32> to vector<8xf32>
    %801 = vector.shape_cast %800 : vector<8xf32> to vector<8x1xf32>
    %802 = tpu.concatenate %655, %673, %693, %711, %731, %749, %769, %787, %669, %687, %707, %725, %745, %763, %783, %801 in 1 : vector<8x1xf32>, vector<8x1xf32>, vector<8x1xf32>, vector<8x1xf32>, vector<8x1xf32>, vector<8x1xf32>, vector<8x1xf32>, vector<8x1xf32>, vector<8x1xf32>, vector<8x1xf32>, vector<8x1xf32>, vector<8x1xf32>, vector<8x1xf32>, vector<8x1xf32>, vector<8x1xf32>, vector<8x1xf32> -> vector<8x16xf32>
    %c0_296 = arith.constant 0 : index
    %c0_297 = arith.constant 0 : index
    %c0_298 = arith.constant 0 : index
    %803 = vector.load %arg3[%c0_296, %c0_297, %c0_298] : memref<3x32x512xf32, #tpu.memory_space<vmem>>, vector<1x32x512xf32>
    %804 = vector.shape_cast %803 : vector<1x32x512xf32> to vector<32x512xf32>
    %cst_299 = arith.constant dense<0.000000e+00> : vector<8x512xf32>
    %805 = tpu.matmul %627, %804, %cst_299 {dimension_numbers = #tpu.dot_dimension_numbers<[1], [0], [0], [1], [0, 0, 1, 1], [], []>} : vector<8x32xf32>, vector<32x512xf32>, vector<8x512xf32> -> vector<8x512xf32>
    %cst_300 = arith.constant dense<0.000000e+00> : vector<8x32xf32>
    %806 = tpu.matmul %18, %627, %cst_300 {dimension_numbers = #tpu.dot_dimension_numbers<[1], [0], [0], [1], [0, 0, 1, 1], [], []>} : vector<8x8xf32>, vector<8x32xf32>, vector<8x32xf32> -> vector<8x32xf32>
    %c1_301 = arith.constant 1 : index
    %c0_302 = arith.constant 0 : index
    %c0_303 = arith.constant 0 : index
    %807 = vector.load %arg3[%c1_301, %c0_302, %c0_303] : memref<3x32x512xf32, #tpu.memory_space<vmem>>, vector<1x32x512xf32>
    %808 = vector.shape_cast %807 : vector<1x32x512xf32> to vector<32x512xf32>
    %cst_304 = arith.constant dense<0.000000e+00> : vector<8x512xf32>
    %809 = tpu.matmul %806, %808, %cst_304 {dimension_numbers = #tpu.dot_dimension_numbers<[1], [0], [0], [1], [0, 0, 1, 1], [], []>} : vector<8x32xf32>, vector<32x512xf32>, vector<8x512xf32> -> vector<8x512xf32>
    %810 = arith.addf %805, %809 : vector<8x512xf32>
    %cst_305 = arith.constant dense<0.000000e+00> : vector<8x32xf32>
    %811 = tpu.matmul %24, %627, %cst_305 {dimension_numbers = #tpu.dot_dimension_numbers<[1], [0], [0], [1], [0, 0, 1, 1], [], []>} : vector<8x8xf32>, vector<8x32xf32>, vector<8x32xf32> -> vector<8x32xf32>
    %c2_306 = arith.constant 2 : index
    %c0_307 = arith.constant 0 : index
    %c0_308 = arith.constant 0 : index
    %812 = vector.load %arg3[%c2_306, %c0_307, %c0_308] : memref<3x32x512xf32, #tpu.memory_space<vmem>>, vector<1x32x512xf32>
    %813 = vector.shape_cast %812 : vector<1x32x512xf32> to vector<32x512xf32>
    %cst_309 = arith.constant dense<0.000000e+00> : vector<8x512xf32>
    %814 = tpu.matmul %811, %813, %cst_309 {dimension_numbers = #tpu.dot_dimension_numbers<[1], [0], [0], [1], [0, 0, 1, 1], [], []>} : vector<8x32xf32>, vector<32x512xf32>, vector<8x512xf32> -> vector<8x512xf32>
    %815 = arith.addf %810, %814 : vector<8x512xf32>
    %c0_310 = arith.constant 0 : index
    %c0_311 = arith.constant 0 : index
    %816 = vector.load %arg4[%c0_310, %c0_311] : memref<1x512xf32, #tpu.memory_space<vmem>>, vector<1x512xf32>
    %817 = vector.broadcast %816 : vector<1x512xf32> to vector<8x512xf32>
    %818 = arith.addf %815, %817 : vector<8x512xf32>
    %c0_312 = arith.constant 0 : index
    %c0_313 = arith.constant 0 : index
    %819 = vector.load %arg11[%c0_312, %c0_313] : memref<8x512xf32, #tpu.memory_space<vmem>>, vector<8x512xf32>
    tpu.vector_store %arg11[%c0_312, %c0_313], %818 {strides = array<i32>} : memref<8x512xf32, #tpu.memory_space<vmem>>, vector<8x512xf32>,
    %c0_314 = arith.constant 0 : index
    %c0_315 = arith.constant 0 : index
    %820 = vector.load %arg11[%c0_314, %c0_315] : memref<8x512xf32, #tpu.memory_space<vmem>>, vector<8x32xf32>
    %c0_316 = arith.constant 0 : index
    %c32_317 = arith.constant 32 : index
    %821 = vector.load %arg11[%c0_316, %c32_317] : memref<8x512xf32, #tpu.memory_space<vmem>>, vector<8x32xf32>
    %822 = arith.maximumf %820, %821 : vector<8x32xf32>
    %c0_318 = arith.constant 0 : index
    %c64_319 = arith.constant 64 : index
    %823 = vector.load %arg11[%c0_318, %c64_319] : memref<8x512xf32, #tpu.memory_space<vmem>>, vector<8x32xf32>
    %824 = arith.maximumf %822, %823 : vector<8x32xf32>
    %c0_320 = arith.constant 0 : index
    %c96_321 = arith.constant 96 : index
    %825 = vector.load %arg11[%c0_320, %c96_321] : memref<8x512xf32, #tpu.memory_space<vmem>>, vector<8x32xf32>
    %826 = arith.maximumf %824, %825 : vector<8x32xf32>
    %c0_322 = arith.constant 0 : index
    %c128_323 = arith.constant 128 : index
    %827 = vector.load %arg11[%c0_322, %c128_323] : memref<8x512xf32, #tpu.memory_space<vmem>>, vector<8x32xf32>
    %828 = arith.maximumf %826, %827 : vector<8x32xf32>
    %c0_324 = arith.constant 0 : index
    %c160_325 = arith.constant 160 : index
    %829 = vector.load %arg11[%c0_324, %c160_325] : memref<8x512xf32, #tpu.memory_space<vmem>>, vector<8x32xf32>
    %830 = arith.maximumf %828, %829 : vector<8x32xf32>
    %c0_326 = arith.constant 0 : index
    %c192_327 = arith.constant 192 : index
    %831 = vector.load %arg11[%c0_326, %c192_327] : memref<8x512xf32, #tpu.memory_space<vmem>>, vector<8x32xf32>
    %832 = arith.maximumf %830, %831 : vector<8x32xf32>
    %c0_328 = arith.constant 0 : index
    %c224_329 = arith.constant 224 : index
    %833 = vector.load %arg11[%c0_328, %c224_329] : memref<8x512xf32, #tpu.memory_space<vmem>>, vector<8x32xf32>
    %834 = arith.maximumf %832, %833 : vector<8x32xf32>
    %c8_i32_330 = arith.constant 8 : i32
    %835 = vector.broadcast %c8_i32_330 : i32 to vector<8x32xi32>
    %836 = arith.cmpi slt, %0, %835 : vector<8x32xi32>
    %cst_331 = arith.constant -1.000000e+30 : f32
    %837 = vector.broadcast %cst_331 : f32 to vector<8x32xf32>
    %838 = arith.select %836, %834, %837 : vector<8x32xi1>, vector<8x32xf32>
    %cst_332 = arith.constant dense<0xFF800000> : vector<8xf32>
    %839 = vector.multi_reduction <maximumf>, %838, %cst_332 [1] : vector<8x32xf32> to vector<8xf32>
    %840 = vector.shape_cast %839 : vector<8xf32> to vector<8x1xf32>
    %841 = vector.broadcast %840 : vector<8x1xf32> to vector<8x32xf32>
    %842 = arith.cmpf oeq, %838, %841 : vector<8x32xf32>
    %c32_i32_333 = arith.constant 32 : i32
    %843 = vector.broadcast %c32_i32_333 : i32 to vector<8x32xi32>
    %844 = arith.select %842, %0, %843 : vector<8x32xi1>, vector<8x32xi32>
    %cst_334 = arith.constant dense<2147483647> : vector<8xi32>
    %845 = vector.multi_reduction <minsi>, %844, %cst_334 [1] : vector<8x32xi32> to vector<8xi32>
    %846 = vector.shape_cast %845 : vector<8xi32> to vector<8x1xi32>
    %847 = vector.broadcast %846 : vector<8x1xi32> to vector<8x32xi32>
    %848 = arith.cmpi eq, %0, %847 : vector<8x32xi32>
    %cst_335 = arith.constant 0.000000e+00 : f32
    %849 = vector.shape_cast %649 : vector<1x32xf32> to vector<1x32xf32>
    %850 = vector.broadcast %849 : vector<1x32xf32> to vector<8x32xf32>
    %851 = vector.broadcast %cst_335 : f32 to vector<8x32xf32>
    %852 = arith.select %848, %850, %851 : vector<8x32xi1>, vector<8x32xf32>
    %cst_336 = arith.constant dense<0.000000e+00> : vector<8xf32>
    %853 = vector.multi_reduction <add>, %852, %cst_336 [1] : vector<8x32xf32> to vector<8xf32>
    %854 = vector.shape_cast %853 : vector<8xf32> to vector<8x1xf32>
    %cst_337 = arith.constant -1.000000e+30 : f32
    %855 = vector.broadcast %cst_337 : f32 to vector<8x32xf32>
    %856 = arith.select %848, %855, %838 : vector<8x32xi1>, vector<8x32xf32>
    %cst_338 = arith.constant dense<0xFF800000> : vector<8xf32>
    %857 = vector.multi_reduction <maximumf>, %856, %cst_338 [1] : vector<8x32xf32> to vector<8xf32>
    %858 = vector.shape_cast %857 : vector<8xf32> to vector<8x1xf32>
    %859 = vector.broadcast %858 : vector<8x1xf32> to vector<8x32xf32>
    %860 = arith.cmpf oeq, %856, %859 : vector<8x32xf32>
    %c32_i32_339 = arith.constant 32 : i32
    %861 = vector.broadcast %c32_i32_339 : i32 to vector<8x32xi32>
    %862 = arith.select %860, %0, %861 : vector<8x32xi1>, vector<8x32xi32>
    %cst_340 = arith.constant dense<2147483647> : vector<8xi32>
    %863 = vector.multi_reduction <minsi>, %862, %cst_340 [1] : vector<8x32xi32> to vector<8xi32>
    %864 = vector.shape_cast %863 : vector<8xi32> to vector<8x1xi32>
    %865 = vector.broadcast %864 : vector<8x1xi32> to vector<8x32xi32>
    %866 = arith.cmpi eq, %0, %865 : vector<8x32xi32>
    %cst_341 = arith.constant 0.000000e+00 : f32
    %867 = vector.shape_cast %649 : vector<1x32xf32> to vector<1x32xf32>
    %868 = vector.broadcast %867 : vector<1x32xf32> to vector<8x32xf32>
    %869 = vector.broadcast %cst_341 : f32 to vector<8x32xf32>
    %870 = arith.select %866, %868, %869 : vector<8x32xi1>, vector<8x32xf32>
    %cst_342 = arith.constant dense<0.000000e+00> : vector<8xf32>
    %871 = vector.multi_reduction <add>, %870, %cst_342 [1] : vector<8x32xf32> to vector<8xf32>
    %872 = vector.shape_cast %871 : vector<8xf32> to vector<8x1xf32>
    %c16_i32_343 = arith.constant 16 : i32
    %873 = vector.broadcast %c16_i32_343 : i32 to vector<8x32xi32>
    %874 = arith.cmpi slt, %0, %873 : vector<8x32xi32>
    %cst_344 = arith.constant -1.000000e+30 : f32
    %875 = vector.broadcast %cst_344 : f32 to vector<8x32xf32>
    %876 = arith.select %874, %834, %875 : vector<8x32xi1>, vector<8x32xf32>
    %cst_345 = arith.constant dense<0xFF800000> : vector<8xf32>
    %877 = vector.multi_reduction <maximumf>, %876, %cst_345 [1] : vector<8x32xf32> to vector<8xf32>
    %878 = vector.shape_cast %877 : vector<8xf32> to vector<8x1xf32>
    %879 = vector.broadcast %878 : vector<8x1xf32> to vector<8x32xf32>
    %880 = arith.cmpf oeq, %876, %879 : vector<8x32xf32>
    %c32_i32_346 = arith.constant 32 : i32
    %881 = vector.broadcast %c32_i32_346 : i32 to vector<8x32xi32>
    %882 = arith.select %880, %0, %881 : vector<8x32xi1>, vector<8x32xi32>
    %cst_347 = arith.constant dense<2147483647> : vector<8xi32>
    %883 = vector.multi_reduction <minsi>, %882, %cst_347 [1] : vector<8x32xi32> to vector<8xi32>
    %884 = vector.shape_cast %883 : vector<8xi32> to vector<8x1xi32>
    %885 = vector.broadcast %884 : vector<8x1xi32> to vector<8x32xi32>
    %886 = arith.cmpi eq, %0, %885 : vector<8x32xi32>
    %cst_348 = arith.constant 0.000000e+00 : f32
    %887 = vector.shape_cast %649 : vector<1x32xf32> to vector<1x32xf32>
    %888 = vector.broadcast %887 : vector<1x32xf32> to vector<8x32xf32>
    %889 = vector.broadcast %cst_348 : f32 to vector<8x32xf32>
    %890 = arith.select %886, %888, %889 : vector<8x32xi1>, vector<8x32xf32>
    %cst_349 = arith.constant dense<0.000000e+00> : vector<8xf32>
    %891 = vector.multi_reduction <add>, %890, %cst_349 [1] : vector<8x32xf32> to vector<8xf32>
    %892 = vector.shape_cast %891 : vector<8xf32> to vector<8x1xf32>
    %cst_350 = arith.constant -1.000000e+30 : f32
    %893 = vector.broadcast %cst_350 : f32 to vector<8x32xf32>
    %894 = arith.select %886, %893, %876 : vector<8x32xi1>, vector<8x32xf32>
    %cst_351 = arith.constant dense<0xFF800000> : vector<8xf32>
    %895 = vector.multi_reduction <maximumf>, %894, %cst_351 [1] : vector<8x32xf32> to vector<8xf32>
    %896 = vector.shape_cast %895 : vector<8xf32> to vector<8x1xf32>
    %897 = vector.broadcast %896 : vector<8x1xf32> to vector<8x32xf32>
    %898 = arith.cmpf oeq, %894, %897 : vector<8x32xf32>
    %c32_i32_352 = arith.constant 32 : i32
    %899 = vector.broadcast %c32_i32_352 : i32 to vector<8x32xi32>
    %900 = arith.select %898, %0, %899 : vector<8x32xi1>, vector<8x32xi32>
    %cst_353 = arith.constant dense<2147483647> : vector<8xi32>
    %901 = vector.multi_reduction <minsi>, %900, %cst_353 [1] : vector<8x32xi32> to vector<8xi32>
    %902 = vector.shape_cast %901 : vector<8xi32> to vector<8x1xi32>
    %903 = vector.broadcast %902 : vector<8x1xi32> to vector<8x32xi32>
    %904 = arith.cmpi eq, %0, %903 : vector<8x32xi32>
    %cst_354 = arith.constant 0.000000e+00 : f32
    %905 = vector.shape_cast %649 : vector<1x32xf32> to vector<1x32xf32>
    %906 = vector.broadcast %905 : vector<1x32xf32> to vector<8x32xf32>
    %907 = vector.broadcast %cst_354 : f32 to vector<8x32xf32>
    %908 = arith.select %904, %906, %907 : vector<8x32xi1>, vector<8x32xf32>
    %cst_355 = arith.constant dense<0.000000e+00> : vector<8xf32>
    %909 = vector.multi_reduction <add>, %908, %cst_355 [1] : vector<8x32xf32> to vector<8xf32>
    %910 = vector.shape_cast %909 : vector<8xf32> to vector<8x1xf32>
    %c24_i32_356 = arith.constant 24 : i32
    %911 = vector.broadcast %c24_i32_356 : i32 to vector<8x32xi32>
    %912 = arith.cmpi slt, %0, %911 : vector<8x32xi32>
    %cst_357 = arith.constant -1.000000e+30 : f32
    %913 = vector.broadcast %cst_357 : f32 to vector<8x32xf32>
    %914 = arith.select %912, %834, %913 : vector<8x32xi1>, vector<8x32xf32>
    %cst_358 = arith.constant dense<0xFF800000> : vector<8xf32>
    %915 = vector.multi_reduction <maximumf>, %914, %cst_358 [1] : vector<8x32xf32> to vector<8xf32>
    %916 = vector.shape_cast %915 : vector<8xf32> to vector<8x1xf32>
    %917 = vector.broadcast %916 : vector<8x1xf32> to vector<8x32xf32>
    %918 = arith.cmpf oeq, %914, %917 : vector<8x32xf32>
    %c32_i32_359 = arith.constant 32 : i32
    %919 = vector.broadcast %c32_i32_359 : i32 to vector<8x32xi32>
    %920 = arith.select %918, %0, %919 : vector<8x32xi1>, vector<8x32xi32>
    %cst_360 = arith.constant dense<2147483647> : vector<8xi32>
    %921 = vector.multi_reduction <minsi>, %920, %cst_360 [1] : vector<8x32xi32> to vector<8xi32>
    %922 = vector.shape_cast %921 : vector<8xi32> to vector<8x1xi32>
    %923 = vector.broadcast %922 : vector<8x1xi32> to vector<8x32xi32>
    %924 = arith.cmpi eq, %0, %923 : vector<8x32xi32>
    %cst_361 = arith.constant 0.000000e+00 : f32
    %925 = vector.shape_cast %649 : vector<1x32xf32> to vector<1x32xf32>
    %926 = vector.broadcast %925 : vector<1x32xf32> to vector<8x32xf32>
    %927 = vector.broadcast %cst_361 : f32 to vector<8x32xf32>
    %928 = arith.select %924, %926, %927 : vector<8x32xi1>, vector<8x32xf32>
    %cst_362 = arith.constant dense<0.000000e+00> : vector<8xf32>
    %929 = vector.multi_reduction <add>, %928, %cst_362 [1] : vector<8x32xf32> to vector<8xf32>
    %930 = vector.shape_cast %929 : vector<8xf32> to vector<8x1xf32>
    %cst_363 = arith.constant -1.000000e+30 : f32
    %931 = vector.broadcast %cst_363 : f32 to vector<8x32xf32>
    %932 = arith.select %924, %931, %914 : vector<8x32xi1>, vector<8x32xf32>
    %cst_364 = arith.constant dense<0xFF800000> : vector<8xf32>
    %933 = vector.multi_reduction <maximumf>, %932, %cst_364 [1] : vector<8x32xf32> to vector<8xf32>
    %934 = vector.shape_cast %933 : vector<8xf32> to vector<8x1xf32>
    %935 = vector.broadcast %934 : vector<8x1xf32> to vector<8x32xf32>
    %936 = arith.cmpf oeq, %932, %935 : vector<8x32xf32>
    %c32_i32_365 = arith.constant 32 : i32
    %937 = vector.broadcast %c32_i32_365 : i32 to vector<8x32xi32>
    %938 = arith.select %936, %0, %937 : vector<8x32xi1>, vector<8x32xi32>
    %cst_366 = arith.constant dense<2147483647> : vector<8xi32>
    %939 = vector.multi_reduction <minsi>, %938, %cst_366 [1] : vector<8x32xi32> to vector<8xi32>
    %940 = vector.shape_cast %939 : vector<8xi32> to vector<8x1xi32>
    %941 = vector.broadcast %940 : vector<8x1xi32> to vector<8x32xi32>
    %942 = arith.cmpi eq, %0, %941 : vector<8x32xi32>
    %cst_367 = arith.constant 0.000000e+00 : f32
    %943 = vector.shape_cast %649 : vector<1x32xf32> to vector<1x32xf32>
    %944 = vector.broadcast %943 : vector<1x32xf32> to vector<8x32xf32>
    %945 = vector.broadcast %cst_367 : f32 to vector<8x32xf32>
    %946 = arith.select %942, %944, %945 : vector<8x32xi1>, vector<8x32xf32>
    %cst_368 = arith.constant dense<0.000000e+00> : vector<8xf32>
    %947 = vector.multi_reduction <add>, %946, %cst_368 [1] : vector<8x32xf32> to vector<8xf32>
    %948 = vector.shape_cast %947 : vector<8xf32> to vector<8x1xf32>
    %c32_i32_369 = arith.constant 32 : i32
    %949 = vector.broadcast %c32_i32_369 : i32 to vector<8x32xi32>
    %950 = arith.cmpi slt, %0, %949 : vector<8x32xi32>
    %cst_370 = arith.constant -1.000000e+30 : f32
    %951 = vector.broadcast %cst_370 : f32 to vector<8x32xf32>
    %952 = arith.select %950, %834, %951 : vector<8x32xi1>, vector<8x32xf32>
    %cst_371 = arith.constant dense<0xFF800000> : vector<8xf32>
    %953 = vector.multi_reduction <maximumf>, %952, %cst_371 [1] : vector<8x32xf32> to vector<8xf32>
    %954 = vector.shape_cast %953 : vector<8xf32> to vector<8x1xf32>
    %955 = vector.broadcast %954 : vector<8x1xf32> to vector<8x32xf32>
    %956 = arith.cmpf oeq, %952, %955 : vector<8x32xf32>
    %c32_i32_372 = arith.constant 32 : i32
    %957 = vector.broadcast %c32_i32_372 : i32 to vector<8x32xi32>
    %958 = arith.select %956, %0, %957 : vector<8x32xi1>, vector<8x32xi32>
    %cst_373 = arith.constant dense<2147483647> : vector<8xi32>
    %959 = vector.multi_reduction <minsi>, %958, %cst_373 [1] : vector<8x32xi32> to vector<8xi32>
    %960 = vector.shape_cast %959 : vector<8xi32> to vector<8x1xi32>
    %961 = vector.broadcast %960 : vector<8x1xi32> to vector<8x32xi32>
    %962 = arith.cmpi eq, %0, %961 : vector<8x32xi32>
    %cst_374 = arith.constant 0.000000e+00 : f32
    %963 = vector.shape_cast %649 : vector<1x32xf32> to vector<1x32xf32>
    %964 = vector.broadcast %963 : vector<1x32xf32> to vector<8x32xf32>
    %965 = vector.broadcast %cst_374 : f32 to vector<8x32xf32>
    %966 = arith.select %962, %964, %965 : vector<8x32xi1>, vector<8x32xf32>
    %cst_375 = arith.constant dense<0.000000e+00> : vector<8xf32>
    %967 = vector.multi_reduction <add>, %966, %cst_375 [1] : vector<8x32xf32> to vector<8xf32>
    %968 = vector.shape_cast %967 : vector<8xf32> to vector<8x1xf32>
    %cst_376 = arith.constant -1.000000e+30 : f32
    %969 = vector.broadcast %cst_376 : f32 to vector<8x32xf32>
    %970 = arith.select %962, %969, %952 : vector<8x32xi1>, vector<8x32xf32>
    %cst_377 = arith.constant dense<0xFF800000> : vector<8xf32>
    %971 = vector.multi_reduction <maximumf>, %970, %cst_377 [1] : vector<8x32xf32> to vector<8xf32>
    %972 = vector.shape_cast %971 : vector<8xf32> to vector<8x1xf32>
    %973 = vector.broadcast %972 : vector<8x1xf32> to vector<8x32xf32>
    %974 = arith.cmpf oeq, %970, %973 : vector<8x32xf32>
    %c32_i32_378 = arith.constant 32 : i32
    %975 = vector.broadcast %c32_i32_378 : i32 to vector<8x32xi32>
    %976 = arith.select %974, %0, %975 : vector<8x32xi1>, vector<8x32xi32>
    %cst_379 = arith.constant dense<2147483647> : vector<8xi32>
    %977 = vector.multi_reduction <minsi>, %976, %cst_379 [1] : vector<8x32xi32> to vector<8xi32>
    %978 = vector.shape_cast %977 : vector<8xi32> to vector<8x1xi32>
    %979 = vector.broadcast %978 : vector<8x1xi32> to vector<8x32xi32>
    %980 = arith.cmpi eq, %0, %979 : vector<8x32xi32>
    %cst_380 = arith.constant 0.000000e+00 : f32
    %981 = vector.shape_cast %649 : vector<1x32xf32> to vector<1x32xf32>
    %982 = vector.broadcast %981 : vector<1x32xf32> to vector<8x32xf32>
    %983 = vector.broadcast %cst_380 : f32 to vector<8x32xf32>
    %984 = arith.select %980, %982, %983 : vector<8x32xi1>, vector<8x32xf32>
    %cst_381 = arith.constant dense<0.000000e+00> : vector<8xf32>
    %985 = vector.multi_reduction <add>, %984, %cst_381 [1] : vector<8x32xf32> to vector<8xf32>
    %986 = vector.shape_cast %985 : vector<8xf32> to vector<8x1xf32>
    %987 = tpu.concatenate %840, %858, %878, %896, %916, %934, %954, %972, %854, %872, %892, %910, %930, %948, %968, %986 in 1 : vector<8x1xf32>, vector<8x1xf32>, vector<8x1xf32>, vector<8x1xf32>, vector<8x1xf32>, vector<8x1xf32>, vector<8x1xf32>, vector<8x1xf32>, vector<8x1xf32>, vector<8x1xf32>, vector<8x1xf32>, vector<8x1xf32>, vector<8x1xf32>, vector<8x1xf32>, vector<8x1xf32>, vector<8x1xf32> -> vector<8x16xf32>
    %c0_382 = arith.constant 0 : index
    %c256_383 = arith.constant 256 : index
    %988 = vector.load %arg11[%c0_382, %c256_383] : memref<8x512xf32, #tpu.memory_space<vmem>>, vector<8x32xf32>
    %c0_384 = arith.constant 0 : index
    %c288_385 = arith.constant 288 : index
    %989 = vector.load %arg11[%c0_384, %c288_385] : memref<8x512xf32, #tpu.memory_space<vmem>>, vector<8x32xf32>
    %990 = arith.maximumf %988, %989 : vector<8x32xf32>
    %c0_386 = arith.constant 0 : index
    %c320_387 = arith.constant 320 : index
    %991 = vector.load %arg11[%c0_386, %c320_387] : memref<8x512xf32, #tpu.memory_space<vmem>>, vector<8x32xf32>
    %992 = arith.maximumf %990, %991 : vector<8x32xf32>
    %c0_388 = arith.constant 0 : index
    %c352_389 = arith.constant 352 : index
    %993 = vector.load %arg11[%c0_388, %c352_389] : memref<8x512xf32, #tpu.memory_space<vmem>>, vector<8x32xf32>
    %994 = arith.maximumf %992, %993 : vector<8x32xf32>
    %c0_390 = arith.constant 0 : index
    %c384_391 = arith.constant 384 : index
    %995 = vector.load %arg11[%c0_390, %c384_391] : memref<8x512xf32, #tpu.memory_space<vmem>>, vector<8x32xf32>
    %996 = arith.maximumf %994, %995 : vector<8x32xf32>
    %c0_392 = arith.constant 0 : index
    %c416_393 = arith.constant 416 : index
    %997 = vector.load %arg11[%c0_392, %c416_393] : memref<8x512xf32, #tpu.memory_space<vmem>>, vector<8x32xf32>
    %998 = arith.maximumf %996, %997 : vector<8x32xf32>
    %c0_394 = arith.constant 0 : index
    %c448_395 = arith.constant 448 : index
    %999 = vector.load %arg11[%c0_394, %c448_395] : memref<8x512xf32, #tpu.memory_space<vmem>>, vector<8x32xf32>
    %1000 = arith.maximumf %998, %999 : vector<8x32xf32>
    %c0_396 = arith.constant 0 : index
    %c480_397 = arith.constant 480 : index
    %1001 = vector.load %arg11[%c0_396, %c480_397] : memref<8x512xf32, #tpu.memory_space<vmem>>, vector<8x32xf32>
    %1002 = arith.maximumf %1000, %1001 : vector<8x32xf32>
    %c8_i32_398 = arith.constant 8 : i32
    %1003 = vector.broadcast %c8_i32_398 : i32 to vector<8x32xi32>
    %1004 = arith.cmpi slt, %0, %1003 : vector<8x32xi32>
    %cst_399 = arith.constant -1.000000e+30 : f32
    %1005 = vector.broadcast %cst_399 : f32 to vector<8x32xf32>
    %1006 = arith.select %1004, %1002, %1005 : vector<8x32xi1>, vector<8x32xf32>
    %cst_400 = arith.constant dense<0xFF800000> : vector<8xf32>
    %1007 = vector.multi_reduction <maximumf>, %1006, %cst_400 [1] : vector<8x32xf32> to vector<8xf32>
    %1008 = vector.shape_cast %1007 : vector<8xf32> to vector<8x1xf32>
    %1009 = vector.broadcast %1008 : vector<8x1xf32> to vector<8x32xf32>
    %1010 = arith.cmpf oeq, %1006, %1009 : vector<8x32xf32>
    %c32_i32_401 = arith.constant 32 : i32
    %1011 = vector.broadcast %c32_i32_401 : i32 to vector<8x32xi32>
    %1012 = arith.select %1010, %0, %1011 : vector<8x32xi1>, vector<8x32xi32>
    %cst_402 = arith.constant dense<2147483647> : vector<8xi32>
    %1013 = vector.multi_reduction <minsi>, %1012, %cst_402 [1] : vector<8x32xi32> to vector<8xi32>
    %1014 = vector.shape_cast %1013 : vector<8xi32> to vector<8x1xi32>
    %1015 = vector.broadcast %1014 : vector<8x1xi32> to vector<8x32xi32>
    %1016 = arith.cmpi eq, %0, %1015 : vector<8x32xi32>
    %cst_403 = arith.constant 0.000000e+00 : f32
    %1017 = vector.shape_cast %649 : vector<1x32xf32> to vector<1x32xf32>
    %1018 = vector.broadcast %1017 : vector<1x32xf32> to vector<8x32xf32>
    %1019 = vector.broadcast %cst_403 : f32 to vector<8x32xf32>
    %1020 = arith.select %1016, %1018, %1019 : vector<8x32xi1>, vector<8x32xf32>
    %cst_404 = arith.constant dense<0.000000e+00> : vector<8xf32>
    %1021 = vector.multi_reduction <add>, %1020, %cst_404 [1] : vector<8x32xf32> to vector<8xf32>
    %1022 = vector.shape_cast %1021 : vector<8xf32> to vector<8x1xf32>
    %cst_405 = arith.constant -1.000000e+30 : f32
    %1023 = vector.broadcast %cst_405 : f32 to vector<8x32xf32>
    %1024 = arith.select %1016, %1023, %1006 : vector<8x32xi1>, vector<8x32xf32>
    %cst_406 = arith.constant dense<0xFF800000> : vector<8xf32>
    %1025 = vector.multi_reduction <maximumf>, %1024, %cst_406 [1] : vector<8x32xf32> to vector<8xf32>
    %1026 = vector.shape_cast %1025 : vector<8xf32> to vector<8x1xf32>
    %1027 = vector.broadcast %1026 : vector<8x1xf32> to vector<8x32xf32>
    %1028 = arith.cmpf oeq, %1024, %1027 : vector<8x32xf32>
    %c32_i32_407 = arith.constant 32 : i32
    %1029 = vector.broadcast %c32_i32_407 : i32 to vector<8x32xi32>
    %1030 = arith.select %1028, %0, %1029 : vector<8x32xi1>, vector<8x32xi32>
    %cst_408 = arith.constant dense<2147483647> : vector<8xi32>
    %1031 = vector.multi_reduction <minsi>, %1030, %cst_408 [1] : vector<8x32xi32> to vector<8xi32>
    %1032 = vector.shape_cast %1031 : vector<8xi32> to vector<8x1xi32>
    %1033 = vector.broadcast %1032 : vector<8x1xi32> to vector<8x32xi32>
    %1034 = arith.cmpi eq, %0, %1033 : vector<8x32xi32>
    %cst_409 = arith.constant 0.000000e+00 : f32
    %1035 = vector.shape_cast %649 : vector<1x32xf32> to vector<1x32xf32>
    %1036 = vector.broadcast %1035 : vector<1x32xf32> to vector<8x32xf32>
    %1037 = vector.broadcast %cst_409 : f32 to vector<8x32xf32>
    %1038 = arith.select %1034, %1036, %1037 : vector<8x32xi1>, vector<8x32xf32>
    %cst_410 = arith.constant dense<0.000000e+00> : vector<8xf32>
    %1039 = vector.multi_reduction <add>, %1038, %cst_410 [1] : vector<8x32xf32> to vector<8xf32>
    %1040 = vector.shape_cast %1039 : vector<8xf32> to vector<8x1xf32>
    %c16_i32_411 = arith.constant 16 : i32
    %1041 = vector.broadcast %c16_i32_411 : i32 to vector<8x32xi32>
    %1042 = arith.cmpi slt, %0, %1041 : vector<8x32xi32>
    %cst_412 = arith.constant -1.000000e+30 : f32
    %1043 = vector.broadcast %cst_412 : f32 to vector<8x32xf32>
    %1044 = arith.select %1042, %1002, %1043 : vector<8x32xi1>, vector<8x32xf32>
    %cst_413 = arith.constant dense<0xFF800000> : vector<8xf32>
    %1045 = vector.multi_reduction <maximumf>, %1044, %cst_413 [1] : vector<8x32xf32> to vector<8xf32>
    %1046 = vector.shape_cast %1045 : vector<8xf32> to vector<8x1xf32>
    %1047 = vector.broadcast %1046 : vector<8x1xf32> to vector<8x32xf32>
    %1048 = arith.cmpf oeq, %1044, %1047 : vector<8x32xf32>
    %c32_i32_414 = arith.constant 32 : i32
    %1049 = vector.broadcast %c32_i32_414 : i32 to vector<8x32xi32>
    %1050 = arith.select %1048, %0, %1049 : vector<8x32xi1>, vector<8x32xi32>
    %cst_415 = arith.constant dense<2147483647> : vector<8xi32>
    %1051 = vector.multi_reduction <minsi>, %1050, %cst_415 [1] : vector<8x32xi32> to vector<8xi32>
    %1052 = vector.shape_cast %1051 : vector<8xi32> to vector<8x1xi32>
    %1053 = vector.broadcast %1052 : vector<8x1xi32> to vector<8x32xi32>
    %1054 = arith.cmpi eq, %0, %1053 : vector<8x32xi32>
    %cst_416 = arith.constant 0.000000e+00 : f32
    %1055 = vector.shape_cast %649 : vector<1x32xf32> to vector<1x32xf32>
    %1056 = vector.broadcast %1055 : vector<1x32xf32> to vector<8x32xf32>
    %1057 = vector.broadcast %cst_416 : f32 to vector<8x32xf32>
    %1058 = arith.select %1054, %1056, %1057 : vector<8x32xi1>, vector<8x32xf32>
    %cst_417 = arith.constant dense<0.000000e+00> : vector<8xf32>
    %1059 = vector.multi_reduction <add>, %1058, %cst_417 [1] : vector<8x32xf32> to vector<8xf32>
    %1060 = vector.shape_cast %1059 : vector<8xf32> to vector<8x1xf32>
    %cst_418 = arith.constant -1.000000e+30 : f32
    %1061 = vector.broadcast %cst_418 : f32 to vector<8x32xf32>
    %1062 = arith.select %1054, %1061, %1044 : vector<8x32xi1>, vector<8x32xf32>
    %cst_419 = arith.constant dense<0xFF800000> : vector<8xf32>
    %1063 = vector.multi_reduction <maximumf>, %1062, %cst_419 [1] : vector<8x32xf32> to vector<8xf32>
    %1064 = vector.shape_cast %1063 : vector<8xf32> to vector<8x1xf32>
    %1065 = vector.broadcast %1064 : vector<8x1xf32> to vector<8x32xf32>
    %1066 = arith.cmpf oeq, %1062, %1065 : vector<8x32xf32>
    %c32_i32_420 = arith.constant 32 : i32
    %1067 = vector.broadcast %c32_i32_420 : i32 to vector<8x32xi32>
    %1068 = arith.select %1066, %0, %1067 : vector<8x32xi1>, vector<8x32xi32>
    %cst_421 = arith.constant dense<2147483647> : vector<8xi32>
    %1069 = vector.multi_reduction <minsi>, %1068, %cst_421 [1] : vector<8x32xi32> to vector<8xi32>
    %1070 = vector.shape_cast %1069 : vector<8xi32> to vector<8x1xi32>
    %1071 = vector.broadcast %1070 : vector<8x1xi32> to vector<8x32xi32>
    %1072 = arith.cmpi eq, %0, %1071 : vector<8x32xi32>
    %cst_422 = arith.constant 0.000000e+00 : f32
    %1073 = vector.shape_cast %649 : vector<1x32xf32> to vector<1x32xf32>
    %1074 = vector.broadcast %1073 : vector<1x32xf32> to vector<8x32xf32>
    %1075 = vector.broadcast %cst_422 : f32 to vector<8x32xf32>
    %1076 = arith.select %1072, %1074, %1075 : vector<8x32xi1>, vector<8x32xf32>
    %cst_423 = arith.constant dense<0.000000e+00> : vector<8xf32>
    %1077 = vector.multi_reduction <add>, %1076, %cst_423 [1] : vector<8x32xf32> to vector<8xf32>
    %1078 = vector.shape_cast %1077 : vector<8xf32> to vector<8x1xf32>
    %c24_i32_424 = arith.constant 24 : i32
    %1079 = vector.broadcast %c24_i32_424 : i32 to vector<8x32xi32>
    %1080 = arith.cmpi slt, %0, %1079 : vector<8x32xi32>
    %cst_425 = arith.constant -1.000000e+30 : f32
    %1081 = vector.broadcast %cst_425 : f32 to vector<8x32xf32>
    %1082 = arith.select %1080, %1002, %1081 : vector<8x32xi1>, vector<8x32xf32>
    %cst_426 = arith.constant dense<0xFF800000> : vector<8xf32>
    %1083 = vector.multi_reduction <maximumf>, %1082, %cst_426 [1] : vector<8x32xf32> to vector<8xf32>
    %1084 = vector.shape_cast %1083 : vector<8xf32> to vector<8x1xf32>
    %1085 = vector.broadcast %1084 : vector<8x1xf32> to vector<8x32xf32>
    %1086 = arith.cmpf oeq, %1082, %1085 : vector<8x32xf32>
    %c32_i32_427 = arith.constant 32 : i32
    %1087 = vector.broadcast %c32_i32_427 : i32 to vector<8x32xi32>
    %1088 = arith.select %1086, %0, %1087 : vector<8x32xi1>, vector<8x32xi32>
    %cst_428 = arith.constant dense<2147483647> : vector<8xi32>
    %1089 = vector.multi_reduction <minsi>, %1088, %cst_428 [1] : vector<8x32xi32> to vector<8xi32>
    %1090 = vector.shape_cast %1089 : vector<8xi32> to vector<8x1xi32>
    %1091 = vector.broadcast %1090 : vector<8x1xi32> to vector<8x32xi32>
    %1092 = arith.cmpi eq, %0, %1091 : vector<8x32xi32>
    %cst_429 = arith.constant 0.000000e+00 : f32
    %1093 = vector.shape_cast %649 : vector<1x32xf32> to vector<1x32xf32>
    %1094 = vector.broadcast %1093 : vector<1x32xf32> to vector<8x32xf32>
    %1095 = vector.broadcast %cst_429 : f32 to vector<8x32xf32>
    %1096 = arith.select %1092, %1094, %1095 : vector<8x32xi1>, vector<8x32xf32>
    %cst_430 = arith.constant dense<0.000000e+00> : vector<8xf32>
    %1097 = vector.multi_reduction <add>, %1096, %cst_430 [1] : vector<8x32xf32> to vector<8xf32>
    %1098 = vector.shape_cast %1097 : vector<8xf32> to vector<8x1xf32>
    %cst_431 = arith.constant -1.000000e+30 : f32
    %1099 = vector.broadcast %cst_431 : f32 to vector<8x32xf32>
    %1100 = arith.select %1092, %1099, %1082 : vector<8x32xi1>, vector<8x32xf32>
    %cst_432 = arith.constant dense<0xFF800000> : vector<8xf32>
    %1101 = vector.multi_reduction <maximumf>, %1100, %cst_432 [1] : vector<8x32xf32> to vector<8xf32>
    %1102 = vector.shape_cast %1101 : vector<8xf32> to vector<8x1xf32>
    %1103 = vector.broadcast %1102 : vector<8x1xf32> to vector<8x32xf32>
    %1104 = arith.cmpf oeq, %1100, %1103 : vector<8x32xf32>
    %c32_i32_433 = arith.constant 32 : i32
    %1105 = vector.broadcast %c32_i32_433 : i32 to vector<8x32xi32>
    %1106 = arith.select %1104, %0, %1105 : vector<8x32xi1>, vector<8x32xi32>
    %cst_434 = arith.constant dense<2147483647> : vector<8xi32>
    %1107 = vector.multi_reduction <minsi>, %1106, %cst_434 [1] : vector<8x32xi32> to vector<8xi32>
    %1108 = vector.shape_cast %1107 : vector<8xi32> to vector<8x1xi32>
    %1109 = vector.broadcast %1108 : vector<8x1xi32> to vector<8x32xi32>
    %1110 = arith.cmpi eq, %0, %1109 : vector<8x32xi32>
    %cst_435 = arith.constant 0.000000e+00 : f32
    %1111 = vector.shape_cast %649 : vector<1x32xf32> to vector<1x32xf32>
    %1112 = vector.broadcast %1111 : vector<1x32xf32> to vector<8x32xf32>
    %1113 = vector.broadcast %cst_435 : f32 to vector<8x32xf32>
    %1114 = arith.select %1110, %1112, %1113 : vector<8x32xi1>, vector<8x32xf32>
    %cst_436 = arith.constant dense<0.000000e+00> : vector<8xf32>
    %1115 = vector.multi_reduction <add>, %1114, %cst_436 [1] : vector<8x32xf32> to vector<8xf32>
    %1116 = vector.shape_cast %1115 : vector<8xf32> to vector<8x1xf32>
    %c32_i32_437 = arith.constant 32 : i32
    %1117 = vector.broadcast %c32_i32_437 : i32 to vector<8x32xi32>
    %1118 = arith.cmpi slt, %0, %1117 : vector<8x32xi32>
    %cst_438 = arith.constant -1.000000e+30 : f32
    %1119 = vector.broadcast %cst_438 : f32 to vector<8x32xf32>
    %1120 = arith.select %1118, %1002, %1119 : vector<8x32xi1>, vector<8x32xf32>
    %cst_439 = arith.constant dense<0xFF800000> : vector<8xf32>
    %1121 = vector.multi_reduction <maximumf>, %1120, %cst_439 [1] : vector<8x32xf32> to vector<8xf32>
    %1122 = vector.shape_cast %1121 : vector<8xf32> to vector<8x1xf32>
    %1123 = vector.broadcast %1122 : vector<8x1xf32> to vector<8x32xf32>
    %1124 = arith.cmpf oeq, %1120, %1123 : vector<8x32xf32>
    %c32_i32_440 = arith.constant 32 : i32
    %1125 = vector.broadcast %c32_i32_440 : i32 to vector<8x32xi32>
    %1126 = arith.select %1124, %0, %1125 : vector<8x32xi1>, vector<8x32xi32>
    %cst_441 = arith.constant dense<2147483647> : vector<8xi32>
    %1127 = vector.multi_reduction <minsi>, %1126, %cst_441 [1] : vector<8x32xi32> to vector<8xi32>
    %1128 = vector.shape_cast %1127 : vector<8xi32> to vector<8x1xi32>
    %1129 = vector.broadcast %1128 : vector<8x1xi32> to vector<8x32xi32>
    %1130 = arith.cmpi eq, %0, %1129 : vector<8x32xi32>
    %cst_442 = arith.constant 0.000000e+00 : f32
    %1131 = vector.shape_cast %649 : vector<1x32xf32> to vector<1x32xf32>
    %1132 = vector.broadcast %1131 : vector<1x32xf32> to vector<8x32xf32>
    %1133 = vector.broadcast %cst_442 : f32 to vector<8x32xf32>
    %1134 = arith.select %1130, %1132, %1133 : vector<8x32xi1>, vector<8x32xf32>
    %cst_443 = arith.constant dense<0.000000e+00> : vector<8xf32>
    %1135 = vector.multi_reduction <add>, %1134, %cst_443 [1] : vector<8x32xf32> to vector<8xf32>
    %1136 = vector.shape_cast %1135 : vector<8xf32> to vector<8x1xf32>
    %cst_444 = arith.constant -1.000000e+30 : f32
    %1137 = vector.broadcast %cst_444 : f32 to vector<8x32xf32>
    %1138 = arith.select %1130, %1137, %1120 : vector<8x32xi1>, vector<8x32xf32>
    %cst_445 = arith.constant dense<0xFF800000> : vector<8xf32>
    %1139 = vector.multi_reduction <maximumf>, %1138, %cst_445 [1] : vector<8x32xf32> to vector<8xf32>
    %1140 = vector.shape_cast %1139 : vector<8xf32> to vector<8x1xf32>
    %1141 = vector.broadcast %1140 : vector<8x1xf32> to vector<8x32xf32>
    %1142 = arith.cmpf oeq, %1138, %1141 : vector<8x32xf32>
    %c32_i32_446 = arith.constant 32 : i32
    %1143 = vector.broadcast %c32_i32_446 : i32 to vector<8x32xi32>
    %1144 = arith.select %1142, %0, %1143 : vector<8x32xi1>, vector<8x32xi32>
    %cst_447 = arith.constant dense<2147483647> : vector<8xi32>
    %1145 = vector.multi_reduction <minsi>, %1144, %cst_447 [1] : vector<8x32xi32> to vector<8xi32>
    %1146 = vector.shape_cast %1145 : vector<8xi32> to vector<8x1xi32>
    %1147 = vector.broadcast %1146 : vector<8x1xi32> to vector<8x32xi32>
    %1148 = arith.cmpi eq, %0, %1147 : vector<8x32xi32>
    %cst_448 = arith.constant 0.000000e+00 : f32
    %1149 = vector.shape_cast %649 : vector<1x32xf32> to vector<1x32xf32>
    %1150 = vector.broadcast %1149 : vector<1x32xf32> to vector<8x32xf32>
    %1151 = vector.broadcast %cst_448 : f32 to vector<8x32xf32>
    %1152 = arith.select %1148, %1150, %1151 : vector<8x32xi1>, vector<8x32xf32>
    %cst_449 = arith.constant dense<0.000000e+00> : vector<8xf32>
    %1153 = vector.multi_reduction <add>, %1152, %cst_449 [1] : vector<8x32xf32> to vector<8xf32>
    %1154 = vector.shape_cast %1153 : vector<8xf32> to vector<8x1xf32>
    %1155 = tpu.concatenate %1008, %1026, %1046, %1064, %1084, %1102, %1122, %1140, %1022, %1040, %1060, %1078, %1098, %1116, %1136, %1154 in 1 : vector<8x1xf32>, vector<8x1xf32>, vector<8x1xf32>, vector<8x1xf32>, vector<8x1xf32>, vector<8x1xf32>, vector<8x1xf32>, vector<8x1xf32>, vector<8x1xf32>, vector<8x1xf32>, vector<8x1xf32>, vector<8x1xf32>, vector<8x1xf32>, vector<8x1xf32>, vector<8x1xf32>, vector<8x1xf32> -> vector<8x16xf32>
    %1156 = tpu.concatenate %802, %987, %1155 in 1 : vector<8x16xf32>, vector<8x16xf32>, vector<8x16xf32> -> vector<8x48xf32>
    %c0_450 = arith.constant 0 : index
    %c0_451 = arith.constant 0 : index
    %1157 = vector.load %arg5[%c0_450, %c0_451] : memref<48x1024xf32, #tpu.memory_space<vmem>>, vector<48x1024xf32>
    %cst_452 = arith.constant dense<0.000000e+00> : vector<8x1024xf32>
    %1158 = tpu.matmul %1156, %1157, %cst_452 {dimension_numbers = #tpu.dot_dimension_numbers<[1], [0], [0], [1], [0, 0, 1, 1], [], []>} : vector<8x48xf32>, vector<48x1024xf32>, vector<8x1024xf32> -> vector<8x1024xf32>
    %1159 = vector.extract_strided_slice %1158 {offsets = [0, 0], sizes = [1, 128], strides = [1, 1]} : vector<8x1024xf32> to vector<1x128xf32>
    %1160 = vector.extract_strided_slice %1158 {offsets = [1, 128], sizes = [1, 128], strides = [1, 1]} : vector<8x1024xf32> to vector<1x128xf32>
    %1161 = arith.addf %1159, %1160 : vector<1x128xf32>
    %1162 = vector.extract_strided_slice %1158 {offsets = [2, 256], sizes = [1, 128], strides = [1, 1]} : vector<8x1024xf32> to vector<1x128xf32>
    %1163 = arith.addf %1161, %1162 : vector<1x128xf32>
    %1164 = vector.extract_strided_slice %1158 {offsets = [3, 384], sizes = [1, 128], strides = [1, 1]} : vector<8x1024xf32> to vector<1x128xf32>
    %1165 = arith.addf %1163, %1164 : vector<1x128xf32>
    %1166 = vector.extract_strided_slice %1158 {offsets = [4, 512], sizes = [1, 128], strides = [1, 1]} : vector<8x1024xf32> to vector<1x128xf32>
    %1167 = arith.addf %1165, %1166 : vector<1x128xf32>
    %1168 = vector.extract_strided_slice %1158 {offsets = [5, 640], sizes = [1, 128], strides = [1, 1]} : vector<8x1024xf32> to vector<1x128xf32>
    %1169 = arith.addf %1167, %1168 : vector<1x128xf32>
    %1170 = vector.extract_strided_slice %1158 {offsets = [6, 768], sizes = [1, 128], strides = [1, 1]} : vector<8x1024xf32> to vector<1x128xf32>
    %1171 = arith.addf %1169, %1170 : vector<1x128xf32>
    %1172 = vector.extract_strided_slice %1158 {offsets = [7, 896], sizes = [1, 128], strides = [1, 1]} : vector<8x1024xf32> to vector<1x128xf32>
    %1173 = arith.addf %1171, %1172 : vector<1x128xf32>
    %c0_453 = arith.constant 0 : index
    %c0_454 = arith.constant 0 : index
    %1174 = vector.load %arg6[%c0_453, %c0_454] : memref<1x128xf32, #tpu.memory_space<vmem>>, vector<1x128xf32>
    %1175 = arith.addf %1173, %1174 : vector<1x128xf32>
    %cst_455 = arith.constant 0.000000e+00 : f32
    %1176 = vector.broadcast %cst_455 : f32 to vector<1x128xf32>
    %1177 = arith.maximumf %1175, %1176 : vector<1x128xf32>
    %c0_456 = arith.constant 0 : index
    %c0_457 = arith.constant 0 : index
    %1178 = vector.load %arg7[%c0_456, %c0_457] : memref<128x128xf32, #tpu.memory_space<vmem>>, vector<128x128xf32>
    %cst_458 = arith.constant dense<0.000000e+00> : vector<1x128xf32>
    %1179 = tpu.matmul %1177, %1178, %cst_458 {dimension_numbers = #tpu.dot_dimension_numbers<[1], [0], [0], [1], [0, 0, 1, 1], [], []>} : vector<1x128xf32>, vector<128x128xf32>, vector<1x128xf32> -> vector<1x128xf32>
    %c0_459 = arith.constant 0 : index
    %c0_460 = arith.constant 0 : index
    %1180 = vector.load %arg8[%c0_459, %c0_460] : memref<1x128xf32, #tpu.memory_space<vmem>>, vector<1x128xf32>
    %1181 = arith.addf %1179, %1180 : vector<1x128xf32>
    %cst_461 = arith.constant 0.000000e+00 : f32
    %1182 = vector.broadcast %cst_461 : f32 to vector<1x128xf32>
    %1183 = arith.maximumf %1181, %1182 : vector<1x128xf32>
    %c0_462 = arith.constant 0 : index
    %c0_463 = arith.constant 0 : index
    %1184 = vector.load %arg9[%c0_462, %c0_463] : memref<1x128xf32, #tpu.memory_space<vmem>>, vector<1x128xf32>
    %1185 = arith.mulf %1183, %1184 : vector<1x128xf32>
    %cst_464 = arith.constant dense<0.000000e+00> : vector<1xf32>
    %1186 = vector.multi_reduction <add>, %1185, %cst_464 [1] : vector<1x128xf32> to vector<1xf32>
    %1187 = vector.shape_cast %1186 : vector<1xf32> to vector<1x1xf32>
    %c1_465 = arith.constant 1 : index
    %c0_466 = arith.constant 0 : index
    %1188 = vector.load %arg10[%c1_465, %c0_466] : memref<2x1xf32, #tpu.memory_space<vmem>>, vector<1x1xf32>
    tpu.vector_store %arg10[%c1_465, %c0_466], %1187 {strides = array<i32>} : memref<2x1xf32, #tpu.memory_space<vmem>>, vector<1x1xf32>,
    return
  }
  func.func @transform_0(%arg0: i32) -> (i32, i32, i32) {
    %c0_i32 = arith.constant 0 : i32
    %c0_i32_0 = arith.constant 0 : i32
    %c0_i32_1 = arith.constant 0 : i32
    return %arg0, %c0_i32, %c0_i32_0 : i32, i32, i32
  }
  func.func @transform_1(%arg0: i32) -> (i32, i32, i32) {
    %c0_i32 = arith.constant 0 : i32
    %c0_i32_0 = arith.constant 0 : i32
    %c0_i32_1 = arith.constant 0 : i32
    return %arg0, %c0_i32, %c0_i32_0 : i32, i32, i32
  }
  func.func @transform_2(%arg0: i32) -> (i32, i32, i32) {
    %c0_i32 = arith.constant 0 : i32
    %c0_i32_0 = arith.constant 0 : i32
    %c0_i32_1 = arith.constant 0 : i32
    %c0_i32_2 = arith.constant 0 : i32
    return %c0_i32, %c0_i32_0, %c0_i32_1 : i32, i32, i32
  }
  func.func @transform_3(%arg0: i32) -> (i32, i32) {
    %c0_i32 = arith.constant 0 : i32
    %c0_i32_0 = arith.constant 0 : i32
    %c0_i32_1 = arith.constant 0 : i32
    return %c0_i32, %c0_i32_0 : i32, i32
  }
  func.func @transform_4(%arg0: i32) -> (i32, i32) {
    %c0_i32 = arith.constant 0 : i32
    %c0_i32_0 = arith.constant 0 : i32
    %c0_i32_1 = arith.constant 0 : i32
    return %c0_i32, %c0_i32_0 : i32, i32
  }
  func.func @transform_5(%arg0: i32) -> (i32, i32) {
    %c0_i32 = arith.constant 0 : i32
    %c0_i32_0 = arith.constant 0 : i32
    %c0_i32_1 = arith.constant 0 : i32
    return %c0_i32, %c0_i32_0 : i32, i32
  }
  func.func @transform_6(%arg0: i32) -> (i32, i32) {
    %c0_i32 = arith.constant 0 : i32
    %c0_i32_0 = arith.constant 0 : i32
    %c0_i32_1 = arith.constant 0 : i32
    return %c0_i32, %c0_i32_0 : i32, i32
  }
  func.func @transform_7(%arg0: i32) -> (i32, i32) {
    %c0_i32 = arith.constant 0 : i32
    %c0_i32_0 = arith.constant 0 : i32
    %c0_i32_1 = arith.constant 0 : i32
    return %c0_i32, %c0_i32_0 : i32, i32
  }
  func.func @transform_8(%arg0: i32) -> (i32, i32) {
    %c0_i32 = arith.constant 0 : i32
    %c0_i32_0 = arith.constant 0 : i32
    %c0_i32_1 = arith.constant 0 : i32
    return %c0_i32, %c0_i32_0 : i32, i32
  }
  func.func @transform_9(%arg0: i32) -> (i32, i32) {
    %c0_i32 = arith.constant 0 : i32
    %c0_i32_0 = arith.constant 0 : i32
    return %arg0, %c0_i32 : i32, i32
  }
}

</mosaic_0001>

<bundles_post_ra>
// kernel: tpu_custom_call.1
= control target key start
LH: loop header
LB: loop body
LE: loop exit
PB: predicated region body
PF: predicated region fallthrough
CT: control target
= control target key end

     0   :  { %14 = vsyncpa [#allocation4], 0  ;;  %s7392_s0 = inlined_call_operand.hbm [shape: f32[2,8,32], index: 0, kind: input, shape index: {}]   ;;  %s7393_s1 = inlined_call_operand.hbm [shape: f32[2,32,32], index: 1, kind: input, shape index: {}]   ;;  %s7394_s2 = inlined_call_operand.hbm [shape: f32[3,32,512], index: 2, kind: input, shape index: {}]   ;;  %s7395_s3 = inlined_call_operand.vmem [shape: f32[1,512], index: 3, kind: input, shape index: {}]   ;;  %s7396_s4 = inlined_call_operand.hbm [shape: f32[48,1024], index: 4, kind: input, shape index: {}]   ;;  %s7397_s5 = inlined_call_operand.vmem [shape: f32[1,128], index: 5, kind: input, shape index: {}]   ;;  %s7398_s6 = inlined_call_operand.hbm [shape: f32[128,128], index: 6, kind: input, shape index: {}]   ;;  %s7399_s7 = inlined_call_operand.vmem [shape: f32[1,128], index: 7, kind: input, shape index: {}]   ;;  %s7400_s8 = inlined_call_operand.vmem [shape: f32[1,128], index: 8, kind: input, shape index: {}]   ;;  %s7401_s9 = inlined_call_operand.vmem [shape: f32[2,1], index: 9, kind: output, shape index: {}]  }
   0x1   :  { %15 = vsyncpa [#allocation6], 0 }
   0x2   :  { %16 = vsyncpa [#allocation9], 0  ;;  %s5212_s30 = smov [#allocation5]   ;;  %s5213_s11 = smov [#allocation8]  }
   0x3   :  { %s34_s10 = sshll.u32 %s5212_s30, 4  ;;  %s60_s12 = sshll.u32 %s5213_s11, 4  ;;  %s35_s10 = int_to_ptr.vmem [resolvable:$true] %s34_s10  ;;  %s61_s12 = int_to_ptr.vmem [resolvable:$true] %s60_s12 }
   0x4   :  { %s5114_s13 = scalar_lea.vmem %s35_s10, 1024  ;;  %p5119_p1 = scmp.lt.s32.totalorder %s35_s10, %s35_s10 }
   0x5   :  { %p5115_p0 = scmp.ne.s32.totalorder %s35_s10, %s5114_s13  ;;  %p5120_p2 = scmp.lt.s32.totalorder %s5114_s13, %s5114_s13 }
   0x7   :  { %p5121_p3 = por %p5120_p2, %p5119_p1 }
   0x9   :  { %p5122_p4 = pnand %p5121_p3, %p5115_p0 }
   0xb   :  { %5125 = shalt.err (!%p5122_p4)
}
   0xc   :  { %s5214_s14 = smov 128   ;;  %s5215_s15 = smov 8  }
   0xd   :  { %40 = dma.hbm_to_vmem [thread:$0]  %s7393_s1, 1024, %s35_s10, [#allocation6], %s5214_s14, %s5214_s14, %s5215_s15  }
   0xe   :  { %s5134_s18 = scalar_lea.vmem %s61_s12, 6144  ;;  %p5139_p6 = scmp.lt.s32.totalorder %s61_s12, %s61_s12 }
   0xf   :  { %p5135_p5 = scmp.ne.s32.totalorder %s61_s12, %s5134_s18  ;;  %p5140_p7 = scmp.lt.s32.totalorder %s5134_s18, %s5134_s18 }
  0x11   :  { %p5141_p8 = por %p5140_p7, %p5139_p6 }
  0x13   :  { %p5142_p9 = pnand %p5141_p8, %p5135_p5 }
  0x15   :  { %5145 = shalt.err (!%p5142_p9)
}
  0x16   :  { %s5216_s19 = smov 1024   ;;  %s5217_s20 = smov 64  }
  0x17   :  { %66 = dma.hbm_to_vmem [thread:$0]  %s7396_s4, 6144, %s61_s12, [#allocation9], %s5216_s19, %s5216_s19, %s5217_s20  }
  0x18   :  { %s5218_s23 = smov [#allocation3]   ;;  %s5219_s25 = smov [#allocation7]  }
  0x19   :  { %s22_s24 = sshll.u32 %s5218_s23, 4  ;;  %s46_s26 = sshll.u32 %s5219_s25, 4  ;;  %s23_s24 = int_to_ptr.vmem [resolvable:$true] %s22_s24  ;;  %s47_s26 = int_to_ptr.vmem [resolvable:$true] %s46_s26 }
  0x1a   :  { %s5154_s1 = scalar_lea.vmem %s23_s24, 256  ;;  %p5159_p11 = scmp.lt.s32.totalorder %s23_s24, %s23_s24 }
  0x1b   :  { %p5155_p10 = scmp.ne.s32.totalorder %s23_s24, %s5154_s1  ;;  %p5160_p12 = scmp.lt.s32.totalorder %s5154_s1, %s5154_s1 }
  0x1d   :  { %p5161_p13 = por %p5160_p12, %p5159_p11 }
  0x1f   :  { %p5162_p0 = pnand %p5161_p13, %p5155_p10 }
  0x21   :  { %5165 = shalt.err (!%p5162_p0)
}
  0x22   :  { %28 = dma.hbm_to_vmem [thread:$0]  %s7392_s0, 256, %s23_s24, [#allocation4], %s5214_s14, %s5214_s14, %s5215_s15  }
  0x23   :  { %s5174_s4 = scalar_lea.vmem %s47_s26, 6144  ;;  %p5179_p2 = scmp.lt.s32.totalorder %s47_s26, %s47_s26 }
  0x24   :  { %p5175_p1 = scmp.ne.s32.totalorder %s47_s26, %s5174_s4  ;;  %p5180_p3 = scmp.lt.s32.totalorder %s5174_s4, %s5174_s4 }
  0x26   :  { %p5181_p4 = por %p5180_p3, %p5179_p2 }
  0x28   :  { %p5182_p5 = pnand %p5181_p4, %p5175_p1 }
  0x2a   :  { %5185 = shalt.err (!%p5182_p5)
}
  0x2b   :  { %s5220_s29 = smov 512   ;;  %s5221_s30 = smov 32  }
  0x2c   :  { %52 = dma.hbm_to_vmem [thread:$0]  %s7394_s2, 6144, %s47_s26, [#allocation6], %s5220_s29, %s5220_s29, %s5221_s30  }
  0x2d   :  { %s5222_s12 = smov [#allocation10]  }
  0x2e   :  { %s74_s13 = sshll.u32 %s5222_s12, 4  ;;  %s75_s13 = int_to_ptr.vmem [resolvable:$true] %s74_s13 }
  0x2f   :  { %s5194_s16 = scalar_lea.vmem %s75_s13, 2048  ;;  %p5199_p7 = scmp.lt.s32.totalorder %s75_s13, %s75_s13 }
  0x30   :  { %p5195_p6 = scmp.ne.s32.totalorder %s75_s13, %s5194_s16  ;;  %p5200_p8 = scmp.lt.s32.totalorder %s5194_s16, %s5194_s16 }
  0x32   :  { %p5201_p9 = por %p5200_p8, %p5199_p7 }
  0x34   :  { %p5202_p10 = pnand %p5201_p9, %p5195_p6 }
  0x36   :  { %5205 = shalt.err (!%p5202_p10)
}
  0x37   :  { %80 = dma.hbm_to_vmem [thread:$0]  %s7398_s6, 2048, %s75_s13, [#allocation9], %s5214_s14, %s5214_s14, %s5215_s15  }
  0x38   :  { %5206 = dma.done.wait [#allocation4], 256  }
  0x39   :  { %5207 = vsyncadd [#allocation4], 4294967040 }
  0x3a   :  { %5208 = dma.done.wait [#allocation6], 7168  }
  0x3b   :  { %5209 = vsyncadd [#allocation6], 4294960128 }
  0x3c   :  { %5210 = dma.done.wait [#allocation9], 8192  }
  0x3d   :  { %5211 = vsyncadd [#allocation9], 4294959104  ;;  %v5303_v0 = vld [vmem:[#allocation5 + $0x18] sm:$0xff]  ;;  %vm139_vm0 = vcmask 261120   ;;  %v5305_v1 = vld [vmem:[#allocation5 + $0x8] sm:$0xff]  ;;  %v7405_v15 = vmov 0.0   ;;  %v100_v51 = vlaneseq }
  0x3e   :  { %v5307_v2 = vld [vmem:[#allocation5 + $0x10] sm:$0xff]  ;;  %v156_v3 = vmul.f32 %v5303_v0, %v5303_v0  ;;  %v154_v4 = vmul.f32 %v5305_v1, %v5305_v1  ;;  %v5315_v6 = vld [vmem:[#allocation5] sm:$0xff]  ;;  %4849 = vmatprep.subr.mxu1 %v7405_v15  ;;  %4885 = vmatprep.subr.mxu0 %v7405_v15  ;;  %vm7416_vm1 = vmmov 0   ;;  %s5225_s14 = smov 96   ;;  %s5226_s15 = smov 16  }
  0x3f   :  { %v155_v5 = vmul.f32 %v5307_v2, %v5307_v2  ;;  %v153_v7 = vmul.f32 %v5315_v6, %v5315_v6  ;;  %v5319_v8 = vld [vmem:[#allocation3] sm:$0xff]  ;;  %4857 = vmatprep.mubr.msk.f32.mxu1 %vm7416_vm1, %v7405_v15  ;;  %4887 = vmatprep.mubr.msk.f32.mxu0 %vm7416_vm1, %v7405_v15  ;;  %v5335_v54 = vshrl.u32 %v100_v51, 7  ;;  %v5340_v58 = vand.u32 127, %v100_v51 }
  0x40   :  { %v166_v9 = vsel %vm139_vm0, %v156_v3, 0.0  ;;  %v160_v10 = vsel %vm139_vm0, %v154_v4, 0.0  ;;  %v138_v13 = vmul.f32 %v5319_v8, %v5319_v8 }
  0x41   :  { %167 = vadd.xlane.f32.xlu0 %v166_v9  ;;  %161 = vadd.xlane.f32.xlu1 %v160_v10  ;;  %v163_v11 = vsel %vm139_vm0, %v155_v5, 0.0  ;;  %v157_v12 = vsel %vm139_vm0, %v153_v7, 0.0  ;;  %7450 = vst [vmem:[#allocation14_spill] sm:$0xff] %v5335_v54  ;;  %v111_v59 = vadd.s32 6, %v5335_v54  ;;  %v104_v61 = vadd.s32 8, %v5335_v54 }
  0x42   :  { %v140_v14 = vsel %vm139_vm0, %v138_v13, 0.0  ;;  %vm107_vm12 = vcmp.ge.s32.totalorder %v5340_v58, %v5335_v54  ;;  %v105_v63 = vadd.s32 16, %v5335_v54  ;;  %v106_v7 = vadd.s32 24, %v5335_v54 }
  0x43   :  { %vm115_vm13 = vcmp.lt.s32.totalorder %v5340_v58, %v111_v59  ;;  %v112_v5 = vadd.s32 6, %v104_v61  ;;  %vm108_vm15 = vcmp.ge.s32.totalorder %v5340_v58, %v104_v61 }
  0x44   :  { %vm119_vm14 = vmand %vm107_vm12, %vm115_vm13  ;;  %v113_v9 = vadd.s32 6, %v105_v63 }
  0x45   :  { %164 = vadd.xlane.f32.xlu0 %v163_v11  ;;  %158 = vadd.xlane.f32.xlu1 %v157_v12  ;;  %v5359_v11 = vsel %vm119_vm14, 0.16666667, %v7405_v15  ;;  %v114_v12 = vadd.s32 6, %v106_v7 }
  0x46   :  { %7451 = vst [vmem:[#allocation15_spill] sm:$0xff] %v5359_v11 }
  0x49   :  { %141 = vadd.xlane.f32.xlu0 %v140_v14  ;;  %v127_v14 = vadd.s32 1, %v5335_v54 }
  0xca   :  { %v168_v16 = vpop.xlane.xlu0 %167  ;;  %v162_v17 = vpop.xlane.xlu1 %161 }
  0xcb   :  { %5026 = vrsqrt.f32 %v168_v16  ;;  %vm192_vm2 = vcmp.eq.f32.partialorder %v168_v16, inf  ;;  %v195_v24 = vand.u32 2147483648, %v168_v16  ;;  %vm194_vm3 = vcmp.eq.f32.partialorder %v168_v16, 0.0 }
  0xcc   :  { %5028 = vrsqrt.f32 %v162_v17  ;;  %vm178_vm4 = vcmp.eq.f32.partialorder %v162_v17, inf  ;;  %v181_v30 = vand.u32 2147483648, %v162_v17  ;;  %vm180_vm5 = vcmp.eq.f32.partialorder %v162_v17, 0.0 }
  0xce   :  { %v165_v18 = vpop.xlane.xlu0 %164  ;;  %v159_v19 = vpop.xlane.xlu1 %158 }
  0xcf   :  { %5030 = vrsqrt.f32 %v165_v18  ;;  %vm185_vm6 = vcmp.eq.f32.partialorder %v165_v18, inf  ;;  %v188_v35 = vand.u32 2147483648, %v165_v18  ;;  %vm187_vm7 = vcmp.eq.f32.partialorder %v165_v18, 0.0 }
  0xd0   :  { %5032 = vrsqrt.f32 %v159_v19  ;;  %vm171_vm8 = vcmp.eq.f32.partialorder %v159_v19, inf  ;;  %v174_v41 = vand.u32 2147483648, %v159_v19  ;;  %vm173_vm9 = vcmp.eq.f32.partialorder %v159_v19, 0.0 }
  0xd2   :  { %v142_v20 = vpop.xlane.xlu0 %141 }
  0xd3   :  { %5034 = vrsqrt.f32 %v142_v20  ;;  %vm145_vm10 = vcmp.eq.f32.partialorder %v142_v20, inf  ;;  %v148_v47 = vand.u32 2147483648, %v142_v20  ;;  %vm147_vm11 = vcmp.eq.f32.partialorder %v142_v20, 0.0 }
  0xd8   :  { %v5027_v21 = vpop.eup %5026 }
  0xd9   :  { %v5029_v22 = vpop.eup %5028  ;;  %v191_v23 = vmul.f32 %v5027_v21, %v168_v16 }
  0xda   :  { %v177_v25 = vmul.f32 %v5029_v22, %v162_v17 }
  0xdb   :  { %v193_v26 = vsel %vm192_vm2, %v168_v16, %v191_v23  ;;  %vm116_vm2 = vcmp.lt.s32.totalorder %v5340_v58, %v112_v5 }
  0xdc   :  { %v5031_v27 = vpop.eup %5030  ;;  %v196_v28 = vsel %vm194_vm3, %v195_v24, %v193_v26  ;;  %v179_v29 = vsel %vm178_vm4, %v162_v17, %v177_v25  ;;  %vm109_vm3 = vcmp.ge.s32.totalorder %v5340_v58, %v105_v63  ;;  %vm117_vm4 = vcmp.lt.s32.totalorder %v5340_v58, %v113_v9 }
  0xdd   :  { %v5033_v31 = vpop.eup %5032  ;;  %v200_v32 = vadd.f32 1e-13, %v196_v28  ;;  %v184_v33 = vmul.f32 %v5031_v27, %v165_v18  ;;  %v182_v34 = vsel %vm180_vm5, %v181_v30, %v179_v29  ;;  %vm120_vm5 = vmand %vm108_vm15, %vm116_vm2 }
  0xde   :  { %v170_v36 = vmul.f32 %v5033_v31, %v159_v19  ;;  %v198_v42 = vadd.f32 1e-13, %v182_v34  ;;  %v5376_v13 = vsel %vm120_vm5, 0.16666667, %v7405_v15 }
  0xdf   :  { %v186_v37 = vsel %vm185_vm6, %v165_v18, %v184_v33  ;;  %5036 = vrcp.f32 %v200_v32  ;;  %vm121_vm6 = vmand %vm109_vm3, %vm117_vm4  ;;  %7452 = vst [vmem:[#allocation16_spill] sm:$0xff] %v5376_v13 }
  0xe0   :  { %v5035_v38 = vpop.eup %5034  ;;  %v189_v39 = vsel %vm187_vm7, %v188_v35, %v186_v37  ;;  %v172_v40 = vsel %vm171_vm8, %v159_v19, %v170_v36  ;;  %vm110_vm7 = vcmp.ge.s32.totalorder %v5340_v58, %v106_v7  ;;  %vm118_vm8 = vcmp.lt.s32.totalorder %v5340_v58, %v114_v12 }
  0xe1   :  { %v199_v43 = vadd.f32 1e-13, %v189_v39  ;;  %v144_v44 = vmul.f32 %v5035_v38, %v142_v20  ;;  %v175_v45 = vsel %vm173_vm9, %v174_v41, %v172_v40  ;;  %vm122_vm9 = vmand %vm110_vm7, %vm118_vm8  ;;  %v904_v38 = vld [vmem:[#allocation7 + $0xe8] sm:$0xff]  ;;  %v903_v39 = vld [vmem:[#allocation7 + $0xe0] sm:$0xff] }
  0xe2   :  { %v197_v48 = vadd.f32 1e-13, %v175_v45  ;;  %v900_v40 = vld [vmem:[#allocation7 + $0xc8] sm:$0xff]  ;;  %v899_v41 = vld [vmem:[#allocation7 + $0xc0] sm:$0xff] }
  0xe3   :  { %5038 = vrcp.f32 %v199_v43  ;;  %v146_v46 = vsel %vm145_vm10, %v142_v20, %v144_v44  ;;  %vm128_vm10 = vcmp.eq.s32.totalorder %v5340_v58, %v127_v14  ;;  %v895_v43 = vld [vmem:[#allocation7 + $0xa0] sm:$0xff]  ;;  %v892_v44 = vld [vmem:[#allocation7 + $0x88] sm:$0xff] }
  0xe4   :  { %5040 = vrcp.f32 %v198_v42  ;;  %v149_v49 = vsel %vm147_vm11, %v148_v47, %v146_v46  ;;  %v5400_v18 = vsel %vm128_vm10, 1.0, %v7405_v15  ;;  %vm7418_vm11 = vcmask 64512   ;;  %v896_v42 = vld [vmem:[#allocation7 + $0xa8] sm:$0xff]  ;;  %v891_v45 = vld [vmem:[#allocation7 + $0x80] sm:$0xff] }
  0xe5   :  { %v150_v50 = vadd.f32 1e-13, %v149_v49  ;;  %5042 = vrcp.f32 %v197_v48  ;;  %7455 = vst [vmem:[#allocation19_spill] sm:$0xff] %v5400_v18  ;;  %v814_v46 = vld [vmem:[#allocation7 + $0x68] sm:$0xff]  ;;  %vm7414_vm10 = vcmp.lt.s32.totalorder %v5340_v58, 16 }
  0xe7   :  { %5044 = vrcp.f32 %v150_v50 }
  0xec   :  { %v5037_v52 = vpop.eup %5036 }
  0xed   :  { %v208_v53 = vmul.f32 %v5037_v52, %v5303_v0 }
  0xef   :  { %4850 = vmatpush3.xpose.msk.msra.mxu1 %vm139_vm0, %v208_v53 }
  0xf0   :  { %v5039_v55 = vpop.eup %5038  ;;  %4851 = vmatprep.subr.mxu1 %v7405_v15 }
  0xf1   :  { %v206_v56 = vmul.f32 %v5039_v55, %v5307_v2  ;;  %v5041_v57 = vpop.eup %5040 }
  0xf2   :  { %v204_v60 = vmul.f32 %v5041_v57, %v5305_v1  ;;  %v5043_v62 = vpop.eup %5042 }
  0xf3   :  { %4852 = vmatpush3.xpose.msk.msra.mxu1 %vm139_vm0, %v206_v56  ;;  %v202_v4 = vmul.f32 %v5043_v62, %v5315_v6 }
  0xf4   :  { %4853 = vmatprep.subr.mxu1 %v7405_v15  ;;  %v5045_v3 = vpop.eup %5044 }
  0xf5   :  { %v152_v10 = vmul.f32 %v5045_v3, %v5319_v8 }
  0xf7   :  { %4854 = vmatpush3.xpose.msk.msra.mxu1 %vm139_vm0, %v204_v60 }
  0xf8   :  { %4855 = vmatprep.subr.mxu1 %v7405_v15 }
  0xfb   :  { %4856 = vmatpush3.xpose.msk.msra.mxu1 %vm139_vm0, %v202_v4 }
  0xfc   :  { %4860 = vmatprep.subr.mxu1 %v5303_v0 }
  0xfe   :  { %4858 = vmatmul.mubr.msk.f32.vlgmr.msra.gmra.mxu1 %vm139_vm0, %v152_v10 }
  0xff   :  { %4861 = vmatpush3.msra.mxu1 %v5303_v0  ;;  %4868 = vmatprep.mubr.msk.f32.mxu1 %vm139_vm0, %v5359_v11  ;;  %v5380_v0 = vsel %vm121_vm6, 0.16666667, %v7405_v15 }
 0x100   :  { %4862 = vmatprep.subr.mxu1 %v5307_v2  ;;  %7453 = vst [vmem:[#allocation17_spill] sm:$0xff] %v5380_v0 }
 0x101   :  { %4863 = vmatpush3.msra.mxu1 %v5307_v2  ;;  %v294_v2 = vsel %vm139_vm0, %v5319_v8, 0.0 }
 0x102   :  { %4864 = vmatprep.subr.mxu1 %v5305_v1 }
 0x103   :  { %4865 = vmatpush3.msra.mxu1 %v5305_v1  ;;  %v5389_v1 = vsel %vm122_vm9, 0.16666667, %v7405_v15  ;;  %vm7415_vm9 = vcmp.lt.s32.totalorder %v5340_v58, 8 }
 0x104   :  { %4866 = vmatprep.subr.mxu1 %v5315_v6  ;;  %7454 = vst [vmem:[#allocation18_spill] sm:$0xff] %v5389_v1 }
 0x105   :  { %4867 = vmatpush3.msra.mxu1 %v5315_v6  ;;  %v295_v6 = vrot.slane %v294_v2, 4 }
 0x106   :  { %4869 = vmatmul.mubr.msk.f32.vlgmr.msra.gmra.mxu1 %vm139_vm0, %v5376_v13  ;;  %4874 = vmatprep.subr.mxu1 %v7405_v15 }
 0x107   :  { %4871 = vmatprep.mubr.msk.f32.mxu1 %vm139_vm0, %v5380_v0  ;;  %v296_v16 = vadd.f32 %v295_v6, %v294_v2 }
 0x109   :  { %v297_v17 = vrot.slane %v296_v16, 2 }
 0x10a   :  { %4872 = vmatmul.mubr.msk.f32.gmra.mxu1 %vm139_vm0, %v5389_v1 }
 0x10b   :  { %4882 = vmatprep.mubr.msk.f32.mxu1 %vm7416_vm1, %v7405_v15  ;;  %v298_v20 = vadd.f32 %v297_v17, %v296_v16 }
 0x10d   :  { %v299_v8 = vrot.slane %v298_v20, 1 }
 0x10f   :  { %v300_v23 = vadd.f32 %v299_v8, %v298_v20 }
 0x111   :  { %v5418_v28 = vmul.f32 0.125, %v300_v23 }
 0x113   :  { %v303_v35 = vmul.f32 %v5418_v28, %v5418_v28 }
 0x115   :  { %v304_v37 = vsel %vm139_vm0, %v303_v35, 0.0 }
 0x1be   :  { %v5402_v19 = vpop.f32.mrf.mxu1 }
 0x1bf   :  { %4886 = vmatpush3.msra.mxu0 %v5402_v19 }
 0x1c0   :  { %v4859_v21 = vpop.f32.mrf.mxu1  ;;  %4888 = vmatmul.mubr.msk.f32.vlgmr.msra.gmra.mxu0 %vm7418_vm11, %v5400_v18  ;;  %934 = vmatprep.subr.mxu0 %v904_v38 }
 0x1c1   :  { %974 = vmatprep.mubr.f32.mxu0 %v7405_v15  ;;  %935 = vmatpush1.msra.mxu0 %v903_v39  ;;  %v810_v39 = vld [vmem:[#allocation7 + $0x48] sm:$0xff] }
 0x1c2   :  { %936 = vmatprep.subr.mxu0 %v900_v40  ;;  %v809_v40 = vld [vmem:[#allocation7 + $0x40] sm:$0xff] }
 0x1c3   :  { %937 = vmatpush1.msra.mxu0 %v899_v41 }
 0x1c4   :  { %938 = vmatprep.subr.mxu0 %v896_v42  ;;  %v806_v42 = vld [vmem:[#allocation7 + $0x28] sm:$0xff] }
 0x1c5   :  { %939 = vmatpush1.msra.mxu0 %v895_v43 }
 0x1c6   :  { %v5408_v22 = vpop.f32.mrf.mxu1  ;;  %940 = vmatprep.subr.mxu0 %v892_v44  ;;  %v130_v44 = vadd.s32 2, %v5335_v54 }
 0x1c7   :  { %v415_v26 = vmul.f32 %v5408_v22, %v5408_v22  ;;  %941 = vmatpush1.msra.mxu0 %v891_v45 }
 0x1c8   :  { %v5410_v24 = vpop.f32.mrf.mxu1  ;;  %1079 = vmatprep.subr.mxu0 %v814_v46  ;;  %v802_v46 = vld [vmem:[#allocation7 + $0x8] sm:$0xff]  ;;  %vm131_vm8 = vcmp.eq.s32.totalorder %v5340_v58, %v130_v44 }
 0x1c9   :  { %v414_v30 = vmul.f32 %v5410_v24, %v5410_v24  ;;  %v421_v34 = vsel %vm139_vm0, %v415_v26, 0.0 }
 0x1ca   :  { %v5412_v25 = vpop.f32.mrf.mxu1 }
 0x1cb   :  { %v417_v27 = vmul.f32 %v5412_v25, %v5412_v25  ;;  %v418_v36 = vsel %vm139_vm0, %v414_v30, 0.0 }
 0x1cc   :  { %v5420_v29 = vpop.f32.mrf.mxu1 }
 0x1cd   :  { %v416_v31 = vmul.f32 %v5420_v29, %v5420_v29  ;;  %v427_v32 = vsel %vm139_vm0, %v417_v27, 0.0 }
 0x1ce   :  { %428 = vadd.xlane.f32.xlu1 %v427_v32 }
 0x1cf   :  { %v424_v33 = vsel %vm139_vm0, %v416_v31, 0.0 }
 0x1d0   :  { %425 = vadd.xlane.f32.xlu0 %v424_v33 }
 0x1d2   :  { %422 = vadd.xlane.f32.xlu1 %v421_v34 }
 0x1d4   :  { %419 = vadd.xlane.f32.xlu0 %v418_v36 }
 0x1d6   :  { %305 = vadd.xlane.f32.xlu1 %v304_v37  ;;  %v813_v37 = vld [vmem:[#allocation7 + $0x60] sm:$0xff] }
 0x257   :  { %v429_v47 = vpop.xlane.xlu1 %428 }
 0x258   :  { %5046 = vrsqrt.f32 %v429_v47  ;;  %vm453_vm12 = vcmp.eq.f32.partialorder %v429_v47, inf  ;;  %v456_v53 = vand.u32 2147483648, %v429_v47  ;;  %vm455_vm13 = vcmp.eq.f32.partialorder %v429_v47, 0.0 }
 0x259   :  { %v426_v48 = vpop.xlane.xlu0 %425 }
 0x25a   :  { %5048 = vrsqrt.f32 %v426_v48  ;;  %vm446_vm14 = vcmp.eq.f32.partialorder %v426_v48, inf  ;;  %v449_v57 = vand.u32 2147483648, %v426_v48  ;;  %vm448_vm15 = vcmp.eq.f32.partialorder %v426_v48, 0.0 }
 0x25b   :  { %v423_v49 = vpop.xlane.xlu1 %422 }
 0x25c   :  { %5050 = vrsqrt.f32 %v423_v49  ;;  %vm439_vm2 = vcmp.eq.f32.partialorder %v423_v49, inf  ;;  %v442_v63 = vand.u32 2147483648, %v423_v49  ;;  %vm441_vm3 = vcmp.eq.f32.partialorder %v423_v49, 0.0 }
 0x25d   :  { %v420_v50 = vpop.xlane.xlu0 %419 }
 0x25e   :  { %5052 = vrsqrt.f32 %v420_v50  ;;  %vm432_vm4 = vcmp.eq.f32.partialorder %v420_v50, inf  ;;  %vm434_vm5 = vcmp.eq.f32.partialorder %v420_v50, 0.0  ;;  %v435_v10 = vand.u32 2147483648, %v420_v50 }
 0x25f   :  { %v306_v51 = vpop.xlane.xlu1 %305 }
 0x260   :  { %5054 = vrsqrt.f32 %v306_v51  ;;  %vm309_vm6 = vcmp.eq.f32.partialorder %v306_v51, inf  ;;  %vm311_vm7 = vcmp.eq.f32.partialorder %v306_v51, 0.0  ;;  %v312_v17 = vand.u32 2147483648, %v306_v51 }
 0x265   :  { %v5047_v52 = vpop.eup %5046 }
 0x266   :  { %v452_v55 = vmul.f32 %v5047_v52, %v429_v47  ;;  %v898_v52 = vld [vmem:[#allocation7 + $0xb8] sm:$0xff] }
 0x267   :  { %v5049_v56 = vpop.eup %5048 }
 0x268   :  { %v454_v59 = vsel %vm453_vm12, %v429_v47, %v452_v55  ;;  %v445_v60 = vmul.f32 %v5049_v56, %v426_v48  ;;  %v801_v47 = vld [vmem:[#allocation7] sm:$0xff]  ;;  %v894_v55 = vld [vmem:[#allocation7 + $0x98] sm:$0xff]  ;;  %v893_v56 = vld [vmem:[#allocation7 + $0x90] sm:$0xff]  ;;  %vm7413_vm12 = vcmp.lt.s32.totalorder %v5340_v58, 24 }
 0x269   :  { %v5051_v61 = vpop.eup %5050  ;;  %v457_v62 = vsel %vm455_vm13, %v456_v53, %v454_v59  ;;  %v897_v53 = vld [vmem:[#allocation7 + $0xb0] sm:$0xff]  ;;  %vm7412_vm13 = vcmp.lt.s32.totalorder %v5340_v58, 32 }
 0x26a   :  { %v461_v3 = vadd.f32 1e-13, %v457_v62  ;;  %v447_v4 = vsel %vm446_vm14, %v426_v48, %v445_v60  ;;  %v438_v5 = vmul.f32 %v5051_v61, %v423_v49  ;;  %v906_v48 = vld [vmem:[#allocation7 + $0xf8] sm:$0xff]  ;;  %v815_v59 = vld [vmem:[#allocation7 + $0x70] sm:$0xff] }
 0x26b   :  { %v5053_v7 = vpop.eup %5052  ;;  %v450_v9 = vsel %vm448_vm15, %v449_v57, %v447_v4  ;;  %v816_v57 = vld [vmem:[#allocation7 + $0x78] sm:$0xff]  ;;  %v811_v61 = vld [vmem:[#allocation7 + $0x50] sm:$0xff] }
 0x26c   :  { %5056 = vrcp.f32 %v461_v3  ;;  %v460_v12 = vadd.f32 1e-13, %v450_v9  ;;  %v440_v2 = vsel %vm439_vm2, %v423_v49, %v438_v5  ;;  %v431_v6 = vmul.f32 %v5053_v7, %v420_v50  ;;  %v812_v60 = vld [vmem:[#allocation7 + $0x58] sm:$0xff]  ;;  %v803_v4 = vld [vmem:[#allocation7 + $0x10] sm:$0xff]  ;;  %v1284_v5 = vld [vmem:[#allocation7 + $0x168] sm:$0xff] }
 0x26d   :  { %v5055_v14 = vpop.eup %5054  ;;  %v443_v16 = vsel %vm441_vm3, %v442_v63, %v440_v2  ;;  %v808_v62 = vld [vmem:[#allocation7 + $0x38] sm:$0xff]  ;;  %v807_v63 = vld [vmem:[#allocation7 + $0x30] sm:$0xff]  ;;  %v1283_v9 = vld [vmem:[#allocation7 + $0x160] sm:$0xff] }
 0x26e   :  { %5058 = vrcp.f32 %v460_v12  ;;  %v459_v20 = vadd.f32 1e-13, %v443_v16  ;;  %v433_v21 = vsel %vm432_vm4, %v420_v50, %v431_v6  ;;  %v308_v8 = vmul.f32 %v5055_v14, %v306_v51  ;;  %v905_v50 = vld [vmem:[#allocation7 + $0xf0] sm:$0xff]  ;;  %v804_v3 = vld [vmem:[#allocation7 + $0x18] sm:$0xff]  ;;  %v1280_v12 = vld [vmem:[#allocation7 + $0x148] sm:$0xff] }
 0x26f   :  { %v436_v23 = vsel %vm434_vm5, %v435_v10, %v433_v21  ;;  %v1286_v7 = vld [vmem:[#allocation7 + $0x178] sm:$0xff]  ;;  %v1285_v10 = vld [vmem:[#allocation7 + $0x170] sm:$0xff]  ;;  %v1279_v6 = vld [vmem:[#allocation7 + $0x140] sm:$0xff] }
 0x270   :  { %v310_v26 = vsel %vm309_vm6, %v306_v51, %v308_v8  ;;  %5060 = vrcp.f32 %v459_v20  ;;  %v458_v30 = vadd.f32 1e-13, %v436_v23  ;;  %v902_v51 = vld [vmem:[#allocation7 + $0xd8] sm:$0xff]  ;;  %v1281_v14 = vld [vmem:[#allocation7 + $0x150] sm:$0xff]  ;;  %v1276_v16 = vld [vmem:[#allocation7 + $0x128] sm:$0xff] }
 0x271   :  { %v313_v27 = vsel %vm311_vm7, %v312_v17, %v310_v26  ;;  %v1282_v2 = vld [vmem:[#allocation7 + $0x158] sm:$0xff]  ;;  %v1275_v20 = vld [vmem:[#allocation7 + $0x120] sm:$0xff]  ;;  %v1277_v21 = vld [vmem:[#allocation7 + $0x130] sm:$0xff] }
 0x272   :  { %v314_v31 = vadd.f32 1e-13, %v313_v27  ;;  %5062 = vrcp.f32 %v458_v30  ;;  %v1278_v17 = vld [vmem:[#allocation7 + $0x138] sm:$0xff]  ;;  %v1272_v8 = vld [vmem:[#allocation7 + $0x108] sm:$0xff]  ;;  %v1271_v26 = vld [vmem:[#allocation7 + $0x100] sm:$0xff] }
 0x273   :  { %v1274_v23 = vld [vmem:[#allocation7 + $0x118] sm:$0xff]  ;;  %v1273_v27 = vld [vmem:[#allocation7 + $0x110] sm:$0xff] }
 0x274   :  { %5064 = vrcp.f32 %v314_v31 }
 0x279   :  { %v5057_v32 = vpop.eup %5056 }
 0x27a   :  { %v469_v33 = vmul.f32 %v5057_v32, %v5412_v25 }
 0x27b   :  { %v5059_v34 = vpop.eup %5058 }
 0x27c   :  { %4875 = vmatpush3.xpose.msk.msra.mxu1 %vm139_vm0, %v469_v33  ;;  %v467_v35 = vmul.f32 %v5059_v34, %v5420_v29  ;;  %v805_v29 = vld [vmem:[#allocation7 + $0x20] sm:$0xff] }
 0x27d   :  { %4876 = vmatprep.subr.mxu1 %v7405_v15  ;;  %v5061_v36 = vpop.eup %5060 }
 0x27e   :  { %v465_v41 = vmul.f32 %v5061_v36, %v5408_v22 }
 0x27f   :  { %v5063_v43 = vpop.eup %5062 }
 0x280   :  { %4877 = vmatpush3.xpose.msk.msra.mxu1 %vm139_vm0, %v467_v35  ;;  %v886_v38 = vpop.f32.mrf.mxu0  ;;  %v463_v22 = vmul.f32 %v5063_v43, %v5410_v24  ;;  %v5454_v24 = vsel %vm131_vm8, 1.0, %v7405_v15  ;;  %v1436_v43 = vld [vmem:[%s7395_s3] sm:$0xf] }
 0x281   :  { %4734 = vmatmul.mubr.msk.f32.vlgmr.msra.gmra.mxu0 %vm139_vm0, %v886_v38  ;;  %4878 = vmatprep.subr.mxu1 %v7405_v15  ;;  %v5065_v45 = vpop.eup %5064  ;;  %7456 = vst [vmem:[#allocation20_spill] sm:$0xff] %v5454_v24 }
 0x282   :  { %1080 = vmatpush1.msra.mxu0 %v813_v37  ;;  %v4889_v25 = vpop.f32.mrf.mxu0  ;;  %1119 = vmatprep.mubr.f32.mxu0 %v7405_v15  ;;  %v316_v49 = vmul.f32 %v5065_v45, %v5418_v28  ;;  %v901_v28 = vld [vmem:[#allocation7 + $0xd0] sm:$0xff] }
 0x283   :  { %1081 = vmatprep.subr.mxu0 %v810_v39 }
 0x284   :  { %1082 = vmatpush1.msra.mxu0 %v809_v40  ;;  %4879 = vmatpush3.xpose.msk.msra.mxu1 %vm139_vm0, %v465_v41 }
 0x285   :  { %1083 = vmatprep.subr.mxu0 %v806_v42  ;;  %4880 = vmatprep.subr.mxu1 %v7405_v15  ;;  %v7404_v42 = vsub.s32 2, %v5335_v54 }
 0x286   :  { %1084 = vmatpush1.msra.mxu0 %v805_v29  ;;  %v5479_v29 = vsub.s32 0, %v5335_v54 }
 0x287   :  { %1085 = vmatprep.subr.mxu0 %v802_v46 }
 0x288   :  { %1086 = vmatpush1.msra.mxu0 %v801_v47  ;;  %4881 = vmatpush3.xpose.msk.msra.mxu1 %vm139_vm0, %v463_v22  ;;  %v1441_v46 = vrot.slane %v1436_v43, %v5479_v29  ;;  %v1449_v47 = vrot.slane %v1436_v43, %v7404_v42 }
 0x289   :  { %4736 = vmatmul.mubr.msk.f32.vlgmr.msra.gmra.mxu0 %vm139_vm0, %v5402_v19  ;;  %4890 = vmatprep.subr.mxu0 %v7405_v15 }
 0x28a   :  { %4891 = vmatpush3.msra.mxu0 %v5402_v19  ;;  %1005 = vmatprep.subr.mxu1 %v906_v48 }
 0x28b   :  { %4892 = vmatprep.mubr.msk.f32.mxu0 %vm7416_vm1, %v7405_v15  ;;  %4883 = vmatmul.mubr.msk.f32.vlgmr.msra.gmra.mxu1 %vm139_vm0, %v316_v49 }
 0x28c   :  { %1006 = vmatpush1.msra.mxu1 %v905_v50  ;;  %1045 = vmatprep.mubr.f32.mxu1 %v7405_v15 }
 0x28d   :  { %4893 = vmatmul.mubr.msk.f32.vlgmr.msra.gmra.mxu0 %vm7418_vm11, %v5454_v24  ;;  %1007 = vmatprep.subr.mxu1 %v902_v51 }
 0x28e   :  { %1008 = vmatpush1.msra.mxu1 %v901_v28  ;;  %1354 = vmatprep.mubr.f32.mxu0 %v7405_v15 }
 0x28f   :  { %1009 = vmatprep.subr.mxu1 %v898_v52  ;;  %1314 = vmatprep.subr.mxu0 %v1284_v5  ;;  %v7403_v52 = vsub.s32 1, %v5335_v54 }
 0x290   :  { %1010 = vmatpush1.msra.mxu1 %v897_v53  ;;  %1315 = vmatpush1.msra.mxu0 %v1283_v9 }
 0x291   :  { %1011 = vmatprep.subr.mxu1 %v894_v55  ;;  %1316 = vmatprep.subr.mxu0 %v1280_v12 }
 0x292   :  { %1012 = vmatpush1.msra.mxu1 %v893_v56  ;;  %1317 = vmatpush1.msra.mxu0 %v1279_v6  ;;  %v1445_v56 = vrot.slane %v1436_v43, %v7403_v52 }
 0x293   :  { %4735 = vmatmul.mubr.msk.f32.vlgmr.msra.gmra.mxu1 %vm139_vm0, %v886_v38  ;;  %1150 = vmatprep.subr.mxu1 %v816_v57 }
 0x294   :  { %1151 = vmatpush1.msra.mxu1 %v815_v59  ;;  %1190 = vmatprep.mubr.f32.mxu1 %v7405_v15  ;;  %v7402_v59 = vsub.s32 3, %v5335_v54 }
 0x295   :  { %1152 = vmatprep.subr.mxu1 %v812_v60  ;;  %1318 = vmatprep.subr.mxu0 %v1276_v16 }
 0x296   :  { %1153 = vmatpush1.msra.mxu1 %v811_v61  ;;  %1319 = vmatpush1.msra.mxu0 %v1275_v20 }
 0x297   :  { %1154 = vmatprep.subr.mxu1 %v808_v62  ;;  %1320 = vmatprep.subr.mxu0 %v1272_v8 }
 0x298   :  { %1155 = vmatpush1.msra.mxu1 %v807_v63  ;;  %1321 = vmatpush1.msra.mxu0 %v1271_v26  ;;  %v1453_v63 = vrot.slane %v1436_v43, %v7402_v59 }
 0x299   :  { %1156 = vmatprep.subr.mxu1 %v804_v3 }
 0x29a   :  { %1157 = vmatpush1.msra.mxu1 %v803_v4 }
 0x29b   :  { %4737 = vmatmul.mubr.msk.f32.vlgmr.msra.gmra.mxu1 %vm139_vm0, %v5402_v19  ;;  %1385 = vmatprep.subr.mxu1 %v1286_v7 }
 0x29c   :  { %1425 = vmatprep.mubr.f32.mxu1 %v7405_v15  ;;  %1386 = vmatpush1.msra.mxu1 %v1285_v10 }
 0x29d   :  { %1387 = vmatprep.subr.mxu1 %v1282_v2 }
 0x29e   :  { %1388 = vmatpush1.msra.mxu1 %v1281_v14 }
 0x29f   :  { %1389 = vmatprep.subr.mxu1 %v1278_v17 }
 0x2a0   :  { %1390 = vmatpush1.msra.mxu1 %v1277_v21 }
 0x2a1   :  { %1391 = vmatprep.subr.mxu1 %v1274_v23 }
 0x2a2   :  { %1392 = vmatpush1.msra.mxu1 %v1273_v27 }
 0x341   :  { %v976_v30 = vpop.f32.mrf.mxu0 }
 0x343   :  { %v978_v31 = vpop.f32.mrf.mxu0 }
 0x349   :  { %v1121_v32 = vpop.f32.mrf.mxu0 }
 0x34a   :  { %v1122_v33 = vadd.f32 %v1121_v32, %v976_v30 }
 0x34b   :  { %v1123_v34 = vpop.f32.mrf.mxu0  ;;  %v5468_v35 = vpop.f32.mrf.mxu1 }
 0x34c   :  { %v1124_v36 = vadd.f32 %v1123_v34, %v978_v31 }
 0x34d   :  { %v1266_v37 = vpop.f32.mrf.mxu0  ;;  %v4884_v38 = vpop.f32.mrf.mxu1 }
 0x34e   :  { %4739 = vmatmul.mubr.msk.f32.vlgmr.msra.gmra.mxu0 %vm139_vm0, %v1266_v37  ;;  %4740 = vmatmul.mubr.msk.f32.vlgmr.msra.gmra.mxu1 %vm139_vm0, %v1266_v37 }
 0x34f   :  { %v4894_v39 = vpop.f32.mrf.mxu0  ;;  %2097 = vmatprep.mubr.f32.mxu0 %v7405_v15  ;;  %2168 = vmatprep.mubr.f32.mxu1 %v7405_v15 }
 0x353   :  { %v1047_v40 = vpop.f32.mrf.mxu1 }
 0x355   :  { %v1049_v25 = vpop.f32.mrf.mxu1 }
 0x35b   :  { %v1192_v41 = vpop.f32.mrf.mxu1 }
 0x35c   :  { %v1193_v45 = vadd.f32 %v1192_v41, %v1047_v40 }
 0x35d   :  { %v1194_v44 = vpop.f32.mrf.mxu1 }
 0x35e   :  { %v1195_v61 = vadd.f32 %v1194_v44, %v1049_v25 }
 0x40e   :  { %v1356_v22 = vpop.f32.mrf.mxu0  ;;  %v1427_v48 = vpop.f32.mrf.mxu1 }
 0x40f   :  { %v1432_v49 = vadd.f32 %v1356_v22, %v1122_v33  ;;  %v1434_v50 = vadd.f32 %v1427_v48, %v1193_v45 }
 0x410   :  { %v1358_v53 = vpop.f32.mrf.mxu0  ;;  %v1429_v60 = vpop.f32.mrf.mxu1 }
 0x411   :  { %v1458_v51 = vadd.f32 %v1441_v46, %v1432_v49  ;;  %v1460_v28 = vadd.f32 %v1449_v47, %v1434_v50  ;;  %v1433_v55 = vadd.f32 %v1358_v53, %v1124_v36  ;;  %v1435_v62 = vadd.f32 %v1429_v60, %v1195_v61 }
 0x413   :  { %1468 = vrot.lane.b32.xlu0 %v1458_v51, %s5225_s14  ;;  %1720 = vrot.lane.b32.xlu1 %v1460_v28, %s5225_s14  ;;  %v1459_v57 = vadd.f32 %v1445_v56, %v1433_v55  ;;  %v1461_v3 = vadd.f32 %v1453_v63, %v1435_v62  ;;  %v5557_v56 = vsel %vm7414_vm10, %v5402_v19, -1e+30  ;;  %v5571_v62 = vsel %vm7412_vm13, %v5402_v19, -1e+30 }
 0x414   :  { %v614_v60 = vsel %vm139_vm0, %v5557_v56, -inf  ;;  %v5576_v63 = vsel %vm7413_vm12, %v5402_v19, -1e+30 }
 0x417   :  { %1476 = vrot.lane.b32.xlu0 %v1458_v51, %s5221_s30  ;;  %1472 = vrot.lane.b32.xlu1 %v1458_v51, %s5217_s20 }
 0x41b   :  { %1483 = vrot.lane.b32.xlu0 %v1459_v57, %s5225_s14  ;;  %1724 = vrot.lane.b32.xlu1 %v1460_v28, %s5217_s20 }
 0x41f   :  { %1487 = vrot.lane.b32.xlu0 %v1459_v57, %s5217_s20  ;;  %1728 = vrot.lane.b32.xlu1 %v1460_v28, %s5221_s30 }
 0x423   :  { %1491 = vrot.lane.b32.xlu0 %v1459_v57, %s5221_s30  ;;  %1735 = vrot.lane.b32.xlu1 %v1461_v3, %s5225_s14 }
 0x427   :  { %1739 = vrot.lane.b32.xlu1 %v1461_v3, %s5217_s20 }
 0x42b   :  { %1743 = vrot.lane.b32.xlu1 %v1461_v3, %s5221_s30 }
 0x485   :  { %v1721_v4 = vpop.permute.xlu1 %1720  ;;  %v1469_v5 = vpop.permute.xlu0 %1468 }
 0x486   :  { %v1471_v7 = vmax.f32 %v1458_v51, %v1469_v5  ;;  %v1723_v16 = vmax.f32 %v1460_v28, %v1721_v4  ;;  %v667_v4 = vsel %vm139_vm0, %v5576_v63, -inf }
 0x489   :  { %v1473_v9 = vpop.permute.xlu1 %1472  ;;  %v1477_v10 = vpop.permute.xlu0 %1476 }
 0x48a   :  { %v1475_v12 = vmax.f32 %v1471_v7, %v1473_v9 }
 0x48c   :  { %v1479_v2 = vmax.f32 %v1475_v12, %v1477_v10 }
 0x48d   :  { %v1725_v6 = vpop.permute.xlu1 %1724  ;;  %v1484_v14 = vpop.permute.xlu0 %1483 }
 0x48e   :  { %v1481_v17 = vmax.f32 %v1479_v2, %v1459_v57  ;;  %v1727_v20 = vmax.f32 %v1723_v16, %v1725_v6  ;;  %v5562_v57 = vsel %vm7415_vm9, %v5402_v19, -1e+30 }
 0x48f   :  { %v557_v61 = vsel %vm139_vm0, %v5562_v57, -inf }
 0x490   :  { %v1486_v21 = vmax.f32 %v1481_v17, %v1484_v14 }
 0x491   :  { %v1729_v8 = vpop.permute.xlu1 %1728  ;;  %v1488_v23 = vpop.permute.xlu0 %1487 }
 0x492   :  { %v1731_v26 = vmax.f32 %v1727_v20, %v1729_v8  ;;  %v1490_v27 = vmax.f32 %v1486_v21, %v1488_v23 }
 0x494   :  { %v1733_v32 = vmax.f32 %v1731_v26, %v1461_v3  ;;  %v720_v3 = vsel %vm139_vm0, %v5571_v62, -inf }
 0x495   :  { %v1736_v30 = vpop.permute.xlu1 %1735  ;;  %v1492_v31 = vpop.permute.xlu0 %1491 }
 0x496   :  { %v1494_v33 = vmax.f32 %v1490_v27, %v1492_v31  ;;  %v1738_v38 = vmax.f32 %v1733_v32, %v1736_v30 }
 0x498   :  { %v5505_v34 = vsel %vm7415_vm9, %v1494_v33, -1e+30  ;;  %v5512_v39 = vsel %vm7414_vm10, %v1494_v33, -1e+30  ;;  %v5535_v48 = vsel %vm7413_vm12, %v1494_v33, -1e+30 }
 0x499   :  { %v1740_v36 = vpop.permute.xlu1 %1739  ;;  %v1496_v37 = vsel %vm139_vm0, %v5505_v34, -inf  ;;  %v1548_v41 = vsel %vm139_vm0, %v5512_v39, -inf  ;;  %v1600_v50 = vsel %vm139_vm0, %v5535_v48, -inf  ;;  %v5548_v28 = vsel %vm7412_vm13, %v1494_v33, -1e+30 }
 0x49a   :  { %1497 = vmax.xlane.f32.xlu0 %v1496_v37  ;;  %v1742_v40 = vmax.f32 %v1738_v38, %v1740_v36  ;;  %v1652_v55 = vsel %vm139_vm0, %v5548_v28, -inf }
 0x49d   :  { %v1744_v25 = vpop.permute.xlu1 %1743 }
 0x49e   :  { %v1746_v43 = vmax.f32 %v1742_v40, %v1744_v25  ;;  %1549 = vmax.xlane.f32.xlu0 %v1548_v41 }
 0x4a0   :  { %v5518_v44 = vsel %vm7415_vm9, %v1746_v43, -1e+30  ;;  %v5522_v45 = vsel %vm7414_vm10, %v1746_v43, -1e+30  ;;  %v5531_v22 = vsel %vm7413_vm12, %v1746_v43, -1e+30 }
 0x4a1   :  { %v1748_v46 = vsel %vm139_vm0, %v5518_v44, -inf  ;;  %v1800_v47 = vsel %vm139_vm0, %v5522_v45, -inf  ;;  %v1852_v49 = vsel %vm139_vm0, %v5531_v22, -inf  ;;  %v5544_v51 = vsel %vm7412_vm13, %v1746_v43, -1e+30 }
 0x4a2   :  { %1749 = vmax.xlane.f32.xlu1 %v1748_v46  ;;  %1801 = vmax.xlane.f32.xlu0 %v1800_v47  ;;  %v1904_v53 = vsel %vm139_vm0, %v5544_v51, -inf }
 0x4a6   :  { %1853 = vmax.xlane.f32.xlu1 %v1852_v49  ;;  %1601 = vmax.xlane.f32.xlu0 %v1600_v50 }
 0x4aa   :  { %1905 = vmax.xlane.f32.xlu1 %v1904_v53  ;;  %1653 = vmax.xlane.f32.xlu0 %v1652_v55 }
 0x4ae   :  { %615 = vmax.xlane.f32.xlu1 %v614_v60  ;;  %558 = vmax.xlane.f32.xlu0 %v557_v61 }
 0x4b2   :  { %721 = vmax.xlane.f32.xlu1 %v720_v3  ;;  %668 = vmax.xlane.f32.xlu0 %v667_v4 }
 0x523   :  { %v5582_v5 = vpop.xlane.xlu0 %1497 }
 0x524   :  { %vm1499_vm14 = vcmp.eq.f32.partialorder %v5505_v34, %v5582_v5 }
 0x525   :  { %v1500_v7 = vsel %vm1499_vm14, %v5340_v58, 32 }
 0x526   :  { %v5588_v9 = vsel %vm139_vm0, %v1500_v7, 2147483647 }
 0x527   :  { %v5590_v19 = vpop.xlane.xlu0 %1549  ;;  %v1503_v10 = vshra.s32 %v5588_v9, 16 }
 0x528   :  { %vm1551_vm15 = vcmp.eq.f32.partialorder %v5512_v39, %v5590_v19 }
 0x529   :  { %v5595_v12 = vcvt.s32.f32 %v1503_v10  ;;  %v1552_v2 = vsel %vm1551_vm15, %v5340_v58, 32 }
 0x52a   :  { %v5599_v6 = vsel %vm139_vm0, %v1552_v2, 2147483647 }
 0x52b   :  { %v5601_v14 = vpop.xlane.xlu1 %1749  ;;  %1506 = vmin.xlane.f32.xlu0 %v5595_v12  ;;  %v5604_v16 = vpop.xlane.xlu0 %1801  ;;  %v1555_v17 = vshra.s32 %v5599_v6, 16 }
 0x52c   :  { %vm1751_vm2 = vcmp.eq.f32.partialorder %v5518_v44, %v5601_v14  ;;  %vm1803_vm3 = vcmp.eq.f32.partialorder %v5522_v45, %v5604_v16 }
 0x52d   :  { %v5611_v20 = vcvt.s32.f32 %v1555_v17  ;;  %v1752_v21 = vsel %vm1751_vm2, %v5340_v58, 32  ;;  %v1804_v8 = vsel %vm1803_vm3, %v5340_v58, 32 }
 0x52e   :  { %v5616_v23 = vsel %vm139_vm0, %v1752_v21, 2147483647  ;;  %v5619_v26 = vsel %vm139_vm0, %v1804_v8, 2147483647 }
 0x52f   :  { %v5621_v27 = vpop.xlane.xlu1 %1853  ;;  %1558 = vmin.xlane.f32.xlu0 %v5611_v20  ;;  %v5624_v30 = vpop.xlane.xlu0 %1601  ;;  %v1755_v31 = vshra.s32 %v5616_v23, 16  ;;  %v1807_v32 = vshra.s32 %v5619_v26, 16 }
 0x530   :  { %vm1855_vm4 = vcmp.eq.f32.partialorder %v5531_v22, %v5621_v27  ;;  %vm1603_vm5 = vcmp.eq.f32.partialorder %v5535_v48, %v5624_v30 }
 0x531   :  { %v5632_v33 = vcvt.s32.f32 %v1755_v31  ;;  %v1604_v36 = vsel %vm1603_vm5, %v5340_v58, 32  ;;  %v1856_v37 = vsel %vm1855_vm4, %v5340_v58, 32  ;;  %v5652_v46 = vcvt.s32.f32 %v1807_v32 }
 0x532   :  { %v5637_v38 = vsel %vm139_vm0, %v1604_v36, 2147483647  ;;  %v5640_v40 = vsel %vm139_vm0, %v1856_v37, 2147483647 }
 0x533   :  { %1758 = vmin.xlane.f32.xlu1 %v5632_v33  ;;  %v5643_v25 = vpop.xlane.xlu1 %1905  ;;  %v5645_v41 = vpop.xlane.xlu0 %1653  ;;  %v1607_v43 = vshra.s32 %v5637_v38, 16  ;;  %v1859_v49 = vshra.s32 %v5640_v40, 16  ;;  %v1606_v1 = vand.u32 65535, %v5637_v38 }
 0x534   :  { %vm1907_vm6 = vcmp.eq.f32.partialorder %v5544_v51, %v5643_v25  ;;  %vm1655_vm7 = vcmp.eq.f32.partialorder %v5548_v28, %v5645_v41 }
 0x535   :  { %v5654_v47 = vcvt.s32.f32 %v1607_v43  ;;  %v1656_v50 = vsel %vm1655_vm7, %v5340_v58, 32  ;;  %v1908_v53 = vsel %vm1907_vm6, %v5340_v58, 32  ;;  %v5677_v10 = vcvt.s32.f32 %v1859_v49 }
 0x536   :  { %v5660_v55 = vsel %vm139_vm0, %v1656_v50, 2147483647  ;;  %v5663_v60 = vsel %vm139_vm0, %v1908_v53, 2147483647 }
 0x537   :  { %v5665_v61 = vpop.xlane.xlu1 %615  ;;  %1810 = vmin.xlane.f32.xlu1 %v5652_v46  ;;  %1610 = vmin.xlane.f32.xlu0 %v5654_v47  ;;  %v5669_v3 = vpop.xlane.xlu0 %558  ;;  %v1659_v4 = vshra.s32 %v5660_v55, 16  ;;  %v1911_v7 = vshra.s32 %v5663_v60, 16 }
 0x538   :  { %7457 = vst [vmem:[#allocation21_spill] sm:$0xff] %v5665_v61  ;;  %7458 = vst [vmem:[#allocation22_spill] sm:$0xff] %v5669_v3  ;;  %vm617_vm8 = vcmp.eq.f32.partialorder %v5557_v56, %v5665_v61  ;;  %vm560_vm14 = vcmp.eq.f32.partialorder %v5562_v57, %v5669_v3 }
 0x539   :  { %v5679_v2 = vcvt.s32.f32 %v1659_v4  ;;  %v561_v17 = vsel %vm560_vm14, %v5340_v58, 32  ;;  %v618_v21 = vsel %vm617_vm8, %v5340_v58, 32  ;;  %v5700_v43 = vcvt.s32.f32 %v1911_v7 }
 0x53a   :  { %v5684_v8 = vsel %vm139_vm0, %v561_v17, 2147483647  ;;  %v5687_v31 = vsel %vm139_vm0, %v618_v21, 2147483647 }
 0x53b   :  { %v5689_v32 = vpop.xlane.xlu1 %721  ;;  %1862 = vmin.xlane.f32.xlu1 %v5677_v10  ;;  %1662 = vmin.xlane.f32.xlu0 %v5679_v2  ;;  %v5693_v36 = vpop.xlane.xlu0 %668  ;;  %v564_v37 = vshra.s32 %v5684_v8, 16  ;;  %v621_v50 = vshra.s32 %v5687_v31, 16 }
 0x53c   :  { %7459 = vst [vmem:[#allocation23_spill] sm:$0xff] %v5689_v32  ;;  %7460 = vst [vmem:[#allocation24_spill] sm:$0xff] %v5693_v36  ;;  %vm723_vm15 = vcmp.eq.f32.partialorder %v5571_v62, %v5689_v32  ;;  %vm670_vm2 = vcmp.eq.f32.partialorder %v5576_v63, %v5693_v36 }
 0x53d   :  { %v5702_v49 = vcvt.s32.f32 %v564_v37  ;;  %v671_v53 = vsel %vm670_vm2, %v5340_v58, 32  ;;  %v724_v4 = vsel %vm723_vm15, %v5340_v58, 32  ;;  %v5716_v37 = vcvt.s32.f32 %v621_v50 }
 0x53e   :  { %v5708_v17 = vsel %vm139_vm0, %v671_v53, 2147483647  ;;  %v5711_v21 = vsel %vm139_vm0, %v724_v4, 2147483647  ;;  %v1502_v4 = vand.u32 65535, %v5588_v9  ;;  %v1554_v50 = vand.u32 65535, %v5599_v6 }
 0x53f   :  { %1914 = vmin.xlane.f32.xlu1 %v5700_v43  ;;  %567 = vmin.xlane.f32.xlu0 %v5702_v49  ;;  %v674_v7 = vshra.s32 %v5708_v17, 16  ;;  %v727_v52 = vshra.s32 %v5711_v21, 16  ;;  %v1806_v6 = vand.u32 65535, %v5619_v26 }
 0x540   :  { %v1504_v15 = vcvt.s32.f32 %v1502_v4  ;;  %v1556_v24 = vcvt.s32.f32 %v1554_v50 }
 0x541   :  { %v5718_v59 = vcvt.s32.f32 %v674_v7  ;;  %v5723_v53 = vcvt.s32.f32 %v727_v52  ;;  %v1754_v52 = vand.u32 65535, %v5616_v23  ;;  %v1808_v50 = vcvt.s32.f32 %v1806_v6 }
 0x543   :  { %624 = vmin.xlane.f32.xlu1 %v5716_v37  ;;  %677 = vmin.xlane.f32.xlu0 %v5718_v59  ;;  %v1756_v4 = vcvt.s32.f32 %v1754_v52 }
 0x547   :  { %730 = vmin.xlane.f32.xlu1 %v5723_v53 }
 0x5b4   :  { %v5727_v42 = vpop.xlane.xlu0 %1506 }
 0x5b5   :  { %vm1508_vm3 = vcmp.eq.f32.partialorder %v5595_v12, %v5727_v42 }
 0x5b6   :  { %v1509_v7 = vsel %vm1508_vm3, %v1504_v15, inf }
 0x5b7   :  { %1510 = vmin.xlane.f32.xlu0 %v1509_v7 }
 0x5b8   :  { %v5732_v54 = vpop.xlane.xlu0 %1558 }
 0x5b9   :  { %vm1560_vm4 = vcmp.eq.f32.partialorder %v5611_v20, %v5732_v54  ;;  %v1608_v20 = vcvt.s32.f32 %v1606_v1 }
 0x5ba   :  { %v1561_v18 = vsel %vm1560_vm4, %v1556_v24, inf  ;;  %v1658_v24 = vand.u32 65535, %v5660_v55  ;;  %v563_v55 = vand.u32 65535, %v5684_v8  ;;  %v673_v8 = vand.u32 65535, %v5708_v17 }
 0x5bb   :  { %1562 = vmin.xlane.f32.xlu0 %v1561_v18  ;;  %v1858_v18 = vand.u32 65535, %v5640_v40  ;;  %v1910_v40 = vand.u32 65535, %v5663_v60  ;;  %v620_v60 = vand.u32 65535, %v5687_v31  ;;  %v726_v31 = vand.u32 65535, %v5711_v21 }
 0x5bc   :  { %v5737_v9 = vpop.xlane.xlu1 %1758  ;;  %v1660_v1 = vcvt.s32.f32 %v1658_v24  ;;  %v1513_v21 = vcvt.f32.s32 %v5727_v42 }
 0x5bd   :  { %vm1760_vm5 = vcmp.eq.f32.partialorder %v5632_v33, %v5737_v9  ;;  %v1860_v52 = vcvt.s32.f32 %v1858_v18  ;;  %v622_v24 = vcvt.s32.f32 %v620_v60 }
 0x5be   :  { %v1761_v15 = vsel %vm1760_vm5, %v1756_v4, inf }
 0x5bf   :  { %1762 = vmin.xlane.f32.xlu1 %v1761_v15  ;;  %v1912_v15 = vcvt.s32.f32 %v1910_v40  ;;  %v1514_v40 = vshll.u32 %v1513_v21, 16 }
 0x5c0   :  { %v5743_v12 = vpop.xlane.xlu1 %1810  ;;  %v5745_v23 = vpop.xlane.xlu0 %1610 }
 0x5c1   :  { %vm1812_vm6 = vcmp.eq.f32.partialorder %v5652_v46, %v5743_v12  ;;  %vm1612_vm7 = vcmp.eq.f32.partialorder %v5654_v47, %v5745_v23  ;;  %v1817_v60 = vcvt.f32.s32 %v5743_v12 }
 0x5c2   :  { %v1813_v26 = vsel %vm1812_vm6, %v1808_v50, inf  ;;  %v1613_v33 = vsel %vm1612_vm7, %v1608_v20, inf  ;;  %v565_v50 = vcvt.s32.f32 %v563_v55 }
 0x5c3   :  { %1814 = vmin.xlane.f32.xlu1 %v1813_v26  ;;  %1614 = vmin.xlane.f32.xlu0 %v1613_v33  ;;  %v675_v26 = vcvt.s32.f32 %v673_v8  ;;  %v728_v33 = vcvt.s32.f32 %v726_v31 }
 0x5c4   :  { %v5753_v38 = vpop.xlane.xlu1 %1862  ;;  %v5755_v7 = vpop.xlane.xlu0 %1662 }
 0x5c5   :  { %vm1864_vm8 = vcmp.eq.f32.partialorder %v5677_v10, %v5753_v38  ;;  %vm1664_vm14 = vcmp.eq.f32.partialorder %v5679_v2, %v5755_v7  ;;  %v1869_v31 = vcvt.f32.s32 %v5753_v38 }
 0x5c6   :  { %v1865_v46 = vsel %vm1864_vm8, %v1860_v52, inf  ;;  %v1665_v47 = vsel %vm1664_vm14, %v1660_v1, inf }
 0x5c7   :  { %1866 = vmin.xlane.f32.xlu1 %v1865_v46  ;;  %1666 = vmin.xlane.f32.xlu0 %v1665_v47 }
 0x5c8   :  { %v5763_v4 = vpop.xlane.xlu1 %1914  ;;  %v5765_v6 = vpop.xlane.xlu0 %567 }
 0x5c9   :  { %vm1916_vm15 = vcmp.eq.f32.partialorder %v5700_v43, %v5763_v4  ;;  %vm569_vm2 = vcmp.eq.f32.partialorder %v5702_v49, %v5765_v6 }
 0x5ca   :  { %v1917_v10 = vsel %vm1916_vm15, %v1912_v15, inf  ;;  %v570_v2 = vsel %vm569_vm2, %v565_v50, inf  ;;  %v1765_v15 = vcvt.f32.s32 %v5737_v9 }
 0x5cb   :  { %1918 = vmin.xlane.f32.xlu1 %v1917_v10  ;;  %571 = vmin.xlane.f32.xlu0 %v570_v2  ;;  %v1617_v10 = vcvt.f32.s32 %v5745_v23  ;;  %v1669_v23 = vcvt.f32.s32 %v5755_v7 }
 0x5cc   :  { %v5773_v20 = vpop.xlane.xlu1 %624  ;;  %v5775_v18 = vpop.xlane.xlu0 %677  ;;  %v1766_v9 = vshll.u32 %v1765_v15, 16 }
 0x5cd   :  { %vm626_vm3 = vcmp.eq.f32.partialorder %v5716_v37, %v5773_v20  ;;  %vm679_vm4 = vcmp.eq.f32.partialorder %v5718_v59, %v5775_v18  ;;  %v1565_v37 = vcvt.f32.s32 %v5732_v54 }
 0x5ce   :  { %v627_v43 = vsel %vm626_vm3, %v622_v24, inf  ;;  %v680_v49 = vsel %vm679_vm4, %v675_v26, inf  ;;  %v1818_v26 = vshll.u32 %v1817_v60, 16 }
 0x5cf   :  { %628 = vmin.xlane.f32.xlu1 %v627_v43  ;;  %681 = vmin.xlane.f32.xlu0 %v680_v49  ;;  %v1566_v47 = vshll.u32 %v1565_v37, 16  ;;  %v1670_v37 = vshll.u32 %v1669_v23, 16 }
 0x5d0   :  { %v5782_v17 = vpop.xlane.xlu1 %730 }
 0x5d1   :  { %vm732_vm5 = vcmp.eq.f32.partialorder %v5723_v53, %v5782_v17 }
 0x5d2   :  { %v733_v52 = vsel %vm732_vm5, %v728_v33, inf  ;;  %v1618_v33 = vshll.u32 %v1617_v10, 16 }
 0x5d3   :  { %734 = vmin.xlane.f32.xlu1 %v733_v52 }
 0x640   :  { %v1511_v1 = vpop.xlane.xlu0 %1510 }
 0x641   :  { %v1512_v55 = vcvt.f32.s32 %v1511_v1 }
 0x643   :  { %v5788_v59 = vadd.s32 %v1514_v40, %v1512_v55  ;;  %v1870_v40 = vshll.u32 %v1869_v31, 16  ;;  %v1921_v55 = vcvt.f32.s32 %v5763_v4 }
 0x644   :  { %v1563_v46 = vpop.xlane.xlu0 %1562 }
 0x645   :  { %v1564_v50 = vcvt.f32.s32 %v1563_v46  ;;  %vm1516_vm6 = vcmp.eq.s32.totalorder %v5340_v58, %v5788_v59  ;;  %v574_v46 = vcvt.f32.s32 %v5765_v6  ;;  %v1922_v10 = vshll.u32 %v1921_v55, 16 }
 0x646   :  { %v5797_v42 = vsel %vm1516_vm6, -1e+30, %v5505_v34 }
 0x647   :  { %v5799_v53 = vadd.s32 %v1566_v47, %v1564_v50  ;;  %v1522_v54 = vsel %vm139_vm0, %v5797_v42, -inf }
 0x648   :  { %v1763_v8 = vpop.xlane.xlu1 %1762  ;;  %1523 = vmax.xlane.f32.xlu0 %v1522_v54 }
 0x649   :  { %v1764_v2 = vcvt.f32.s32 %v1763_v8  ;;  %vm1568_vm7 = vcmp.eq.s32.totalorder %v5340_v58, %v5799_v53 }
 0x64a   :  { %v5811_v34 = vsel %vm1568_vm7, -1e+30, %v5512_v39 }
 0x64b   :  { %v5813_v24 = vadd.s32 %v1766_v9, %v1764_v2  ;;  %v1574_v12 = vsel %vm139_vm0, %v5811_v34, -inf  ;;  %v575_v2 = vshll.u32 %v574_v46, 16 }
 0x64c   :  { %v1815_v43 = vpop.xlane.xlu1 %1814  ;;  %1575 = vmax.xlane.f32.xlu0 %v1574_v12  ;;  %v1615_v49 = vpop.xlane.xlu0 %1614  ;;  %v684_v12 = vcvt.f32.s32 %v5775_v18 }
 0x64d   :  { %v1816_v52 = vcvt.f32.s32 %v1815_v43  ;;  %v1616_v21 = vcvt.f32.s32 %v1615_v49  ;;  %vm1768_vm8 = vcmp.eq.s32.totalorder %v5340_v58, %v5813_v24 }
 0x64e   :  { %v5825_v39 = vsel %vm1768_vm8, -1e+30, %v5518_v44 }
 0x64f   :  { %v5827_v1 = vadd.s32 %v1818_v26, %v1816_v52  ;;  %v5829_v38 = vadd.s32 %v1618_v33, %v1616_v21  ;;  %v1774_v7 = vsel %vm139_vm0, %v5825_v39, -inf }
 0x650   :  { %1775 = vmax.xlane.f32.xlu1 %v1774_v7  ;;  %v1867_v47 = vpop.xlane.xlu1 %1866  ;;  %v1667_v15 = vpop.xlane.xlu0 %1666  ;;  %v685_v7 = vshll.u32 %v684_v12, 16 }
 0x651   :  { %v1868_v50 = vcvt.f32.s32 %v1867_v47  ;;  %v1668_v54 = vcvt.f32.s32 %v1667_v15  ;;  %vm1820_vm14 = vcmp.eq.s32.totalorder %v5340_v58, %v5827_v1  ;;  %vm1620_vm15 = vcmp.eq.s32.totalorder %v5340_v58, %v5829_v38 }
 0x652   :  { %v5843_v44 = vsel %vm1820_vm14, -1e+30, %v5522_v45  ;;  %v5849_v4 = vsel %vm1620_vm15, -1e+30, %v5535_v48  ;;  %v631_v45 = vcvt.f32.s32 %v5773_v20 }
 0x653   :  { %v5851_v6 = vadd.s32 %v1870_v40, %v1868_v50  ;;  %v5853_v60 = vadd.s32 %v1670_v37, %v1668_v54  ;;  %v1826_v8 = vsel %vm139_vm0, %v5843_v44, -inf  ;;  %v1626_v9 = vsel %vm139_vm0, %v5849_v4, -inf }
 0x654   :  { %1827 = vmax.xlane.f32.xlu1 %v1826_v8  ;;  %v1919_v26 = vpop.xlane.xlu1 %1918  ;;  %1627 = vmax.xlane.f32.xlu0 %v1626_v9  ;;  %v572_v48 = vpop.xlane.xlu0 %571  ;;  %v632_v21 = vshll.u32 %v631_v45, 16 }
 0x655   :  { %v1920_v31 = vcvt.f32.s32 %v1919_v26  ;;  %v573_v23 = vcvt.f32.s32 %v572_v48  ;;  %vm1872_vm2 = vcmp.eq.s32.totalorder %v5340_v58, %v5851_v6  ;;  %vm1672_vm3 = vcmp.eq.s32.totalorder %v5340_v58, %v5853_v60 }
 0x656   :  { %v5869_v43 = vsel %vm1872_vm2, -1e+30, %v5531_v22  ;;  %v5875_v20 = vsel %vm1672_vm3, -1e+30, %v5548_v28  ;;  %v737_v22 = vcvt.f32.s32 %v5782_v17 }
 0x657   :  { %v5877_v18 = vadd.s32 %v1922_v10, %v1920_v31  ;;  %v5879_v49 = vadd.s32 %v575_v2, %v573_v23  ;;  %v1878_v33 = vsel %vm139_vm0, %v5869_v43, -inf  ;;  %v1678_v52 = vsel %vm139_vm0, %v5875_v20, -inf }
 0x658   :  { %1879 = vmax.xlane.f32.xlu1 %v1878_v33  ;;  %v629_v40 = vpop.xlane.xlu1 %628  ;;  %1679 = vmax.xlane.f32.xlu0 %v1678_v52  ;;  %v682_v37 = vpop.xlane.xlu0 %681 }
 0x659   :  { %v630_v28 = vcvt.f32.s32 %v629_v40  ;;  %v683_v55 = vcvt.f32.s32 %v682_v37  ;;  %vm1924_vm4 = vcmp.eq.s32.totalorder %v5340_v58, %v5877_v18  ;;  %vm577_vm5 = vcmp.eq.s32.totalorder %v5340_v58, %v5879_v49 }
 0x65a   :  { %v5894_v46 = vsel %vm1924_vm4, -1e+30, %v5544_v51  ;;  %v5900_v17 = vsel %vm577_vm5, -1e+30, %v5562_v57  ;;  %v738_v51 = vshll.u32 %v737_v22, 16 }
 0x65b   :  { %v5902_v47 = vadd.s32 %v632_v21, %v630_v28  ;;  %v5904_v15 = vadd.s32 %v685_v7, %v683_v55  ;;  %v1930_v50 = vsel %vm139_vm0, %v5894_v46, -inf  ;;  %v587_v54 = vsel %vm139_vm0, %v5900_v17, -inf }
 0x65c   :  { %1931 = vmax.xlane.f32.xlu1 %v1930_v50  ;;  %v735_v8 = vpop.xlane.xlu1 %734  ;;  %588 = vmax.xlane.f32.xlu0 %v587_v54 }
 0x65d   :  { %v736_v9 = vcvt.f32.s32 %v735_v8  ;;  %vm634_vm13 = vcmp.eq.s32.totalorder %v5340_v58, %v5902_v47  ;;  %vm687_vm12 = vcmp.eq.s32.totalorder %v5340_v58, %v5904_v15 }
 0x65e   :  { %v5918_v57 = vsel %vm634_vm13, -1e+30, %v5557_v56  ;;  %v5924_v10 = vsel %vm687_vm12, -1e+30, %v5576_v63 }
 0x65f   :  { %v5926_v2 = vadd.s32 %v738_v51, %v736_v9  ;;  %v640_v45 = vsel %vm139_vm0, %v5918_v57, -inf  ;;  %v693_v12 = vsel %vm139_vm0, %v5924_v10, -inf }
 0x660   :  { %641 = vmax.xlane.f32.xlu1 %v640_v45  ;;  %694 = vmax.xlane.f32.xlu0 %v693_v12 }
 0x661   :  { %vm740_vm10 = vcmp.eq.s32.totalorder %v5340_v58, %v5926_v2  ;;  %v2016_v2 = vld [vmem:[#allocation8 + $0x118] sm:$0xff] }
 0x662   :  { %v5938_v56 = vsel %vm740_vm10, -1e+30, %v5571_v62 }
 0x663   :  { %v746_v63 = vsel %vm139_vm0, %v5938_v56, -inf }
 0x664   :  { %747 = vmax.xlane.f32.xlu1 %v746_v63 }
 0x6d1   :  { %v5942_v26 = vpop.xlane.xlu0 %1523 }
 0x6d2   :  { %vm1525_vm9 = vcmp.eq.f32.partialorder %v5797_v42, %v5942_v26 }
 0x6d3   :  { %v1526_v48 = vsel %vm1525_vm9, %v5340_v58, 32 }
 0x6d4   :  { %v5948_v31 = vsel %vm139_vm0, %v1526_v48, 2147483647 }
 0x6d5   :  { %v5950_v23 = vpop.xlane.xlu0 %1575  ;;  %v1529_v33 = vshra.s32 %v5948_v31, 16 }
 0x6d6   :  { %vm1577_vm1 = vcmp.eq.f32.partialorder %v5811_v34, %v5950_v23 }
 0x6d7   :  { %v5955_v62 = vcvt.s32.f32 %v1529_v33  ;;  %v1578_v52 = vsel %vm1577_vm1, %v5340_v58, 32 }
 0x6d8   :  { %v5959_v21 = vsel %vm139_vm0, %v1578_v52, 2147483647 }
 0x6d9   :  { %v5961_v42 = vpop.xlane.xlu1 %1775  ;;  %1532 = vmin.xlane.f32.xlu0 %v5955_v62  ;;  %v1581_v7 = vshra.s32 %v5959_v21, 16 }
 0x6da   :  { %vm1777_vm9 = vcmp.eq.f32.partialorder %v5825_v39, %v5961_v42 }
 0x6db   :  { %v5967_v22 = vcvt.s32.f32 %v1581_v7  ;;  %v1778_v34 = vsel %vm1777_vm9, %v5340_v58, 32 }
 0x6dc   :  { %v5971_v40 = vsel %vm139_vm0, %v1778_v34, 2147483647 }
 0x6dd   :  { %v5973_v37 = vpop.xlane.xlu1 %1827  ;;  %1584 = vmin.xlane.f32.xlu0 %v5967_v22  ;;  %v5976_v28 = vpop.xlane.xlu0 %1627  ;;  %v1781_v55 = vshra.s32 %v5971_v40, 16 }
 0x6de   :  { %vm1829_vm1 = vcmp.eq.f32.partialorder %v5843_v44, %v5973_v37  ;;  %vm1629_vm11 = vcmp.eq.f32.partialorder %v5849_v4, %v5976_v28 }
 0x6df   :  { %v5983_v39 = vcvt.s32.f32 %v1781_v55  ;;  %v1830_v50 = vsel %vm1829_vm1, %v5340_v58, 32  ;;  %v1630_v8 = vsel %vm1629_vm11, %v5340_v58, 32 }
 0x6e0   :  { %v5987_v54 = vsel %vm139_vm0, %v1830_v50, 2147483647  ;;  %v5997_v45 = vsel %vm139_vm0, %v1630_v8, 2147483647 }
 0x6e1   :  { %1784 = vmin.xlane.f32.xlu1 %v5983_v39  ;;  %v5991_v51 = vpop.xlane.xlu1 %1879  ;;  %v5993_v9 = vpop.xlane.xlu0 %1679  ;;  %v1833_v44 = vshra.s32 %v5987_v54, 16  ;;  %v1633_v12 = vshra.s32 %v5997_v45, 16 }
 0x6e2   :  { %vm1881_vm9 = vcmp.eq.f32.partialorder %v5869_v43, %v5991_v51  ;;  %vm1681_vm1 = vcmp.eq.f32.partialorder %v5875_v20, %v5993_v9 }
 0x6e3   :  { %v6003_v4 = vcvt.s32.f32 %v1833_v44  ;;  %v1882_v63 = vsel %vm1881_vm9, %v5340_v58, 32  ;;  %v1682_v33 = vsel %vm1681_vm1, %v5340_v58, 32  ;;  %v6014_v7 = vcvt.s32.f32 %v1633_v12 }
 0x6e4   :  { %v6008_v48 = vsel %vm139_vm0, %v1882_v63, 2147483647  ;;  %v6020_v34 = vsel %vm139_vm0, %v1682_v33, 2147483647 }
 0x6e5   :  { %1836 = vmin.xlane.f32.xlu1 %v6003_v4  ;;  %v6012_v52 = vpop.xlane.xlu1 %1931  ;;  %v6016_v43 = vpop.xlane.xlu0 %588  ;;  %v1885_v20 = vshra.s32 %v6008_v48, 16  ;;  %1636 = vmin.xlane.f32.xlu0 %v6014_v7  ;;  %v1685_v50 = vshra.s32 %v6020_v34, 16 }
 0x6e6   :  { %7461 = vst [vmem:[#allocation25_spill] sm:$0xff] %v6016_v43  ;;  %vm1933_vm11 = vcmp.eq.f32.partialorder %v5894_v46, %v6012_v52  ;;  %vm590_vm9 = vcmp.eq.f32.partialorder %v5900_v17, %v6016_v43 }
 0x6e7   :  { %v6027_v55 = vcvt.s32.f32 %v1885_v20  ;;  %v1934_v8 = vsel %vm1933_vm11, %v5340_v58, 32  ;;  %v591_v12 = vsel %vm590_vm9, %v5340_v58, 32  ;;  %v6038_v46 = vcvt.s32.f32 %v1685_v50 }
 0x6e8   :  { %v6032_v44 = vsel %vm139_vm0, %v1934_v8, 2147483647  ;;  %v6044_v20 = vsel %vm139_vm0, %v591_v12, 2147483647 }
 0x6e9   :  { %1888 = vmin.xlane.f32.xlu1 %v6027_v55  ;;  %v6036_v63 = vpop.xlane.xlu1 %641  ;;  %v6040_v17 = vpop.xlane.xlu0 %694  ;;  %v1937_v33 = vshra.s32 %v6032_v44, 16  ;;  %v594_v8 = vshra.s32 %v6044_v20, 16  ;;  %1688 = vmin.xlane.f32.xlu0 %v6038_v46 }
 0x6ea   :  { %7462 = vst [vmem:[#allocation26_spill] sm:$0xff] %v6036_v63  ;;  %7463 = vst [vmem:[#allocation27_spill] sm:$0xff] %v6040_v17  ;;  %vm643_vm1 = vcmp.eq.f32.partialorder %v5918_v57, %v6036_v63  ;;  %vm696_vm11 = vcmp.eq.f32.partialorder %v5924_v10, %v6040_v17 }
 0x6eb   :  { %v6052_v0 = vcvt.s32.f32 %v1937_v33  ;;  %v644_v50 = vsel %vm643_vm1, %v5340_v58, 32  ;;  %v697_v13 = vsel %vm696_vm11, %v5340_v58, 32  ;;  %v6056_v11 = vcvt.s32.f32 %v594_v8 }
 0x6ec   :  { %v6059_v12 = vsel %vm139_vm0, %v644_v50, 2147483647  ;;  %v6062_v57 = vsel %vm139_vm0, %v697_v13, 2147483647 }
 0x6ed   :  { %1940 = vmin.xlane.f32.xlu1 %v6052_v0  ;;  %v6065_v10 = vpop.xlane.xlu1 %747  ;;  %v647_v32 = vshra.s32 %v6059_v12, 16  ;;  %v700_v33 = vshra.s32 %v6062_v57, 16  ;;  %597 = vmin.xlane.f32.xlu0 %v6056_v11 }
 0x6ee   :  { %7464 = vst [vmem:[#allocation28_spill] sm:$0xff] %v6065_v10  ;;  %vm749_vm9 = vcmp.eq.f32.partialorder %v5938_v56, %v6065_v10  ;;  %v1580_v10 = vand.u32 65535, %v5959_v21  ;;  %v1832_v21 = vand.u32 65535, %v5987_v54  ;;  %v1684_v54 = vand.u32 65535, %v6020_v34 }
 0x6ef   :  { %v6072_v8 = vcvt.s32.f32 %v647_v32  ;;  %v6074_v50 = vcvt.s32.f32 %v700_v33  ;;  %v750_v13 = vsel %vm749_vm9, %v5340_v58, 32  ;;  %v1528_v32 = vand.u32 65535, %v5948_v31 }
 0x6f0   :  { %v6078_v17 = vsel %vm139_vm0, %v750_v13, 2147483647  ;;  %v1582_v3 = vcvt.s32.f32 %v1580_v10  ;;  %v593_v34 = vand.u32 65535, %v6044_v20  ;;  %v699_v20 = vand.u32 65535, %v6062_v57 }
 0x6f1   :  { %650 = vmin.xlane.f32.xlu1 %v6072_v8  ;;  %v753_v36 = vshra.s32 %v6078_v17, 16  ;;  %703 = vmin.xlane.f32.xlu0 %v6074_v50  ;;  %v1530_v33 = vcvt.s32.f32 %v1528_v32  ;;  %v6142_v57 = vrot.slane %v5468_v35, %v5479_v29 }
 0x6f3   :  { %v6083_v63 = vcvt.s32.f32 %v753_v36  ;;  %v1780_v36 = vand.u32 65535, %v5971_v40  ;;  %v1834_v40 = vcvt.s32.f32 %v1832_v21  ;;  %v1686_v21 = vcvt.s32.f32 %v1684_v54 }
 0x6f4   :  { %v1569_v35 = vsel %vm1568_vm7, %v6142_v57, 0.0  ;;  %v1621_v59 = vsel %vm1620_vm15, %v6142_v57, 0.0  ;;  %v1821_v53 = vsel %vm1820_vm14, %v6142_v57, 0.0  ;;  %v1673_v24 = vsel %vm1672_vm3, %v6142_v57, 0.0 }
 0x6f5   :  { %756 = vmin.xlane.f32.xlu1 %v6083_v63  ;;  %v1782_v32 = vcvt.s32.f32 %v1780_v36  ;;  %v1873_v38 = vsel %vm1872_vm2, %v6142_v57, 0.0  ;;  %v635_v49 = vsel %vm634_vm13, %v6142_v57, 0.0  ;;  %v688_v47 = vsel %vm687_vm12, %v6142_v57, 0.0 }
 0x6f6   :  { %v1874_v1 = vsel %vm139_vm0, %v1873_v38, 0.0  ;;  %vm773_vm12 = vcmask 15360  }
 0x762   :  { %v6087_v56 = vpop.xlane.xlu0 %1532 }
 0x763   :  { %vm1534_vm1 = vcmp.eq.f32.partialorder %v5955_v62, %v6087_v56 }
 0x764   :  { %v1535_v13 = vsel %vm1534_vm1, %v1530_v33, inf  ;;  %v1632_v33 = vand.u32 65535, %v5997_v45 }
 0x765   :  { %1536 = vmin.xlane.f32.xlu0 %v1535_v13  ;;  %v1884_v13 = vand.u32 65535, %v6008_v48 }
 0x766   :  { %v6092_v61 = vpop.xlane.xlu0 %1584 }
 0x767   :  { %vm1586_vm11 = vcmp.eq.f32.partialorder %v5967_v22, %v6092_v61  ;;  %v1886_v36 = vcvt.s32.f32 %v1884_v13  ;;  %v595_v13 = vcvt.s32.f32 %v593_v34  ;;  %v1622_v34 = vsel %vm139_vm0, %v1621_v59, 0.0 }
 0x768   :  { %v1587_v43 = vsel %vm1586_vm11, %v1582_v3, inf  ;;  %v1591_v60 = vcvt.f32.s32 %v6092_v61 }
 0x769   :  { %1588 = vmin.xlane.f32.xlu0 %v1587_v43  ;;  %v1634_v43 = vcvt.s32.f32 %v1632_v33 }
 0x76a   :  { %v6097_v31 = vpop.xlane.xlu1 %1784 }
 0x76b   :  { %vm1786_vm9 = vcmp.eq.f32.partialorder %v5983_v39, %v6097_v31 }
 0x76c   :  { %v1787_v62 = vsel %vm1786_vm9, %v1782_v32, inf  ;;  %v1936_v32 = vand.u32 65535, %v6032_v44  ;;  %v646_v44 = vand.u32 65535, %v6059_v12  ;;  %v752_v12 = vand.u32 65535, %v6078_v17 }
 0x76d   :  { %1788 = vmin.xlane.f32.xlu1 %v1787_v62 }
 0x76e   :  { %v6103_v10 = vpop.xlane.xlu1 %1836  ;;  %v6108_v3 = vpop.xlane.xlu0 %1636  ;;  %v1938_v33 = vcvt.s32.f32 %v1936_v32  ;;  %v754_v17 = vcvt.s32.f32 %v752_v12  ;;  %v1592_v12 = vshll.u32 %v1591_v60, 16 }
 0x76f   :  { %vm1838_vm1 = vcmp.eq.f32.partialorder %v6003_v4, %v6103_v10  ;;  %vm1638_vm11 = vcmp.eq.f32.partialorder %v6014_v7, %v6108_v3 }
 0x770   :  { %v1839_v22 = vsel %vm1838_vm1, %v1834_v40, inf  ;;  %v1639_v39 = vsel %vm1638_vm11, %v1634_v43, inf  ;;  %v648_v43 = vcvt.s32.f32 %v646_v44  ;;  %v1539_v44 = vcvt.f32.s32 %v6087_v56 }
 0x771   :  { %1840 = vmin.xlane.f32.xlu1 %v1839_v22  ;;  %1640 = vmin.xlane.f32.xlu0 %v1639_v39  ;;  %v701_v39 = vcvt.s32.f32 %v699_v20 }
 0x772   :  { %v6113_v45 = vpop.xlane.xlu1 %1888  ;;  %v6118_v4 = vpop.xlane.xlu0 %1688 }
 0x773   :  { %vm1890_vm9 = vcmp.eq.f32.partialorder %v6027_v55, %v6113_v45  ;;  %vm1690_vm1 = vcmp.eq.f32.partialorder %v6038_v46, %v6118_v4 }
 0x774   :  { %v1891_v48 = vsel %vm1890_vm9, %v1886_v36, inf  ;;  %v1691_v7 = vsel %vm1690_vm1, %v1686_v21, inf }
 0x775   :  { %1892 = vmin.xlane.f32.xlu1 %v1891_v48  ;;  %1692 = vmin.xlane.f32.xlu0 %v1691_v7  ;;  %v1570_v48 = vsel %vm139_vm0, %v1569_v35, 0.0  ;;  %v1822_v7 = vsel %vm139_vm0, %v1821_v53, 0.0 }
 0x776   :  { %v6123_v62 = vpop.xlane.xlu1 %1940  ;;  %v6128_v55 = vpop.xlane.xlu0 %597 }
 0x777   :  { %vm1942_vm11 = vcmp.eq.f32.partialorder %v6052_v0, %v6123_v62  ;;  %vm599_vm9 = vcmp.eq.f32.partialorder %v6056_v11, %v6128_v55 }
 0x778   :  { %v1943_v40 = vsel %vm1942_vm11, %v1938_v33, inf  ;;  %v600_v46 = vsel %vm599_vm9, %v595_v13, inf  ;;  %v1674_v33 = vsel %vm139_vm0, %v1673_v24, 0.0  ;;  %v1540_v13 = vshll.u32 %v1539_v44, 16 }
 0x779   :  { %1944 = vmin.xlane.f32.xlu1 %v1943_v40  ;;  %601 = vmin.xlane.f32.xlu0 %v600_v46 }
 0x77a   :  { %v6133_v22 = vpop.xlane.xlu1 %650  ;;  %v6138_v0 = vpop.xlane.xlu0 %703 }
 0x77b   :  { %vm652_vm1 = vcmp.eq.f32.partialorder %v6072_v8, %v6133_v22  ;;  %vm705_vm11 = vcmp.eq.f32.partialorder %v6074_v50, %v6138_v0  ;;  %v1517_v8 = vsel %vm1516_vm6, %v6142_v57, 0.0 }
 0x77c   :  { %v653_v54 = vsel %vm652_vm1, %v648_v43, inf  ;;  %v706_v11 = vsel %vm705_vm11, %v701_v39, inf  ;;  %v1518_v50 = vsel %vm139_vm0, %v1517_v8, 0.0 }
 0x77d   :  { %654 = vmin.xlane.f32.xlu1 %v653_v54  ;;  %707 = vmin.xlane.f32.xlu0 %v706_v11  ;;  %v1791_v54 = vcvt.f32.s32 %v6097_v31  ;;  %v1643_v31 = vcvt.f32.s32 %v6108_v3 }
 0x77e   :  { %v6146_v36 = vpop.xlane.xlu1 %756 }
 0x77f   :  { %vm758_vm9 = vcmp.eq.f32.partialorder %v6083_v63, %v6146_v36  ;;  %v1769_v63 = vsel %vm1768_vm8, %v6142_v57, 0.0  ;;  %v1792_v56 = vshll.u32 %v1791_v54, 16 }
 0x780   :  { %v759_v32 = vsel %vm758_vm9, %v754_v17, inf  ;;  %v1770_v21 = vsel %vm139_vm0, %v1769_v63, 0.0  ;;  %vm775_vm9 = vcmask 23552  }
 0x781   :  { %760 = vmin.xlane.f32.xlu1 %v759_v32  ;;  %1519 = vadd.xlane.f32.xlu0 %v1518_v50  ;;  %v1843_v32 = vcvt.f32.s32 %v6103_v10  ;;  %v1695_v10 = vcvt.f32.s32 %v6118_v4 }
 0x783   :  { %v1844_v59 = vshll.u32 %v1843_v32, 16  ;;  %v1696_v60 = vshll.u32 %v1695_v10, 16  ;;  %v6227_v10 = vld [vmem:[#allocation5 + $0x28] sm:$0xff] }
 0x785   :  { %1571 = vadd.xlane.f32.xlu1 %v1570_v48  ;;  %1771 = vadd.xlane.f32.xlu0 %v1770_v21  ;;  %v1895_v21 = vcvt.f32.s32 %v6113_v45 }
 0x789   :  { %1623 = vadd.xlane.f32.xlu1 %v1622_v34  ;;  %1823 = vadd.xlane.f32.xlu0 %v1822_v7  ;;  %v1644_v7 = vshll.u32 %v1643_v31, 16 }
 0x78d   :  { %1675 = vadd.xlane.f32.xlu1 %v1674_v33  ;;  %1875 = vadd.xlane.f32.xlu0 %v1874_v1  ;;  %v1947_v1 = vcvt.f32.s32 %v6123_v62 }
 0x78f   :  { %v1948_v54 = vshll.u32 %v1947_v1, 16 }
 0x7ee   :  { %v1537_v40 = vpop.xlane.xlu0 %1536 }
 0x7ef   :  { %v1538_v20 = vcvt.f32.s32 %v1537_v40  ;;  %v1896_v40 = vshll.u32 %v1895_v21, 16 }
 0x7f1   :  { %v1541_v46 = vadd.s32 %v1540_v13, %v1538_v20 }
 0x7f2   :  { %v1589_v43 = vpop.xlane.xlu0 %1588 }
 0x7f3   :  { %v1590_v6 = vcvt.f32.s32 %v1589_v43  ;;  %vm1542_vm6 = vcmp.eq.s32.totalorder %v5340_v58, %v1541_v46 }
 0x7f4   :  { %v1543_v39 = vsel %vm1542_vm6, %v6142_v57, 0.0  ;;  %vm7430_vm6 = vcmask 31744  }
 0x7f5   :  { %v1593_v11 = vadd.s32 %v1592_v12, %v1590_v6  ;;  %v1544_v17 = vsel %vm139_vm0, %v1543_v39, 0.0 }
 0x7f6   :  { %v1789_v8 = vpop.xlane.xlu1 %1788  ;;  %1545 = vadd.xlane.f32.xlu1 %v1544_v17 }
 0x7f7   :  { %v1790_v61 = vcvt.f32.s32 %v1789_v8  ;;  %vm1594_vm7 = vcmp.eq.s32.totalorder %v5340_v58, %v1593_v11 }
 0x7f8   :  { %v1595_v35 = vsel %vm1594_vm7, %v6142_v57, 0.0  ;;  %vm7431_vm7 = vcmask 39936  }
 0x7f9   :  { %v1793_v50 = vadd.s32 %v1792_v56, %v1790_v61  ;;  %v1596_v63 = vsel %vm139_vm0, %v1595_v35, 0.0  ;;  %v6210_v56 = vld [vmem:[#allocation5 + $0x38] sm:$0xff] }
 0x7fa   :  { %v1841_v48 = vpop.xlane.xlu1 %1840  ;;  %1597 = vadd.xlane.f32.xlu1 %v1596_v63  ;;  %v1641_v34 = vpop.xlane.xlu0 %1640  ;;  %v6219_v63 = vld [vmem:[#allocation5 + $0x30] sm:$0xff]  ;;  %v2468_v21 = vmul.f32 %v6210_v56, %v6210_v56 }
 0x7fb   :  { %v1842_v53 = vcvt.f32.s32 %v1841_v48  ;;  %vm1794_vm8 = vcmp.eq.s32.totalorder %v5340_v58, %v1793_v50  ;;  %v1642_v33 = vcvt.f32.s32 %v1641_v34  ;;  %v1925_v50 = vsel %vm1924_vm4, %v6142_v57, 0.0 }
 0x7fc   :  { %v1795_v24 = vsel %vm1794_vm8, %v6142_v57, 0.0  ;;  %v604_v48 = vcvt.f32.s32 %v6128_v55  ;;  %v1926_v18 = vsel %vm139_vm0, %v1925_v50, 0.0  ;;  %v2467_v55 = vmul.f32 %v6219_v63, %v6219_v63 }
 0x7fd   :  { %v1845_v38 = vadd.s32 %v1844_v59, %v1842_v53  ;;  %v1796_v3 = vsel %vm139_vm0, %v1795_v24, 0.0  ;;  %v1645_v13 = vadd.s32 %v1644_v7, %v1642_v33  ;;  %v6233_v7 = vld [vmem:[#allocation5 + $0x20] sm:$0xff]  ;;  %v2478_v33 = vsel %vm139_vm0, %v2468_v21, 0.0 }
 0x7fe   :  { %v1893_v44 = vpop.xlane.xlu1 %1892  ;;  %1797 = vadd.xlane.f32.xlu0 %v1796_v3  ;;  %v1693_v20 = vpop.xlane.xlu0 %1692  ;;  %v2466_v3 = vmul.f32 %v6227_v10, %v6227_v10  ;;  %vm7432_vm8 = vcmask 48128  }
 0x7ff   :  { %v1894_v45 = vcvt.f32.s32 %v1893_v44  ;;  %vm1846_vm14 = vcmp.eq.s32.totalorder %v5340_v58, %v1845_v38  ;;  %v1694_v43 = vcvt.f32.s32 %v1693_v20  ;;  %vm1646_vm15 = vcmp.eq.s32.totalorder %v5340_v58, %v1645_v13 }
 0x800   :  { %v1847_v4 = vsel %vm1846_vm14, %v6142_v57, 0.0  ;;  %v1647_v62 = vsel %vm1646_vm15, %v6142_v57, 0.0  ;;  %v605_v38 = vshll.u32 %v604_v48, 16  ;;  %v657_v44 = vcvt.f32.s32 %v6133_v22 }
 0x801   :  { %v1897_v46 = vadd.s32 %v1896_v40, %v1894_v45  ;;  %v1848_v12 = vsel %vm139_vm0, %v1847_v4, 0.0  ;;  %v1697_v39 = vadd.s32 %v1696_v60, %v1694_v43  ;;  %v1648_v17 = vsel %vm139_vm0, %v1647_v62, 0.0 }
 0x802   :  { %v1945_v6 = vpop.xlane.xlu1 %1944  ;;  %1849 = vadd.xlane.f32.xlu0 %v1848_v12  ;;  %1649 = vadd.xlane.f32.xlu1 %v1648_v17  ;;  %v602_v35 = vpop.xlane.xlu0 %601  ;;  %v2475_v13 = vsel %vm139_vm0, %v2467_v55, 0.0  ;;  %v2465_v45 = vmul.f32 %v6233_v7, %v6233_v7  ;;  %v2472_v20 = vsel %vm139_vm0, %v2466_v3, 0.0  ;;  %v710_v43 = vcvt.f32.s32 %v6138_v0  ;;  %v2022_v3 = vld [vmem:[#allocation8 + $0x148] sm:$0xff] }
 0x803   :  { %v1946_v11 = vcvt.f32.s32 %v1945_v6  ;;  %vm1898_vm2 = vcmp.eq.s32.totalorder %v5340_v58, %v1897_v46  ;;  %vm1698_vm3 = vcmp.eq.s32.totalorder %v5340_v58, %v1697_v39  ;;  %v603_v34 = vcvt.f32.s32 %v602_v35  ;;  %2053 = vmatprep.subr.mxu0 %v2022_v3 }
 0x804   :  { %v1899_v8 = vsel %vm1898_vm2, %v6142_v57, 0.0  ;;  %v1699_v31 = vsel %vm1698_vm3, %v6142_v57, 0.0  ;;  %v658_v46 = vshll.u32 %v657_v44, 16  ;;  %v2469_v12 = vsel %vm139_vm0, %v2465_v45, 0.0  ;;  %v2021_v44 = vld [vmem:[#allocation8 + $0x140] sm:$0xff] }
 0x805   :  { %v1949_v32 = vadd.s32 %v1948_v54, %v1946_v11  ;;  %v1900_v61 = vsel %vm139_vm0, %v1899_v8, 0.0  ;;  %v1700_v59 = vsel %vm139_vm0, %v1699_v31, 0.0  ;;  %v606_v40 = vadd.s32 %v605_v38, %v603_v34  ;;  %v6250_v54 = vld [vmem:[#allocation3 + $0x8] sm:$0xff]  ;;  %2054 = vmatpush1.msra.mxu0 %v2021_v44  ;;  %v2013_v45 = vld [vmem:[#allocation8 + $0x100] sm:$0xff] }
 0x806   :  { %1901 = vadd.xlane.f32.xlu0 %v1900_v61  ;;  %1701 = vadd.xlane.f32.xlu1 %v1700_v59  ;;  %v655_v1 = vpop.xlane.xlu1 %654  ;;  %v708_v4 = vpop.xlane.xlu0 %707  ;;  %v582_v22 = vsel %vm577_vm5, %v6142_v57, 0.0  ;;  %v711_v17 = vshll.u32 %v710_v43, 16  ;;  %v763_v0 = vcvt.f32.s32 %v6146_v36  ;;  %v636_v36 = vsel %vm139_vm0, %v635_v49, 0.0  ;;  %v1998_v43 = vld [vmem:[#allocation8 + $0x88] sm:$0xff] }
 0x807   :  { %vm1950_vm1 = vcmp.eq.s32.totalorder %v5340_v58, %v1949_v32  ;;  %v656_v60 = vcvt.f32.s32 %v655_v1  ;;  %vm607_vm4 = vcmp.eq.s32.totalorder %v5340_v58, %v606_v40  ;;  %v709_v62 = vcvt.f32.s32 %v708_v4  ;;  %v2024_v1 = vld [vmem:[#allocation8 + $0x158] sm:$0xff]  ;;  %v2023_v40 = vld [vmem:[#allocation8 + $0x150] sm:$0xff]  ;;  %v2005_v4 = vld [vmem:[#allocation8 + $0xc0] sm:$0xff] }
 0x808   :  { %v1951_v53 = vsel %vm1950_vm1, %v6142_v57, 0.0  ;;  %v608_v11 = vsel %vm607_vm4, %v6142_v57, 0.0  ;;  %v583_v8 = vsel %vm139_vm0, %v582_v22, 0.0  ;;  %v2451_v32 = vmul.f32 %v6250_v54, %v6250_v54  ;;  %2124 = vmatprep.subr.mxu1 %v2024_v1 }
 0x809   :  { %v1952_v24 = vsel %vm139_vm0, %v1951_v53, 0.0  ;;  %v659_v6 = vadd.s32 %v658_v46, %v656_v60  ;;  %v712_v61 = vadd.s32 %v711_v17, %v709_v62  ;;  %v609_v31 = vsel %vm139_vm0, %v608_v11, 0.0  ;;  %2125 = vmatpush1.msra.mxu1 %v2023_v40  ;;  %v2015_v60 = vld [vmem:[#allocation8 + $0x110] sm:$0xff] }
 0x80a   :  { %1927 = vadd.xlane.f32.xlu0 %v1926_v18  ;;  %1953 = vadd.xlane.f32.xlu1 %v1952_v24  ;;  %v761_v39 = vpop.xlane.xlu1 %760  ;;  %v764_v50 = vshll.u32 %v763_v0, 16  ;;  %v2452_v48 = vsel %vm139_vm0, %v2451_v32, 0.0  ;;  %v689_v18 = vsel %vm139_vm0, %v688_v47, 0.0  ;;  %v741_v24 = vsel %vm740_vm10, %v6142_v57, 0.0  ;;  %v2007_v46 = vld [vmem:[#allocation8 + $0xd0] sm:$0xff]  ;;  %v1520_v22 = vpop.xlane.xlu0 %1519  ;;  %v1984_v47 = vld [vmem:[#allocation8 + $0x18] sm:$0xff] }
 0x80b   :  { %v762_v35 = vcvt.f32.s32 %v761_v39  ;;  %vm660_vm5 = vcmp.eq.s32.totalorder %v5340_v58, %v659_v6  ;;  %vm713_vm11 = vcmp.eq.s32.totalorder %v5340_v58, %v712_v61  ;;  %v742_v38 = vsel %vm139_vm0, %v741_v24, 0.0  ;;  %2126 = vmatprep.subr.mxu1 %v2016_v2  ;;  %v1983_v24 = vld [vmem:[#allocation8 + $0x10] sm:$0xff] }
 0x80c   :  { %v661_v59 = vsel %vm660_vm5, %v6142_v57, 0.0  ;;  %v714_v34 = vsel %vm713_vm11, %v6142_v57, 0.0  ;;  %2127 = vmatpush1.msra.mxu1 %v2015_v60  ;;  %vm771_vm10 = vcmask 7168   ;;  %vm7433_vm14 = vcmask 56320  }
 0x80d   :  { %v765_v21 = vadd.s32 %v764_v50, %v762_v35  ;;  %v662_v53 = vsel %vm139_vm0, %v661_v59, 0.0  ;;  %v715_v55 = vsel %vm139_vm0, %v714_v34, 0.0  ;;  %v1703_v11 = vsel %vm771_vm10, %v5582_v5, %v5942_v26  ;;  %v1999_v50 = vld [vmem:[#allocation8 + $0x90] sm:$0xff]  ;;  %v1989_v59 = vld [vmem:[#allocation8 + $0x40] sm:$0xff] }
 0x80e   :  { %2479 = vadd.xlane.f32.xlu0 %v2478_v33  ;;  %2476 = vadd.xlane.f32.xlu1 %v2475_v13  ;;  %v2014_v13 = vld [vmem:[#allocation8 + $0x108] sm:$0xff]  ;;  %v1572_v6 = vpop.xlane.xlu1 %1571  ;;  %v1772_v62 = vpop.xlane.xlu0 %1771  ;;  %v1704_v17 = vsel %vm773_vm12, %v1703_v11, %v5590_v19  ;;  %vm7442_vm15 = vcmask 72704   ;;  %vm7465_vm2 = vcmask 64512   ;;  %vm7441_vm3 = vcmask 80896   ;;  %v7467_v11 = vld [vmem:[#allocation25_spill] sm:$0xff] }
 0x80f   :  { %vm766_vm13 = vcmp.eq.s32.totalorder %v5340_v58, %v765_v21  ;;  %2055 = vmatprep.subr.mxu0 %v2014_v13  ;;  %v1705_v0 = vsel %vm775_vm9, %v1704_v17, %v5950_v23  ;;  %vm7440_vm1 = vcmask 89088   ;;  %v1991_v21 = vld [vmem:[#allocation8 + $0x50] sm:$0xff]  ;;  %vm7466_vm4 = vmmov %vm7465_vm2  ;;  %vm7439_vm5 = vcmask 97280   ;;  %v7468_v17 = vld [vmem:[#allocation22_spill] sm:$0xff] }
 0x810   :  { %v767_v15 = vsel %vm766_vm13, %v6142_v57, 0.0  ;;  %v2008_v57 = vld [vmem:[#allocation8 + $0xd8] sm:$0xff]  ;;  %2056 = vmatpush1.msra.mxu0 %v2013_v45  ;;  %v1706_v5 = vsel %vm7430_vm6, %v1705_v0, %v5624_v30  ;;  %vm7438_vm11 = vcmask 105472   ;;  %vm7434_vm13 = vcmask 113664  }
 0x811   :  { %v768_v33 = vsel %vm139_vm0, %v767_v15, 0.0  ;;  %2128 = vmatprep.subr.mxu1 %v2008_v57  ;;  %v1707_v19 = vsel %vm7431_vm7, %v1706_v5, %v5976_v28  ;;  %v772_v0 = vsel %vm771_vm10, %v7468_v17, %v7467_v11 }
 0x812   :  { %2473 = vadd.xlane.f32.xlu0 %v2472_v20  ;;  %2470 = vadd.xlane.f32.xlu1 %v2469_v12  ;;  %v2006_v20 = vld [vmem:[#allocation8 + $0xc8] sm:$0xff]  ;;  %v2000_v12 = vld [vmem:[#allocation8 + $0x98] sm:$0xff]  ;;  %v6283_v39 = vpop.xlane.xlu1 %1623  ;;  %v1824_v32 = vpop.xlane.xlu0 %1823 }
 0x813   :  { %2057 = vmatprep.subr.mxu0 %v2006_v20  ;;  %2129 = vmatpush1.msra.mxu1 %v2007_v46 }
 0x814   :  { %2058 = vmatpush1.msra.mxu0 %v2005_v4  ;;  %2130 = vmatprep.subr.mxu1 %v2000_v12 }
 0x815   :  { %2059 = vmatprep.subr.mxu0 %v1998_v43  ;;  %2131 = vmatpush1.msra.mxu1 %v1999_v50 }
 0x816   :  { %584 = vadd.xlane.f32.xlu0 %v583_v8  ;;  %610 = vadd.xlane.f32.xlu1 %v609_v31  ;;  %v1955_v8 = vsel %vm771_vm10, %v5601_v14, %v5961_v42  ;;  %v6295_v49 = vpop.xlane.xlu1 %1675  ;;  %v1708_v14 = vsel %vm7432_vm8, %v1707_v19, %v5645_v41  ;;  %v1876_v42 = vpop.xlane.xlu0 %1875  ;;  %v1997_v31 = vld [vmem:[#allocation8 + $0x80] sm:$0xff] }
 0x817   :  { %v1956_v26 = vsel %vm773_vm12, %v1955_v8, %v5604_v16  ;;  %v1709_v16 = vsel %vm7433_vm14, %v1708_v14, %v5993_v9  ;;  %2060 = vmatpush1.msra.mxu0 %v1997_v31 }
 0x818   :  { %v1957_v23 = vsel %vm775_vm9, %v1956_v26, %v5973_v37  ;;  %v1710_v35 = vsel %vm7465_vm2, %v1709_v16, %v1520_v22  ;;  %vm7437_vm2 = vcmask 121856   ;;  %v7470_v26 = vld [vmem:[#allocation26_spill] sm:$0xff] }
 0x819   :  { %v1958_v30 = vsel %vm7430_vm6, %v1957_v23, %v5621_v27  ;;  %v1992_v27 = vld [vmem:[#allocation8 + $0x58] sm:$0xff] }
 0x81a   :  { %637 = vadd.xlane.f32.xlu0 %v636_v36  ;;  %2453 = vadd.xlane.f32.xlu1 %v2452_v48  ;;  %v1959_v28 = vsel %vm7431_vm7, %v1958_v30, %v5991_v51  ;;  %v1990_v36 = vld [vmem:[#allocation8 + $0x48] sm:$0xff] }
 0x81b   :  { %v1960_v9 = vsel %vm7432_vm8, %v1959_v28, %v5643_v25  ;;  %2061 = vmatprep.subr.mxu0 %v1990_v36  ;;  %2132 = vmatprep.subr.mxu1 %v1992_v27  ;;  %v1982_v51 = vld [vmem:[#allocation8 + $0x8] sm:$0xff]  ;;  %v7474_v36 = vld [vmem:[#allocation28_spill] sm:$0xff] }
 0x81c   :  { %v1961_v34 = vsel %vm7433_vm14, %v1960_v9, %v6012_v52  ;;  %2062 = vmatpush1.msra.mxu0 %v1989_v59  ;;  %2133 = vmatpush1.msra.mxu1 %v1991_v21  ;;  %v2026_v25 = vld [vmem:[#allocation8 + $0x168] sm:$0xff] }
 0x81d   :  { %2063 = vmatprep.subr.mxu0 %v1982_v51  ;;  %2134 = vmatprep.subr.mxu1 %v1984_v47  ;;  %v7472_v30 = vld [vmem:[#allocation27_spill] sm:$0xff] }
 0x81e   :  { %663 = vadd.xlane.f32.xlu0 %v662_v53  ;;  %690 = vadd.xlane.f32.xlu1 %v689_v18  ;;  %v1981_v53 = vld [vmem:[#allocation8] sm:$0xff] }
 0x81f   :  { %2064 = vmatpush1.msra.mxu0 %v1981_v53  ;;  %2135 = vmatpush1.msra.mxu1 %v1983_v24 }
 0x820   :  { %2195 = vmatprep.subr.mxu0 %v2026_v25 }
 0x822   :  { %716 = vadd.xlane.f32.xlu0 %v715_v55  ;;  %743 = vadd.xlane.f32.xlu1 %v742_v38  ;;  %v1962_v55 = vsel %vm7466_vm4, %v1961_v34, %v1772_v62  ;;  %v2028_v38 = vld [vmem:[#allocation8 + $0x178] sm:$0xff] }
 0x823   :  { %2266 = vmatprep.subr.mxu1 %v2028_v38 }
 0x826   :  { %769 = vadd.xlane.f32.xlu0 %v768_v33 }
 0x87f   :  { %v1546_v61 = vpop.xlane.xlu1 %1545 }
 0x880   :  { %v1711_v37 = vsel %vm7442_vm15, %v1710_v35, %v1546_v61  ;;  %v7471_v61 = vld [vmem:[#allocation24_spill] sm:$0xff] }
 0x881   :  { %v1712_v18 = vsel %vm7441_vm3, %v1711_v37, %v1572_v6  ;;  %v7473_v37 = vld [vmem:[#allocation23_spill] sm:$0xff] }
 0x883   :  { %v1598_v41 = vpop.xlane.xlu1 %1597 }
 0x884   :  { %v1713_v15 = vsel %vm7440_vm1, %v1712_v18, %v1598_v41 }
 0x885   :  { %v1714_v1 = vsel %vm7439_vm5, %v1713_v15, %v6283_v39 }
 0x887   :  { %v1798_v48 = vpop.xlane.xlu0 %1797 }
 0x888   :  { %v1963_v33 = vsel %vm7442_vm15, %v1962_v55, %v1798_v48 }
 0x889   :  { %v1964_v40 = vsel %vm7441_vm3, %v1963_v33, %v1824_v32  ;;  %v7469_v32 = vld [vmem:[#allocation21_spill] sm:$0xff] }
 0x88b   :  { %v1850_v3 = vpop.xlane.xlu0 %1849  ;;  %v1650_v52 = vpop.xlane.xlu1 %1649 }
 0x88c   :  { %v1715_v44 = vsel %vm7438_vm11, %v1714_v1, %v1650_v52  ;;  %v1965_v13 = vsel %vm7440_vm1, %v1964_v40, %v1850_v3 }
 0x88d   :  { %v1716_v60 = vsel %vm7434_vm13, %v1715_v44, %v6295_v49  ;;  %v1966_v57 = vsel %vm7439_vm5, %v1965_v13, %v1876_v42  ;;  %v774_v49 = vsel %vm773_vm12, %v772_v0, %v7469_v32  ;;  %v2027_v0 = vld [vmem:[#allocation8 + $0x170] sm:$0xff] }
 0x88e   :  { %v776_v19 = vsel %vm775_vm9, %v774_v49, %v7470_v26  ;;  %v2020_v26 = vld [vmem:[#allocation8 + $0x138] sm:$0xff] }
 0x88f   :  { %v1902_v2 = vpop.xlane.xlu0 %1901  ;;  %v1702_v45 = vpop.xlane.xlu1 %1701  ;;  %v778_v14 = vsel %vm7430_vm6, %v776_v19, %v7471_v61  ;;  %vm7475_vm6 = vcmask 64512   ;;  %v2017_v19 = vld [vmem:[#allocation8 + $0x120] sm:$0xff] }
 0x890   :  { %v1717_v20 = vsel %vm7437_vm2, %v1716_v60, %v1702_v45  ;;  %v1967_v4 = vsel %vm7438_vm11, %v1966_v57, %v1902_v2  ;;  %v780_v16 = vsel %vm7431_vm7, %v778_v14, %v7472_v30  ;;  %v2012_v30 = vld [vmem:[#allocation8 + $0xf8] sm:$0xff] }
 0x891   :  { %1971 = vrot.lane.b32.xlu1 %v1717_v20, %s5226_s15  ;;  %v782_v31 = vsel %vm7432_vm8, %v780_v16, %v7473_v37  ;;  %v2009_v37 = vld [vmem:[#allocation8 + $0xe0] sm:$0xff] }
 0x892   :  { %v784_v41 = vsel %vm7433_vm14, %v782_v31, %v7474_v36  ;;  %v2011_v31 = vld [vmem:[#allocation8 + $0xf0] sm:$0xff]  ;;  %v2004_v36 = vld [vmem:[#allocation8 + $0xb8] sm:$0xff] }
 0x893   :  { %v1928_v46 = vpop.xlane.xlu0 %1927  ;;  %v1954_v12 = vpop.xlane.xlu1 %1953 }
 0x894   :  { %v1968_v43 = vsel %vm7434_vm13, %v1967_v4, %v1928_v46 }
 0x895   :  { %v1969_v22 = vsel %vm7437_vm2, %v1968_v43, %v1954_v12 }
 0x896   :  { %1975 = vrot.lane.b32.xlu0 %v1969_v22, %s5221_s30 }
 0x897   :  { %v2480_v6 = vpop.xlane.xlu0 %2479  ;;  %v2477_v62 = vpop.xlane.xlu1 %2476 }
 0x898   :  { %5066 = vrsqrt.f32 %v2480_v6  ;;  %vm2504_vm4 = vcmp.eq.f32.partialorder %v2480_v6, inf  ;;  %v2507_v9 = vand.u32 2147483648, %v2480_v6  ;;  %vm2506_vm7 = vcmp.eq.f32.partialorder %v2480_v6, 0.0 }
 0x899   :  { %5068 = vrsqrt.f32 %v2477_v62  ;;  %vm2497_vm8 = vcmp.eq.f32.partialorder %v2477_v62, inf  ;;  %v2500_v15 = vand.u32 2147483648, %v2477_v62  ;;  %vm2499_vm14 = vcmp.eq.f32.partialorder %v2477_v62, 0.0 }
 0x89b   :  { %v6337_v39 = vpop.xlane.xlu0 %2473  ;;  %v6342_v8 = vpop.xlane.xlu1 %2470 }
 0x89c   :  { %5070 = vrsqrt.f32 %v6337_v39  ;;  %v2493_v2 = vand.u32 2147483648, %v6337_v39  ;;  %v2486_v22 = vand.u32 2147483648, %v6342_v8 }
 0x89d   :  { %5072 = vrsqrt.f32 %v6342_v8 }
 0x89f   :  { %v585_v5 = vpop.xlane.xlu0 %584  ;;  %v611_v23 = vpop.xlane.xlu1 %610 }
 0x8a0   :  { %v786_v59 = vsel %vm7475_vm6, %v784_v41, %v585_v5  ;;  %vm2490_vm6 = vcmp.eq.f32.partialorder %v6337_v39, inf  ;;  %v2018_v5 = vld [vmem:[#allocation8 + $0x128] sm:$0xff]  ;;  %v2001_v41 = vld [vmem:[#allocation8 + $0xa0] sm:$0xff] }
 0x8a1   :  { %v788_v53 = vsel %vm7442_vm15, %v786_v59, %v611_v23  ;;  %v2019_v23 = vld [vmem:[#allocation8 + $0x130] sm:$0xff]  ;;  %v1994_v59 = vld [vmem:[#allocation8 + $0x68] sm:$0xff] }
 0x8a3   :  { %v638_v42 = vpop.xlane.xlu0 %637  ;;  %v6354_v28 = vpop.xlane.xlu1 %2453 }
 0x8a4   :  { %5074 = vrsqrt.f32 %v6354_v28  ;;  %v790_v18 = vsel %vm7441_vm3, %v788_v53, %v638_v42  ;;  %v2460_v14 = vand.u32 2147483648, %v6354_v28  ;;  %v2010_v42 = vld [vmem:[#allocation8 + $0xe8] sm:$0xff] }
 0x8a5   :  { %v5067_v35 = vpop.eup %5066 }
 0x8a6   :  { %v2503_v48 = vmul.f32 %v5067_v35, %v2480_v6  ;;  %v5069_v27 = vpop.eup %5068 }
 0x8a7   :  { %v664_v50 = vpop.xlane.xlu0 %663  ;;  %v691_v21 = vpop.xlane.xlu1 %690  ;;  %v2496_v51 = vmul.f32 %v5069_v27, %v2477_v62 }
 0x8a8   :  { %v2505_v47 = vsel %vm2504_vm4, %v2480_v6, %v2503_v48  ;;  %v792_v55 = vsel %vm7440_vm1, %v790_v18, %v664_v50  ;;  %vm2483_vm4 = vcmp.eq.f32.partialorder %v6342_v8, inf  ;;  %v2002_v50 = vld [vmem:[#allocation8 + $0xa8] sm:$0xff]  ;;  %v2003_v48 = vld [vmem:[#allocation8 + $0xb0] sm:$0xff] }
 0x8a9   :  { %v5071_v34 = vpop.eup %5070  ;;  %v2508_v25 = vsel %vm2506_vm7, %v2507_v9, %v2505_v47  ;;  %v2498_v38 = vsel %vm2497_vm8, %v2477_v62, %v2496_v51  ;;  %v794_v1 = vsel %vm7439_vm5, %v792_v55, %v691_v21  ;;  %vm2492_vm7 = vcmp.eq.f32.partialorder %v6337_v39, 0.0  ;;  %v1996_v21 = vld [vmem:[#allocation8 + $0x78] sm:$0xff]  ;;  %v1995_v9 = vld [vmem:[#allocation8 + $0x70] sm:$0xff]  ;;  %v1986_v51 = vld [vmem:[#allocation8 + $0x28] sm:$0xff] }
 0x8aa   :  { %v2489_v33 = vmul.f32 %v5071_v34, %v6337_v39  ;;  %v5073_v52 = vpop.eup %5072  ;;  %v2512_v44 = vadd.f32 1e-13, %v2508_v25  ;;  %v2501_v13 = vsel %vm2499_vm14, %v2500_v15, %v2498_v38  ;;  %vm7436_vm8 = vcmask 130048   ;;  %v1988_v47 = vld [vmem:[#allocation8 + $0x38] sm:$0xff]  ;;  %v1985_v34 = vld [vmem:[#allocation8 + $0x20] sm:$0xff]  ;;  %v1987_v18 = vld [vmem:[#allocation8 + $0x30] sm:$0xff] }
 0x8ab   :  { %v717_v24 = vpop.xlane.xlu0 %716  ;;  %v744_v3 = vpop.xlane.xlu1 %743  ;;  %v2482_v20 = vmul.f32 %v5073_v52, %v6342_v8  ;;  %v2511_v43 = vadd.f32 1e-13, %v2501_v13  ;;  %vm7435_vm14 = vcmask 392192   ;;  %v7476_v55 = vmov 0.0   ;;  %v2363_v25 = vld [vmem:[#allocation10 + $0x78] sm:$0xff]  ;;  %v2361_v52 = vld [vmem:[#allocation10 + $0x68] sm:$0xff] }
 0x8ac   :  { %v796_v40 = vsel %vm7438_vm11, %v794_v1, %v717_v24  ;;  %v2491_v57 = vsel %vm2490_vm6, %v6337_v39, %v2489_v33  ;;  %5076 = vrcp.f32 %v2512_v44  ;;  %v2025_v39 = vld [vmem:[#allocation8 + $0x160] sm:$0xff]  ;;  %vm2485_vm6 = vcmp.eq.f32.partialorder %v6342_v8, 0.0  ;;  %v2362_v33 = vld [vmem:[#allocation10 + $0x70] sm:$0xff] }
 0x8ad   :  { %v798_v46 = vsel %vm7434_vm13, %v796_v40, %v744_v3  ;;  %v2494_v6 = vsel %vm2492_vm7, %v2493_v2, %v2491_v57  ;;  %v2484_v32 = vsel %vm2483_vm4, %v6342_v8, %v2482_v20  ;;  %vm2457_vm13 = vcmp.eq.f32.partialorder %v6354_v28, inf  ;;  %v7479_v20 = vld [vmem:[#allocation16_spill] sm:$0xff]  ;;  %v7481_v57 = vld [vmem:[#allocation18_spill] sm:$0xff] }
 0x8ae   :  { %5078 = vrcp.f32 %v2511_v43  ;;  %v2510_v61 = vadd.f32 1e-13, %v2494_v6  ;;  %v2487_v16 = vsel %vm2485_vm6, %v2486_v22, %v2484_v32  ;;  %vm2459_vm7 = vcmp.eq.f32.partialorder %v6354_v28, 0.0  ;;  %v2355_v43 = vld [vmem:[#allocation10 + $0x38] sm:$0xff]  ;;  %v2353_v22 = vld [vmem:[#allocation10 + $0x28] sm:$0xff]  ;;  %v2352_v6 = vld [vmem:[#allocation10 + $0x20] sm:$0xff] }
 0x8af   :  { %v770_v45 = vpop.xlane.xlu0 %769  ;;  %v2509_v8 = vadd.f32 1e-13, %v2487_v16  ;;  %vm7483_vm4 = vcmask 64512  }
 0x8b0   :  { %v800_v12 = vsel %vm7437_vm2, %v798_v46, %v770_v45  ;;  %5080 = vrcp.f32 %v2510_v61  ;;  %v2356_v46 = vld [vmem:[#allocation10 + $0x40] sm:$0xff] }
 0x8b1   :  { %v5075_v60 = vpop.eup %5074  ;;  %5082 = vrcp.f32 %v2509_v8 }
 0x8b2   :  { %v2456_v62 = vmul.f32 %v5075_v60, %v6354_v28  ;;  %v7478_v60 = vld [vmem:[#allocation15_spill] sm:$0xff] }
 0x8b4   :  { %v2458_v35 = vsel %vm2457_vm13, %v6354_v28, %v2456_v62  ;;  %v1993_v28 = vld [vmem:[#allocation8 + $0x60] sm:$0xff]  ;;  %vm7477_vm13 = vmmov 0   ;;  %v2351_v62 = vld [vmem:[#allocation10 + $0x18] sm:$0xff] }
 0x8b5   :  { %v2461_v27 = vsel %vm2459_vm7, %v2460_v14, %v2458_v35 }
 0x8b6   :  { %v2462_v53 = vadd.f32 1e-13, %v2461_v27 }
 0x8b8   :  { %5084 = vrcp.f32 %v2462_v53 }
 0x8b9   :  { %v5077_v24 = vpop.eup %5076 }
 0x8ba   :  { %v2520_v15 = vmul.f32 %v5077_v24, %v6210_v56 }
 0x8bb   :  { %v5079_v38 = vpop.eup %5078 }
 0x8bc   :  { %v2518_v3 = vmul.f32 %v5079_v38, %v6219_v63 }
 0x8bd   :  { %v5081_v1 = vpop.eup %5080 }
 0x8be   :  { %v2516_v44 = vmul.f32 %v5081_v1, %v6227_v10  ;;  %v5083_v40 = vpop.eup %5082 }
 0x8bf   :  { %v2514_v2 = vmul.f32 %v5083_v40, %v6233_v7 }
 0x8c5   :  { %v5085_v13 = vpop.eup %5084 }
 0x8c6   :  { %v2464_v45 = vmul.f32 %v5085_v13, %v6250_v54 }
 0x903   :  { %v1972_v4 = vpop.permute.xlu1 %1971 }
 0x904   :  { %v1979_v11 = vsel %vm7436_vm8, %v800_v12, %v1972_v4  ;;  %v2357_v4 = vld [vmem:[#allocation10 + $0x48] sm:$0xff]  ;;  %v2354_v12 = vld [vmem:[#allocation10 + $0x30] sm:$0xff] }
 0x908   :  { %v1976_v17 = vpop.permute.xlu0 %1975 }
 0x909   :  { %v1980_v49 = vsel %vm139_vm0, %v1979_v11, %v1976_v17  ;;  %v2350_v11 = vld [vmem:[#allocation10 + $0x10] sm:$0xff]  ;;  %v2349_v17 = vld [vmem:[#allocation10 + $0x8] sm:$0xff] }
 0x90a   :  { %4741 = vmatmul.mubr.msk.f32.vlgmr.msra.gmra.mxu0 %vm7435_vm14, %v1980_v49  ;;  %4742 = vmatmul.mubr.msk.f32.vlgmr.msra.gmra.mxu1 %vm7435_vm14, %v1980_v49 }
 0x90b   :  { %2196 = vmatpush1.msra.mxu0 %v2025_v39  ;;  %2267 = vmatpush1.msra.mxu1 %v2027_v0  ;;  %v2348_v39 = vld [vmem:[#allocation10] sm:$0xff] }
 0x90c   :  { %2197 = vmatprep.subr.mxu0 %v2018_v5  ;;  %2268 = vmatprep.subr.mxu1 %v2020_v26 }
 0x90d   :  { %2198 = vmatpush1.msra.mxu0 %v2017_v19  ;;  %2269 = vmatpush1.msra.mxu1 %v2019_v23 }
 0x90e   :  { %2199 = vmatprep.subr.mxu0 %v2010_v42  ;;  %2270 = vmatprep.subr.mxu1 %v2012_v30 }
 0x90f   :  { %2200 = vmatpush1.msra.mxu0 %v2009_v37  ;;  %2271 = vmatpush1.msra.mxu1 %v2011_v31  ;;  %v2606_v31 = vsel %vm139_vm0, %v6250_v54, 0.0 }
 0x910   :  { %2201 = vmatprep.subr.mxu0 %v2002_v50  ;;  %2272 = vmatprep.subr.mxu1 %v2004_v36  ;;  %v2607_v27 = vrot.slane %v2606_v31, 4 }
 0x911   :  { %2202 = vmatpush1.msra.mxu0 %v2001_v41  ;;  %2273 = vmatpush1.msra.mxu1 %v2003_v48 }
 0x912   :  { %2203 = vmatprep.subr.mxu0 %v1994_v59  ;;  %2274 = vmatprep.subr.mxu1 %v1996_v21 }
 0x913   :  { %2204 = vmatpush1.msra.mxu0 %v1993_v28  ;;  %2275 = vmatpush1.msra.mxu1 %v1995_v9  ;;  %v2345_v28 = vld [vmem:[%s7397_s5] sm:$0x1] }
 0x914   :  { %2205 = vmatprep.subr.mxu0 %v1986_v51  ;;  %2276 = vmatprep.subr.mxu1 %v1988_v47  ;;  %v2608_v51 = vadd.f32 %v2607_v27, %v2606_v31 }
 0x915   :  { %2206 = vmatpush1.msra.mxu0 %v1985_v34  ;;  %2239 = vmatprep.mubr.f32.mxu0 %v7476_v55 }
 0x916   :  { %2277 = vmatpush1.msra.mxu1 %v1987_v18  ;;  %2310 = vmatprep.mubr.f32.mxu1 %v7476_v55  ;;  %v2609_v34 = vrot.slane %v2608_v51, 2 }
 0x917   :  { %4743 = vmatmul.mubr.msk.f32.vlgmr.msra.gmra.mxu0 %vm7435_vm14, %v1980_v49  ;;  %4744 = vmatmul.mubr.msk.f32.vlgmr.msra.gmra.mxu1 %vm7435_vm14, %v1980_v49 }
 0x918   :  { %4930 = vmatprep.subr.mxu1 %v7476_v55  ;;  %4938 = vmatprep.mubr.msk.f32.mxu1 %vm7477_vm13, %v7476_v55  ;;  %v2610_v18 = vadd.f32 %v2609_v34, %v2608_v51 }
 0x919   :  { %4931 = vmatpush3.xpose.msk.msra.mxu1 %vm139_vm0, %v2520_v15  ;;  %4895 = vmatprep.subr.mxu0 %v7476_v55  ;;  %v7482_v15 = vld [vmem:[#allocation19_spill] sm:$0xff] }
 0x91a   :  { %4932 = vmatprep.subr.mxu1 %v7476_v55  ;;  %4896 = vmatpush3.msra.mxu0 %v2363_v25  ;;  %v2611_v25 = vrot.slane %v2610_v18, 1 }
 0x91b   :  { %4897 = vmatprep.subr.mxu0 %v7476_v55  ;;  %4927 = vmatprep.mubr.msk.f32.mxu0 %vm7477_vm13, %v7476_v55 }
 0x91c   :  { %4898 = vmatpush3.msra.mxu0 %v2362_v33  ;;  %v2612_v33 = vadd.f32 %v2611_v25, %v2610_v18 }
 0x91d   :  { %4933 = vmatpush3.xpose.msk.msra.mxu1 %vm139_vm0, %v2518_v3  ;;  %4899 = vmatprep.subr.mxu0 %v7476_v55 }
 0x91e   :  { %4934 = vmatprep.subr.mxu1 %v7476_v55  ;;  %4900 = vmatpush3.msra.mxu0 %v2361_v52  ;;  %v6473_v40 = vmul.f32 0.125, %v2612_v33 }
 0x91f   :  { %4901 = vmatprep.subr.mxu0 %v7476_v55 }
 0x921   :  { %4935 = vmatpush3.xpose.msk.msra.mxu1 %vm139_vm0, %v2516_v44 }
 0x922   :  { %4936 = vmatprep.subr.mxu1 %v7476_v55 }
 0x925   :  { %4937 = vmatpush3.xpose.msk.msra.mxu1 %vm139_vm0, %v2514_v2 }
 0x926   :  { %4941 = vmatprep.subr.mxu1 %v6210_v56 }
 0x928   :  { %4939 = vmatmul.mubr.msk.f32.vlgmr.msra.gmra.mxu1 %vm139_vm0, %v2464_v45 }
 0x929   :  { %4942 = vmatpush3.msra.mxu1 %v6210_v56  ;;  %4949 = vmatprep.mubr.msk.f32.mxu1 %vm139_vm0, %v7478_v60  ;;  %v7480_v56 = vld [vmem:[#allocation17_spill] sm:$0xff] }
 0x92a   :  { %4943 = vmatprep.subr.mxu1 %v6219_v63 }
 0x92b   :  { %4944 = vmatpush3.msra.mxu1 %v6219_v63  ;;  %v2360_v63 = vld [vmem:[#allocation10 + $0x60] sm:$0xff] }
 0x92c   :  { %4945 = vmatprep.subr.mxu1 %v6227_v10  ;;  %4902 = vmatpush3.msra.mxu0 %v2360_v63 }
 0x92d   :  { %4946 = vmatpush3.msra.mxu1 %v6227_v10  ;;  %4903 = vmatprep.subr.mxu0 %v7476_v55  ;;  %v2359_v10 = vld [vmem:[#allocation10 + $0x58] sm:$0xff] }
 0x92e   :  { %4947 = vmatprep.subr.mxu1 %v6233_v7  ;;  %4904 = vmatpush3.msra.mxu0 %v2359_v10 }
 0x92f   :  { %4948 = vmatpush3.msra.mxu1 %v6233_v7  ;;  %4905 = vmatprep.subr.mxu0 %v7476_v55  ;;  %v2358_v7 = vld [vmem:[#allocation10 + $0x50] sm:$0xff] }
 0x930   :  { %4950 = vmatmul.mubr.msk.f32.vlgmr.msra.gmra.mxu1 %vm139_vm0, %v7479_v20  ;;  %4955 = vmatprep.subr.mxu1 %v7476_v55 }
 0x931   :  { %4952 = vmatprep.mubr.msk.f32.mxu1 %vm139_vm0, %v7480_v56  ;;  %4906 = vmatpush3.msra.mxu0 %v2358_v7  ;;  %v3180_v7 = vld [vmem:[#allocation7 + $0xe8] sm:$0xff] }
 0x932   :  { %4907 = vmatprep.subr.mxu0 %v7476_v55 }
 0x933   :  { %4908 = vmatpush3.msra.mxu0 %v2357_v4  ;;  %v3179_v4 = vld [vmem:[#allocation7 + $0xe0] sm:$0xff] }
 0x934   :  { %4953 = vmatmul.mubr.msk.f32.gmra.mxu1 %vm139_vm0, %v7481_v57  ;;  %4909 = vmatprep.subr.mxu0 %v7476_v55  ;;  %v2614_v57 = vmul.f32 %v6473_v40, %v6473_v40 }
 0x935   :  { %4963 = vmatprep.mubr.msk.f32.mxu1 %vm7477_vm13, %v7476_v55  ;;  %4910 = vmatpush3.msra.mxu0 %v2356_v46  ;;  %v3176_v46 = vld [vmem:[#allocation7 + $0xc8] sm:$0xff] }
 0x936   :  { %4911 = vmatprep.subr.mxu0 %v7476_v55  ;;  %v2615_v10 = vsel %vm139_vm0, %v2614_v57, 0.0 }
 0x937   :  { %4912 = vmatpush3.msra.mxu0 %v2355_v43  ;;  %v3175_v43 = vld [vmem:[#allocation7 + $0xc0] sm:$0xff] }
 0x938   :  { %4913 = vmatprep.subr.mxu0 %v7476_v55 }
 0x939   :  { %4914 = vmatpush3.msra.mxu0 %v2354_v12  ;;  %v3172_v12 = vld [vmem:[#allocation7 + $0xa8] sm:$0xff] }
 0x93a   :  { %4915 = vmatprep.subr.mxu0 %v7476_v55 }
 0x93b   :  { %4916 = vmatpush3.msra.mxu0 %v2353_v22  ;;  %v3171_v22 = vld [vmem:[#allocation7 + $0xa0] sm:$0xff] }
 0x93c   :  { %4917 = vmatprep.subr.mxu0 %v7476_v55 }
 0x93d   :  { %4918 = vmatpush3.msra.mxu0 %v2352_v6  ;;  %v3168_v6 = vld [vmem:[#allocation7 + $0x88] sm:$0xff] }
 0x93e   :  { %4919 = vmatprep.subr.mxu0 %v7476_v55 }
 0x93f   :  { %4920 = vmatpush3.msra.mxu0 %v2351_v62  ;;  %v3167_v62 = vld [vmem:[#allocation7 + $0x80] sm:$0xff] }
 0x940   :  { %4921 = vmatprep.subr.mxu0 %v7476_v55 }
 0x941   :  { %4922 = vmatpush3.msra.mxu0 %v2350_v11  ;;  %v3094_v11 = vld [vmem:[#allocation7 + $0x68] sm:$0xff] }
 0x942   :  { %4923 = vmatprep.subr.mxu0 %v7476_v55 }
 0x943   :  { %4924 = vmatpush3.msra.mxu0 %v2349_v17 }
 0x944   :  { %4925 = vmatprep.subr.mxu0 %v7476_v55 }
 0x945   :  { %4926 = vmatpush3.msra.mxu0 %v2348_v39 }
 0x946   :  { %4966 = vmatprep.subr.mxu0 %v7476_v55 }
 0x9ca   :  { %v2099_v0 = vpop.f32.mrf.mxu0  ;;  %v2170_v5 = vpop.f32.mrf.mxu1 }
 0x9cb   :  { %v2322_v19 = vrot.slane %v2170_v5, 2 }
 0x9cc   :  { %v2101_v32 = vpop.f32.mrf.mxu0  ;;  %v2172_v23 = vpop.f32.mrf.mxu1 }
 0x9cd   :  { %v2318_v49 = vrot.slane %v2101_v32, 1  ;;  %v2326_v14 = vrot.slane %v2172_v23, 3 }
 0x9cf   :  { %v2320_v26 = vadd.f32 %v2318_v49, %v2099_v0 }
 0x9d1   :  { %v2324_v61 = vadd.f32 %v2322_v19, %v2320_v26 }
 0x9d3   :  { %v2328_v16 = vadd.f32 %v2326_v14, %v2324_v61 }
 0x9d7   :  { %v2241_v42 = vpop.f32.mrf.mxu0  ;;  %v2312_v30 = vpop.f32.mrf.mxu1 }
 0x9d8   :  { %v2330_v35 = vrot.slane %v2241_v42, 4  ;;  %v2338_v48 = vrot.slane %v2312_v30, 6 }
 0x9d9   :  { %v2243_v37 = vpop.f32.mrf.mxu0  ;;  %v2314_v41 = vpop.f32.mrf.mxu1 }
 0x9da   :  { %v2332_v50 = vadd.f32 %v2330_v35, %v2328_v16  ;;  %v2334_v36 = vrot.slane %v2243_v37, 5  ;;  %v2342_v21 = vrot.slane %v2314_v41, 7 }
 0x9dc   :  { %v2336_v8 = vadd.f32 %v2334_v36, %v2332_v50 }
 0x9de   :  { %v2340_v59 = vadd.f32 %v2338_v48, %v2336_v8 }
 0x9e0   :  { %v2344_v9 = vadd.f32 %v2342_v21, %v2340_v59 }
 0x9e2   :  { %v2346_v47 = vadd.f32 %v2345_v28, %v2344_v9 }
 0x9e4   :  { %v2347_v53 = vmax.f32 %v2346_v47, 0.0 }
 0x9e6   :  { %4928 = vmatmul.mubr.f32.vlgmr.msra.gmra.mxu0 %v2347_v53 }
 0x9e7   :  { %4968 = vmatprep.mubr.msk.f32.mxu0 %vm7477_vm13, %v7476_v55 }
 0x9e8   :  { %v6457_v54 = vpop.f32.mrf.mxu1 }
 0x9e9   :  { %4967 = vmatpush3.msra.mxu0 %v6457_v54 }
 0x9ea   :  { %v4940_v24 = vpop.f32.mrf.mxu1  ;;  %4969 = vmatmul.mubr.msk.f32.vlgmr.msra.gmra.mxu0 %vm7483_vm4, %v7482_v15  ;;  %3210 = vmatprep.subr.mxu0 %v3180_v7 }
 0x9eb   :  { %3250 = vmatprep.mubr.f32.mxu0 %v7476_v55  ;;  %3211 = vmatpush1.msra.mxu0 %v3179_v4  ;;  %v3086_v4 = vld [vmem:[#allocation7 + $0x28] sm:$0xff] }
 0x9ec   :  { %3212 = vmatprep.subr.mxu0 %v3176_v46 }
 0x9ed   :  { %3213 = vmatpush1.msra.mxu0 %v3175_v43 }
 0x9ee   :  { %3214 = vmatprep.subr.mxu0 %v3172_v12  ;;  %v3082_v12 = vld [vmem:[#allocation7 + $0x8] sm:$0xff] }
 0x9ef   :  { %3215 = vmatpush1.msra.mxu0 %v3171_v22  ;;  %v3081_v22 = vld [vmem:[#allocation7] sm:$0xff] }
 0x9f0   :  { %v6463_v38 = vpop.f32.mrf.mxu1  ;;  %3216 = vmatprep.subr.mxu0 %v3168_v6 }
 0x9f1   :  { %v2714_v1 = vmul.f32 %v6463_v38, %v6463_v38  ;;  %3217 = vmatpush1.msra.mxu0 %v3167_v62 }
 0x9f2   :  { %v6465_v3 = vpop.f32.mrf.mxu1  ;;  %3355 = vmatprep.subr.mxu0 %v3094_v11  ;;  %v3181_v11 = vld [vmem:[#allocation7 + $0xf0] sm:$0xff] }
 0x9f3   :  { %v2713_v2 = vmul.f32 %v6465_v3, %v6465_v3  ;;  %v2720_v56 = vsel %vm139_vm0, %v2714_v1, 0.0 }
 0x9f4   :  { %v6467_v52 = vpop.f32.mrf.mxu1 }
 0x9f5   :  { %v2716_v44 = vmul.f32 %v6467_v52, %v6467_v52  ;;  %v2717_v63 = vsel %vm139_vm0, %v2713_v2, 0.0 }
 0x9f6   :  { %v6475_v13 = vpop.f32.mrf.mxu1 }
 0x9f7   :  { %v2715_v45 = vmul.f32 %v6475_v13, %v6475_v13  ;;  %v2726_v60 = vsel %vm139_vm0, %v2716_v44, 0.0 }
 0x9f8   :  { %2727 = vadd.xlane.f32.xlu1 %v2726_v60 }
 0x9f9   :  { %v2723_v20 = vsel %vm139_vm0, %v2715_v45, 0.0 }
 0x9fa   :  { %2724 = vadd.xlane.f32.xlu0 %v2723_v20 }
 0x9fc   :  { %2721 = vadd.xlane.f32.xlu1 %v2720_v56  ;;  %v3093_v56 = vld [vmem:[#allocation7 + $0x60] sm:$0xff] }
 0x9fe   :  { %2718 = vadd.xlane.f32.xlu0 %v2717_v63  ;;  %v3090_v63 = vld [vmem:[#allocation7 + $0x48] sm:$0xff] }
 0xa00   :  { %2616 = vadd.xlane.f32.xlu1 %v2615_v10 }
 0xa81   :  { %v2728_v17 = vpop.xlane.xlu1 %2727 }
 0xa82   :  { %5086 = vrsqrt.f32 %v2728_v17  ;;  %vm2752_vm6 = vcmp.eq.f32.partialorder %v2728_v17, inf  ;;  %v2755_v26 = vand.u32 2147483648, %v2728_v17  ;;  %vm2754_vm7 = vcmp.eq.f32.partialorder %v2728_v17, 0.0 }
 0xa83   :  { %v2725_v39 = vpop.xlane.xlu0 %2724 }
 0xa84   :  { %5088 = vrsqrt.f32 %v2725_v39  ;;  %vm2745_vm4 = vcmp.eq.f32.partialorder %v2725_v39, inf  ;;  %v2748_v61 = vand.u32 2147483648, %v2725_v39  ;;  %vm2747_vm14 = vcmp.eq.f32.partialorder %v2725_v39, 0.0 }
 0xa85   :  { %v2722_v0 = vpop.xlane.xlu1 %2721 }
 0xa86   :  { %5090 = vrsqrt.f32 %v2722_v0  ;;  %vm2738_vm8 = vcmp.eq.f32.partialorder %v2722_v0, inf  ;;  %v2741_v35 = vand.u32 2147483648, %v2722_v0  ;;  %vm2740_vm2 = vcmp.eq.f32.partialorder %v2722_v0, 0.0 }
 0xa87   :  { %v2719_v32 = vpop.xlane.xlu0 %2718 }
 0xa88   :  { %5092 = vrsqrt.f32 %v2719_v32  ;;  %vm2731_vm11 = vcmp.eq.f32.partialorder %v2719_v32, inf  ;;  %vm2733_vm5 = vcmp.eq.f32.partialorder %v2719_v32, 0.0  ;;  %v2734_v48 = vand.u32 2147483648, %v2719_v32 }
 0xa89   :  { %v2617_v49 = vpop.xlane.xlu1 %2616 }
 0xa8a   :  { %5094 = vrsqrt.f32 %v2617_v49  ;;  %vm2622_vm1 = vcmp.eq.f32.partialorder %v2617_v49, 0.0  ;;  %v2623_v9 = vand.u32 2147483648, %v2617_v49 }
 0xa8f   :  { %v5087_v5 = vpop.eup %5086 }
 0xa90   :  { %v2751_v19 = vmul.f32 %v5087_v5, %v2728_v17  ;;  %v3096_v5 = vld [vmem:[#allocation7 + $0x78] sm:$0xff] }
 0xa91   :  { %v5089_v23 = vpop.eup %5088 }
 0xa92   :  { %v2753_v14 = vsel %vm2752_vm6, %v2728_v17, %v2751_v19  ;;  %v2744_v42 = vmul.f32 %v5089_v23, %v2725_v39  ;;  %vm2620_vm6 = vcmp.eq.f32.partialorder %v2617_v49, inf  ;;  %v3178_v17 = vld [vmem:[#allocation7 + $0xd8] sm:$0xff]  ;;  %v3091_v23 = vld [vmem:[#allocation7 + $0x50] sm:$0xff] }
 0xa93   :  { %v5091_v30 = vpop.eup %5090  ;;  %v2756_v16 = vsel %vm2754_vm7, %v2755_v26, %v2753_v14  ;;  %v3095_v26 = vld [vmem:[#allocation7 + $0x70] sm:$0xff]  ;;  %v3092_v19 = vld [vmem:[#allocation7 + $0x58] sm:$0xff] }
 0xa94   :  { %v2760_v37 = vadd.f32 1e-13, %v2756_v16  ;;  %v2746_v31 = vsel %vm2745_vm4, %v2725_v39, %v2744_v42  ;;  %v2737_v50 = vmul.f32 %v5091_v30, %v2722_v0  ;;  %v7484_v39 = vld [vmem:[#allocation20_spill] sm:$0xff]  ;;  %v3084_v42 = vld [vmem:[#allocation7 + $0x18] sm:$0xff]  ;;  %v3556_v16 = vld [vmem:[#allocation7 + $0x168] sm:$0xff]  ;;  %vm7496_vm4 = vcmp.lt.s32.totalorder %v5340_v58, 32 }
 0xa95   :  { %v5093_v36 = vpop.eup %5092  ;;  %v2749_v41 = vsel %vm2747_vm14, %v2748_v61, %v2746_v31  ;;  %v3088_v61 = vld [vmem:[#allocation7 + $0x38] sm:$0xff]  ;;  %v3087_v14 = vld [vmem:[#allocation7 + $0x30] sm:$0xff]  ;;  %vm7494_vm14 = vcmp.lt.s32.totalorder %v5340_v58, 24 }
 0xa96   :  { %5096 = vrcp.f32 %v2760_v37  ;;  %v2759_v8 = vadd.f32 1e-13, %v2749_v41  ;;  %v2739_v27 = vsel %vm2738_vm8, %v2722_v0, %v2737_v50  ;;  %v2730_v59 = vmul.f32 %v5093_v36, %v2719_v32  ;;  %v3173_v0 = vld [vmem:[#allocation7 + $0xb0] sm:$0xff]  ;;  %v3555_v37 = vld [vmem:[#allocation7 + $0x160] sm:$0xff]  ;;  %v3552_v50 = vld [vmem:[#allocation7 + $0x148] sm:$0xff] }
 0xa97   :  { %v5095_v21 = vpop.eup %5094  ;;  %v2742_v28 = vsel %vm2740_vm2, %v2741_v35, %v2739_v27  ;;  %v3083_v30 = vld [vmem:[#allocation7 + $0x10] sm:$0xff]  ;;  %v3558_v35 = vld [vmem:[#allocation7 + $0x178] sm:$0xff]  ;;  %v3551_v41 = vld [vmem:[#allocation7 + $0x140] sm:$0xff] }
 0xa98   :  { %5098 = vrcp.f32 %v2759_v8  ;;  %v2758_v51 = vadd.f32 1e-13, %v2742_v28  ;;  %v2732_v47 = vsel %vm2731_vm11, %v2719_v32, %v2730_v59  ;;  %v2619_v53 = vmul.f32 %v5095_v21, %v2617_v49  ;;  %v3170_v32 = vld [vmem:[#allocation7 + $0x98] sm:$0xff]  ;;  %v3557_v31 = vld [vmem:[#allocation7 + $0x170] sm:$0xff]  ;;  %v3548_v8 = vld [vmem:[#allocation7 + $0x128] sm:$0xff] }
 0xa99   :  { %v2735_v34 = vsel %vm2733_vm5, %v2734_v48, %v2732_v47  ;;  %v3554_v36 = vld [vmem:[#allocation7 + $0x158] sm:$0xff]  ;;  %v3553_v48 = vld [vmem:[#allocation7 + $0x150] sm:$0xff]  ;;  %v3547_v59 = vld [vmem:[#allocation7 + $0x120] sm:$0xff]  ;;  %vm7490_vm5 = vcmp.lt.s32.totalorder %v5340_v58, 8  ;;  %vm7491_vm11 = vcmp.lt.s32.totalorder %v5340_v58, 16 }
 0xa9a   :  { %v2621_v18 = vsel %vm2620_vm6, %v2617_v49, %v2619_v53  ;;  %5100 = vrcp.f32 %v2758_v51  ;;  %v2757_v15 = vadd.f32 1e-13, %v2735_v34  ;;  %v3169_v49 = vld [vmem:[#allocation7 + $0x90] sm:$0xff]  ;;  %v3550_v27 = vld [vmem:[#allocation7 + $0x138] sm:$0xff]  ;;  %v3544_v28 = vld [vmem:[#allocation7 + $0x108] sm:$0xff] }
 0xa9b   :  { %v2624_v24 = vsel %vm2622_vm1, %v2623_v9, %v2621_v18  ;;  %vm7485_vm1 = vcmask 64512   ;;  %v3549_v21 = vld [vmem:[#allocation7 + $0x130] sm:$0xff]  ;;  %v3546_v9 = vld [vmem:[#allocation7 + $0x118] sm:$0xff]  ;;  %v3543_v51 = vld [vmem:[#allocation7 + $0x100] sm:$0xff] }
 0xa9c   :  { %v2625_v25 = vadd.f32 1e-13, %v2624_v24  ;;  %5102 = vrcp.f32 %v2757_v15  ;;  %v3545_v47 = vld [vmem:[#allocation7 + $0x110] sm:$0xff]  ;;  %vm7492_vm2 = vmmov %vm7490_vm5 }
 0xa9d   :  { %vm7493_vm8 = vmmov %vm7491_vm11 }
 0xa9e   :  { %5104 = vrcp.f32 %v2625_v25  ;;  %vm7495_vm7 = vmmov %vm7494_vm14 }
 0xa9f   :  { %vm7497_vm6 = vmmov %vm7496_vm4 }
 0xaa3   :  { %v5097_v33 = vpop.eup %5096 }
 0xaa4   :  { %v2768_v1 = vmul.f32 %v5097_v33, %v6467_v52  ;;  %v3089_v52 = vld [vmem:[#allocation7 + $0x40] sm:$0xff] }
 0xaa5   :  { %v5099_v44 = vpop.eup %5098 }
 0xaa6   :  { %4956 = vmatpush3.xpose.msk.msra.mxu1 %vm139_vm0, %v2768_v1  ;;  %v6490_v2 = vpop.f32.mrf.mxu0  ;;  %v2766_v60 = vmul.f32 %v5099_v44, %v6475_v13  ;;  %v3085_v13 = vld [vmem:[#allocation7 + $0x20] sm:$0xff] }
 0xaa7   :  { %4957 = vmatprep.subr.mxu1 %v7476_v55  ;;  %v5101_v20 = vpop.eup %5100 }
 0xaa8   :  { %v4929_v45 = vpop.f32.mrf.mxu0  ;;  %v2764_v7 = vmul.f32 %v5101_v20, %v6463_v38  ;;  %v3182_v38 = vld [vmem:[#allocation7 + $0xf8] sm:$0xff] }
 0xaa9   :  { %v5103_v46 = vpop.eup %5102 }
 0xaaa   :  { %4958 = vmatpush3.xpose.msk.msra.mxu1 %vm139_vm0, %v2766_v60  ;;  %v3163_v57 = vpop.f32.mrf.mxu0  ;;  %v2762_v6 = vmul.f32 %v5103_v46, %v6465_v3  ;;  %v3177_v3 = vld [vmem:[#allocation7 + $0xd0] sm:$0xff] }
 0xaab   :  { %4760 = vmatmul.mubr.msk.f32.vlgmr.msra.gmra.mxu0 %vm139_vm0, %v3163_v57  ;;  %4959 = vmatprep.subr.mxu1 %v7476_v55  ;;  %v5105_v43 = vpop.eup %5104 }
 0xaac   :  { %3356 = vmatpush1.msra.mxu0 %v3093_v56  ;;  %v4970_v10 = vpop.f32.mrf.mxu0  ;;  %3395 = vmatprep.mubr.f32.mxu0 %v7476_v55  ;;  %v2627_v62 = vmul.f32 %v5105_v43, %v6473_v40  ;;  %v3174_v40 = vld [vmem:[#allocation7 + $0xb8] sm:$0xff] }
 0xaad   :  { %3357 = vmatprep.subr.mxu0 %v3090_v63 }
 0xaae   :  { %4960 = vmatpush3.xpose.msk.msra.mxu1 %vm139_vm0, %v2764_v7  ;;  %3358 = vmatpush1.msra.mxu0 %v3089_v52  ;;  %v7486_v7 = vld [vmem:[#allocation14_spill] sm:$0xff] }
 0xaaf   :  { %3359 = vmatprep.subr.mxu0 %v3086_v4  ;;  %4961 = vmatprep.subr.mxu1 %v7476_v55  ;;  %v7487_v4 = vsub.s32 2, %v7486_v7 }
 0xab0   :  { %3360 = vmatpush1.msra.mxu0 %v3085_v13 }
 0xab1   :  { %3361 = vmatprep.subr.mxu0 %v3082_v12 }
 0xab2   :  { %4962 = vmatpush3.xpose.msk.msra.mxu1 %vm139_vm0, %v2762_v6  ;;  %3362 = vmatpush1.msra.mxu0 %v3081_v22 }
 0xab3   :  { %4762 = vmatmul.mubr.msk.f32.vlgmr.msra.gmra.mxu0 %vm139_vm0, %v6457_v54  ;;  %4971 = vmatprep.subr.mxu0 %v7476_v55 }
 0xab4   :  { %4972 = vmatpush3.msra.mxu0 %v6457_v54  ;;  %3281 = vmatprep.subr.mxu1 %v3182_v38 }
 0xab5   :  { %4964 = vmatmul.mubr.msk.f32.vlgmr.msra.gmra.mxu1 %vm139_vm0, %v2627_v62  ;;  %4973 = vmatprep.mubr.msk.f32.mxu0 %vm7477_vm13, %v7476_v55 }
 0xab6   :  { %3282 = vmatpush1.msra.mxu1 %v3181_v11  ;;  %3321 = vmatprep.mubr.f32.mxu1 %v7476_v55 }
 0xab7   :  { %3283 = vmatprep.subr.mxu1 %v3178_v17  ;;  %4974 = vmatmul.mubr.msk.f32.vlgmr.msra.gmra.mxu0 %vm7485_vm1, %v7484_v39  ;;  %v7488_v17 = vsub.s32 1, %v7486_v7  ;;  %vm7498_vm1 = vmmov %vm7493_vm8 }
 0xab8   :  { %3284 = vmatpush1.msra.mxu1 %v3177_v3  ;;  %3626 = vmatprep.mubr.f32.mxu0 %v7476_v55 }
 0xab9   :  { %3285 = vmatprep.subr.mxu1 %v3174_v40  ;;  %3586 = vmatprep.subr.mxu0 %v3556_v16 }
 0xaba   :  { %3286 = vmatpush1.msra.mxu1 %v3173_v0  ;;  %3587 = vmatpush1.msra.mxu0 %v3555_v37 }
 0xabb   :  { %3287 = vmatprep.subr.mxu1 %v3170_v32  ;;  %3588 = vmatprep.subr.mxu0 %v3552_v50 }
 0xabc   :  { %3288 = vmatpush1.msra.mxu1 %v3169_v49  ;;  %3589 = vmatpush1.msra.mxu0 %v3551_v41  ;;  %v7489_v49 = vsub.s32 3, %v7486_v7 }
 0xabd   :  { %4761 = vmatmul.mubr.msk.f32.vlgmr.msra.gmra.mxu1 %vm139_vm0, %v3163_v57  ;;  %3426 = vmatprep.subr.mxu1 %v3096_v5  ;;  %v3708_v57 = vld [vmem:[%s7395_s3] sm:$0xf] }
 0xabe   :  { %3427 = vmatpush1.msra.mxu1 %v3095_v26  ;;  %3466 = vmatprep.mubr.f32.mxu1 %v7476_v55  ;;  %v3713_v10 = vrot.slane %v3708_v57, %v5479_v29  ;;  %v3721_v46 = vrot.slane %v3708_v57, %v7487_v4  ;;  %v3717_v3 = vrot.slane %v3708_v57, %v7488_v17 }
 0xabf   :  { %3428 = vmatprep.subr.mxu1 %v3092_v19  ;;  %3590 = vmatprep.subr.mxu0 %v3548_v8  ;;  %v3725_v5 = vrot.slane %v3708_v57, %v7489_v49 }
 0xac0   :  { %3429 = vmatpush1.msra.mxu1 %v3091_v23  ;;  %3591 = vmatpush1.msra.mxu0 %v3547_v59 }
 0xac1   :  { %3430 = vmatprep.subr.mxu1 %v3088_v61  ;;  %3592 = vmatprep.subr.mxu0 %v3544_v28 }
 0xac2   :  { %3431 = vmatpush1.msra.mxu1 %v3087_v14  ;;  %3593 = vmatpush1.msra.mxu0 %v3543_v51 }
 0xac3   :  { %3432 = vmatprep.subr.mxu1 %v3084_v42 }
 0xac4   :  { %3433 = vmatpush1.msra.mxu1 %v3083_v30 }
 0xac5   :  { %4763 = vmatmul.mubr.msk.f32.vlgmr.msra.gmra.mxu1 %vm139_vm0, %v6457_v54  ;;  %3657 = vmatprep.subr.mxu1 %v3558_v35 }
 0xac6   :  { %3697 = vmatprep.mubr.f32.mxu1 %v7476_v55  ;;  %3658 = vmatpush1.msra.mxu1 %v3557_v31 }
 0xac7   :  { %3659 = vmatprep.subr.mxu1 %v3554_v36 }
 0xac8   :  { %3660 = vmatpush1.msra.mxu1 %v3553_v48 }
 0xac9   :  { %3661 = vmatprep.subr.mxu1 %v3550_v27 }
 0xaca   :  { %3662 = vmatpush1.msra.mxu1 %v3549_v21 }
 0xacb   :  { %3663 = vmatprep.subr.mxu1 %v3546_v9 }
 0xacc   :  { %3664 = vmatpush1.msra.mxu1 %v3545_v47 }
 0xb6b   :  { %v3252_v53 = vpop.f32.mrf.mxu0 }
 0xb6d   :  { %v3254_v34 = vpop.f32.mrf.mxu0 }
 0xb73   :  { %v3397_v18 = vpop.f32.mrf.mxu0 }
 0xb74   :  { %v3398_v24 = vadd.f32 %v3397_v18, %v3252_v53 }
 0xb75   :  { %v3399_v15 = vpop.f32.mrf.mxu0  ;;  %v6520_v25 = vpop.f32.mrf.mxu1 }
 0xb76   :  { %v3400_v33 = vadd.f32 %v3399_v15, %v3254_v34 }
 0xb77   :  { %v3539_v1 = vpop.f32.mrf.mxu0  ;;  %v4965_v44 = vpop.f32.mrf.mxu1 }
 0xb78   :  { %4765 = vmatmul.mubr.msk.f32.vlgmr.msra.gmra.mxu0 %vm139_vm0, %v3539_v1  ;;  %4766 = vmatmul.mubr.msk.f32.vlgmr.msra.gmra.mxu1 %vm139_vm0, %v3539_v1 }
 0xb79   :  { %v4975_v45 = vpop.f32.mrf.mxu0  ;;  %4367 = vmatprep.mubr.f32.mxu0 %v7476_v55  ;;  %4438 = vmatprep.mubr.f32.mxu1 %v7476_v55 }
 0xb7d   :  { %v3323_v60 = vpop.f32.mrf.mxu1 }
 0xb7f   :  { %v3325_v20 = vpop.f32.mrf.mxu1 }
 0xb85   :  { %v3468_v56 = vpop.f32.mrf.mxu1 }
 0xb86   :  { %v3469_v52 = vadd.f32 %v3468_v56, %v3323_v60 }
 0xb87   :  { %v3470_v63 = vpop.f32.mrf.mxu1 }
 0xb88   :  { %v3471_v0 = vadd.f32 %v3470_v63, %v3325_v20 }
 0xc38   :  { %v3628_v13 = vpop.f32.mrf.mxu0  ;;  %v3699_v43 = vpop.f32.mrf.mxu1 }
 0xc39   :  { %v3704_v12 = vadd.f32 %v3628_v13, %v3398_v24  ;;  %v3706_v22 = vadd.f32 %v3699_v43, %v3469_v52  ;;  %v6599_v43 = vsel %vm7498_vm1, %v6457_v54, -1e+30 }
 0xc3a   :  { %v3630_v62 = vpop.f32.mrf.mxu0  ;;  %v3701_v39 = vpop.f32.mrf.mxu1 }
 0xc3b   :  { %v3730_v6 = vadd.f32 %v3713_v10, %v3704_v12  ;;  %v3732_v38 = vadd.f32 %v3721_v46, %v3706_v22  ;;  %v3705_v11 = vadd.f32 %v3630_v62, %v3400_v33  ;;  %v3707_v32 = vadd.f32 %v3701_v39, %v3471_v0 }
 0xc3c   :  { %v2911_v22 = vsel %vm139_vm0, %v6599_v43, -inf }
 0xc3d   :  { %3992 = vrot.lane.b32.xlu1 %v3732_v38, %s5225_s14  ;;  %3740 = vrot.lane.b32.xlu0 %v3730_v6, %s5225_s14  ;;  %v3731_v40 = vadd.f32 %v3717_v3, %v3705_v11  ;;  %v3733_v26 = vadd.f32 %v3725_v5, %v3707_v32 }
 0xc41   :  { %3744 = vrot.lane.b32.xlu1 %v3730_v6, %s5217_s20  ;;  %3748 = vrot.lane.b32.xlu0 %v3730_v6, %s5221_s30 }
 0xc45   :  { %3996 = vrot.lane.b32.xlu1 %v3732_v38, %s5217_s20  ;;  %3755 = vrot.lane.b32.xlu0 %v3731_v40, %s5225_s14 }
 0xc49   :  { %4000 = vrot.lane.b32.xlu1 %v3732_v38, %s5221_s30  ;;  %3759 = vrot.lane.b32.xlu0 %v3731_v40, %s5217_s20 }
 0xc4d   :  { %4007 = vrot.lane.b32.xlu1 %v3733_v26, %s5225_s14  ;;  %3763 = vrot.lane.b32.xlu0 %v3731_v40, %s5221_s30 }
 0xc51   :  { %4011 = vrot.lane.b32.xlu1 %v3733_v26, %s5217_s20 }
 0xc55   :  { %4015 = vrot.lane.b32.xlu1 %v3733_v26, %s5221_s30 }
 0xcaf   :  { %v3993_v19 = vpop.permute.xlu1 %3992  ;;  %v3741_v23 = vpop.permute.xlu0 %3740 }
 0xcb0   :  { %v3743_v61 = vmax.f32 %v3730_v6, %v3741_v23  ;;  %v3995_v31 = vmax.f32 %v3732_v38, %v3993_v19 }
 0xcb3   :  { %v3745_v14 = vpop.permute.xlu1 %3744  ;;  %v3749_v42 = vpop.permute.xlu0 %3748 }
 0xcb4   :  { %v3747_v30 = vmax.f32 %v3743_v61, %v3745_v14 }
 0xcb6   :  { %v3751_v16 = vmax.f32 %v3747_v30, %v3749_v42 }
 0xcb7   :  { %v3997_v35 = vpop.permute.xlu1 %3996  ;;  %v3756_v37 = vpop.permute.xlu0 %3755 }
 0xcb8   :  { %v3753_v50 = vmax.f32 %v3751_v16, %v3731_v40  ;;  %v3999_v36 = vmax.f32 %v3995_v31, %v3997_v35 }
 0xcba   :  { %v3758_v41 = vmax.f32 %v3753_v50, %v3756_v37 }
 0xcbb   :  { %v4001_v48 = vpop.permute.xlu1 %4000  ;;  %v3760_v8 = vpop.permute.xlu0 %3759 }
 0xcbc   :  { %v4003_v27 = vmax.f32 %v3999_v36, %v4001_v48  ;;  %v3762_v59 = vmax.f32 %v3758_v41, %v3760_v8 }
 0xcbe   :  { %v4005_v9 = vmax.f32 %v4003_v27, %v3733_v26 }
 0xcbf   :  { %v4008_v21 = vpop.permute.xlu1 %4007  ;;  %v3764_v28 = vpop.permute.xlu0 %3763 }
 0xcc0   :  { %v3766_v51 = vmax.f32 %v3762_v59, %v3764_v28  ;;  %v4010_v18 = vmax.f32 %v4005_v9, %v4008_v21 }
 0xcc2   :  { %v6550_v47 = vsel %vm7490_vm5, %v3766_v51, -1e+30  ;;  %v6556_v24 = vsel %vm7491_vm11, %v3766_v51, -1e+30  ;;  %v6578_v63 = vsel %vm7495_vm7, %v3766_v51, -1e+30  ;;  %vm7499_vm5 = vmmov %vm7492_vm2 }
 0xcc3   :  { %v4012_v53 = vpop.permute.xlu1 %4011  ;;  %v3768_v34 = vsel %vm139_vm0, %v6550_v47, -inf  ;;  %v3820_v1 = vsel %vm139_vm0, %v6556_v24, -inf  ;;  %v3872_v10 = vsel %vm139_vm0, %v6578_v63, -inf  ;;  %v6590_v4 = vsel %vm7497_vm6, %v3766_v51, -1e+30  ;;  %vm7500_vm11 = vmmov %vm7496_vm4 }
 0xcc4   :  { %3769 = vmax.xlane.f32.xlu0 %v3768_v34  ;;  %v4014_v15 = vmax.f32 %v4010_v18, %v4012_v53  ;;  %v3924_v13 = vsel %vm139_vm0, %v6590_v4, -inf  ;;  %v6604_v12 = vsel %vm7499_vm5, %v6457_v54, -1e+30  ;;  %v6613_v38 = vsel %vm7500_vm11, %v6457_v54, -1e+30 }
 0xcc5   :  { %v2855_v6 = vsel %vm139_vm0, %v6604_v12, -inf  ;;  %v3015_v11 = vsel %vm139_vm0, %v6613_v38, -inf }
 0xcc7   :  { %v4016_v33 = vpop.permute.xlu1 %4015 }
 0xcc8   :  { %v4018_v44 = vmax.f32 %v4014_v15, %v4016_v33  ;;  %3821 = vmax.xlane.f32.xlu0 %v3820_v1 }
 0xcca   :  { %v6562_v45 = vsel %vm7492_vm2, %v4018_v44, -1e+30  ;;  %v6566_v60 = vsel %vm7493_vm8, %v4018_v44, -1e+30  ;;  %v6574_v57 = vsel %vm7494_vm14, %v4018_v44, -1e+30  ;;  %vm7501_vm2 = vmmov %vm7495_vm7 }
 0xccb   :  { %v4020_v20 = vsel %vm139_vm0, %v6562_v45, -inf  ;;  %v4072_v56 = vsel %vm139_vm0, %v6566_v60, -inf  ;;  %v4124_v52 = vsel %vm139_vm0, %v6574_v57, -inf  ;;  %v6586_v7 = vsel %vm7496_vm4, %v4018_v44, -1e+30 }
 0xccc   :  { %4021 = vmax.xlane.f32.xlu1 %v4020_v20  ;;  %4073 = vmax.xlane.f32.xlu0 %v4072_v56  ;;  %v4176_v46 = vsel %vm139_vm0, %v6586_v7, -inf  ;;  %v6618_v62 = vsel %vm7501_vm2, %v6457_v54, -1e+30 }
 0xccd   :  { %v2963_v17 = vsel %vm139_vm0, %v6618_v62, -inf }
 0xcd0   :  { %4125 = vmax.xlane.f32.xlu1 %v4124_v52  ;;  %3873 = vmax.xlane.f32.xlu0 %v3872_v10 }
 0xcd4   :  { %4177 = vmax.xlane.f32.xlu1 %v4176_v46  ;;  %3925 = vmax.xlane.f32.xlu0 %v3924_v13 }
 0xcd8   :  { %2912 = vmax.xlane.f32.xlu1 %v2911_v22  ;;  %2856 = vmax.xlane.f32.xlu0 %v2855_v6 }
 0xcdc   :  { %3016 = vmax.xlane.f32.xlu1 %v3015_v11  ;;  %2964 = vmax.xlane.f32.xlu0 %v2963_v17 }
 0xd4d   :  { %v6624_v3 = vpop.xlane.xlu0 %3769 }
 0xd4e   :  { %vm3771_vm8 = vcmp.eq.f32.partialorder %v6550_v47, %v6624_v3 }
 0xd4f   :  { %v3772_v40 = vsel %vm3771_vm8, %v5340_v58, 32 }
 0xd50   :  { %v6630_v39 = vsel %vm139_vm0, %v3772_v40, 2147483647 }
 0xd51   :  { %v6632_v54 = vpop.xlane.xlu0 %3821  ;;  %v3775_v0 = vshra.s32 %v6630_v39, 16 }
 0xd52   :  { %vm3823_vm14 = vcmp.eq.f32.partialorder %v6556_v24, %v6632_v54 }
 0xd53   :  { %v3824_v32 = vsel %vm3823_vm14, %v5340_v58, 32  ;;  %v6638_v49 = vcvt.s32.f32 %v3775_v0 }
 0xd54   :  { %v6641_v5 = vsel %vm139_vm0, %v3824_v32, 2147483647 }
 0xd55   :  { %v6643_v26 = vpop.xlane.xlu1 %4021  ;;  %3778 = vmin.xlane.f32.xlu0 %v6638_v49  ;;  %v6646_v19 = vpop.xlane.xlu0 %4073  ;;  %v3827_v23 = vshra.s32 %v6641_v5, 16 }
 0xd56   :  { %vm4023_vm7 = vcmp.eq.f32.partialorder %v6562_v45, %v6643_v26  ;;  %vm4075_vm4 = vcmp.eq.f32.partialorder %v6566_v60, %v6646_v19 }
 0xd57   :  { %v4024_v61 = vsel %vm4023_vm7, %v5340_v58, 32  ;;  %v4076_v14 = vsel %vm4075_vm4, %v5340_v58, 32  ;;  %v6655_v42 = vcvt.s32.f32 %v3827_v23 }
 0xd58   :  { %v6658_v30 = vsel %vm139_vm0, %v4024_v61, 2147483647  ;;  %v6661_v16 = vsel %vm139_vm0, %v4076_v14, 2147483647 }
 0xd59   :  { %v6663_v35 = vpop.xlane.xlu1 %4125  ;;  %3830 = vmin.xlane.f32.xlu0 %v6655_v42  ;;  %v6666_v37 = vpop.xlane.xlu0 %3873  ;;  %v4027_v31 = vshra.s32 %v6658_v30, 16  ;;  %v4079_v50 = vshra.s32 %v6661_v16, 16 }
 0xd5a   :  { %vm4127_vm6 = vcmp.eq.f32.partialorder %v6574_v57, %v6663_v35  ;;  %vm3875_vm1 = vcmp.eq.f32.partialorder %v6578_v63, %v6666_v37 }
 0xd5b   :  { %v4128_v36 = vsel %vm4127_vm6, %v5340_v58, 32  ;;  %v3876_v41 = vsel %vm3875_vm1, %v5340_v58, 32  ;;  %v6676_v48 = vcvt.s32.f32 %v4027_v31  ;;  %v6694_v9 = vcvt.s32.f32 %v4079_v50 }
 0xd5c   :  { %v6679_v8 = vsel %vm139_vm0, %v4128_v36, 2147483647  ;;  %v6682_v27 = vsel %vm139_vm0, %v3876_v41, 2147483647 }
 0xd5d   :  { %4030 = vmin.xlane.f32.xlu1 %v6676_v48  ;;  %v6685_v59 = vpop.xlane.xlu1 %4177  ;;  %v6687_v21 = vpop.xlane.xlu0 %3925  ;;  %v3879_v28 = vshra.s32 %v6682_v27, 16  ;;  %v4131_v18 = vshra.s32 %v6679_v8, 16 }
 0xd5e   :  { %vm4179_vm5 = vcmp.eq.f32.partialorder %v6586_v7, %v6685_v59  ;;  %vm3927_vm11 = vcmp.eq.f32.partialorder %v6590_v4, %v6687_v21 }
 0xd5f   :  { %v4180_v51 = vsel %vm4179_vm5, %v5340_v58, 32  ;;  %v3928_v53 = vsel %vm3927_vm11, %v5340_v58, 32  ;;  %v6698_v34 = vcvt.s32.f32 %v3879_v28  ;;  %v6721_v46 = vcvt.s32.f32 %v4131_v18 }
 0xd60   :  { %v6702_v15 = vsel %vm139_vm0, %v4180_v51, 2147483647  ;;  %v6705_v33 = vsel %vm139_vm0, %v3928_v53, 2147483647  ;;  %v3774_v18 = vand.u32 65535, %v6630_v39 }
 0xd61   :  { %v6707_v1 = vpop.xlane.xlu1 %2912  ;;  %4082 = vmin.xlane.f32.xlu1 %v6694_v9  ;;  %3882 = vmin.xlane.f32.xlu0 %v6698_v34  ;;  %v6711_v44 = vpop.xlane.xlu0 %2856  ;;  %v3931_v20 = vshra.s32 %v6705_v33, 16  ;;  %v4183_v56 = vshra.s32 %v6702_v15, 16 }
 0xd62   :  { %vm2914_vm2 = vcmp.eq.f32.partialorder %v6599_v43, %v6707_v1  ;;  %vm2858_vm8 = vcmp.eq.f32.partialorder %v6604_v12, %v6711_v44 }
 0xd63   :  { %v2915_v52 = vsel %vm2914_vm2, %v5340_v58, 32  ;;  %v2859_v10 = vsel %vm2858_vm8, %v5340_v58, 32  ;;  %v6723_v13 = vcvt.s32.f32 %v3931_v20  ;;  %v6742_v0 = vcvt.s32.f32 %v4183_v56 }
 0xd64   :  { %v6726_v22 = vsel %vm139_vm0, %v2915_v52, 2147483647  ;;  %v6729_v6 = vsel %vm139_vm0, %v2859_v10, 2147483647  ;;  %v3776_v56 = vcvt.s32.f32 %v3774_v18  ;;  %v3826_v52 = vand.u32 65535, %v6641_v5 }
 0xd65   :  { %v6731_v11 = vpop.xlane.xlu1 %3016  ;;  %4134 = vmin.xlane.f32.xlu1 %v6721_v46  ;;  %3934 = vmin.xlane.f32.xlu0 %v6723_v13  ;;  %v6735_v17 = vpop.xlane.xlu0 %2964  ;;  %v2862_v40 = vshra.s32 %v6729_v6, 16  ;;  %v2918_v14 = vshra.s32 %v6726_v22, 16  ;;  %v4078_v5 = vand.u32 65535, %v6661_v16 }
 0xd66   :  { %vm3018_vm14 = vcmp.eq.f32.partialorder %v6613_v38, %v6731_v11  ;;  %vm2966_vm7 = vcmp.eq.f32.partialorder %v6618_v62, %v6735_v17 }
 0xd67   :  { %v3019_v32 = vsel %vm3018_vm14, %v5340_v58, 32  ;;  %v2967_v23 = vsel %vm2966_vm7, %v5340_v58, 32  ;;  %v6746_v61 = vcvt.s32.f32 %v2862_v40  ;;  %v6758_v41 = vcvt.s32.f32 %v2918_v14 }
 0xd68   :  { %v6750_v31 = vsel %vm139_vm0, %v3019_v32, 2147483647  ;;  %v6753_v50 = vsel %vm139_vm0, %v2967_v23, 2147483647  ;;  %v3828_v32 = vcvt.s32.f32 %v3826_v52  ;;  %v4026_v23 = vand.u32 65535, %v6658_v30 }
 0xd69   :  { %4186 = vmin.xlane.f32.xlu1 %v6742_v0  ;;  %2865 = vmin.xlane.f32.xlu0 %v6746_v61  ;;  %v2970_v36 = vshra.s32 %v6753_v50, 16  ;;  %v3022_v51 = vshra.s32 %v6750_v31, 16  ;;  %v4130_v52 = vand.u32 65535, %v6679_v8  ;;  %v4182_v8 = vand.u32 65535, %v6702_v15 }
 0xd6a   :  { %v2917_v15 = vand.u32 65535, %v6726_v22  ;;  %v3021_v22 = vand.u32 65535, %v6750_v31 }
 0xd6b   :  { %v6760_v28 = vcvt.s32.f32 %v2970_v36  ;;  %v6765_v53 = vcvt.s32.f32 %v3022_v51  ;;  %v4028_v36 = vcvt.s32.f32 %v4026_v23  ;;  %v3878_v51 = vand.u32 65535, %v6682_v27 }
 0xd6c   :  { %v4132_v23 = vcvt.s32.f32 %v4130_v52  ;;  %v2919_v52 = vcvt.s32.f32 %v2917_v15 }
 0xd6d   :  { %2921 = vmin.xlane.f32.xlu1 %v6758_v41  ;;  %2973 = vmin.xlane.f32.xlu0 %v6760_v28 }
 0xd71   :  { %3025 = vmin.xlane.f32.xlu1 %v6765_v53 }
 0xdde   :  { %v6769_v20 = vpop.xlane.xlu0 %3778 }
 0xddf   :  { %vm3780_vm4 = vcmp.eq.f32.partialorder %v6638_v49, %v6769_v20  ;;  %v3785_v31 = vcvt.f32.s32 %v6769_v20 }
 0xde0   :  { %v3781_v10 = vsel %vm3780_vm4, %v3776_v56, inf  ;;  %v4080_v56 = vcvt.s32.f32 %v4078_v5 }
 0xde1   :  { %3782 = vmin.xlane.f32.xlu0 %v3781_v10  ;;  %v3930_v10 = vand.u32 65535, %v6705_v33  ;;  %v2861_v33 = vand.u32 65535, %v6729_v6  ;;  %v2969_v6 = vand.u32 65535, %v6753_v50 }
 0xde2   :  { %v6774_v40 = vpop.xlane.xlu0 %3830 }
 0xde3   :  { %vm3832_vm6 = vcmp.eq.f32.partialorder %v6655_v42, %v6774_v40  ;;  %v3880_v42 = vcvt.s32.f32 %v3878_v51  ;;  %v4184_v51 = vcvt.s32.f32 %v4182_v8 }
 0xde4   :  { %v3833_v14 = vsel %vm3832_vm6, %v3828_v32, inf }
 0xde5   :  { %3834 = vmin.xlane.f32.xlu0 %v3833_v14  ;;  %v3932_v14 = vcvt.s32.f32 %v3930_v10  ;;  %v2971_v10 = vcvt.s32.f32 %v2969_v6 }
 0xde6   :  { %v6779_v39 = vpop.xlane.xlu1 %4030 }
 0xde7   :  { %vm4032_vm1 = vcmp.eq.f32.partialorder %v6676_v48, %v6779_v39 }
 0xde8   :  { %v4033_v49 = vsel %vm4032_vm1, %v4028_v36, inf }
 0xde9   :  { %4034 = vmin.xlane.f32.xlu1 %v4033_v49  ;;  %v2863_v49 = vcvt.s32.f32 %v2861_v33 }
 0xdea   :  { %v6785_v18 = vpop.xlane.xlu1 %4082  ;;  %v6787_v30 = vpop.xlane.xlu0 %3882 }
 0xdeb   :  { %vm4084_vm5 = vcmp.eq.f32.partialorder %v6694_v9, %v6785_v18  ;;  %vm3884_vm11 = vcmp.eq.f32.partialorder %v6698_v34, %v6787_v30  ;;  %v3889_v6 = vcvt.f32.s32 %v6787_v30 }
 0xdec   :  { %v4085_v16 = vsel %vm4084_vm5, %v4080_v56, inf  ;;  %v3885_v48 = vsel %vm3884_vm11, %v3880_v42, inf }
 0xded   :  { %4086 = vmin.xlane.f32.xlu1 %v4085_v16  ;;  %3886 = vmin.xlane.f32.xlu0 %v3885_v48  ;;  %v3023_v16 = vcvt.s32.f32 %v3021_v22 }
 0xdee   :  { %v6795_v27 = vpop.xlane.xlu1 %4134  ;;  %v6797_v32 = vpop.xlane.xlu0 %3934 }
 0xdef   :  { %vm4136_vm2 = vcmp.eq.f32.partialorder %v6721_v46, %v6795_v27  ;;  %vm3936_vm8 = vcmp.eq.f32.partialorder %v6723_v13, %v6797_v32  ;;  %v3941_v30 = vcvt.f32.s32 %v6797_v32 }
 0xdf0   :  { %v4137_v9 = vsel %vm4136_vm2, %v4132_v23, inf  ;;  %v3937_v34 = vsel %vm3936_vm8, %v3932_v14, inf  ;;  %v3786_v14 = vshll.u32 %v3785_v31, 16 }
 0xdf1   :  { %4138 = vmin.xlane.f32.xlu1 %v4137_v9  ;;  %3938 = vmin.xlane.f32.xlu0 %v3937_v34  ;;  %v4037_v34 = vcvt.f32.s32 %v6779_v39 }
 0xdf2   :  { %v6805_v36 = vpop.xlane.xlu1 %4186  ;;  %v6807_v5 = vpop.xlane.xlu0 %2865 }
 0xdf3   :  { %vm4188_vm14 = vcmp.eq.f32.partialorder %v6742_v0, %v6805_v36  ;;  %vm2867_vm7 = vcmp.eq.f32.partialorder %v6746_v61, %v6807_v5  ;;  %v4038_v39 = vshll.u32 %v4037_v34, 16 }
 0xdf4   :  { %v4189_v46 = vsel %vm4188_vm14, %v4184_v51, inf  ;;  %v2868_v13 = vsel %vm2867_vm7, %v2863_v49, inf  ;;  %v4089_v49 = vcvt.f32.s32 %v6785_v18 }
 0xdf5   :  { %4190 = vmin.xlane.f32.xlu1 %v4189_v46  ;;  %2869 = vmin.xlane.f32.xlu0 %v2868_v13 }
 0xdf6   :  { %v6815_v56 = vpop.xlane.xlu1 %2921  ;;  %v6817_v42 = vpop.xlane.xlu0 %2973 }
 0xdf7   :  { %vm2923_vm4 = vcmp.eq.f32.partialorder %v6758_v41, %v6815_v56  ;;  %vm2975_vm6 = vcmp.eq.f32.partialorder %v6760_v28, %v6817_v42  ;;  %v3837_v41 = vcvt.f32.s32 %v6774_v40 }
 0xdf8   :  { %v2924_v0 = vsel %vm2923_vm4, %v2919_v52, inf  ;;  %v2976_v61 = vsel %vm2975_vm6, %v2971_v10, inf  ;;  %v4090_v52 = vshll.u32 %v4089_v49, 16  ;;  %v4141_v10 = vcvt.f32.s32 %v6795_v27 }
 0xdf9   :  { %2925 = vmin.xlane.f32.xlu1 %v2924_v0  ;;  %2977 = vmin.xlane.f32.xlu0 %v2976_v61  ;;  %v3838_v9 = vshll.u32 %v3837_v41, 16  ;;  %v3890_v61 = vshll.u32 %v3889_v6, 16  ;;  %v4193_v41 = vcvt.f32.s32 %v6805_v36 }
 0xdfa   :  { %v6824_v50 = vpop.xlane.xlu1 %3025 }
 0xdfb   :  { %vm3027_vm1 = vcmp.eq.f32.partialorder %v6765_v53, %v6824_v50 }
 0xdfc   :  { %v3028_v48 = vsel %vm3027_vm1, %v3023_v16, inf }
 0xdfd   :  { %3029 = vmin.xlane.f32.xlu1 %v3028_v48 }
 0xe6a   :  { %v3783_v23 = vpop.xlane.xlu0 %3782 }
 0xe6b   :  { %v3784_v8 = vcvt.f32.s32 %v3783_v23  ;;  %v4142_v23 = vshll.u32 %v4141_v10, 16 }
 0xe6d   :  { %v6830_v28 = vadd.s32 %v3786_v14, %v3784_v8  ;;  %v3942_v14 = vshll.u32 %v3941_v30, 16  ;;  %v2872_v8 = vcvt.f32.s32 %v6807_v5 }
 0xe6e   :  { %v3835_v33 = vpop.xlane.xlu0 %3834 }
 0xe6f   :  { %v3836_v51 = vcvt.f32.s32 %v3835_v33  ;;  %vm3788_vm5 = vcmp.eq.s32.totalorder %v5340_v58, %v6830_v28  ;;  %v2873_v6 = vshll.u32 %v2872_v8, 16 }
 0xe70   :  { %v6839_v53 = vsel %vm3788_vm5, -1e+30, %v6550_v47 }
 0xe71   :  { %v6841_v20 = vadd.s32 %v3838_v9, %v3836_v51  ;;  %v3794_v40 = vsel %vm139_vm0, %v6839_v53, -inf }
 0xe72   :  { %v4035_v15 = vpop.xlane.xlu1 %4034  ;;  %3795 = vmax.xlane.f32.xlu0 %v3794_v40 }
 0xe73   :  { %v4036_v46 = vcvt.f32.s32 %v4035_v15  ;;  %vm3840_vm11 = vcmp.eq.s32.totalorder %v5340_v58, %v6841_v20 }
 0xe74   :  { %v6853_v47 = vsel %vm3840_vm11, -1e+30, %v6556_v24 }
 0xe75   :  { %v6855_v13 = vadd.s32 %v4038_v39, %v4036_v46  ;;  %v3846_v18 = vsel %vm139_vm0, %v6853_v47, -inf  ;;  %v4194_v39 = vshll.u32 %v4193_v41, 16  ;;  %v2980_v46 = vcvt.f32.s32 %v6817_v42 }
 0xe76   :  { %v4087_v22 = vpop.xlane.xlu1 %4086  ;;  %3847 = vmax.xlane.f32.xlu0 %v3846_v18  ;;  %v3887_v0 = vpop.xlane.xlu0 %3886 }
 0xe77   :  { %v4088_v16 = vcvt.f32.s32 %v4087_v22  ;;  %v3888_v48 = vcvt.f32.s32 %v3887_v0  ;;  %vm4040_vm2 = vcmp.eq.s32.totalorder %v5340_v58, %v6855_v13 }
 0xe78   :  { %v6867_v24 = vsel %vm4040_vm2, -1e+30, %v6562_v45 }
 0xe79   :  { %v6869_v31 = vadd.s32 %v4090_v52, %v4088_v16  ;;  %v6871_v27 = vadd.s32 %v3890_v61, %v3888_v48  ;;  %v4046_v32 = vsel %vm139_vm0, %v6867_v24, -inf  ;;  %v2981_v48 = vshll.u32 %v2980_v46, 16 }
 0xe7a   :  { %4047 = vmax.xlane.f32.xlu1 %v4046_v32  ;;  %v4139_v33 = vpop.xlane.xlu1 %4138  ;;  %v3939_v9 = vpop.xlane.xlu0 %3938 }
 0xe7b   :  { %v4140_v34 = vcvt.f32.s32 %v4139_v33  ;;  %v3940_v51 = vcvt.f32.s32 %v3939_v9  ;;  %vm4092_vm8 = vcmp.eq.s32.totalorder %v5340_v58, %v6869_v31  ;;  %vm3892_vm14 = vcmp.eq.s32.totalorder %v5340_v58, %v6871_v27 }
 0xe7c   :  { %v6885_v45 = vsel %vm4092_vm8, -1e+30, %v6566_v60  ;;  %v6891_v36 = vsel %vm3892_vm14, -1e+30, %v6578_v63  ;;  %v2928_v60 = vcvt.f32.s32 %v6815_v56 }
 0xe7d   :  { %v6893_v5 = vadd.s32 %v4142_v23, %v4140_v34  ;;  %v6895_v40 = vadd.s32 %v3942_v14, %v3940_v51  ;;  %v4098_v49 = vsel %vm139_vm0, %v6885_v45, -inf  ;;  %v3898_v15 = vsel %vm139_vm0, %v6891_v36, -inf }
 0xe7e   :  { %4099 = vmax.xlane.f32.xlu1 %v4098_v49  ;;  %v4191_v18 = vpop.xlane.xlu1 %4190  ;;  %3899 = vmax.xlane.f32.xlu0 %v3898_v15  ;;  %v2870_v63 = vpop.xlane.xlu0 %2869  ;;  %v2929_v16 = vshll.u32 %v2928_v60, 16 }
 0xe7f   :  { %v4192_v52 = vcvt.f32.s32 %v4191_v18  ;;  %v2871_v10 = vcvt.f32.s32 %v2870_v63  ;;  %vm7448_vm7 = vcmp.eq.s32.totalorder %v5340_v58, %v6893_v5  ;;  %vm7449_vm4 = vcmp.eq.s32.totalorder %v5340_v58, %v6895_v40 }
 0xe80   :  { %v6911_v30 = vsel %vm7448_vm7, -1e+30, %v6574_v57  ;;  %v6917_v56 = vsel %vm7449_vm4, -1e+30, %v6590_v4  ;;  %v3032_v57 = vcvt.f32.s32 %v6824_v50  ;;  %vm7506_vm4 = vcmask 56320  }
 0xe81   :  { %v6919_v42 = vadd.s32 %v4194_v39, %v4192_v52  ;;  %v6921_v22 = vadd.s32 %v2873_v6, %v2871_v10  ;;  %v4150_v0 = vsel %vm139_vm0, %v6911_v30, -inf  ;;  %v3950_v61 = vsel %vm139_vm0, %v6917_v56, -inf }
 0xe82   :  { %4151 = vmax.xlane.f32.xlu1 %v4150_v0  ;;  %v2926_v32 = vpop.xlane.xlu1 %2925  ;;  %3951 = vmax.xlane.f32.xlu0 %v3950_v61  ;;  %v2978_v23 = vpop.xlane.xlu0 %2977 }
 0xe83   :  { %v2927_v4 = vcvt.f32.s32 %v2926_v32  ;;  %v2979_v14 = vcvt.f32.s32 %v2978_v23  ;;  %vm7447_vm6 = vcmp.eq.s32.totalorder %v5340_v58, %v6919_v42  ;;  %vm7446_vm1 = vcmp.eq.s32.totalorder %v5340_v58, %v6921_v22 }
 0xe84   :  { %v6936_v41 = vsel %vm7447_vm6, -1e+30, %v6586_v7  ;;  %v6942_v50 = vsel %vm7446_vm1, -1e+30, %v6604_v12  ;;  %v3033_v7 = vshll.u32 %v3032_v57, 16  ;;  %vm7503_vm6 = vcmask 39936  }
 0xe85   :  { %v6944_v8 = vadd.s32 %v2929_v16, %v2927_v4  ;;  %v6946_v33 = vadd.s32 %v2981_v48, %v2979_v14  ;;  %v4202_v9 = vsel %vm139_vm0, %v6936_v41, -inf  ;;  %v2885_v34 = vsel %vm139_vm0, %v6942_v50, -inf }
 0xe86   :  { %4203 = vmax.xlane.f32.xlu1 %v4202_v9  ;;  %v3030_v51 = vpop.xlane.xlu1 %3029  ;;  %2886 = vmax.xlane.f32.xlu0 %v2885_v34 }
 0xe87   :  { %v3031_v49 = vcvt.f32.s32 %v3030_v51  ;;  %vm7443_vm3 = vcmp.eq.s32.totalorder %v5340_v58, %v6944_v8  ;;  %vm7444_vm15 = vcmp.eq.s32.totalorder %v5340_v58, %v6946_v33 }
 0xe88   :  { %v6960_v12 = vsel %vm7443_vm3, -1e+30, %v6599_v43  ;;  %v6966_v15 = vsel %vm7444_vm15, -1e+30, %v6618_v62 }
 0xe89   :  { %v6968_v39 = vadd.s32 %v3033_v7, %v3031_v49  ;;  %v2937_v6 = vsel %vm139_vm0, %v6960_v12, -inf  ;;  %v2989_v60 = vsel %vm139_vm0, %v6966_v15, -inf }
 0xe8a   :  { %2938 = vmax.xlane.f32.xlu1 %v2937_v6  ;;  %2990 = vmax.xlane.f32.xlu0 %v2989_v60 }
 0xe8b   :  { %vm7445_vm3 = vcmp.eq.s32.totalorder %v5340_v58, %v6968_v39 }
 0xe8c   :  { %v6980_v43 = vsel %vm7445_vm3, -1e+30, %v6613_v38 }
 0xe8d   :  { %v3041_v62 = vsel %vm139_vm0, %v6980_v43, -inf }
 0xe8e   :  { %3042 = vmax.xlane.f32.xlu1 %v3041_v62 }
 0xefb   :  { %v3796_v46 = vpop.xlane.xlu0 %3795 }
 0xefc   :  { %vm3797_vm15 = vcmp.eq.f32.partialorder %v6839_v53, %v3796_v46  ;;  %v3975_v18 = vsel %vm771_vm10, %v6624_v3, %v3796_v46 }
 0xefd   :  { %v3798_v63 = vsel %vm3797_vm15, %v5340_v58, 32  ;;  %v3976_v10 = vsel %vm773_vm12, %v3975_v18, %v6632_v54 }
 0xefe   :  { %v6989_v52 = vsel %vm139_vm0, %v3798_v63, 2147483647 }
 0xeff   :  { %v3848_v38 = vpop.xlane.xlu0 %3847  ;;  %v3801_v0 = vshra.s32 %v6989_v52, 16 }
 0xf00   :  { %vm3849_vm3 = vcmp.eq.f32.partialorder %v6853_v47, %v3848_v38  ;;  %v3977_v61 = vsel %vm775_vm9, %v3976_v10, %v3848_v38 }
 0xf01   :  { %v3850_v53 = vsel %vm3849_vm3, %v5340_v58, 32  ;;  %v6997_v16 = vcvt.s32.f32 %v3801_v0  ;;  %vm7502_vm3 = vcmask 31744  }
 0xf02   :  { %v7000_v3 = vsel %vm139_vm0, %v3850_v53, 2147483647  ;;  %v3978_v9 = vsel %vm7502_vm3, %v3977_v61, %v6666_v37 }
 0xf03   :  { %v4048_v48 = vpop.xlane.xlu1 %4047  ;;  %3804 = vmin.xlane.f32.xlu0 %v6997_v16  ;;  %v3853_v57 = vshra.s32 %v7000_v3, 16 }
 0xf04   :  { %vm4049_vm15 = vcmp.eq.f32.partialorder %v6867_v24, %v4048_v48  ;;  %v4227_v54 = vsel %vm771_vm10, %v6643_v26, %v4048_v48 }
 0xf05   :  { %v4050_v47 = vsel %vm4049_vm15, %v5340_v58, 32  ;;  %v7008_v32 = vcvt.s32.f32 %v3853_v57  ;;  %v4228_v4 = vsel %vm773_vm12, %v4227_v54, %v6646_v19 }
 0xf06   :  { %v7011_v23 = vsel %vm139_vm0, %v4050_v47, 2147483647 }
 0xf07   :  { %v4100_v14 = vpop.xlane.xlu1 %4099  ;;  %3856 = vmin.xlane.f32.xlu0 %v7008_v32  ;;  %v3900_v24 = vpop.xlane.xlu0 %3899  ;;  %v4053_v34 = vshra.s32 %v7011_v23, 16 }
 0xf08   :  { %vm4101_vm1 = vcmp.eq.f32.partialorder %v6885_v45, %v4100_v14  ;;  %v4229_v26 = vsel %vm775_vm9, %v4228_v4, %v4100_v14  ;;  %vm3901_vm15 = vcmp.eq.f32.partialorder %v6891_v36, %v3900_v24  ;;  %v3979_v51 = vsel %vm7503_vm6, %v3978_v9, %v3900_v24 }
 0xf09   :  { %v4102_v7 = vsel %vm4101_vm1, %v5340_v58, 32  ;;  %v3902_v19 = vsel %vm3901_vm15, %v5340_v58, 32  ;;  %v7025_v49 = vcvt.s32.f32 %v4053_v34  ;;  %v4230_v45 = vsel %vm7502_vm3, %v4229_v26, %v6663_v35 }
 0xf0a   :  { %v7028_v6 = vsel %vm139_vm0, %v4102_v7, 2147483647  ;;  %v7031_v37 = vsel %vm139_vm0, %v3902_v19, 2147483647  ;;  %vm7504_vm6 = vcmask 48128   ;;  %vm7505_vm15 = vcmask 39936  }
 0xf0b   :  { %4056 = vmin.xlane.f32.xlu1 %v7025_v49  ;;  %v4152_v36 = vpop.xlane.xlu1 %4151  ;;  %v3980_v60 = vsel %vm7504_vm6, %v3979_v51, %v6687_v21  ;;  %v3952_v62 = vpop.xlane.xlu0 %3951  ;;  %v4105_v46 = vshra.s32 %v7028_v6, 16  ;;  %v3905_v18 = vshra.s32 %v7031_v37, 16  ;;  %vm7507_vm3 = vmmov %vm7504_vm6 }
 0xf0c   :  { %vm4153_vm1 = vcmp.eq.f32.partialorder %v6911_v30, %v4152_v36  ;;  %v4231_v63 = vsel %vm7505_vm15, %v4230_v45, %v4152_v36  ;;  %vm3953_vm7 = vcmp.eq.f32.partialorder %v6917_v56, %v3952_v62  ;;  %v7044_v10 = vsel %vm7506_vm4, %v3980_v60, %v3952_v62 }
 0xf0d   :  { %v4154_v35 = vsel %vm4153_vm1, %v5340_v58, 32  ;;  %v3954_v38 = vsel %vm3953_vm7, %v5340_v58, 32  ;;  %v7048_v0 = vcvt.s32.f32 %v4105_v46  ;;  %v7056_v30 = vcvt.s32.f32 %v3905_v18 }
 0xf0e   :  { %v7051_v21 = vsel %vm139_vm0, %v4154_v35, 2147483647  ;;  %v7054_v61 = vsel %vm139_vm0, %v3954_v38, 2147483647  ;;  %v4232_v56 = vsel %vm7507_vm3, %v4231_v63, %v6685_v59 }
 0xf0f   :  { %4108 = vmin.xlane.f32.xlu1 %v7048_v0  ;;  %v4204_v53 = vpop.xlane.xlu1 %4203  ;;  %v2887_v48 = vpop.xlane.xlu0 %2886  ;;  %v4157_v57 = vshra.s32 %v7051_v21, 16  ;;  %v3957_v54 = vshra.s32 %v7054_v61, 16  ;;  %3908 = vmin.xlane.f32.xlu0 %v7056_v30 }
 0xf10   :  { %vm4205_vm7 = vcmp.eq.f32.partialorder %v6936_v41, %v4204_v53  ;;  %v7065_v47 = vsel %vm7506_vm4, %v4232_v56, %v4204_v53  ;;  %vm2888_vm6 = vcmp.eq.f32.partialorder %v6942_v50, %v2887_v48  ;;  %v3066_v4 = vsel %vm771_vm10, %v6711_v44, %v2887_v48 }
 0xf11   :  { %v4206_v59 = vsel %vm4205_vm7, %v5340_v58, 32  ;;  %v2889_v14 = vsel %vm2888_vm6, %v5340_v58, 32  ;;  %v7073_v9 = vcvt.s32.f32 %v4157_v57  ;;  %v7081_v34 = vcvt.s32.f32 %v3957_v54 }
 0xf12   :  { %v7076_v24 = vsel %vm139_vm0, %v4206_v59, 2147483647  ;;  %v7079_v41 = vsel %vm139_vm0, %v2889_v14, 2147483647  ;;  %v3067_v44 = vsel %vm773_vm12, %v3066_v4, %v6707_v1  ;;  %v3852_v4 = vand.u32 65535, %v7000_v3 }
 0xf13   :  { %4160 = vmin.xlane.f32.xlu1 %v7073_v9  ;;  %v2939_v50 = vpop.xlane.xlu1 %2938  ;;  %v7086_v26 = vpop.xlane.xlu0 %2990  ;;  %v4209_v51 = vshra.s32 %v7076_v24, 16  ;;  %v2892_v7 = vshra.s32 %v7079_v41, 16  ;;  %3960 = vmin.xlane.f32.xlu0 %v7081_v34  ;;  %v4104_v3 = vand.u32 65535, %v7028_v6  ;;  %v3956_v6 = vand.u32 65535, %v7054_v61 }
 0xf14   :  { %vm2940_vm10 = vcmp.eq.f32.partialorder %v6960_v12, %v2939_v50  ;;  %v7092_v19 = vsel %vm775_vm9, %v3067_v44, %v2939_v50  ;;  %vm2992_vm1 = vcmp.eq.f32.partialorder %v6966_v15, %v7086_v26  ;;  %v3854_v50 = vcvt.s32.f32 %v3852_v4 }
 0xf15   :  { %v2941_v45 = vsel %vm2940_vm10, %v5340_v58, 32  ;;  %v2993_v1 = vsel %vm2992_vm1, %v5340_v58, 32  ;;  %v7099_v36 = vcvt.s32.f32 %v4209_v51  ;;  %v7107_v12 = vcvt.s32.f32 %v2892_v7 }
 0xf16   :  { %v7102_v60 = vsel %vm139_vm0, %v2941_v45, 2147483647  ;;  %v7105_v62 = vsel %vm139_vm0, %v2993_v1, 2147483647  ;;  %v4052_v44 = vand.u32 65535, %v7011_v23  ;;  %v4106_v23 = vcvt.s32.f32 %v4104_v3 }
 0xf17   :  { %4212 = vmin.xlane.f32.xlu1 %v7099_v36  ;;  %v7110_v46 = vpop.xlane.xlu1 %3042  ;;  %v2944_v15 = vshra.s32 %v7102_v60, 16  ;;  %v2996_v18 = vshra.s32 %v7105_v62, 16  ;;  %2895 = vmin.xlane.f32.xlu0 %v7107_v12  ;;  %v2891_v61 = vand.u32 65535, %v7079_v41  ;;  %v2995_v41 = vand.u32 65535, %v7105_v62 }
 0xf18   :  { %vm3044_vm12 = vcmp.eq.f32.partialorder %v6980_v43, %v7110_v46  ;;  %v3800_v43 = vand.u32 65535, %v6989_v52  ;;  %v4054_v7 = vcvt.s32.f32 %v4052_v44  ;;  %v7187_v62 = vrot.slane %v6520_v25, %v5479_v29 }
 0xf19   :  { %v3045_v63 = vsel %vm3044_vm12, %v5340_v58, 32  ;;  %v7118_v35 = vcvt.s32.f32 %v2944_v15  ;;  %v7120_v38 = vcvt.s32.f32 %v2996_v18  ;;  %v4156_v15 = vand.u32 65535, %v7051_v21 }
 0xf1a   :  { %v7123_v56 = vsel %vm139_vm0, %v3045_v63, 2147483647  ;;  %v3802_v54 = vcvt.s32.f32 %v3800_v43  ;;  %v4208_v21 = vand.u32 65535, %v7076_v24  ;;  %v3958_v43 = vcvt.s32.f32 %v3956_v6 }
 0xf1b   :  { %2947 = vmin.xlane.f32.xlu1 %v7118_v35  ;;  %v3048_v53 = vshra.s32 %v7123_v56, 16  ;;  %2999 = vmin.xlane.f32.xlu0 %v7120_v38  ;;  %v2943_v24 = vand.u32 65535, %v7102_v60  ;;  %v3047_v60 = vand.u32 65535, %v7123_v56  ;;  %v2997_v3 = vcvt.s32.f32 %v2995_v41 }
 0xf1c   :  { %v4093_v20 = vsel %vm4092_vm8, %v7187_v62, 0.0 }
 0xf1d   :  { %v7128_v48 = vcvt.s32.f32 %v3048_v53  ;;  %v4158_v53 = vcvt.s32.f32 %v4156_v15  ;;  %v3049_v56 = vcvt.s32.f32 %v3047_v60  ;;  %v3893_v15 = vsel %vm3892_vm14, %v7187_v62, 0.0 }
 0xf1e   :  { %v4094_v13 = vsel %vm139_vm0, %v4093_v20, 0.0 }
 0xf1f   :  { %3051 = vmin.xlane.f32.xlu1 %v7128_v48 }
 0xf8c   :  { %v7132_v57 = vpop.xlane.xlu0 %3804 }
 0xf8d   :  { %vm3806_vm9 = vcmp.eq.f32.partialorder %v6997_v16, %v7132_v57  ;;  %v3904_v16 = vand.u32 65535, %v7031_v37 }
 0xf8e   :  { %v3807_v59 = vsel %vm3806_vm9, %v3802_v54, inf }
 0xf8f   :  { %3808 = vmin.xlane.f32.xlu0 %v3807_v59  ;;  %v3906_v18 = vcvt.s32.f32 %v3904_v16  ;;  %v4210_v59 = vcvt.s32.f32 %v4208_v21 }
 0xf90   :  { %v7137_v14 = vpop.xlane.xlu0 %3856 }
 0xf91   :  { %vm3858_vm15 = vcmp.eq.f32.partialorder %v7008_v32, %v7137_v14 }
 0xf92   :  { %v3859_v51 = vsel %vm3858_vm15, %v3854_v50, inf  ;;  %v2893_v50 = vcvt.s32.f32 %v2891_v61 }
 0xf93   :  { %3860 = vmin.xlane.f32.xlu0 %v3859_v51 }
 0xf94   :  { %v7142_v52 = vpop.xlane.xlu1 %4056 }
 0xf95   :  { %vm4058_vm3 = vcmp.eq.f32.partialorder %v7025_v49, %v7142_v52 }
 0xf96   :  { %v4059_v45 = vsel %vm4058_vm3, %v4054_v7, inf  ;;  %v2945_v7 = vcvt.s32.f32 %v2943_v24 }
 0xf97   :  { %4060 = vmin.xlane.f32.xlu1 %v4059_v45 }
 0xf98   :  { %v7148_v1 = vpop.xlane.xlu1 %4108  ;;  %v7153_v32 = vpop.xlane.xlu0 %3908 }
 0xf99   :  { %vm4110_vm7 = vcmp.eq.f32.partialorder %v7048_v0, %v7148_v1  ;;  %vm3910_vm4 = vcmp.eq.f32.partialorder %v7056_v30, %v7153_v32 }
 0xf9a   :  { %v4111_v49 = vsel %vm4110_vm7, %v4106_v23, inf  ;;  %v3911_v37 = vsel %vm3910_vm4, %v3906_v18, inf  ;;  %v4041_v23 = vsel %vm4040_vm2, %v7187_v62, 0.0  ;;  %v3894_v18 = vsel %vm139_vm0, %v3893_v15, 0.0 }
 0xf9b   :  { %4112 = vmin.xlane.f32.xlu1 %v4111_v49  ;;  %3912 = vmin.xlane.f32.xlu0 %v3911_v37  ;;  %v3811_v37 = vcvt.f32.s32 %v7132_v57 }
 0xf9c   :  { %v7158_v63 = vpop.xlane.xlu1 %4160  ;;  %v7163_v0 = vpop.xlane.xlu0 %3960 }
 0xf9d   :  { %vm4162_vm6 = vcmp.eq.f32.partialorder %v7073_v9, %v7158_v63  ;;  %vm3962_vm10 = vcmp.eq.f32.partialorder %v7081_v34, %v7163_v0  ;;  %v3812_v21 = vshll.u32 %v3811_v37, 16 }
 0xf9e   :  { %v4163_v30 = vsel %vm4162_vm6, %v4158_v53, inf  ;;  %v3963_v54 = vsel %vm3962_vm10, %v3958_v43, inf  ;;  %v3863_v43 = vcvt.f32.s32 %v7137_v14 }
 0xf9f   :  { %4164 = vmin.xlane.f32.xlu1 %v4163_v30  ;;  %3964 = vmin.xlane.f32.xlu0 %v3963_v54 }
 0xfa0   :  { %v7168_v4 = vpop.xlane.xlu1 %4212  ;;  %v7173_v9 = vpop.xlane.xlu0 %2895  ;;  %v3864_v54 = vshll.u32 %v3863_v43, 16 }
 0xfa1   :  { %vm4214_vm1 = vcmp.eq.f32.partialorder %v7099_v36, %v7168_v4  ;;  %vm2897_vm12 = vcmp.eq.f32.partialorder %v7107_v12, %v7173_v9 }
 0xfa2   :  { %v4215_v34 = vsel %vm4214_vm1, %v4210_v59, inf  ;;  %v2898_v44 = vsel %vm2897_vm12, %v2893_v50, inf  ;;  %v4063_v59 = vcvt.f32.s32 %v7142_v52  ;;  %vm7510_vm1 = vcmp.eq.s32.totalorder %v5340_v58, %v6919_v42 }
 0xfa3   :  { %4216 = vmin.xlane.f32.xlu1 %v4215_v34  ;;  %2899 = vmin.xlane.f32.xlu0 %v2898_v44  ;;  %v4115_v44 = vcvt.f32.s32 %v7148_v1 }
 0xfa4   :  { %v7178_v51 = vpop.xlane.xlu1 %2947  ;;  %v7183_v36 = vpop.xlane.xlu0 %2999  ;;  %v4064_v57 = vshll.u32 %v4063_v59, 16 }
 0xfa5   :  { %vm2949_vm9 = vcmp.eq.f32.partialorder %v7118_v35, %v7178_v51  ;;  %vm3001_vm15 = vcmp.eq.f32.partialorder %v7120_v38, %v7183_v36  ;;  %v3789_v35 = vsel %vm3788_vm5, %v7187_v62, 0.0  ;;  %v3841_v38 = vsel %vm3840_vm11, %v7187_v62, 0.0 }
 0xfa6   :  { %v2950_v12 = vsel %vm2949_vm9, %v2945_v7, inf  ;;  %v3002_v16 = vsel %vm3001_vm15, %v2997_v3, inf  ;;  %v3790_v25 = vsel %vm139_vm0, %v3789_v35, 0.0  ;;  %v3842_v28 = vsel %vm139_vm0, %v3841_v38, 0.0 }
 0xfa7   :  { %2951 = vmin.xlane.f32.xlu1 %v2950_v12  ;;  %3003 = vmin.xlane.f32.xlu0 %v3002_v16  ;;  %vm7508_vm5 = vcmp.eq.s32.totalorder %v5340_v58, %v6895_v40  ;;  %vm7509_vm11 = vcmp.eq.s32.totalorder %v5340_v58, %v6893_v5  ;;  %v3915_v7 = vcvt.f32.s32 %v7153_v32  ;;  %v4167_v12 = vcvt.f32.s32 %v7158_v63 }
 0xfa8   :  { %v7191_v45 = vpop.xlane.xlu1 %3051  ;;  %v3945_v6 = vsel %vm7508_vm5, %v7187_v62, 0.0  ;;  %v4145_v27 = vsel %vm7509_vm11, %v7187_v62, 0.0  ;;  %v3967_v35 = vcvt.f32.s32 %v7163_v0  ;;  %vm7511_vm15 = vcmp.eq.s32.totalorder %v5340_v58, %v6921_v22 }
 0xfa9   :  { %vm3053_vm3 = vcmp.eq.f32.partialorder %v7128_v48, %v7191_v45  ;;  %v4042_v48 = vsel %vm139_vm0, %v4041_v23, 0.0  ;;  %v3946_v49 = vsel %vm139_vm0, %v3945_v6, 0.0  ;;  %v4146_v31 = vsel %vm139_vm0, %v4145_v27, 0.0 }
 0xfaa   :  { %v3054_v29 = vsel %vm3053_vm3, %v3049_v56, inf  ;;  %v4116_v56 = vshll.u32 %v4115_v44, 16  ;;  %v3916_v1 = vshll.u32 %v3915_v7, 16  ;;  %v3968_v63 = vshll.u32 %v3967_v35, 16 }
 0xfab   :  { %3055 = vmin.xlane.f32.xlu1 %v3054_v29  ;;  %3791 = vadd.xlane.f32.xlu0 %v3790_v25  ;;  %v2902_v6 = vcvt.f32.s32 %v7173_v9  ;;  %v3058_v42 = vcvt.f32.s32 %v7191_v45  ;;  %vm7512_vm5 = vcmp.eq.s32.totalorder %v5340_v58, %v6944_v8 }
 0xfaf   :  { %3843 = vadd.xlane.f32.xlu1 %v3842_v28  ;;  %4043 = vadd.xlane.f32.xlu0 %v4042_v48  ;;  %v4168_v48 = vshll.u32 %v4167_v12, 16 }
 0xfb3   :  { %3895 = vadd.xlane.f32.xlu1 %v3894_v18  ;;  %4095 = vadd.xlane.f32.xlu0 %v4094_v13  ;;  %v4219_v18 = vcvt.f32.s32 %v7168_v4 }
 0xfb7   :  { %3947 = vadd.xlane.f32.xlu1 %v3946_v49  ;;  %4147 = vadd.xlane.f32.xlu0 %v4146_v31 }
0x1018   :  { %v3809_v53 = vpop.xlane.xlu0 %3808 }
0x1019   :  { %v3810_v40 = vcvt.f32.s32 %v3809_v53 }
0x101b   :  { %v3813_v61 = vadd.s32 %v3812_v21, %v3810_v40  ;;  %v4220_v40 = vshll.u32 %v4219_v18, 16 }
0x101c   :  { %v3861_v30 = vpop.xlane.xlu0 %3860 }
0x101d   :  { %v3862_v5 = vcvt.f32.s32 %v3861_v30  ;;  %vm3814_vm2 = vcmp.eq.s32.totalorder %v5340_v58, %v3813_v61  ;;  %v2954_v61 = vcvt.f32.s32 %v7178_v51 }
0x101e   :  { %v3815_v24 = vsel %vm3814_vm2, %v7187_v62, 0.0  ;;  %vm7513_vm2 = vcmp.eq.s32.totalorder %v5340_v58, %v6946_v33 }
0x101f   :  { %v3865_v50 = vadd.s32 %v3864_v54, %v3862_v5  ;;  %v3816_v41 = vsel %vm139_vm0, %v3815_v24, 0.0  ;;  %v2903_v54 = vshll.u32 %v2902_v6, 16  ;;  %v2955_v7 = vshll.u32 %v2954_v61, 16  ;;  %v4276_v61 = vld [vmem:[#allocation8 + $0xc0] sm:$0xff] }
0x1020   :  { %v4061_v34 = vpop.xlane.xlu1 %4060  ;;  %3817 = vadd.xlane.f32.xlu1 %v3816_v41  ;;  %v2984_v18 = vsel %vm7513_vm2, %v7187_v62, 0.0  ;;  %vm7526_vm2 = vcmask 121856  }
0x1021   :  { %v4062_v14 = vcvt.f32.s32 %v4061_v34  ;;  %vm3866_vm8 = vcmp.eq.s32.totalorder %v5340_v58, %v3865_v50  ;;  %v3006_v34 = vcvt.f32.s32 %v7183_v36 }
0x1022   :  { %v3867_v52 = vsel %vm3866_vm8, %v7187_v62, 0.0 }
0x1023   :  { %v4065_v60 = vadd.s32 %v4064_v57, %v4062_v14  ;;  %v3868_v3 = vsel %vm139_vm0, %v3867_v52, 0.0  ;;  %v4197_v14 = vsel %vm7510_vm1, %v7187_v62, 0.0  ;;  %v3007_v35 = vshll.u32 %v3006_v34, 16 }
0x1024   :  { %v4113_v16 = vpop.xlane.xlu1 %4112  ;;  %3869 = vadd.xlane.f32.xlu1 %v3868_v3  ;;  %v3913_v25 = vpop.xlane.xlu0 %3912 }
0x1025   :  { %v4114_v29 = vcvt.f32.s32 %v4113_v16  ;;  %vm4066_vm14 = vcmp.eq.s32.totalorder %v5340_v58, %v4065_v60  ;;  %v3914_v38 = vcvt.f32.s32 %v3913_v25  ;;  %v4198_v16 = vsel %vm139_vm0, %v4197_v14, 0.0 }
0x1026   :  { %v4067_v32 = vsel %vm4066_vm14, %v7187_v62, 0.0  ;;  %v2880_v25 = vsel %vm7511_vm15, %v7187_v62, 0.0  ;;  %vm7514_vm14 = vcmp.eq.s32.totalorder %v5340_v58, %v6968_v39  ;;  %v4286_v39 = vld [vmem:[#allocation8 + $0x110] sm:$0xff]  ;;  %vm7522_vm15 = vcmask 105472  }
0x1027   :  { %v4117_v23 = vadd.s32 %v4116_v56, %v4114_v29  ;;  %v4068_v28 = vsel %vm139_vm0, %v4067_v32, 0.0  ;;  %v3917_v15 = vadd.s32 %v3916_v1, %v3914_v38  ;;  %v3036_v6 = vsel %vm7514_vm14, %v7187_v62, 0.0  ;;  %vm7528_vm14 = vmmov %vm7522_vm15 }
0x1028   :  { %v4165_v20 = vpop.xlane.xlu1 %4164  ;;  %4069 = vadd.xlane.f32.xlu0 %v4068_v28  ;;  %v3965_v0 = vpop.xlane.xlu0 %3964  ;;  %v3059_v28 = vshll.u32 %v3058_v42, 16  ;;  %v3037_v33 = vsel %vm139_vm0, %v3036_v6, 0.0  ;;  %v4255_v42 = vld [vmem:[#allocation8 + $0x18] sm:$0xff] }
0x1029   :  { %v4166_v13 = vcvt.f32.s32 %v4165_v20  ;;  %vm4118_vm7 = vcmp.eq.s32.totalorder %v5340_v58, %v4117_v23  ;;  %v3966_v27 = vcvt.f32.s32 %v3965_v0  ;;  %vm3918_vm4 = vcmp.eq.s32.totalorder %v5340_v58, %v3917_v15 }
0x102a   :  { %v4119_v49 = vsel %vm4118_vm7, %v7187_v62, 0.0  ;;  %v3919_v53 = vsel %vm3918_vm4, %v7187_v62, 0.0  ;;  %v2881_v23 = vsel %vm139_vm0, %v2880_v25, 0.0  ;;  %vm7515_vm7 = vcmask 64512  }
0x102b   :  { %v4169_v31 = vadd.s32 %v4168_v48, %v4166_v13  ;;  %v4120_v37 = vsel %vm139_vm0, %v4119_v49, 0.0  ;;  %v3969_v21 = vadd.s32 %v3968_v63, %v3966_v27  ;;  %v3920_v4 = vsel %vm139_vm0, %v3919_v53, 0.0  ;;  %v4292_v53 = vld [vmem:[#allocation8 + $0x140] sm:$0xff]  ;;  %vm7519_vm1 = vmmov %vm7515_vm7 }
0x102c   :  { %v4217_v43 = vpop.xlane.xlu1 %4216  ;;  %4121 = vadd.xlane.f32.xlu0 %v4120_v37  ;;  %3921 = vadd.xlane.f32.xlu1 %v3920_v4  ;;  %v2900_v9 = vpop.xlane.xlu0 %2899  ;;  %v2932_v48 = vsel %vm7512_vm5, %v7187_v62, 0.0  ;;  %v2985_v13 = vsel %vm139_vm0, %v2984_v18, 0.0  ;;  %v4295_v37 = vld [vmem:[#allocation8 + $0x158] sm:$0xff]  ;;  %vm7516_vm4 = vcmask 72704  }
0x102d   :  { %v4218_v30 = vcvt.f32.s32 %v4217_v43  ;;  %vm4170_vm6 = vcmp.eq.s32.totalorder %v5340_v58, %v4169_v31  ;;  %v2901_v59 = vcvt.f32.s32 %v2900_v9  ;;  %vm3970_vm10 = vcmp.eq.s32.totalorder %v5340_v58, %v3969_v21  ;;  %v4293_v31 = vld [vmem:[#allocation8 + $0x148] sm:$0xff]  ;;  %4394 = vmatprep.subr.mxu1 %v4295_v37  ;;  %v4294_v21 = vld [vmem:[#allocation8 + $0x150] sm:$0xff]  ;;  %v4287_v4 = vld [vmem:[#allocation8 + $0x118] sm:$0xff] }
0x102e   :  { %v4171_v5 = vsel %vm4170_vm6, %v7187_v62, 0.0  ;;  %v3971_v41 = vsel %vm3970_vm10, %v7187_v62, 0.0  ;;  %v2933_v20 = vsel %vm139_vm0, %v2932_v48, 0.0  ;;  %4323 = vmatprep.subr.mxu0 %v4293_v31  ;;  %v4285_v43 = vld [vmem:[#allocation8 + $0x108] sm:$0xff]  ;;  %4395 = vmatpush1.msra.mxu1 %v4294_v21  ;;  %vm7517_vm6 = vcmask 80896  }
0x102f   :  { %v4221_v24 = vadd.s32 %v4220_v40, %v4218_v30  ;;  %v4172_v50 = vsel %vm139_vm0, %v4171_v5, 0.0  ;;  %v2904_v57 = vadd.s32 %v2903_v54, %v2901_v59  ;;  %v3972_v44 = vsel %vm139_vm0, %v3971_v41, 0.0  ;;  %4324 = vmatpush1.msra.mxu0 %v4292_v53  ;;  %v4277_v40 = vld [vmem:[#allocation8 + $0xc8] sm:$0xff]  ;;  %4396 = vmatprep.subr.mxu1 %v4287_v4  ;;  %v4278_v30 = vld [vmem:[#allocation8 + $0xd0] sm:$0xff]  ;;  %v4271_v54 = vld [vmem:[#allocation8 + $0x98] sm:$0xff] }
0x1030   :  { %v2952_v51 = vpop.xlane.xlu1 %2951  ;;  %4173 = vadd.xlane.f32.xlu0 %v4172_v50  ;;  %3973 = vadd.xlane.f32.xlu1 %v3972_v44  ;;  %v3004_v60 = vpop.xlane.xlu0 %3003  ;;  %v4269_v9 = vld [vmem:[#allocation8 + $0x88] sm:$0xff]  ;;  %vm7518_vm10 = vcmask 89088   ;;  %v2364_v37 = vld [vmem:[%s7399_s7] sm:$0x1] }
0x1031   :  { %v2953_v52 = vcvt.f32.s32 %v2952_v51  ;;  %vm4222_vm12 = vcmp.eq.s32.totalorder %v5340_v58, %v4221_v24  ;;  %v3005_v3 = vcvt.f32.s32 %v3004_v60  ;;  %vm2905_vm9 = vcmp.eq.s32.totalorder %v5340_v58, %v2904_v57  ;;  %4325 = vmatprep.subr.mxu0 %v4285_v43  ;;  %4397 = vmatpush1.msra.mxu1 %v4286_v39  ;;  %v4261_v60 = vld [vmem:[#allocation8 + $0x48] sm:$0xff]  ;;  %vm7524_vm5 = vmmov %vm7518_vm10  ;;  %v2436_v43 = vld [vmem:[%s7400_s8] sm:$0x1] }
0x1032   :  { %v4223_v12 = vsel %vm4222_vm12, %v7187_v62, 0.0  ;;  %v2906_v1 = vsel %vm2905_vm9, %v7187_v62, 0.0  ;;  %vm7520_vm12 = vmmov %vm7516_vm4  ;;  %vm7521_vm9 = vcmask 97280   ;;  %v2432_v53 = vadd.f32 %v6490_v2, %v2364_v37  ;;  %v4623_v37 = vld [vmem:[#allocation10 + $0x28] sm:$0xff] }
0x1033   :  { %v2956_v36 = vadd.s32 %v2955_v7, %v2953_v52  ;;  %v4224_v56 = vsel %vm139_vm0, %v4223_v12, 0.0  ;;  %v3008_v38 = vadd.s32 %v3007_v35, %v3005_v3  ;;  %v2907_v45 = vsel %vm139_vm0, %v2906_v1, 0.0  ;;  %v4268_v7 = vld [vmem:[#allocation8 + $0x80] sm:$0xff]  ;;  %v4270_v52 = vld [vmem:[#allocation8 + $0x90] sm:$0xff]  ;;  %v4263_v12 = vld [vmem:[#allocation8 + $0x58] sm:$0xff] }
0x1034   :  { %v3056_v29 = vpop.xlane.xlu1 %3055  ;;  %4199 = vadd.xlane.f32.xlu0 %v4198_v16  ;;  %4225 = vadd.xlane.f32.xlu1 %v4224_v56  ;;  %v3792_v5 = vpop.xlane.xlu0 %3791  ;;  %v4262_v16 = vld [vmem:[#allocation8 + $0x50] sm:$0xff]  ;;  %v4253_v35 = vld [vmem:[#allocation8 + $0x8] sm:$0xff]  ;;  %v2435_v21 = vmax.f32 %v2432_v53, 0.0  ;;  %v4622_v53 = vld [vmem:[#allocation10 + $0x20] sm:$0xff] }
0x1035   :  { %v3057_v32 = vcvt.f32.s32 %v3056_v29  ;;  %vm2957_vm3 = vcmp.eq.s32.totalorder %v5340_v58, %v2956_v36  ;;  %vm3009_vm11 = vcmp.eq.s32.totalorder %v5340_v58, %v3008_v38  ;;  %v3982_v44 = vsel %vm7515_vm7, %v7044_v10, %v3792_v5  ;;  %v4260_v36 = vld [vmem:[#allocation8 + $0x40] sm:$0xff]  ;;  %v4254_v10 = vld [vmem:[#allocation8 + $0x10] sm:$0xff]  ;;  %v4297_v38 = vld [vmem:[#allocation8 + $0x168] sm:$0xff] }
0x1036   :  { %v2958_v22 = vsel %vm2957_vm3, %v7187_v62, 0.0  ;;  %v3010_v8 = vsel %vm3009_vm11, %v7187_v62, 0.0  ;;  %v4252_v29 = vld [vmem:[#allocation8] sm:$0xff]  ;;  %vm7523_vm3 = vmmov %vm7517_vm6  ;;  %vm7525_vm11 = vcmask 113664   ;;  %v2437_v4 = vmul.f32 %v2436_v43, %v2435_v21  ;;  %v4621_v21 = vld [vmem:[#allocation10 + $0x18] sm:$0xff] }
0x1037   :  { %v3060_v15 = vadd.s32 %v3059_v28, %v3057_v32  ;;  %v2959_v63 = vsel %vm139_vm0, %v2958_v22, 0.0  ;;  %v3011_v0 = vsel %vm139_vm0, %v3010_v8, 0.0  ;;  %v4299_v32 = vld [vmem:[#allocation8 + $0x178] sm:$0xff]  ;;  %vm7529_vm7 = vmmov %vm7525_vm11  ;;  %v4620_v43 = vld [vmem:[#allocation10 + $0x10] sm:$0xff] }
0x1038   :  { %2882 = vadd.xlane.f32.xlu0 %v2881_v23  ;;  %2908 = vadd.xlane.f32.xlu1 %v2907_v45  ;;  %v3844_v59 = vpop.xlane.xlu1 %3843  ;;  %v4044_v50 = vpop.xlane.xlu0 %4043 }
0x1039   :  { %vm3061_vm8 = vcmp.eq.s32.totalorder %v5340_v58, %v3060_v15  ;;  %v4284_v58 = vld [vmem:[#allocation8 + $0x100] sm:$0xff]  ;;  %v4234_v23 = vsel %vm7519_vm1, %v7065_v47, %v4044_v50  ;;  %vm7532_vm1 = vcmask 39936  }
0x103a   :  { %v3062_v27 = vsel %vm3061_vm8, %v7187_v62, 0.0  ;;  %v4279_v62 = vld [vmem:[#allocation8 + $0xd8] sm:$0xff]  ;;  %4326 = vmatpush1.msra.mxu0 %v4284_v58  ;;  %vm7527_vm8 = vmmov %vm7521_vm9 }
0x103b   :  { %v3063_v49 = vsel %vm139_vm0, %v3062_v27, 0.0  ;;  %4327 = vmatprep.subr.mxu0 %v4277_v40  ;;  %4398 = vmatprep.subr.mxu1 %v4279_v62 }
0x103c   :  { %2934 = vadd.xlane.f32.xlu0 %v2933_v20  ;;  %2960 = vadd.xlane.f32.xlu1 %v2959_v63  ;;  %v3896_v24 = vpop.xlane.xlu1 %3895  ;;  %v4096_v34 = vpop.xlane.xlu0 %4095 }
0x103d   :  { %4328 = vmatpush1.msra.mxu0 %v4276_v61  ;;  %4399 = vmatpush1.msra.mxu1 %v4278_v30 }
0x103e   :  { %4329 = vmatprep.subr.mxu0 %v4269_v9  ;;  %4400 = vmatprep.subr.mxu1 %v4271_v54 }
0x103f   :  { %4330 = vmatpush1.msra.mxu0 %v4268_v7  ;;  %4401 = vmatpush1.msra.mxu1 %v4270_v52  ;;  %v4296_v7 = vld [vmem:[#allocation8 + $0x160] sm:$0xff]  ;;  %v4298_v52 = vld [vmem:[#allocation8 + $0x170] sm:$0xff] }
0x1040   :  { %2986 = vadd.xlane.f32.xlu0 %v2985_v13  ;;  %3012 = vadd.xlane.f32.xlu1 %v3011_v0  ;;  %v3948_v41 = vpop.xlane.xlu1 %3947  ;;  %v4148_v51 = vpop.xlane.xlu0 %4147 }
0x1041   :  { %4331 = vmatprep.subr.mxu0 %v4261_v60  ;;  %4402 = vmatprep.subr.mxu1 %v4263_v12  ;;  %v4291_v12 = vld [vmem:[#allocation8 + $0x138] sm:$0xff] }
0x1042   :  { %4332 = vmatpush1.msra.mxu0 %v4260_v36  ;;  %4403 = vmatpush1.msra.mxu1 %v4262_v16  ;;  %v4288_v36 = vld [vmem:[#allocation8 + $0x120] sm:$0xff]  ;;  %v4290_v16 = vld [vmem:[#allocation8 + $0x130] sm:$0xff] }
0x1043   :  { %4333 = vmatprep.subr.mxu0 %v4253_v35  ;;  %4404 = vmatprep.subr.mxu1 %v4255_v42  ;;  %v4283_v35 = vld [vmem:[#allocation8 + $0xf8] sm:$0xff]  ;;  %v4280_v42 = vld [vmem:[#allocation8 + $0xe0] sm:$0xff] }
0x1044   :  { %3038 = vadd.xlane.f32.xlu0 %v3037_v33  ;;  %3064 = vadd.xlane.f32.xlu1 %v3063_v49 }
0x1045   :  { %4334 = vmatpush1.msra.mxu0 %v4252_v29  ;;  %4405 = vmatpush1.msra.mxu1 %v4254_v10  ;;  %v4282_v29 = vld [vmem:[#allocation8 + $0xf0] sm:$0xff]  ;;  %v4275_v10 = vld [vmem:[#allocation8 + $0xb8] sm:$0xff] }
0x1046   :  { %4465 = vmatprep.subr.mxu0 %v4297_v38  ;;  %4536 = vmatprep.subr.mxu1 %v4299_v32  ;;  %v4274_v38 = vld [vmem:[#allocation8 + $0xb0] sm:$0xff]  ;;  %v4265_v32 = vld [vmem:[#allocation8 + $0x68] sm:$0xff] }
0x10a9   :  { %v3818_v57 = vpop.xlane.xlu1 %3817 }
0x10aa   :  { %v3983_v14 = vsel %vm7516_vm4, %v3982_v44, %v3818_v57  ;;  %vm7530_vm4 = vmmov %vm7526_vm2 }
0x10ab   :  { %v3984_v25 = vsel %vm7517_vm6, %v3983_v14, %v3844_v59  ;;  %vm2438_vm6 = vcmask 1040384  }
0x10ac   :  { %v2439_v58 = vsel %vm2438_vm6, %v2437_v4, 0.0  ;;  %v4619_v4 = vld [vmem:[#allocation10 + $0x8] sm:$0xff] }
0x10ad   :  { %v3870_v3 = vpop.xlane.xlu1 %3869 }
0x10ae   :  { %v3985_v1 = vsel %vm7518_vm10, %v3984_v25, %v3870_v3  ;;  %vm7531_vm10 = vcmask 31744   ;;  %v4289_v3 = vld [vmem:[#allocation8 + $0x128] sm:$0xff] }
0x10af   :  { %v3986_v22 = vsel %vm7521_vm9, %v3985_v1, %v3896_v24  ;;  %v3069_v39 = vsel %vm7531_vm10, %v7092_v19, %v6735_v17  ;;  %vm7534_vm9 = vcmask 56320   ;;  %vm7544_vm10 = vcmask 392192   ;;  %v4273_v25 = vld [vmem:[#allocation8 + $0xa8] sm:$0xff]  ;;  %v4272_v1 = vld [vmem:[#allocation8 + $0xa0] sm:$0xff] }
0x10b0   :  { %v3070_v62 = vsel %vm7532_vm1, %v3069_v39, %v7086_v26  ;;  %vm7545_vm1 = vmmov %vm7544_vm10 }
0x10b1   :  { %v4070_v56 = vpop.xlane.xlu0 %4069 }
0x10b2   :  { %v4235_v28 = vsel %vm7520_vm12, %v4234_v23, %v4070_v56  ;;  %vm7533_vm12 = vcmask 48128   ;;  %v4281_v56 = vld [vmem:[#allocation8 + $0xe8] sm:$0xff]  ;;  %v4267_v23 = vld [vmem:[#allocation8 + $0x78] sm:$0xff] }
0x10b3   :  { %v4236_v20 = vsel %vm7523_vm3, %v4235_v28, %v4096_v34  ;;  %v3071_v2 = vsel %vm7533_vm12, %v3070_v62, %v6731_v11  ;;  %vm7536_vm3 = vcmask 72704   ;;  %v4264_v28 = vld [vmem:[#allocation8 + $0x60] sm:$0xff] }
0x10b4   :  { %v3072_v9 = vsel %vm7534_vm9, %v3071_v2, %v7110_v46  ;;  %vm2442_vm9 = vcmask 0  }
0x10b5   :  { %v4122_v45 = vpop.xlane.xlu0 %4121  ;;  %v3922_v48 = vpop.xlane.xlu1 %3921 }
0x10b6   :  { %v3987_v15 = vsel %vm7522_vm15, %v3986_v22, %v3922_v48  ;;  %v4237_v63 = vsel %vm7524_vm5, %v4236_v20, %v4122_v45  ;;  %vm7535_vm15 = vcmask 64512   ;;  %vm7537_vm5 = vcmask 80896   ;;  %v4266_v45 = vld [vmem:[#allocation8 + $0x70] sm:$0xff]  ;;  %v4257_v48 = vld [vmem:[#allocation8 + $0x28] sm:$0xff]  ;;  %v4259_v22 = vld [vmem:[#allocation8 + $0x38] sm:$0xff] }
0x10b7   :  { %v3988_v47 = vsel %vm7525_vm11, %v3987_v15, %v3948_v41  ;;  %v4238_v0 = vsel %vm7527_vm8, %v4237_v63, %v4148_v51  ;;  %vm7538_vm11 = vcmask 89088   ;;  %v4256_v15 = vld [vmem:[#allocation8 + $0x20] sm:$0xff]  ;;  %v4258_v20 = vld [vmem:[#allocation8 + $0x30] sm:$0xff]  ;;  %v4633_v63 = vld [vmem:[#allocation10 + $0x78] sm:$0xff] }
0x10b9   :  { %v4174_v18 = vpop.xlane.xlu0 %4173  ;;  %v3974_v8 = vpop.xlane.xlu1 %3973 }
0x10ba   :  { %v3989_v13 = vsel %vm7526_vm2, %v3988_v47, %v3974_v8  ;;  %v4239_v6 = vsel %vm7528_vm14, %v4238_v0, %v4174_v18  ;;  %vm7539_vm2 = vmmov %vm7527_vm8  ;;  %v4632_v18 = vld [vmem:[#allocation10 + $0x70] sm:$0xff]  ;;  %v4631_v8 = vld [vmem:[#allocation10 + $0x68] sm:$0xff] }
0x10bb   :  { %4243 = vrot.lane.b32.xlu0 %v3989_v13, %s5226_s15  ;;  %vm7540_vm8 = vmmov %vm7528_vm14  ;;  %v4630_v13 = vld [vmem:[#allocation10 + $0x60] sm:$0xff]  ;;  %v4629_v0 = vld [vmem:[#allocation10 + $0x58] sm:$0xff] }
0x10bc   :  { %vm7541_vm14 = vmmov %vm7529_vm7 }
0x10bd   :  { %v4200_v27 = vpop.xlane.xlu0 %4199  ;;  %v4226_v33 = vpop.xlane.xlu1 %4225 }
0x10be   :  { %v4240_v49 = vsel %vm7529_vm7, %v4239_v6, %v4200_v27  ;;  %vm7542_vm7 = vmmov %vm7530_vm4  ;;  %v4628_v6 = vld [vmem:[#allocation10 + $0x50] sm:$0xff]  ;;  %v4627_v27 = vld [vmem:[#allocation10 + $0x48] sm:$0xff] }
0x10bf   :  { %v4241_v31 = vsel %vm7530_vm4, %v4240_v49, %v4226_v33  ;;  %vm7543_vm4 = vcmask 130048   ;;  %v4626_v33 = vld [vmem:[#allocation10 + $0x40] sm:$0xff]  ;;  %v4625_v49 = vld [vmem:[#allocation10 + $0x38] sm:$0xff] }
0x10c0   :  { %4247 = vrot.lane.b32.xlu1 %v4241_v31, %s5221_s30  ;;  %v4624_v31 = vld [vmem:[#allocation10 + $0x30] sm:$0xff] }
0x10c1   :  { %v2883_v40 = vpop.xlane.xlu0 %2882  ;;  %v2909_v61 = vpop.xlane.xlu1 %2908 }
0x10c2   :  { %v3073_v54 = vsel %vm7535_vm15, %v3072_v9, %v2883_v40 }
0x10c3   :  { %v3074_v5 = vsel %vm7536_vm3, %v3073_v54, %v2909_v61 }
0x10c5   :  { %v2935_v30 = vpop.xlane.xlu0 %2934  ;;  %v2961_v59 = vpop.xlane.xlu1 %2960 }
0x10c6   :  { %v3075_v17 = vsel %vm7537_vm5, %v3074_v5, %v2935_v30 }
0x10c7   :  { %v3076_v50 = vsel %vm7538_vm11, %v3075_v17, %v2961_v59 }
0x10c9   :  { %v2987_v24 = vpop.xlane.xlu0 %2986  ;;  %v3013_v19 = vpop.xlane.xlu1 %3012 }
0x10ca   :  { %v3077_v26 = vsel %vm7539_vm2, %v3076_v50, %v2987_v24 }
0x10cb   :  { %v3078_v11 = vsel %vm7540_vm8, %v3077_v26, %v3013_v19 }
0x10cd   :  { %v3039_v41 = vpop.xlane.xlu0 %3038  ;;  %v3065_v34 = vpop.xlane.xlu1 %3064 }
0x10ce   :  { %v3079_v57 = vsel %vm7541_vm14, %v3078_v11, %v3039_v41 }
0x10cf   :  { %v3080_v51 = vsel %vm7542_vm7, %v3079_v57, %v3065_v34 }
0x10e4   :  { %2440 = vadd.xlane.f32.xlu1 %v2439_v58  ;;  %v4618_v58 = vld [vmem:[#allocation10] sm:$0xff] }
0x112d   :  { %v4244_v46 = vpop.permute.xlu0 %4243 }
0x112e   :  { %v4250_v44 = vsel %vm7543_vm4, %v3080_v51, %v4244_v46  ;;  %v4615_v51 = vld [vmem:[%s7397_s5] sm:$0x1] }
0x1132   :  { %v4248_v14 = vpop.permute.xlu1 %4247 }
0x1133   :  { %v4251_v60 = vsel %vm139_vm0, %v4250_v44, %v4248_v14  ;;  %vm7546_vm0 = vmmov %vm7545_vm1 }
0x1134   :  { %4767 = vmatmul.mubr.msk.f32.vlgmr.msra.gmra.mxu0 %vm7544_vm10, %v4251_v60  ;;  %4768 = vmatmul.mubr.msk.f32.vlgmr.msra.gmra.mxu1 %vm7545_vm1, %v4251_v60  ;;  %vm7547_vm12 = vmmov %vm7546_vm0 }
0x1135   :  { %4466 = vmatpush1.msra.mxu0 %v4296_v7  ;;  %4537 = vmatpush1.msra.mxu1 %v4298_v52  ;;  %v4634_v52 = vld [vmem:[%s7399_s7] sm:$0x1] }
0x1136   :  { %4467 = vmatprep.subr.mxu0 %v4289_v3  ;;  %4538 = vmatprep.subr.mxu1 %v4291_v12  ;;  %v4706_v12 = vld [vmem:[%s7400_s8] sm:$0x1] }
0x1137   :  { %4468 = vmatpush1.msra.mxu0 %v4288_v36  ;;  %4539 = vmatpush1.msra.mxu1 %v4290_v16 }
0x1138   :  { %4469 = vmatprep.subr.mxu0 %v4281_v56  ;;  %4540 = vmatprep.subr.mxu1 %v4283_v35 }
0x1139   :  { %4470 = vmatpush1.msra.mxu0 %v4280_v42  ;;  %4541 = vmatpush1.msra.mxu1 %v4282_v29 }
0x113a   :  { %4471 = vmatprep.subr.mxu0 %v4273_v25  ;;  %4542 = vmatprep.subr.mxu1 %v4275_v10 }
0x113b   :  { %4472 = vmatpush1.msra.mxu0 %v4272_v1  ;;  %4543 = vmatpush1.msra.mxu1 %v4274_v38 }
0x113c   :  { %4473 = vmatprep.subr.mxu0 %v4265_v32  ;;  %4544 = vmatprep.subr.mxu1 %v4267_v23 }
0x113d   :  { %4474 = vmatpush1.msra.mxu0 %v4264_v28  ;;  %4545 = vmatpush1.msra.mxu1 %v4266_v45 }
0x113e   :  { %4475 = vmatprep.subr.mxu0 %v4257_v48  ;;  %4546 = vmatprep.subr.mxu1 %v4259_v22 }
0x113f   :  { %4476 = vmatpush1.msra.mxu0 %v4256_v15  ;;  %4509 = vmatprep.mubr.f32.mxu0 %v7476_v55 }
0x1140   :  { %4547 = vmatpush1.msra.mxu1 %v4258_v20  ;;  %4580 = vmatprep.mubr.f32.mxu1 %v7476_v55 }
0x1141   :  { %4769 = vmatmul.mubr.msk.f32.vlgmr.msra.gmra.mxu0 %vm7546_vm0, %v4251_v60  ;;  %4770 = vmatmul.mubr.msk.f32.vlgmr.msra.gmra.mxu1 %vm7547_vm12, %v4251_v60 }
0x1142   :  { %4976 = vmatprep.subr.mxu0 %v7476_v55  ;;  %5008 = vmatprep.mubr.msk.f32.mxu0 %vm7477_vm13, %v7476_v55 }
0x1143   :  { %4977 = vmatpush3.msra.mxu0 %v4633_v63 }
0x1144   :  { %4978 = vmatprep.subr.mxu0 %v7476_v55 }
0x1145   :  { %4979 = vmatpush3.msra.mxu0 %v4632_v18 }
0x1146   :  { %4980 = vmatprep.subr.mxu0 %v7476_v55 }
0x1147   :  { %4981 = vmatpush3.msra.mxu0 %v4631_v8 }
0x1148   :  { %4982 = vmatprep.subr.mxu0 %v7476_v55 }
0x1149   :  { %4983 = vmatpush3.msra.mxu0 %v4630_v13 }
0x114a   :  { %4984 = vmatprep.subr.mxu0 %v7476_v55 }
0x114b   :  { %4985 = vmatpush3.msra.mxu0 %v4629_v0 }
0x114c   :  { %4986 = vmatprep.subr.mxu0 %v7476_v55 }
0x114d   :  { %4987 = vmatpush3.msra.mxu0 %v4628_v6 }
0x114e   :  { %4988 = vmatprep.subr.mxu0 %v7476_v55 }
0x114f   :  { %4989 = vmatpush3.msra.mxu0 %v4627_v27 }
0x1150   :  { %4990 = vmatprep.subr.mxu0 %v7476_v55 }
0x1151   :  { %4991 = vmatpush3.msra.mxu0 %v4626_v33 }
0x1152   :  { %4992 = vmatprep.subr.mxu0 %v7476_v55 }
0x1153   :  { %4993 = vmatpush3.msra.mxu0 %v4625_v49 }
0x1154   :  { %4994 = vmatprep.subr.mxu0 %v7476_v55 }
0x1155   :  { %4995 = vmatpush3.msra.mxu0 %v4624_v31 }
0x1156   :  { %4996 = vmatprep.subr.mxu0 %v7476_v55 }
0x1157   :  { %4997 = vmatpush3.msra.mxu0 %v4623_v37 }
0x1158   :  { %4998 = vmatprep.subr.mxu0 %v7476_v55 }
0x1159   :  { %4999 = vmatpush3.msra.mxu0 %v4622_v53 }
0x115a   :  { %5000 = vmatprep.subr.mxu0 %v7476_v55 }
0x115b   :  { %5001 = vmatpush3.msra.mxu0 %v4621_v21 }
0x115c   :  { %5002 = vmatprep.subr.mxu0 %v7476_v55 }
0x115d   :  { %5003 = vmatpush3.msra.mxu0 %v4620_v43 }
0x115e   :  { %5004 = vmatprep.subr.mxu0 %v7476_v55 }
0x115f   :  { %5005 = vmatpush3.msra.mxu0 %v4619_v4 }
0x1160   :  { %5006 = vmatprep.subr.mxu0 %v7476_v55 }
0x1161   :  { %5007 = vmatpush3.msra.mxu0 %v4618_v58 }
0x116d   :  { %v2441_v47 = vpop.xlane.xlu1 %2440 }
0x116e   :  { %2443 = vst.msk [vmem:[%s7401_s9] sm:$0x1] %vm2442_vm9, %v2441_v47 }
0x11f4   :  { %v4369_v39 = vpop.f32.mrf.mxu0  ;;  %v4440_v61 = vpop.f32.mrf.mxu1 }
0x11f5   :  { %v4592_v30 = vrot.slane %v4440_v61, 2 }
0x11f6   :  { %v4371_v40 = vpop.f32.mrf.mxu0  ;;  %v4442_v9 = vpop.f32.mrf.mxu1 }
0x11f7   :  { %v4588_v62 = vrot.slane %v4371_v40, 1  ;;  %v4596_v59 = vrot.slane %v4442_v9, 3 }
0x11f9   :  { %v4590_v2 = vadd.f32 %v4588_v62, %v4369_v39 }
0x11fb   :  { %v4594_v54 = vadd.f32 %v4592_v30, %v4590_v2 }
0x11fd   :  { %v4598_v17 = vadd.f32 %v4596_v59, %v4594_v54 }
0x1201   :  { %v4511_v5 = vpop.f32.mrf.mxu0  ;;  %v4582_v24 = vpop.f32.mrf.mxu1 }
0x1202   :  { %v4600_v19 = vrot.slane %v4511_v5, 4  ;;  %v4608_v34 = vrot.slane %v4582_v24, 6 }
0x1203   :  { %v4513_v50 = vpop.f32.mrf.mxu0  ;;  %v4584_v11 = vpop.f32.mrf.mxu1 }
0x1204   :  { %v4602_v26 = vadd.f32 %v4600_v19, %v4598_v17  ;;  %v4604_v41 = vrot.slane %v4513_v50, 5  ;;  %v4612_v46 = vrot.slane %v4584_v11, 7 }
0x1206   :  { %v4606_v55 = vadd.f32 %v4604_v41, %v4602_v26 }
0x1208   :  { %v4610_v57 = vadd.f32 %v4608_v34, %v4606_v55 }
0x120a   :  { %v4614_v44 = vadd.f32 %v4612_v46, %v4610_v57 }
0x120c   :  { %v4616_v14 = vadd.f32 %v4615_v51, %v4614_v44 }
0x120e   :  { %v4617_v7 = vmax.f32 %v4616_v14, 0.0 }
0x1210   :  { %5009 = vmatmul.mubr.f32.vlgmr.msra.gmra.mxu0 %v4617_v7 }
0x12d0   :  { %v4701_v60 = vpop.f32.mrf.mxu0 }
0x12d1   :  { %v4702_v3 = vadd.f32 %v4701_v60, %v4634_v52 }
0x12d2   :  { %v5010_v36 = vpop.f32.mrf.mxu0 }
0x12d3   :  { %v4705_v16 = vmax.f32 %v4702_v3, 0.0 }
0x12d5   :  { %v4707_v56 = vmul.f32 %v4706_v12, %v4705_v16 }
0x12d7   :  { %v4708_v35 = vsel %vm2438_vm6, %v4707_v56, 0.0 }
0x12d8   :  { %4709 = vadd.xlane.f32.xlu0 %v4708_v35 }
0x1361   :  { %v4710_v42 = vpop.xlane.xlu0 %4709 }
0x1362   :  { %4711 = vst.msk [vmem:[%s7401_s9 + $0x1] sm:$0x1] %vm2442_vm9, %v4710_v42 }
0x1363   :  { %4716 = vsyncpa [#allocation4], 1 }
0x1364   :  { %4717 = vsyncpa [#allocation6], 1 }
0x1365   :  { %4718 = vsyncpa [#allocation9], 1 }

</bundles_post_ra>
